<compile_context>
chip_gen: v7x
topology: tpu7x:2x2x1
jax: 0.10.0
libtpu: 0.0.40
codegen_flags: <defaults>
</compile_context>

<pallas_src>
import jax
import jax.numpy as jnp
from jax.experimental import pallas as pl
from jax.experimental.pallas import tpu as pltpu


LANES = 128  # pad all channel (matmul-N) dims to one full vreg lane width


def _out_dim(n, k, s):
    return (n - k) // s + 1


# ----------------------------- fused Pallas kernel ----------------------------

def _make_fused_kernel(dims, num_actions):
    """dims = (OH1, OW1, OH2, OW2, OH3, OW3, C1, C2, C3)."""
    OH1, OW1, OH2, OW2, OH3, OW3, C1, C2, C3 = dims
    P2, P3 = OH2 * OW2, OH3 * OW3

    def kernel(p1_ref, w1_ref, b1_ref, w2_ref, b2_ref, w3_ref, b3_ref,
               wh_ref, bh_ref, out_ref, act1_s, act2_s, tap2_s, tap3_s):
        # ---- conv1 + ReLU (stride == kernel, patches precomputed in wrapper) ----
        a1 = jnp.dot(p1_ref[...], w1_ref[...], preferred_element_type=jnp.float32)
        act1_s[...] = jnp.maximum(a1 + b1_ref[...], 0.0)          # (P1, 128) lane-dense

        # ---- conv2 + ReLU: in-kernel im2col (k=3, s=2) + 9 tap matmuls ----------
        for i in range(3):
            for j in range(3):
                t = i * 3 + j
                for p in range(P2):
                    oh, ow = divmod(p, OW2)
                    src = (2 * oh + i) * OW1 + (2 * ow + j)
                    tap2_s[t, p:p + 1, :] = act1_s[src:src + 1, :]
        acc2 = jnp.zeros((P2, LANES), jnp.float32)
        for t in range(9):
            acc2 = acc2 + jnp.dot(tap2_s[t][:, :C1], w2_ref[t],
                                  preferred_element_type=jnp.float32)
        act2_s[...] = jnp.maximum(acc2 + b2_ref[...], 0.0)        # (P2, 128)

        # ---- conv3 + ReLU --------------------------------------------------------
        for i in range(3):
            for j in range(3):
                t = i * 3 + j
                for p in range(P3):
                    oh, ow = divmod(p, OW3)
                    src = (2 * oh + i) * OW2 + (2 * ow + j)
                    tap3_s[t, p:p + 1, :] = act2_s[src:src + 1, :]
        acc3 = jnp.zeros((P3, LANES), jnp.float32)
        for t in range(9):
            acc3 = acc3 + jnp.dot(tap3_s[t][:, :C2], w3_ref[t],
                                  preferred_element_type=jnp.float32)
        a3 = jnp.maximum(acc3 + b3_ref[...], 0.0)                 # (P3, 128)

        # ---- fused heads: one stacked [action_scores | value] accumulator --------
        acc_h = bh_ref[...]                                        # (1, 128)
        for p in range(P3):
            acc_h = acc_h + jnp.dot(a3[p:p + 1, :C3], wh_ref[p],
                                    preferred_element_type=jnp.float32)

        lane = jax.lax.broadcasted_iota(jnp.int32, (1, LANES), 1)
        is_action = lane < num_actions
        scores = jnp.where(is_action, acc_h, -1e30)
        m = jnp.max(scores, axis=-1, keepdims=True)
        e = jnp.where(is_action, jnp.exp(scores - m), 0.0)
        denom = jnp.sum(e, axis=-1, keepdims=True)
        probs = e * pl.reciprocal(denom, approx=True)
        value = jnp.where(lane == num_actions, acc_h, 0.0)
        out_ref[...] = probs + value   # lanes [0, A) = probs, lane A = value

    return kernel


def make_actor_critic_forward(input_shape, num_actions):
    C, H, W = input_shape
    OH1, OW1 = _out_dim(H, 3, 3), _out_dim(W, 3, 3)
    OH2, OW2 = _out_dim(OH1, 3, 2), _out_dim(OW1, 3, 2)
    OH3, OW3 = _out_dim(OH2, 3, 2), _out_dim(OW2, 3, 2)
    P1, P2, P3 = OH1 * OW1, OH2 * OW2, OH3 * OW3
    K1 = 9 * C
    assert K1 <= LANES and num_actions + 1 <= LANES

    kernel = _make_fused_kernel((OH1, OW1, OH2, OW2, OH3, OW3, 16, 32, 8),
                                num_actions)
    vmem = pl.BlockSpec(memory_space=pltpu.MemorySpace.VMEM)

    fused = pl.pallas_call(
        kernel,
        out_shape=jax.ShapeDtypeStruct((1, LANES), jnp.float32),
        in_specs=[vmem] * 9,
        out_specs=vmem,
        scratch_shapes=[
            pltpu.VMEM((P1, LANES), jnp.float32),      # conv1 activation
            pltpu.VMEM((P2, LANES), jnp.float32),      # conv2 activation
            pltpu.VMEM((9, P2, LANES), jnp.float32),   # conv2 im2col taps
            pltpu.VMEM((9, P3, LANES), jnp.float32),   # conv3 im2col taps
        ],
    )

    def forward(state_nchw, prepped):
        """state_nchw: (1, C, H, W).  Returns (softmax(action_scores), values)."""
        w1p, b1p, w2p, b2p, w3p, b3p, whp, bhp = prepped
        x = jnp.transpose(state_nchw[0], (1, 2, 0)).astype(jnp.float32)  # (H, W, C)
        # conv1 stride == kernel == 3  ->  im2col is a pure (fused) reshape.
        p1 = x[:OH1 * 3, :OW1 * 3, :].reshape(OH1, 3, OW1, 3, C)
        p1 = jnp.transpose(p1, (0, 2, 1, 3, 4)).reshape(P1, K1)
        p1 = jnp.pad(p1, ((0, 0), (0, LANES - K1)))                      # K -> 128
        out = fused(p1, w1p, b1p, w2p, b2p, w3p, b3p, whp, bhp)
        probs = out[:, :num_actions]
        values = out[:, num_actions:num_actions + 1]
        return probs, values

    return jax.jit(forward)


# --------------------------- one-time parameter prep --------------------------

def prepare_params(params, input_shape, num_actions):
    """Hoisted out of the per-step path: reformat PyTorch-layout params once."""
    (w1, b1), (w2, b2), (w3, b3), (wv, bv), (wa, ba) = params
    C, H, W = input_shape
    OH1, OW1 = _out_dim(H, 3, 3), _out_dim(W, 3, 3)
    OH2, OW2 = _out_dim(OH1, 3, 2), _out_dim(OW1, 3, 2)
    OH3, OW3 = _out_dim(OH2, 3, 2), _out_dim(OW2, 3, 2)
    P3 = OH3 * OW3
    K1 = 9 * C
    A = num_actions

    # conv1: (16, C, 3, 3) -> (kh, kw, cin, cout) -> (9C, 16) -> pad (128, 128).
    w1m = jnp.transpose(w1, (2, 3, 1, 0)).reshape(K1, 16)
    w1p = jnp.zeros((LANES, LANES), jnp.float32).at[:K1, :16].set(w1m)
    b1p = jnp.zeros((1, LANES), jnp.float32).at[0, :16].set(b1)

    # conv2 / conv3: per-tap (cin, cout) matrices, cout zero-padded to 128 lanes.
    w2t = jnp.transpose(w2, (2, 3, 1, 0)).reshape(9, 16, 32)
    w2p = jnp.zeros((9, 16, LANES), jnp.float32).at[:, :, :32].set(w2t)
    b2p = jnp.zeros((1, LANES), jnp.float32).at[0, :32].set(b2)

    w3t = jnp.transpose(w3, (2, 3, 1, 0)).reshape(9, 32, 8)
    w3p = jnp.zeros((9, 32, LANES), jnp.float32).at[:, :, :8].set(w3t)
    b3p = jnp.zeros((1, LANES), jnp.float32).at[0, :8].set(b3)

    # heads: stack [action | value] -> (A+1, 8*P3).  PyTorch's state.view(1, -1)
    # flattens channel-major (f = c*P3 + p), so regroup to wh[p, c, k].
    wcat = jnp.concatenate([wa, wv], axis=0)                       # (A+1, 8*P3)
    wh = jnp.transpose(wcat.reshape(A + 1, 8, P3), (2, 1, 0))      # (P3, 8, A+1)
    whp = jnp.zeros((P3, 8, LANES), jnp.float32).at[:, :, :A + 1].set(wh)
    bhp = (jnp.zeros((1, LANES), jnp.float32)
           .at[0, :A].set(ba).at[0, A].set(bv[0]))
    return (w1p, b1p, w2p, b2p, w3p, b3p, whp, bhp)


def init_params(key, input_shape, num_actions):
    """Deterministic PyTorch-default-style (uniform) initialization."""
    C, H, W = input_shape
    ks = jax.random.split(key, 10)

    def conv_p(k1, k2, cin, cout, ksize=3):
        bound = 1.0 / jnp.sqrt(float(cin * ksize * ksize))
        w = jax.random.uniform(k1, (cout, cin, ksize, ksize), jnp.float32, -bound, bound)
        b = jax.random.uniform(k2, (cout,), jnp.float32, -bound, bound)
        return w, b

    def linear_p(k1, k2, fin, fout):
        bound = 1.0 / jnp.sqrt(float(fin))
        w = jax.random.uniform(k1, (fout, fin), jnp.float32, -bound, bound)
        b = jax.random.uniform(k2, (fout,), jnp.float32, -bound, bound)
        return w, b

    oh1, ow1 = _out_dim(H, 3, 3), _out_dim(W, 3, 3)
    oh2, ow2 = _out_dim(oh1, 3, 2), _out_dim(ow1, 3, 2)
    oh3, ow3 = _out_dim(oh2, 3, 2), _out_dim(ow2, 3, 2)
    feat = 8 * oh3 * ow3   # == ActorCritic.feature_size()

    conv1 = conv_p(ks[0], ks[1], C, 16)
    conv2 = conv_p(ks[2], ks[3], 16, 32)
    conv3 = conv_p(ks[4], ks[5], 32, 8)
    value_head = linear_p(ks[6], ks[7], feat, 1)
    action_head = linear_p(ks[8], ks[9], feat, num_actions)
    return (conv1, conv2, conv3, value_head, action_head)


# --------------------------- pure-JAX reference (for sanity) ------------------

def reference_forward(state, params):
    (w1, b1), (w2, b2), (w3, b3), (wv, bv), (wa, ba) = params
    hp = jax.lax.Precision.HIGHEST

    def conv(x, w, b, s):
        y = jax.lax.conv_general_dilated(
            x, w, (s, s), "VALID",
            dimension_numbers=("NCHW", "OIHW", "NCHW"), precision=hp)
        return jax.nn.relu(y + b.reshape(1, -1, 1, 1))

    x = conv(state.astype(jnp.float32), w1, b1, 3)
    x = conv(x, w2, b2, 2)
    x = conv(x, w3, b3, 2)
    f = x.reshape(1, -1)
    scores = jnp.dot(f, wa.T, precision=hp) + ba
    value = jnp.dot(f, wv.T, precision=hp) + bv
    return jax.nn.softmax(scores, axis=-1), value


# -------------------------------------- main ----------------------------------

if __name__ == "__main__":
    # Small shapes consistent with the module: conv stack (k3/s3, k3/s2, k3/s2)
    # needs H, W >= 21; batch is pinned to 1 by the module's state.view(1, -1).
    input_shape = (4, 36, 36)
    num_actions = 6

    key = jax.random.PRNGKey(0)
    pkey, xkey = jax.random.split(key)
    params = init_params(pkey, input_shape, num_actions)
    prepped = prepare_params(params, input_shape, num_actions)   # one-time prep
    state = jax.random.normal(xkey, (1,) + input_shape, dtype=jnp.float32)  # NCHW

    forward = make_actor_critic_forward(input_shape, num_actions)
    probs, values = forward(state, prepped)
    probs, values = jax.block_until_ready((probs, values))

    assert probs.shape == (1, num_actions)
    assert values.shape == (1, 1)
    assert bool(jnp.isfinite(probs).all()) and bool(jnp.isfinite(values).all())
    assert abs(float(jnp.sum(probs)) - 1.0) < 5e-3   # approx-reciprocal softmax

    # Loose functional check against a pure-JAX/XLA reference.
    ref_probs, ref_values = reference_forward(state, params)
    assert bool(jnp.allclose(probs, ref_probs, rtol=2e-2, atol=2e-2))
    assert bool(jnp.allclose(values, ref_values, rtol=2e-2, atol=2e-2))

    print("KERNEL_OK")
</pallas_src>

<mosaic_0001>
module attributes {stable_mosaic.version = 11 : i64} {
  func.func @kernel(%arg0: memref<144x128xf32, #tpu.memory_space<vmem>>, %arg1: memref<128x128xf32, #tpu.memory_space<vmem>>, %arg2: memref<1x128xf32, #tpu.memory_space<vmem>>, %arg3: memref<9x16x128xf32, #tpu.memory_space<vmem>>, %arg4: memref<1x128xf32, #tpu.memory_space<vmem>>, %arg5: memref<9x32x128xf32, #tpu.memory_space<vmem>>, %arg6: memref<1x128xf32, #tpu.memory_space<vmem>>, %arg7: memref<4x8x128xf32, #tpu.memory_space<vmem>>, %arg8: memref<1x128xf32, #tpu.memory_space<vmem>>, %arg9: memref<1x128xf32, #tpu.memory_space<vmem>>, %arg10: memref<144x128xf32, #tpu.memory_space<vmem>>, %arg11: memref<25x128xf32, #tpu.memory_space<vmem>>, %arg12: memref<9x25x128xf32, #tpu.memory_space<vmem>>, %arg13: memref<9x4x128xf32, #tpu.memory_space<vmem>>) attributes {dimension_semantics = [], scalar_prefetch = 0 : i64, scratch_operands = 4 : i64, tpu.core_type = #tpu.core_type<tc>} {
    %c0 = arith.constant 0 : index
    %c0_0 = arith.constant 0 : index
    %0 = vector.load %arg0[%c0, %c0_0] : memref<144x128xf32, #tpu.memory_space<vmem>>, vector<144x128xf32>
    %c0_1 = arith.constant 0 : index
    %c0_2 = arith.constant 0 : index
    %1 = vector.load %arg1[%c0_1, %c0_2] : memref<128x128xf32, #tpu.memory_space<vmem>>, vector<128x128xf32>
    %cst = arith.constant dense<0.000000e+00> : vector<144x128xf32>
    %2 = tpu.matmul %0, %1, %cst {dimension_numbers = #tpu.dot_dimension_numbers<[1], [0], [0], [1], [0, 0, 1, 1], [], []>} : vector<144x128xf32>, vector<128x128xf32>, vector<144x128xf32> -> vector<144x128xf32>
    %c0_3 = arith.constant 0 : index
    %c0_4 = arith.constant 0 : index
    %3 = vector.load %arg2[%c0_3, %c0_4] : memref<1x128xf32, #tpu.memory_space<vmem>>, vector<1x128xf32>
    %4 = vector.broadcast %3 : vector<1x128xf32> to vector<144x128xf32>
    %5 = arith.addf %2, %4 : vector<144x128xf32>
    %cst_5 = arith.constant 0.000000e+00 : f32
    %6 = vector.broadcast %cst_5 : f32 to vector<144x128xf32>
    %7 = arith.maximumf %5, %6 : vector<144x128xf32>
    %c0_6 = arith.constant 0 : index
    %c0_7 = arith.constant 0 : index
    %8 = vector.load %arg10[%c0_6, %c0_7] : memref<144x128xf32, #tpu.memory_space<vmem>>, vector<144x128xf32>
    tpu.vector_store %arg10[%c0_6, %c0_7], %7 {strides = array<i32>} : memref<144x128xf32, #tpu.memory_space<vmem>>, vector<144x128xf32>,
    %c0_8 = arith.constant 0 : index
    %c0_9 = arith.constant 0 : index
    %9 = vector.load %arg10[%c0_8, %c0_9] : memref<144x128xf32, #tpu.memory_space<vmem>>, vector<1x128xf32>
    %c0_10 = arith.constant 0 : index
    %c0_11 = arith.constant 0 : index
    %c0_12 = arith.constant 0 : index
    %10 = vector.load %arg12[%c0_10, %c0_11, %c0_12] : memref<9x25x128xf32, #tpu.memory_space<vmem>>, vector<1x1x128xf32>
    %11 = vector.shape_cast %10 : vector<1x1x128xf32> to vector<1x128xf32>
    %12 = vector.shape_cast %9 : vector<1x128xf32> to vector<1x1x128xf32>
    tpu.vector_store %arg12[%c0_10, %c0_11, %c0_12], %12 {strides = array<i32>} : memref<9x25x128xf32, #tpu.memory_space<vmem>>, vector<1x1x128xf32>,
    %c2 = arith.constant 2 : index
    %c0_13 = arith.constant 0 : index
    %13 = vector.load %arg10[%c2, %c0_13] : memref<144x128xf32, #tpu.memory_space<vmem>>, vector<1x128xf32>
    %c0_14 = arith.constant 0 : index
    %c1 = arith.constant 1 : index
    %c0_15 = arith.constant 0 : index
    %14 = vector.load %arg12[%c0_14, %c1, %c0_15] : memref<9x25x128xf32, #tpu.memory_space<vmem>>, vector<1x1x128xf32>
    %15 = vector.shape_cast %14 : vector<1x1x128xf32> to vector<1x128xf32>
    %16 = vector.shape_cast %13 : vector<1x128xf32> to vector<1x1x128xf32>
    tpu.vector_store %arg12[%c0_14, %c1, %c0_15], %16 {strides = array<i32>} : memref<9x25x128xf32, #tpu.memory_space<vmem>>, vector<1x1x128xf32>,
    %c4 = arith.constant 4 : index
    %c0_16 = arith.constant 0 : index
    %17 = vector.load %arg10[%c4, %c0_16] : memref<144x128xf32, #tpu.memory_space<vmem>>, vector<1x128xf32>
    %c0_17 = arith.constant 0 : index
    %c2_18 = arith.constant 2 : index
    %c0_19 = arith.constant 0 : index
    %18 = vector.load %arg12[%c0_17, %c2_18, %c0_19] : memref<9x25x128xf32, #tpu.memory_space<vmem>>, vector<1x1x128xf32>
    %19 = vector.shape_cast %18 : vector<1x1x128xf32> to vector<1x128xf32>
    %20 = vector.shape_cast %17 : vector<1x128xf32> to vector<1x1x128xf32>
    tpu.vector_store %arg12[%c0_17, %c2_18, %c0_19], %20 {strides = array<i32>} : memref<9x25x128xf32, #tpu.memory_space<vmem>>, vector<1x1x128xf32>,
    %c6 = arith.constant 6 : index
    %c0_20 = arith.constant 0 : index
    %21 = vector.load %arg10[%c6, %c0_20] : memref<144x128xf32, #tpu.memory_space<vmem>>, vector<1x128xf32>
    %c0_21 = arith.constant 0 : index
    %c3 = arith.constant 3 : index
    %c0_22 = arith.constant 0 : index
    %22 = vector.load %arg12[%c0_21, %c3, %c0_22] : memref<9x25x128xf32, #tpu.memory_space<vmem>>, vector<1x1x128xf32>
    %23 = vector.shape_cast %22 : vector<1x1x128xf32> to vector<1x128xf32>
    %24 = vector.shape_cast %21 : vector<1x128xf32> to vector<1x1x128xf32>
    tpu.vector_store %arg12[%c0_21, %c3, %c0_22], %24 {strides = array<i32>} : memref<9x25x128xf32, #tpu.memory_space<vmem>>, vector<1x1x128xf32>,
    %c8 = arith.constant 8 : index
    %c0_23 = arith.constant 0 : index
    %25 = vector.load %arg10[%c8, %c0_23] : memref<144x128xf32, #tpu.memory_space<vmem>>, vector<1x128xf32>
    %c0_24 = arith.constant 0 : index
    %c4_25 = arith.constant 4 : index
    %c0_26 = arith.constant 0 : index
    %26 = vector.load %arg12[%c0_24, %c4_25, %c0_26] : memref<9x25x128xf32, #tpu.memory_space<vmem>>, vector<1x1x128xf32>
    %27 = vector.shape_cast %26 : vector<1x1x128xf32> to vector<1x128xf32>
    %28 = vector.shape_cast %25 : vector<1x128xf32> to vector<1x1x128xf32>
    tpu.vector_store %arg12[%c0_24, %c4_25, %c0_26], %28 {strides = array<i32>} : memref<9x25x128xf32, #tpu.memory_space<vmem>>, vector<1x1x128xf32>,
    %c24 = arith.constant 24 : index
    %c0_27 = arith.constant 0 : index
    %29 = vector.load %arg10[%c24, %c0_27] : memref<144x128xf32, #tpu.memory_space<vmem>>, vector<1x128xf32>
    %c0_28 = arith.constant 0 : index
    %c5 = arith.constant 5 : index
    %c0_29 = arith.constant 0 : index
    %30 = vector.load %arg12[%c0_28, %c5, %c0_29] : memref<9x25x128xf32, #tpu.memory_space<vmem>>, vector<1x1x128xf32>
    %31 = vector.shape_cast %30 : vector<1x1x128xf32> to vector<1x128xf32>
    %32 = vector.shape_cast %29 : vector<1x128xf32> to vector<1x1x128xf32>
    tpu.vector_store %arg12[%c0_28, %c5, %c0_29], %32 {strides = array<i32>} : memref<9x25x128xf32, #tpu.memory_space<vmem>>, vector<1x1x128xf32>,
    %c26 = arith.constant 26 : index
    %c0_30 = arith.constant 0 : index
    %33 = vector.load %arg10[%c26, %c0_30] : memref<144x128xf32, #tpu.memory_space<vmem>>, vector<1x128xf32>
    %c0_31 = arith.constant 0 : index
    %c6_32 = arith.constant 6 : index
    %c0_33 = arith.constant 0 : index
    %34 = vector.load %arg12[%c0_31, %c6_32, %c0_33] : memref<9x25x128xf32, #tpu.memory_space<vmem>>, vector<1x1x128xf32>
    %35 = vector.shape_cast %34 : vector<1x1x128xf32> to vector<1x128xf32>
    %36 = vector.shape_cast %33 : vector<1x128xf32> to vector<1x1x128xf32>
    tpu.vector_store %arg12[%c0_31, %c6_32, %c0_33], %36 {strides = array<i32>} : memref<9x25x128xf32, #tpu.memory_space<vmem>>, vector<1x1x128xf32>,
    %c28 = arith.constant 28 : index
    %c0_34 = arith.constant 0 : index
    %37 = vector.load %arg10[%c28, %c0_34] : memref<144x128xf32, #tpu.memory_space<vmem>>, vector<1x128xf32>
    %c0_35 = arith.constant 0 : index
    %c7 = arith.constant 7 : index
    %c0_36 = arith.constant 0 : index
    %38 = vector.load %arg12[%c0_35, %c7, %c0_36] : memref<9x25x128xf32, #tpu.memory_space<vmem>>, vector<1x1x128xf32>
    %39 = vector.shape_cast %38 : vector<1x1x128xf32> to vector<1x128xf32>
    %40 = vector.shape_cast %37 : vector<1x128xf32> to vector<1x1x128xf32>
    tpu.vector_store %arg12[%c0_35, %c7, %c0_36], %40 {strides = array<i32>} : memref<9x25x128xf32, #tpu.memory_space<vmem>>, vector<1x1x128xf32>,
    %c30 = arith.constant 30 : index
    %c0_37 = arith.constant 0 : index
    %41 = vector.load %arg10[%c30, %c0_37] : memref<144x128xf32, #tpu.memory_space<vmem>>, vector<1x128xf32>
    %c0_38 = arith.constant 0 : index
    %c8_39 = arith.constant 8 : index
    %c0_40 = arith.constant 0 : index
    %42 = vector.load %arg12[%c0_38, %c8_39, %c0_40] : memref<9x25x128xf32, #tpu.memory_space<vmem>>, vector<1x1x128xf32>
    %43 = vector.shape_cast %42 : vector<1x1x128xf32> to vector<1x128xf32>
    %44 = vector.shape_cast %41 : vector<1x128xf32> to vector<1x1x128xf32>
    tpu.vector_store %arg12[%c0_38, %c8_39, %c0_40], %44 {strides = array<i32>} : memref<9x25x128xf32, #tpu.memory_space<vmem>>, vector<1x1x128xf32>,
    %c32 = arith.constant 32 : index
    %c0_41 = arith.constant 0 : index
    %45 = vector.load %arg10[%c32, %c0_41] : memref<144x128xf32, #tpu.memory_space<vmem>>, vector<1x128xf32>
    %c0_42 = arith.constant 0 : index
    %c9 = arith.constant 9 : index
    %c0_43 = arith.constant 0 : index
    %46 = vector.load %arg12[%c0_42, %c9, %c0_43] : memref<9x25x128xf32, #tpu.memory_space<vmem>>, vector<1x1x128xf32>
    %47 = vector.shape_cast %46 : vector<1x1x128xf32> to vector<1x128xf32>
    %48 = vector.shape_cast %45 : vector<1x128xf32> to vector<1x1x128xf32>
    tpu.vector_store %arg12[%c0_42, %c9, %c0_43], %48 {strides = array<i32>} : memref<9x25x128xf32, #tpu.memory_space<vmem>>, vector<1x1x128xf32>,
    %c48 = arith.constant 48 : index
    %c0_44 = arith.constant 0 : index
    %49 = vector.load %arg10[%c48, %c0_44] : memref<144x128xf32, #tpu.memory_space<vmem>>, vector<1x128xf32>
    %c0_45 = arith.constant 0 : index
    %c10 = arith.constant 10 : index
    %c0_46 = arith.constant 0 : index
    %50 = vector.load %arg12[%c0_45, %c10, %c0_46] : memref<9x25x128xf32, #tpu.memory_space<vmem>>, vector<1x1x128xf32>
    %51 = vector.shape_cast %50 : vector<1x1x128xf32> to vector<1x128xf32>
    %52 = vector.shape_cast %49 : vector<1x128xf32> to vector<1x1x128xf32>
    tpu.vector_store %arg12[%c0_45, %c10, %c0_46], %52 {strides = array<i32>} : memref<9x25x128xf32, #tpu.memory_space<vmem>>, vector<1x1x128xf32>,
    %c50 = arith.constant 50 : index
    %c0_47 = arith.constant 0 : index
    %53 = vector.load %arg10[%c50, %c0_47] : memref<144x128xf32, #tpu.memory_space<vmem>>, vector<1x128xf32>
    %c0_48 = arith.constant 0 : index
    %c11 = arith.constant 11 : index
    %c0_49 = arith.constant 0 : index
    %54 = vector.load %arg12[%c0_48, %c11, %c0_49] : memref<9x25x128xf32, #tpu.memory_space<vmem>>, vector<1x1x128xf32>
    %55 = vector.shape_cast %54 : vector<1x1x128xf32> to vector<1x128xf32>
    %56 = vector.shape_cast %53 : vector<1x128xf32> to vector<1x1x128xf32>
    tpu.vector_store %arg12[%c0_48, %c11, %c0_49], %56 {strides = array<i32>} : memref<9x25x128xf32, #tpu.memory_space<vmem>>, vector<1x1x128xf32>,
    %c52 = arith.constant 52 : index
    %c0_50 = arith.constant 0 : index
    %57 = vector.load %arg10[%c52, %c0_50] : memref<144x128xf32, #tpu.memory_space<vmem>>, vector<1x128xf32>
    %c0_51 = arith.constant 0 : index
    %c12 = arith.constant 12 : index
    %c0_52 = arith.constant 0 : index
    %58 = vector.load %arg12[%c0_51, %c12, %c0_52] : memref<9x25x128xf32, #tpu.memory_space<vmem>>, vector<1x1x128xf32>
    %59 = vector.shape_cast %58 : vector<1x1x128xf32> to vector<1x128xf32>
    %60 = vector.shape_cast %57 : vector<1x128xf32> to vector<1x1x128xf32>
    tpu.vector_store %arg12[%c0_51, %c12, %c0_52], %60 {strides = array<i32>} : memref<9x25x128xf32, #tpu.memory_space<vmem>>, vector<1x1x128xf32>,
    %c54 = arith.constant 54 : index
    %c0_53 = arith.constant 0 : index
    %61 = vector.load %arg10[%c54, %c0_53] : memref<144x128xf32, #tpu.memory_space<vmem>>, vector<1x128xf32>
    %c0_54 = arith.constant 0 : index
    %c13 = arith.constant 13 : index
    %c0_55 = arith.constant 0 : index
    %62 = vector.load %arg12[%c0_54, %c13, %c0_55] : memref<9x25x128xf32, #tpu.memory_space<vmem>>, vector<1x1x128xf32>
    %63 = vector.shape_cast %62 : vector<1x1x128xf32> to vector<1x128xf32>
    %64 = vector.shape_cast %61 : vector<1x128xf32> to vector<1x1x128xf32>
    tpu.vector_store %arg12[%c0_54, %c13, %c0_55], %64 {strides = array<i32>} : memref<9x25x128xf32, #tpu.memory_space<vmem>>, vector<1x1x128xf32>,
    %c56 = arith.constant 56 : index
    %c0_56 = arith.constant 0 : index
    %65 = vector.load %arg10[%c56, %c0_56] : memref<144x128xf32, #tpu.memory_space<vmem>>, vector<1x128xf32>
    %c0_57 = arith.constant 0 : index
    %c14 = arith.constant 14 : index
    %c0_58 = arith.constant 0 : index
    %66 = vector.load %arg12[%c0_57, %c14, %c0_58] : memref<9x25x128xf32, #tpu.memory_space<vmem>>, vector<1x1x128xf32>
    %67 = vector.shape_cast %66 : vector<1x1x128xf32> to vector<1x128xf32>
    %68 = vector.shape_cast %65 : vector<1x128xf32> to vector<1x1x128xf32>
    tpu.vector_store %arg12[%c0_57, %c14, %c0_58], %68 {strides = array<i32>} : memref<9x25x128xf32, #tpu.memory_space<vmem>>, vector<1x1x128xf32>,
    %c72 = arith.constant 72 : index
    %c0_59 = arith.constant 0 : index
    %69 = vector.load %arg10[%c72, %c0_59] : memref<144x128xf32, #tpu.memory_space<vmem>>, vector<1x128xf32>
    %c0_60 = arith.constant 0 : index
    %c15 = arith.constant 15 : index
    %c0_61 = arith.constant 0 : index
    %70 = vector.load %arg12[%c0_60, %c15, %c0_61] : memref<9x25x128xf32, #tpu.memory_space<vmem>>, vector<1x1x128xf32>
    %71 = vector.shape_cast %70 : vector<1x1x128xf32> to vector<1x128xf32>
    %72 = vector.shape_cast %69 : vector<1x128xf32> to vector<1x1x128xf32>
    tpu.vector_store %arg12[%c0_60, %c15, %c0_61], %72 {strides = array<i32>} : memref<9x25x128xf32, #tpu.memory_space<vmem>>, vector<1x1x128xf32>,
    %c74 = arith.constant 74 : index
    %c0_62 = arith.constant 0 : index
    %73 = vector.load %arg10[%c74, %c0_62] : memref<144x128xf32, #tpu.memory_space<vmem>>, vector<1x128xf32>
    %c0_63 = arith.constant 0 : index
    %c16 = arith.constant 16 : index
    %c0_64 = arith.constant 0 : index
    %74 = vector.load %arg12[%c0_63, %c16, %c0_64] : memref<9x25x128xf32, #tpu.memory_space<vmem>>, vector<1x1x128xf32>
    %75 = vector.shape_cast %74 : vector<1x1x128xf32> to vector<1x128xf32>
    %76 = vector.shape_cast %73 : vector<1x128xf32> to vector<1x1x128xf32>
    tpu.vector_store %arg12[%c0_63, %c16, %c0_64], %76 {strides = array<i32>} : memref<9x25x128xf32, #tpu.memory_space<vmem>>, vector<1x1x128xf32>,
    %c76 = arith.constant 76 : index
    %c0_65 = arith.constant 0 : index
    %77 = vector.load %arg10[%c76, %c0_65] : memref<144x128xf32, #tpu.memory_space<vmem>>, vector<1x128xf32>
    %c0_66 = arith.constant 0 : index
    %c17 = arith.constant 17 : index
    %c0_67 = arith.constant 0 : index
    %78 = vector.load %arg12[%c0_66, %c17, %c0_67] : memref<9x25x128xf32, #tpu.memory_space<vmem>>, vector<1x1x128xf32>
    %79 = vector.shape_cast %78 : vector<1x1x128xf32> to vector<1x128xf32>
    %80 = vector.shape_cast %77 : vector<1x128xf32> to vector<1x1x128xf32>
    tpu.vector_store %arg12[%c0_66, %c17, %c0_67], %80 {strides = array<i32>} : memref<9x25x128xf32, #tpu.memory_space<vmem>>, vector<1x1x128xf32>,
    %c78 = arith.constant 78 : index
    %c0_68 = arith.constant 0 : index
    %81 = vector.load %arg10[%c78, %c0_68] : memref<144x128xf32, #tpu.memory_space<vmem>>, vector<1x128xf32>
    %c0_69 = arith.constant 0 : index
    %c18 = arith.constant 18 : index
    %c0_70 = arith.constant 0 : index
    %82 = vector.load %arg12[%c0_69, %c18, %c0_70] : memref<9x25x128xf32, #tpu.memory_space<vmem>>, vector<1x1x128xf32>
    %83 = vector.shape_cast %82 : vector<1x1x128xf32> to vector<1x128xf32>
    %84 = vector.shape_cast %81 : vector<1x128xf32> to vector<1x1x128xf32>
    tpu.vector_store %arg12[%c0_69, %c18, %c0_70], %84 {strides = array<i32>} : memref<9x25x128xf32, #tpu.memory_space<vmem>>, vector<1x1x128xf32>,
    %c80 = arith.constant 80 : index
    %c0_71 = arith.constant 0 : index
    %85 = vector.load %arg10[%c80, %c0_71] : memref<144x128xf32, #tpu.memory_space<vmem>>, vector<1x128xf32>
    %c0_72 = arith.constant 0 : index
    %c19 = arith.constant 19 : index
    %c0_73 = arith.constant 0 : index
    %86 = vector.load %arg12[%c0_72, %c19, %c0_73] : memref<9x25x128xf32, #tpu.memory_space<vmem>>, vector<1x1x128xf32>
    %87 = vector.shape_cast %86 : vector<1x1x128xf32> to vector<1x128xf32>
    %88 = vector.shape_cast %85 : vector<1x128xf32> to vector<1x1x128xf32>
    tpu.vector_store %arg12[%c0_72, %c19, %c0_73], %88 {strides = array<i32>} : memref<9x25x128xf32, #tpu.memory_space<vmem>>, vector<1x1x128xf32>,
    %c96 = arith.constant 96 : index
    %c0_74 = arith.constant 0 : index
    %89 = vector.load %arg10[%c96, %c0_74] : memref<144x128xf32, #tpu.memory_space<vmem>>, vector<1x128xf32>
    %c0_75 = arith.constant 0 : index
    %c20 = arith.constant 20 : index
    %c0_76 = arith.constant 0 : index
    %90 = vector.load %arg12[%c0_75, %c20, %c0_76] : memref<9x25x128xf32, #tpu.memory_space<vmem>>, vector<1x1x128xf32>
    %91 = vector.shape_cast %90 : vector<1x1x128xf32> to vector<1x128xf32>
    %92 = vector.shape_cast %89 : vector<1x128xf32> to vector<1x1x128xf32>
    tpu.vector_store %arg12[%c0_75, %c20, %c0_76], %92 {strides = array<i32>} : memref<9x25x128xf32, #tpu.memory_space<vmem>>, vector<1x1x128xf32>,
    %c98 = arith.constant 98 : index
    %c0_77 = arith.constant 0 : index
    %93 = vector.load %arg10[%c98, %c0_77] : memref<144x128xf32, #tpu.memory_space<vmem>>, vector<1x128xf32>
    %c0_78 = arith.constant 0 : index
    %c21 = arith.constant 21 : index
    %c0_79 = arith.constant 0 : index
    %94 = vector.load %arg12[%c0_78, %c21, %c0_79] : memref<9x25x128xf32, #tpu.memory_space<vmem>>, vector<1x1x128xf32>
    %95 = vector.shape_cast %94 : vector<1x1x128xf32> to vector<1x128xf32>
    %96 = vector.shape_cast %93 : vector<1x128xf32> to vector<1x1x128xf32>
    tpu.vector_store %arg12[%c0_78, %c21, %c0_79], %96 {strides = array<i32>} : memref<9x25x128xf32, #tpu.memory_space<vmem>>, vector<1x1x128xf32>,
    %c100 = arith.constant 100 : index
    %c0_80 = arith.constant 0 : index
    %97 = vector.load %arg10[%c100, %c0_80] : memref<144x128xf32, #tpu.memory_space<vmem>>, vector<1x128xf32>
    %c0_81 = arith.constant 0 : index
    %c22 = arith.constant 22 : index
    %c0_82 = arith.constant 0 : index
    %98 = vector.load %arg12[%c0_81, %c22, %c0_82] : memref<9x25x128xf32, #tpu.memory_space<vmem>>, vector<1x1x128xf32>
    %99 = vector.shape_cast %98 : vector<1x1x128xf32> to vector<1x128xf32>
    %100 = vector.shape_cast %97 : vector<1x128xf32> to vector<1x1x128xf32>
    tpu.vector_store %arg12[%c0_81, %c22, %c0_82], %100 {strides = array<i32>} : memref<9x25x128xf32, #tpu.memory_space<vmem>>, vector<1x1x128xf32>,
    %c102 = arith.constant 102 : index
    %c0_83 = arith.constant 0 : index
    %101 = vector.load %arg10[%c102, %c0_83] : memref<144x128xf32, #tpu.memory_space<vmem>>, vector<1x128xf32>
    %c0_84 = arith.constant 0 : index
    %c23 = arith.constant 23 : index
    %c0_85 = arith.constant 0 : index
    %102 = vector.load %arg12[%c0_84, %c23, %c0_85] : memref<9x25x128xf32, #tpu.memory_space<vmem>>, vector<1x1x128xf32>
    %103 = vector.shape_cast %102 : vector<1x1x128xf32> to vector<1x128xf32>
    %104 = vector.shape_cast %101 : vector<1x128xf32> to vector<1x1x128xf32>
    tpu.vector_store %arg12[%c0_84, %c23, %c0_85], %104 {strides = array<i32>} : memref<9x25x128xf32, #tpu.memory_space<vmem>>, vector<1x1x128xf32>,
    %c104 = arith.constant 104 : index
    %c0_86 = arith.constant 0 : index
    %105 = vector.load %arg10[%c104, %c0_86] : memref<144x128xf32, #tpu.memory_space<vmem>>, vector<1x128xf32>
    %c0_87 = arith.constant 0 : index
    %c24_88 = arith.constant 24 : index
    %c0_89 = arith.constant 0 : index
    %106 = vector.load %arg12[%c0_87, %c24_88, %c0_89] : memref<9x25x128xf32, #tpu.memory_space<vmem>>, vector<1x1x128xf32>
    %107 = vector.shape_cast %106 : vector<1x1x128xf32> to vector<1x128xf32>
    %108 = vector.shape_cast %105 : vector<1x128xf32> to vector<1x1x128xf32>
    tpu.vector_store %arg12[%c0_87, %c24_88, %c0_89], %108 {strides = array<i32>} : memref<9x25x128xf32, #tpu.memory_space<vmem>>, vector<1x1x128xf32>,
    %c1_90 = arith.constant 1 : index
    %c0_91 = arith.constant 0 : index
    %109 = vector.load %arg10[%c1_90, %c0_91] : memref<144x128xf32, #tpu.memory_space<vmem>>, vector<1x128xf32>
    %c1_92 = arith.constant 1 : index
    %c0_93 = arith.constant 0 : index
    %c0_94 = arith.constant 0 : index
    %110 = vector.load %arg12[%c1_92, %c0_93, %c0_94] : memref<9x25x128xf32, #tpu.memory_space<vmem>>, vector<1x1x128xf32>
    %111 = vector.shape_cast %110 : vector<1x1x128xf32> to vector<1x128xf32>
    %112 = vector.shape_cast %109 : vector<1x128xf32> to vector<1x1x128xf32>
    tpu.vector_store %arg12[%c1_92, %c0_93, %c0_94], %112 {strides = array<i32>} : memref<9x25x128xf32, #tpu.memory_space<vmem>>, vector<1x1x128xf32>,
    %c3_95 = arith.constant 3 : index
    %c0_96 = arith.constant 0 : index
    %113 = vector.load %arg10[%c3_95, %c0_96] : memref<144x128xf32, #tpu.memory_space<vmem>>, vector<1x128xf32>
    %c1_97 = arith.constant 1 : index
    %c1_98 = arith.constant 1 : index
    %c0_99 = arith.constant 0 : index
    %114 = vector.load %arg12[%c1_97, %c1_98, %c0_99] : memref<9x25x128xf32, #tpu.memory_space<vmem>>, vector<1x1x128xf32>
    %115 = vector.shape_cast %114 : vector<1x1x128xf32> to vector<1x128xf32>
    %116 = vector.shape_cast %113 : vector<1x128xf32> to vector<1x1x128xf32>
    tpu.vector_store %arg12[%c1_97, %c1_98, %c0_99], %116 {strides = array<i32>} : memref<9x25x128xf32, #tpu.memory_space<vmem>>, vector<1x1x128xf32>,
    %c5_100 = arith.constant 5 : index
    %c0_101 = arith.constant 0 : index
    %117 = vector.load %arg10[%c5_100, %c0_101] : memref<144x128xf32, #tpu.memory_space<vmem>>, vector<1x128xf32>
    %c1_102 = arith.constant 1 : index
    %c2_103 = arith.constant 2 : index
    %c0_104 = arith.constant 0 : index
    %118 = vector.load %arg12[%c1_102, %c2_103, %c0_104] : memref<9x25x128xf32, #tpu.memory_space<vmem>>, vector<1x1x128xf32>
    %119 = vector.shape_cast %118 : vector<1x1x128xf32> to vector<1x128xf32>
    %120 = vector.shape_cast %117 : vector<1x128xf32> to vector<1x1x128xf32>
    tpu.vector_store %arg12[%c1_102, %c2_103, %c0_104], %120 {strides = array<i32>} : memref<9x25x128xf32, #tpu.memory_space<vmem>>, vector<1x1x128xf32>,
    %c7_105 = arith.constant 7 : index
    %c0_106 = arith.constant 0 : index
    %121 = vector.load %arg10[%c7_105, %c0_106] : memref<144x128xf32, #tpu.memory_space<vmem>>, vector<1x128xf32>
    %c1_107 = arith.constant 1 : index
    %c3_108 = arith.constant 3 : index
    %c0_109 = arith.constant 0 : index
    %122 = vector.load %arg12[%c1_107, %c3_108, %c0_109] : memref<9x25x128xf32, #tpu.memory_space<vmem>>, vector<1x1x128xf32>
    %123 = vector.shape_cast %122 : vector<1x1x128xf32> to vector<1x128xf32>
    %124 = vector.shape_cast %121 : vector<1x128xf32> to vector<1x1x128xf32>
    tpu.vector_store %arg12[%c1_107, %c3_108, %c0_109], %124 {strides = array<i32>} : memref<9x25x128xf32, #tpu.memory_space<vmem>>, vector<1x1x128xf32>,
    %c9_110 = arith.constant 9 : index
    %c0_111 = arith.constant 0 : index
    %125 = vector.load %arg10[%c9_110, %c0_111] : memref<144x128xf32, #tpu.memory_space<vmem>>, vector<1x128xf32>
    %c1_112 = arith.constant 1 : index
    %c4_113 = arith.constant 4 : index
    %c0_114 = arith.constant 0 : index
    %126 = vector.load %arg12[%c1_112, %c4_113, %c0_114] : memref<9x25x128xf32, #tpu.memory_space<vmem>>, vector<1x1x128xf32>
    %127 = vector.shape_cast %126 : vector<1x1x128xf32> to vector<1x128xf32>
    %128 = vector.shape_cast %125 : vector<1x128xf32> to vector<1x1x128xf32>
    tpu.vector_store %arg12[%c1_112, %c4_113, %c0_114], %128 {strides = array<i32>} : memref<9x25x128xf32, #tpu.memory_space<vmem>>, vector<1x1x128xf32>,
    %c25 = arith.constant 25 : index
    %c0_115 = arith.constant 0 : index
    %129 = vector.load %arg10[%c25, %c0_115] : memref<144x128xf32, #tpu.memory_space<vmem>>, vector<1x128xf32>
    %c1_116 = arith.constant 1 : index
    %c5_117 = arith.constant 5 : index
    %c0_118 = arith.constant 0 : index
    %130 = vector.load %arg12[%c1_116, %c5_117, %c0_118] : memref<9x25x128xf32, #tpu.memory_space<vmem>>, vector<1x1x128xf32>
    %131 = vector.shape_cast %130 : vector<1x1x128xf32> to vector<1x128xf32>
    %132 = vector.shape_cast %129 : vector<1x128xf32> to vector<1x1x128xf32>
    tpu.vector_store %arg12[%c1_116, %c5_117, %c0_118], %132 {strides = array<i32>} : memref<9x25x128xf32, #tpu.memory_space<vmem>>, vector<1x1x128xf32>,
    %c27 = arith.constant 27 : index
    %c0_119 = arith.constant 0 : index
    %133 = vector.load %arg10[%c27, %c0_119] : memref<144x128xf32, #tpu.memory_space<vmem>>, vector<1x128xf32>
    %c1_120 = arith.constant 1 : index
    %c6_121 = arith.constant 6 : index
    %c0_122 = arith.constant 0 : index
    %134 = vector.load %arg12[%c1_120, %c6_121, %c0_122] : memref<9x25x128xf32, #tpu.memory_space<vmem>>, vector<1x1x128xf32>
    %135 = vector.shape_cast %134 : vector<1x1x128xf32> to vector<1x128xf32>
    %136 = vector.shape_cast %133 : vector<1x128xf32> to vector<1x1x128xf32>
    tpu.vector_store %arg12[%c1_120, %c6_121, %c0_122], %136 {strides = array<i32>} : memref<9x25x128xf32, #tpu.memory_space<vmem>>, vector<1x1x128xf32>,
    %c29 = arith.constant 29 : index
    %c0_123 = arith.constant 0 : index
    %137 = vector.load %arg10[%c29, %c0_123] : memref<144x128xf32, #tpu.memory_space<vmem>>, vector<1x128xf32>
    %c1_124 = arith.constant 1 : index
    %c7_125 = arith.constant 7 : index
    %c0_126 = arith.constant 0 : index
    %138 = vector.load %arg12[%c1_124, %c7_125, %c0_126] : memref<9x25x128xf32, #tpu.memory_space<vmem>>, vector<1x1x128xf32>
    %139 = vector.shape_cast %138 : vector<1x1x128xf32> to vector<1x128xf32>
    %140 = vector.shape_cast %137 : vector<1x128xf32> to vector<1x1x128xf32>
    tpu.vector_store %arg12[%c1_124, %c7_125, %c0_126], %140 {strides = array<i32>} : memref<9x25x128xf32, #tpu.memory_space<vmem>>, vector<1x1x128xf32>,
    %c31 = arith.constant 31 : index
    %c0_127 = arith.constant 0 : index
    %141 = vector.load %arg10[%c31, %c0_127] : memref<144x128xf32, #tpu.memory_space<vmem>>, vector<1x128xf32>
    %c1_128 = arith.constant 1 : index
    %c8_129 = arith.constant 8 : index
    %c0_130 = arith.constant 0 : index
    %142 = vector.load %arg12[%c1_128, %c8_129, %c0_130] : memref<9x25x128xf32, #tpu.memory_space<vmem>>, vector<1x1x128xf32>
    %143 = vector.shape_cast %142 : vector<1x1x128xf32> to vector<1x128xf32>
    %144 = vector.shape_cast %141 : vector<1x128xf32> to vector<1x1x128xf32>
    tpu.vector_store %arg12[%c1_128, %c8_129, %c0_130], %144 {strides = array<i32>} : memref<9x25x128xf32, #tpu.memory_space<vmem>>, vector<1x1x128xf32>,
    %c33 = arith.constant 33 : index
    %c0_131 = arith.constant 0 : index
    %145 = vector.load %arg10[%c33, %c0_131] : memref<144x128xf32, #tpu.memory_space<vmem>>, vector<1x128xf32>
    %c1_132 = arith.constant 1 : index
    %c9_133 = arith.constant 9 : index
    %c0_134 = arith.constant 0 : index
    %146 = vector.load %arg12[%c1_132, %c9_133, %c0_134] : memref<9x25x128xf32, #tpu.memory_space<vmem>>, vector<1x1x128xf32>
    %147 = vector.shape_cast %146 : vector<1x1x128xf32> to vector<1x128xf32>
    %148 = vector.shape_cast %145 : vector<1x128xf32> to vector<1x1x128xf32>
    tpu.vector_store %arg12[%c1_132, %c9_133, %c0_134], %148 {strides = array<i32>} : memref<9x25x128xf32, #tpu.memory_space<vmem>>, vector<1x1x128xf32>,
    %c49 = arith.constant 49 : index
    %c0_135 = arith.constant 0 : index
    %149 = vector.load %arg10[%c49, %c0_135] : memref<144x128xf32, #tpu.memory_space<vmem>>, vector<1x128xf32>
    %c1_136 = arith.constant 1 : index
    %c10_137 = arith.constant 10 : index
    %c0_138 = arith.constant 0 : index
    %150 = vector.load %arg12[%c1_136, %c10_137, %c0_138] : memref<9x25x128xf32, #tpu.memory_space<vmem>>, vector<1x1x128xf32>
    %151 = vector.shape_cast %150 : vector<1x1x128xf32> to vector<1x128xf32>
    %152 = vector.shape_cast %149 : vector<1x128xf32> to vector<1x1x128xf32>
    tpu.vector_store %arg12[%c1_136, %c10_137, %c0_138], %152 {strides = array<i32>} : memref<9x25x128xf32, #tpu.memory_space<vmem>>, vector<1x1x128xf32>,
    %c51 = arith.constant 51 : index
    %c0_139 = arith.constant 0 : index
    %153 = vector.load %arg10[%c51, %c0_139] : memref<144x128xf32, #tpu.memory_space<vmem>>, vector<1x128xf32>
    %c1_140 = arith.constant 1 : index
    %c11_141 = arith.constant 11 : index
    %c0_142 = arith.constant 0 : index
    %154 = vector.load %arg12[%c1_140, %c11_141, %c0_142] : memref<9x25x128xf32, #tpu.memory_space<vmem>>, vector<1x1x128xf32>
    %155 = vector.shape_cast %154 : vector<1x1x128xf32> to vector<1x128xf32>
    %156 = vector.shape_cast %153 : vector<1x128xf32> to vector<1x1x128xf32>
    tpu.vector_store %arg12[%c1_140, %c11_141, %c0_142], %156 {strides = array<i32>} : memref<9x25x128xf32, #tpu.memory_space<vmem>>, vector<1x1x128xf32>,
    %c53 = arith.constant 53 : index
    %c0_143 = arith.constant 0 : index
    %157 = vector.load %arg10[%c53, %c0_143] : memref<144x128xf32, #tpu.memory_space<vmem>>, vector<1x128xf32>
    %c1_144 = arith.constant 1 : index
    %c12_145 = arith.constant 12 : index
    %c0_146 = arith.constant 0 : index
    %158 = vector.load %arg12[%c1_144, %c12_145, %c0_146] : memref<9x25x128xf32, #tpu.memory_space<vmem>>, vector<1x1x128xf32>
    %159 = vector.shape_cast %158 : vector<1x1x128xf32> to vector<1x128xf32>
    %160 = vector.shape_cast %157 : vector<1x128xf32> to vector<1x1x128xf32>
    tpu.vector_store %arg12[%c1_144, %c12_145, %c0_146], %160 {strides = array<i32>} : memref<9x25x128xf32, #tpu.memory_space<vmem>>, vector<1x1x128xf32>,
    %c55 = arith.constant 55 : index
    %c0_147 = arith.constant 0 : index
    %161 = vector.load %arg10[%c55, %c0_147] : memref<144x128xf32, #tpu.memory_space<vmem>>, vector<1x128xf32>
    %c1_148 = arith.constant 1 : index
    %c13_149 = arith.constant 13 : index
    %c0_150 = arith.constant 0 : index
    %162 = vector.load %arg12[%c1_148, %c13_149, %c0_150] : memref<9x25x128xf32, #tpu.memory_space<vmem>>, vector<1x1x128xf32>
    %163 = vector.shape_cast %162 : vector<1x1x128xf32> to vector<1x128xf32>
    %164 = vector.shape_cast %161 : vector<1x128xf32> to vector<1x1x128xf32>
    tpu.vector_store %arg12[%c1_148, %c13_149, %c0_150], %164 {strides = array<i32>} : memref<9x25x128xf32, #tpu.memory_space<vmem>>, vector<1x1x128xf32>,
    %c57 = arith.constant 57 : index
    %c0_151 = arith.constant 0 : index
    %165 = vector.load %arg10[%c57, %c0_151] : memref<144x128xf32, #tpu.memory_space<vmem>>, vector<1x128xf32>
    %c1_152 = arith.constant 1 : index
    %c14_153 = arith.constant 14 : index
    %c0_154 = arith.constant 0 : index
    %166 = vector.load %arg12[%c1_152, %c14_153, %c0_154] : memref<9x25x128xf32, #tpu.memory_space<vmem>>, vector<1x1x128xf32>
    %167 = vector.shape_cast %166 : vector<1x1x128xf32> to vector<1x128xf32>
    %168 = vector.shape_cast %165 : vector<1x128xf32> to vector<1x1x128xf32>
    tpu.vector_store %arg12[%c1_152, %c14_153, %c0_154], %168 {strides = array<i32>} : memref<9x25x128xf32, #tpu.memory_space<vmem>>, vector<1x1x128xf32>,
    %c73 = arith.constant 73 : index
    %c0_155 = arith.constant 0 : index
    %169 = vector.load %arg10[%c73, %c0_155] : memref<144x128xf32, #tpu.memory_space<vmem>>, vector<1x128xf32>
    %c1_156 = arith.constant 1 : index
    %c15_157 = arith.constant 15 : index
    %c0_158 = arith.constant 0 : index
    %170 = vector.load %arg12[%c1_156, %c15_157, %c0_158] : memref<9x25x128xf32, #tpu.memory_space<vmem>>, vector<1x1x128xf32>
    %171 = vector.shape_cast %170 : vector<1x1x128xf32> to vector<1x128xf32>
    %172 = vector.shape_cast %169 : vector<1x128xf32> to vector<1x1x128xf32>
    tpu.vector_store %arg12[%c1_156, %c15_157, %c0_158], %172 {strides = array<i32>} : memref<9x25x128xf32, #tpu.memory_space<vmem>>, vector<1x1x128xf32>,
    %c75 = arith.constant 75 : index
    %c0_159 = arith.constant 0 : index
    %173 = vector.load %arg10[%c75, %c0_159] : memref<144x128xf32, #tpu.memory_space<vmem>>, vector<1x128xf32>
    %c1_160 = arith.constant 1 : index
    %c16_161 = arith.constant 16 : index
    %c0_162 = arith.constant 0 : index
    %174 = vector.load %arg12[%c1_160, %c16_161, %c0_162] : memref<9x25x128xf32, #tpu.memory_space<vmem>>, vector<1x1x128xf32>
    %175 = vector.shape_cast %174 : vector<1x1x128xf32> to vector<1x128xf32>
    %176 = vector.shape_cast %173 : vector<1x128xf32> to vector<1x1x128xf32>
    tpu.vector_store %arg12[%c1_160, %c16_161, %c0_162], %176 {strides = array<i32>} : memref<9x25x128xf32, #tpu.memory_space<vmem>>, vector<1x1x128xf32>,
    %c77 = arith.constant 77 : index
    %c0_163 = arith.constant 0 : index
    %177 = vector.load %arg10[%c77, %c0_163] : memref<144x128xf32, #tpu.memory_space<vmem>>, vector<1x128xf32>
    %c1_164 = arith.constant 1 : index
    %c17_165 = arith.constant 17 : index
    %c0_166 = arith.constant 0 : index
    %178 = vector.load %arg12[%c1_164, %c17_165, %c0_166] : memref<9x25x128xf32, #tpu.memory_space<vmem>>, vector<1x1x128xf32>
    %179 = vector.shape_cast %178 : vector<1x1x128xf32> to vector<1x128xf32>
    %180 = vector.shape_cast %177 : vector<1x128xf32> to vector<1x1x128xf32>
    tpu.vector_store %arg12[%c1_164, %c17_165, %c0_166], %180 {strides = array<i32>} : memref<9x25x128xf32, #tpu.memory_space<vmem>>, vector<1x1x128xf32>,
    %c79 = arith.constant 79 : index
    %c0_167 = arith.constant 0 : index
    %181 = vector.load %arg10[%c79, %c0_167] : memref<144x128xf32, #tpu.memory_space<vmem>>, vector<1x128xf32>
    %c1_168 = arith.constant 1 : index
    %c18_169 = arith.constant 18 : index
    %c0_170 = arith.constant 0 : index
    %182 = vector.load %arg12[%c1_168, %c18_169, %c0_170] : memref<9x25x128xf32, #tpu.memory_space<vmem>>, vector<1x1x128xf32>
    %183 = vector.shape_cast %182 : vector<1x1x128xf32> to vector<1x128xf32>
    %184 = vector.shape_cast %181 : vector<1x128xf32> to vector<1x1x128xf32>
    tpu.vector_store %arg12[%c1_168, %c18_169, %c0_170], %184 {strides = array<i32>} : memref<9x25x128xf32, #tpu.memory_space<vmem>>, vector<1x1x128xf32>,
    %c81 = arith.constant 81 : index
    %c0_171 = arith.constant 0 : index
    %185 = vector.load %arg10[%c81, %c0_171] : memref<144x128xf32, #tpu.memory_space<vmem>>, vector<1x128xf32>
    %c1_172 = arith.constant 1 : index
    %c19_173 = arith.constant 19 : index
    %c0_174 = arith.constant 0 : index
    %186 = vector.load %arg12[%c1_172, %c19_173, %c0_174] : memref<9x25x128xf32, #tpu.memory_space<vmem>>, vector<1x1x128xf32>
    %187 = vector.shape_cast %186 : vector<1x1x128xf32> to vector<1x128xf32>
    %188 = vector.shape_cast %185 : vector<1x128xf32> to vector<1x1x128xf32>
    tpu.vector_store %arg12[%c1_172, %c19_173, %c0_174], %188 {strides = array<i32>} : memref<9x25x128xf32, #tpu.memory_space<vmem>>, vector<1x1x128xf32>,
    %c97 = arith.constant 97 : index
    %c0_175 = arith.constant 0 : index
    %189 = vector.load %arg10[%c97, %c0_175] : memref<144x128xf32, #tpu.memory_space<vmem>>, vector<1x128xf32>
    %c1_176 = arith.constant 1 : index
    %c20_177 = arith.constant 20 : index
    %c0_178 = arith.constant 0 : index
    %190 = vector.load %arg12[%c1_176, %c20_177, %c0_178] : memref<9x25x128xf32, #tpu.memory_space<vmem>>, vector<1x1x128xf32>
    %191 = vector.shape_cast %190 : vector<1x1x128xf32> to vector<1x128xf32>
    %192 = vector.shape_cast %189 : vector<1x128xf32> to vector<1x1x128xf32>
    tpu.vector_store %arg12[%c1_176, %c20_177, %c0_178], %192 {strides = array<i32>} : memref<9x25x128xf32, #tpu.memory_space<vmem>>, vector<1x1x128xf32>,
    %c99 = arith.constant 99 : index
    %c0_179 = arith.constant 0 : index
    %193 = vector.load %arg10[%c99, %c0_179] : memref<144x128xf32, #tpu.memory_space<vmem>>, vector<1x128xf32>
    %c1_180 = arith.constant 1 : index
    %c21_181 = arith.constant 21 : index
    %c0_182 = arith.constant 0 : index
    %194 = vector.load %arg12[%c1_180, %c21_181, %c0_182] : memref<9x25x128xf32, #tpu.memory_space<vmem>>, vector<1x1x128xf32>
    %195 = vector.shape_cast %194 : vector<1x1x128xf32> to vector<1x128xf32>
    %196 = vector.shape_cast %193 : vector<1x128xf32> to vector<1x1x128xf32>
    tpu.vector_store %arg12[%c1_180, %c21_181, %c0_182], %196 {strides = array<i32>} : memref<9x25x128xf32, #tpu.memory_space<vmem>>, vector<1x1x128xf32>,
    %c101 = arith.constant 101 : index
    %c0_183 = arith.constant 0 : index
    %197 = vector.load %arg10[%c101, %c0_183] : memref<144x128xf32, #tpu.memory_space<vmem>>, vector<1x128xf32>
    %c1_184 = arith.constant 1 : index
    %c22_185 = arith.constant 22 : index
    %c0_186 = arith.constant 0 : index
    %198 = vector.load %arg12[%c1_184, %c22_185, %c0_186] : memref<9x25x128xf32, #tpu.memory_space<vmem>>, vector<1x1x128xf32>
    %199 = vector.shape_cast %198 : vector<1x1x128xf32> to vector<1x128xf32>
    %200 = vector.shape_cast %197 : vector<1x128xf32> to vector<1x1x128xf32>
    tpu.vector_store %arg12[%c1_184, %c22_185, %c0_186], %200 {strides = array<i32>} : memref<9x25x128xf32, #tpu.memory_space<vmem>>, vector<1x1x128xf32>,
    %c103 = arith.constant 103 : index
    %c0_187 = arith.constant 0 : index
    %201 = vector.load %arg10[%c103, %c0_187] : memref<144x128xf32, #tpu.memory_space<vmem>>, vector<1x128xf32>
    %c1_188 = arith.constant 1 : index
    %c23_189 = arith.constant 23 : index
    %c0_190 = arith.constant 0 : index
    %202 = vector.load %arg12[%c1_188, %c23_189, %c0_190] : memref<9x25x128xf32, #tpu.memory_space<vmem>>, vector<1x1x128xf32>
    %203 = vector.shape_cast %202 : vector<1x1x128xf32> to vector<1x128xf32>
    %204 = vector.shape_cast %201 : vector<1x128xf32> to vector<1x1x128xf32>
    tpu.vector_store %arg12[%c1_188, %c23_189, %c0_190], %204 {strides = array<i32>} : memref<9x25x128xf32, #tpu.memory_space<vmem>>, vector<1x1x128xf32>,
    %c105 = arith.constant 105 : index
    %c0_191 = arith.constant 0 : index
    %205 = vector.load %arg10[%c105, %c0_191] : memref<144x128xf32, #tpu.memory_space<vmem>>, vector<1x128xf32>
    %c1_192 = arith.constant 1 : index
    %c24_193 = arith.constant 24 : index
    %c0_194 = arith.constant 0 : index
    %206 = vector.load %arg12[%c1_192, %c24_193, %c0_194] : memref<9x25x128xf32, #tpu.memory_space<vmem>>, vector<1x1x128xf32>
    %207 = vector.shape_cast %206 : vector<1x1x128xf32> to vector<1x128xf32>
    %208 = vector.shape_cast %205 : vector<1x128xf32> to vector<1x1x128xf32>
    tpu.vector_store %arg12[%c1_192, %c24_193, %c0_194], %208 {strides = array<i32>} : memref<9x25x128xf32, #tpu.memory_space<vmem>>, vector<1x1x128xf32>,
    %c2_195 = arith.constant 2 : index
    %c0_196 = arith.constant 0 : index
    %209 = vector.load %arg10[%c2_195, %c0_196] : memref<144x128xf32, #tpu.memory_space<vmem>>, vector<1x128xf32>
    %c2_197 = arith.constant 2 : index
    %c0_198 = arith.constant 0 : index
    %c0_199 = arith.constant 0 : index
    %210 = vector.load %arg12[%c2_197, %c0_198, %c0_199] : memref<9x25x128xf32, #tpu.memory_space<vmem>>, vector<1x1x128xf32>
    %211 = vector.shape_cast %210 : vector<1x1x128xf32> to vector<1x128xf32>
    %212 = vector.shape_cast %209 : vector<1x128xf32> to vector<1x1x128xf32>
    tpu.vector_store %arg12[%c2_197, %c0_198, %c0_199], %212 {strides = array<i32>} : memref<9x25x128xf32, #tpu.memory_space<vmem>>, vector<1x1x128xf32>,
    %c4_200 = arith.constant 4 : index
    %c0_201 = arith.constant 0 : index
    %213 = vector.load %arg10[%c4_200, %c0_201] : memref<144x128xf32, #tpu.memory_space<vmem>>, vector<1x128xf32>
    %c2_202 = arith.constant 2 : index
    %c1_203 = arith.constant 1 : index
    %c0_204 = arith.constant 0 : index
    %214 = vector.load %arg12[%c2_202, %c1_203, %c0_204] : memref<9x25x128xf32, #tpu.memory_space<vmem>>, vector<1x1x128xf32>
    %215 = vector.shape_cast %214 : vector<1x1x128xf32> to vector<1x128xf32>
    %216 = vector.shape_cast %213 : vector<1x128xf32> to vector<1x1x128xf32>
    tpu.vector_store %arg12[%c2_202, %c1_203, %c0_204], %216 {strides = array<i32>} : memref<9x25x128xf32, #tpu.memory_space<vmem>>, vector<1x1x128xf32>,
    %c6_205 = arith.constant 6 : index
    %c0_206 = arith.constant 0 : index
    %217 = vector.load %arg10[%c6_205, %c0_206] : memref<144x128xf32, #tpu.memory_space<vmem>>, vector<1x128xf32>
    %c2_207 = arith.constant 2 : index
    %c2_208 = arith.constant 2 : index
    %c0_209 = arith.constant 0 : index
    %218 = vector.load %arg12[%c2_207, %c2_208, %c0_209] : memref<9x25x128xf32, #tpu.memory_space<vmem>>, vector<1x1x128xf32>
    %219 = vector.shape_cast %218 : vector<1x1x128xf32> to vector<1x128xf32>
    %220 = vector.shape_cast %217 : vector<1x128xf32> to vector<1x1x128xf32>
    tpu.vector_store %arg12[%c2_207, %c2_208, %c0_209], %220 {strides = array<i32>} : memref<9x25x128xf32, #tpu.memory_space<vmem>>, vector<1x1x128xf32>,
    %c8_210 = arith.constant 8 : index
    %c0_211 = arith.constant 0 : index
    %221 = vector.load %arg10[%c8_210, %c0_211] : memref<144x128xf32, #tpu.memory_space<vmem>>, vector<1x128xf32>
    %c2_212 = arith.constant 2 : index
    %c3_213 = arith.constant 3 : index
    %c0_214 = arith.constant 0 : index
    %222 = vector.load %arg12[%c2_212, %c3_213, %c0_214] : memref<9x25x128xf32, #tpu.memory_space<vmem>>, vector<1x1x128xf32>
    %223 = vector.shape_cast %222 : vector<1x1x128xf32> to vector<1x128xf32>
    %224 = vector.shape_cast %221 : vector<1x128xf32> to vector<1x1x128xf32>
    tpu.vector_store %arg12[%c2_212, %c3_213, %c0_214], %224 {strides = array<i32>} : memref<9x25x128xf32, #tpu.memory_space<vmem>>, vector<1x1x128xf32>,
    %c10_215 = arith.constant 10 : index
    %c0_216 = arith.constant 0 : index
    %225 = vector.load %arg10[%c10_215, %c0_216] : memref<144x128xf32, #tpu.memory_space<vmem>>, vector<1x128xf32>
    %c2_217 = arith.constant 2 : index
    %c4_218 = arith.constant 4 : index
    %c0_219 = arith.constant 0 : index
    %226 = vector.load %arg12[%c2_217, %c4_218, %c0_219] : memref<9x25x128xf32, #tpu.memory_space<vmem>>, vector<1x1x128xf32>
    %227 = vector.shape_cast %226 : vector<1x1x128xf32> to vector<1x128xf32>
    %228 = vector.shape_cast %225 : vector<1x128xf32> to vector<1x1x128xf32>
    tpu.vector_store %arg12[%c2_217, %c4_218, %c0_219], %228 {strides = array<i32>} : memref<9x25x128xf32, #tpu.memory_space<vmem>>, vector<1x1x128xf32>,
    %c26_220 = arith.constant 26 : index
    %c0_221 = arith.constant 0 : index
    %229 = vector.load %arg10[%c26_220, %c0_221] : memref<144x128xf32, #tpu.memory_space<vmem>>, vector<1x128xf32>
    %c2_222 = arith.constant 2 : index
    %c5_223 = arith.constant 5 : index
    %c0_224 = arith.constant 0 : index
    %230 = vector.load %arg12[%c2_222, %c5_223, %c0_224] : memref<9x25x128xf32, #tpu.memory_space<vmem>>, vector<1x1x128xf32>
    %231 = vector.shape_cast %230 : vector<1x1x128xf32> to vector<1x128xf32>
    %232 = vector.shape_cast %229 : vector<1x128xf32> to vector<1x1x128xf32>
    tpu.vector_store %arg12[%c2_222, %c5_223, %c0_224], %232 {strides = array<i32>} : memref<9x25x128xf32, #tpu.memory_space<vmem>>, vector<1x1x128xf32>,
    %c28_225 = arith.constant 28 : index
    %c0_226 = arith.constant 0 : index
    %233 = vector.load %arg10[%c28_225, %c0_226] : memref<144x128xf32, #tpu.memory_space<vmem>>, vector<1x128xf32>
    %c2_227 = arith.constant 2 : index
    %c6_228 = arith.constant 6 : index
    %c0_229 = arith.constant 0 : index
    %234 = vector.load %arg12[%c2_227, %c6_228, %c0_229] : memref<9x25x128xf32, #tpu.memory_space<vmem>>, vector<1x1x128xf32>
    %235 = vector.shape_cast %234 : vector<1x1x128xf32> to vector<1x128xf32>
    %236 = vector.shape_cast %233 : vector<1x128xf32> to vector<1x1x128xf32>
    tpu.vector_store %arg12[%c2_227, %c6_228, %c0_229], %236 {strides = array<i32>} : memref<9x25x128xf32, #tpu.memory_space<vmem>>, vector<1x1x128xf32>,
    %c30_230 = arith.constant 30 : index
    %c0_231 = arith.constant 0 : index
    %237 = vector.load %arg10[%c30_230, %c0_231] : memref<144x128xf32, #tpu.memory_space<vmem>>, vector<1x128xf32>
    %c2_232 = arith.constant 2 : index
    %c7_233 = arith.constant 7 : index
    %c0_234 = arith.constant 0 : index
    %238 = vector.load %arg12[%c2_232, %c7_233, %c0_234] : memref<9x25x128xf32, #tpu.memory_space<vmem>>, vector<1x1x128xf32>
    %239 = vector.shape_cast %238 : vector<1x1x128xf32> to vector<1x128xf32>
    %240 = vector.shape_cast %237 : vector<1x128xf32> to vector<1x1x128xf32>
    tpu.vector_store %arg12[%c2_232, %c7_233, %c0_234], %240 {strides = array<i32>} : memref<9x25x128xf32, #tpu.memory_space<vmem>>, vector<1x1x128xf32>,
    %c32_235 = arith.constant 32 : index
    %c0_236 = arith.constant 0 : index
    %241 = vector.load %arg10[%c32_235, %c0_236] : memref<144x128xf32, #tpu.memory_space<vmem>>, vector<1x128xf32>
    %c2_237 = arith.constant 2 : index
    %c8_238 = arith.constant 8 : index
    %c0_239 = arith.constant 0 : index
    %242 = vector.load %arg12[%c2_237, %c8_238, %c0_239] : memref<9x25x128xf32, #tpu.memory_space<vmem>>, vector<1x1x128xf32>
    %243 = vector.shape_cast %242 : vector<1x1x128xf32> to vector<1x128xf32>
    %244 = vector.shape_cast %241 : vector<1x128xf32> to vector<1x1x128xf32>
    tpu.vector_store %arg12[%c2_237, %c8_238, %c0_239], %244 {strides = array<i32>} : memref<9x25x128xf32, #tpu.memory_space<vmem>>, vector<1x1x128xf32>,
    %c34 = arith.constant 34 : index
    %c0_240 = arith.constant 0 : index
    %245 = vector.load %arg10[%c34, %c0_240] : memref<144x128xf32, #tpu.memory_space<vmem>>, vector<1x128xf32>
    %c2_241 = arith.constant 2 : index
    %c9_242 = arith.constant 9 : index
    %c0_243 = arith.constant 0 : index
    %246 = vector.load %arg12[%c2_241, %c9_242, %c0_243] : memref<9x25x128xf32, #tpu.memory_space<vmem>>, vector<1x1x128xf32>
    %247 = vector.shape_cast %246 : vector<1x1x128xf32> to vector<1x128xf32>
    %248 = vector.shape_cast %245 : vector<1x128xf32> to vector<1x1x128xf32>
    tpu.vector_store %arg12[%c2_241, %c9_242, %c0_243], %248 {strides = array<i32>} : memref<9x25x128xf32, #tpu.memory_space<vmem>>, vector<1x1x128xf32>,
    %c50_244 = arith.constant 50 : index
    %c0_245 = arith.constant 0 : index
    %249 = vector.load %arg10[%c50_244, %c0_245] : memref<144x128xf32, #tpu.memory_space<vmem>>, vector<1x128xf32>
    %c2_246 = arith.constant 2 : index
    %c10_247 = arith.constant 10 : index
    %c0_248 = arith.constant 0 : index
    %250 = vector.load %arg12[%c2_246, %c10_247, %c0_248] : memref<9x25x128xf32, #tpu.memory_space<vmem>>, vector<1x1x128xf32>
    %251 = vector.shape_cast %250 : vector<1x1x128xf32> to vector<1x128xf32>
    %252 = vector.shape_cast %249 : vector<1x128xf32> to vector<1x1x128xf32>
    tpu.vector_store %arg12[%c2_246, %c10_247, %c0_248], %252 {strides = array<i32>} : memref<9x25x128xf32, #tpu.memory_space<vmem>>, vector<1x1x128xf32>,
    %c52_249 = arith.constant 52 : index
    %c0_250 = arith.constant 0 : index
    %253 = vector.load %arg10[%c52_249, %c0_250] : memref<144x128xf32, #tpu.memory_space<vmem>>, vector<1x128xf32>
    %c2_251 = arith.constant 2 : index
    %c11_252 = arith.constant 11 : index
    %c0_253 = arith.constant 0 : index
    %254 = vector.load %arg12[%c2_251, %c11_252, %c0_253] : memref<9x25x128xf32, #tpu.memory_space<vmem>>, vector<1x1x128xf32>
    %255 = vector.shape_cast %254 : vector<1x1x128xf32> to vector<1x128xf32>
    %256 = vector.shape_cast %253 : vector<1x128xf32> to vector<1x1x128xf32>
    tpu.vector_store %arg12[%c2_251, %c11_252, %c0_253], %256 {strides = array<i32>} : memref<9x25x128xf32, #tpu.memory_space<vmem>>, vector<1x1x128xf32>,
    %c54_254 = arith.constant 54 : index
    %c0_255 = arith.constant 0 : index
    %257 = vector.load %arg10[%c54_254, %c0_255] : memref<144x128xf32, #tpu.memory_space<vmem>>, vector<1x128xf32>
    %c2_256 = arith.constant 2 : index
    %c12_257 = arith.constant 12 : index
    %c0_258 = arith.constant 0 : index
    %258 = vector.load %arg12[%c2_256, %c12_257, %c0_258] : memref<9x25x128xf32, #tpu.memory_space<vmem>>, vector<1x1x128xf32>
    %259 = vector.shape_cast %258 : vector<1x1x128xf32> to vector<1x128xf32>
    %260 = vector.shape_cast %257 : vector<1x128xf32> to vector<1x1x128xf32>
    tpu.vector_store %arg12[%c2_256, %c12_257, %c0_258], %260 {strides = array<i32>} : memref<9x25x128xf32, #tpu.memory_space<vmem>>, vector<1x1x128xf32>,
    %c56_259 = arith.constant 56 : index
    %c0_260 = arith.constant 0 : index
    %261 = vector.load %arg10[%c56_259, %c0_260] : memref<144x128xf32, #tpu.memory_space<vmem>>, vector<1x128xf32>
    %c2_261 = arith.constant 2 : index
    %c13_262 = arith.constant 13 : index
    %c0_263 = arith.constant 0 : index
    %262 = vector.load %arg12[%c2_261, %c13_262, %c0_263] : memref<9x25x128xf32, #tpu.memory_space<vmem>>, vector<1x1x128xf32>
    %263 = vector.shape_cast %262 : vector<1x1x128xf32> to vector<1x128xf32>
    %264 = vector.shape_cast %261 : vector<1x128xf32> to vector<1x1x128xf32>
    tpu.vector_store %arg12[%c2_261, %c13_262, %c0_263], %264 {strides = array<i32>} : memref<9x25x128xf32, #tpu.memory_space<vmem>>, vector<1x1x128xf32>,
    %c58 = arith.constant 58 : index
    %c0_264 = arith.constant 0 : index
    %265 = vector.load %arg10[%c58, %c0_264] : memref<144x128xf32, #tpu.memory_space<vmem>>, vector<1x128xf32>
    %c2_265 = arith.constant 2 : index
    %c14_266 = arith.constant 14 : index
    %c0_267 = arith.constant 0 : index
    %266 = vector.load %arg12[%c2_265, %c14_266, %c0_267] : memref<9x25x128xf32, #tpu.memory_space<vmem>>, vector<1x1x128xf32>
    %267 = vector.shape_cast %266 : vector<1x1x128xf32> to vector<1x128xf32>
    %268 = vector.shape_cast %265 : vector<1x128xf32> to vector<1x1x128xf32>
    tpu.vector_store %arg12[%c2_265, %c14_266, %c0_267], %268 {strides = array<i32>} : memref<9x25x128xf32, #tpu.memory_space<vmem>>, vector<1x1x128xf32>,
    %c74_268 = arith.constant 74 : index
    %c0_269 = arith.constant 0 : index
    %269 = vector.load %arg10[%c74_268, %c0_269] : memref<144x128xf32, #tpu.memory_space<vmem>>, vector<1x128xf32>
    %c2_270 = arith.constant 2 : index
    %c15_271 = arith.constant 15 : index
    %c0_272 = arith.constant 0 : index
    %270 = vector.load %arg12[%c2_270, %c15_271, %c0_272] : memref<9x25x128xf32, #tpu.memory_space<vmem>>, vector<1x1x128xf32>
    %271 = vector.shape_cast %270 : vector<1x1x128xf32> to vector<1x128xf32>
    %272 = vector.shape_cast %269 : vector<1x128xf32> to vector<1x1x128xf32>
    tpu.vector_store %arg12[%c2_270, %c15_271, %c0_272], %272 {strides = array<i32>} : memref<9x25x128xf32, #tpu.memory_space<vmem>>, vector<1x1x128xf32>,
    %c76_273 = arith.constant 76 : index
    %c0_274 = arith.constant 0 : index
    %273 = vector.load %arg10[%c76_273, %c0_274] : memref<144x128xf32, #tpu.memory_space<vmem>>, vector<1x128xf32>
    %c2_275 = arith.constant 2 : index
    %c16_276 = arith.constant 16 : index
    %c0_277 = arith.constant 0 : index
    %274 = vector.load %arg12[%c2_275, %c16_276, %c0_277] : memref<9x25x128xf32, #tpu.memory_space<vmem>>, vector<1x1x128xf32>
    %275 = vector.shape_cast %274 : vector<1x1x128xf32> to vector<1x128xf32>
    %276 = vector.shape_cast %273 : vector<1x128xf32> to vector<1x1x128xf32>
    tpu.vector_store %arg12[%c2_275, %c16_276, %c0_277], %276 {strides = array<i32>} : memref<9x25x128xf32, #tpu.memory_space<vmem>>, vector<1x1x128xf32>,
    %c78_278 = arith.constant 78 : index
    %c0_279 = arith.constant 0 : index
    %277 = vector.load %arg10[%c78_278, %c0_279] : memref<144x128xf32, #tpu.memory_space<vmem>>, vector<1x128xf32>
    %c2_280 = arith.constant 2 : index
    %c17_281 = arith.constant 17 : index
    %c0_282 = arith.constant 0 : index
    %278 = vector.load %arg12[%c2_280, %c17_281, %c0_282] : memref<9x25x128xf32, #tpu.memory_space<vmem>>, vector<1x1x128xf32>
    %279 = vector.shape_cast %278 : vector<1x1x128xf32> to vector<1x128xf32>
    %280 = vector.shape_cast %277 : vector<1x128xf32> to vector<1x1x128xf32>
    tpu.vector_store %arg12[%c2_280, %c17_281, %c0_282], %280 {strides = array<i32>} : memref<9x25x128xf32, #tpu.memory_space<vmem>>, vector<1x1x128xf32>,
    %c80_283 = arith.constant 80 : index
    %c0_284 = arith.constant 0 : index
    %281 = vector.load %arg10[%c80_283, %c0_284] : memref<144x128xf32, #tpu.memory_space<vmem>>, vector<1x128xf32>
    %c2_285 = arith.constant 2 : index
    %c18_286 = arith.constant 18 : index
    %c0_287 = arith.constant 0 : index
    %282 = vector.load %arg12[%c2_285, %c18_286, %c0_287] : memref<9x25x128xf32, #tpu.memory_space<vmem>>, vector<1x1x128xf32>
    %283 = vector.shape_cast %282 : vector<1x1x128xf32> to vector<1x128xf32>
    %284 = vector.shape_cast %281 : vector<1x128xf32> to vector<1x1x128xf32>
    tpu.vector_store %arg12[%c2_285, %c18_286, %c0_287], %284 {strides = array<i32>} : memref<9x25x128xf32, #tpu.memory_space<vmem>>, vector<1x1x128xf32>,
    %c82 = arith.constant 82 : index
    %c0_288 = arith.constant 0 : index
    %285 = vector.load %arg10[%c82, %c0_288] : memref<144x128xf32, #tpu.memory_space<vmem>>, vector<1x128xf32>
    %c2_289 = arith.constant 2 : index
    %c19_290 = arith.constant 19 : index
    %c0_291 = arith.constant 0 : index
    %286 = vector.load %arg12[%c2_289, %c19_290, %c0_291] : memref<9x25x128xf32, #tpu.memory_space<vmem>>, vector<1x1x128xf32>
    %287 = vector.shape_cast %286 : vector<1x1x128xf32> to vector<1x128xf32>
    %288 = vector.shape_cast %285 : vector<1x128xf32> to vector<1x1x128xf32>
    tpu.vector_store %arg12[%c2_289, %c19_290, %c0_291], %288 {strides = array<i32>} : memref<9x25x128xf32, #tpu.memory_space<vmem>>, vector<1x1x128xf32>,
    %c98_292 = arith.constant 98 : index
    %c0_293 = arith.constant 0 : index
    %289 = vector.load %arg10[%c98_292, %c0_293] : memref<144x128xf32, #tpu.memory_space<vmem>>, vector<1x128xf32>
    %c2_294 = arith.constant 2 : index
    %c20_295 = arith.constant 20 : index
    %c0_296 = arith.constant 0 : index
    %290 = vector.load %arg12[%c2_294, %c20_295, %c0_296] : memref<9x25x128xf32, #tpu.memory_space<vmem>>, vector<1x1x128xf32>
    %291 = vector.shape_cast %290 : vector<1x1x128xf32> to vector<1x128xf32>
    %292 = vector.shape_cast %289 : vector<1x128xf32> to vector<1x1x128xf32>
    tpu.vector_store %arg12[%c2_294, %c20_295, %c0_296], %292 {strides = array<i32>} : memref<9x25x128xf32, #tpu.memory_space<vmem>>, vector<1x1x128xf32>,
    %c100_297 = arith.constant 100 : index
    %c0_298 = arith.constant 0 : index
    %293 = vector.load %arg10[%c100_297, %c0_298] : memref<144x128xf32, #tpu.memory_space<vmem>>, vector<1x128xf32>
    %c2_299 = arith.constant 2 : index
    %c21_300 = arith.constant 21 : index
    %c0_301 = arith.constant 0 : index
    %294 = vector.load %arg12[%c2_299, %c21_300, %c0_301] : memref<9x25x128xf32, #tpu.memory_space<vmem>>, vector<1x1x128xf32>
    %295 = vector.shape_cast %294 : vector<1x1x128xf32> to vector<1x128xf32>
    %296 = vector.shape_cast %293 : vector<1x128xf32> to vector<1x1x128xf32>
    tpu.vector_store %arg12[%c2_299, %c21_300, %c0_301], %296 {strides = array<i32>} : memref<9x25x128xf32, #tpu.memory_space<vmem>>, vector<1x1x128xf32>,
    %c102_302 = arith.constant 102 : index
    %c0_303 = arith.constant 0 : index
    %297 = vector.load %arg10[%c102_302, %c0_303] : memref<144x128xf32, #tpu.memory_space<vmem>>, vector<1x128xf32>
    %c2_304 = arith.constant 2 : index
    %c22_305 = arith.constant 22 : index
    %c0_306 = arith.constant 0 : index
    %298 = vector.load %arg12[%c2_304, %c22_305, %c0_306] : memref<9x25x128xf32, #tpu.memory_space<vmem>>, vector<1x1x128xf32>
    %299 = vector.shape_cast %298 : vector<1x1x128xf32> to vector<1x128xf32>
    %300 = vector.shape_cast %297 : vector<1x128xf32> to vector<1x1x128xf32>
    tpu.vector_store %arg12[%c2_304, %c22_305, %c0_306], %300 {strides = array<i32>} : memref<9x25x128xf32, #tpu.memory_space<vmem>>, vector<1x1x128xf32>,
    %c104_307 = arith.constant 104 : index
    %c0_308 = arith.constant 0 : index
    %301 = vector.load %arg10[%c104_307, %c0_308] : memref<144x128xf32, #tpu.memory_space<vmem>>, vector<1x128xf32>
    %c2_309 = arith.constant 2 : index
    %c23_310 = arith.constant 23 : index
    %c0_311 = arith.constant 0 : index
    %302 = vector.load %arg12[%c2_309, %c23_310, %c0_311] : memref<9x25x128xf32, #tpu.memory_space<vmem>>, vector<1x1x128xf32>
    %303 = vector.shape_cast %302 : vector<1x1x128xf32> to vector<1x128xf32>
    %304 = vector.shape_cast %301 : vector<1x128xf32> to vector<1x1x128xf32>
    tpu.vector_store %arg12[%c2_309, %c23_310, %c0_311], %304 {strides = array<i32>} : memref<9x25x128xf32, #tpu.memory_space<vmem>>, vector<1x1x128xf32>,
    %c106 = arith.constant 106 : index
    %c0_312 = arith.constant 0 : index
    %305 = vector.load %arg10[%c106, %c0_312] : memref<144x128xf32, #tpu.memory_space<vmem>>, vector<1x128xf32>
    %c2_313 = arith.constant 2 : index
    %c24_314 = arith.constant 24 : index
    %c0_315 = arith.constant 0 : index
    %306 = vector.load %arg12[%c2_313, %c24_314, %c0_315] : memref<9x25x128xf32, #tpu.memory_space<vmem>>, vector<1x1x128xf32>
    %307 = vector.shape_cast %306 : vector<1x1x128xf32> to vector<1x128xf32>
    %308 = vector.shape_cast %305 : vector<1x128xf32> to vector<1x1x128xf32>
    tpu.vector_store %arg12[%c2_313, %c24_314, %c0_315], %308 {strides = array<i32>} : memref<9x25x128xf32, #tpu.memory_space<vmem>>, vector<1x1x128xf32>,
    %c12_316 = arith.constant 12 : index
    %c0_317 = arith.constant 0 : index
    %309 = vector.load %arg10[%c12_316, %c0_317] : memref<144x128xf32, #tpu.memory_space<vmem>>, vector<1x128xf32>
    %c3_318 = arith.constant 3 : index
    %c0_319 = arith.constant 0 : index
    %c0_320 = arith.constant 0 : index
    %310 = vector.load %arg12[%c3_318, %c0_319, %c0_320] : memref<9x25x128xf32, #tpu.memory_space<vmem>>, vector<1x1x128xf32>
    %311 = vector.shape_cast %310 : vector<1x1x128xf32> to vector<1x128xf32>
    %312 = vector.shape_cast %309 : vector<1x128xf32> to vector<1x1x128xf32>
    tpu.vector_store %arg12[%c3_318, %c0_319, %c0_320], %312 {strides = array<i32>} : memref<9x25x128xf32, #tpu.memory_space<vmem>>, vector<1x1x128xf32>,
    %c14_321 = arith.constant 14 : index
    %c0_322 = arith.constant 0 : index
    %313 = vector.load %arg10[%c14_321, %c0_322] : memref<144x128xf32, #tpu.memory_space<vmem>>, vector<1x128xf32>
    %c3_323 = arith.constant 3 : index
    %c1_324 = arith.constant 1 : index
    %c0_325 = arith.constant 0 : index
    %314 = vector.load %arg12[%c3_323, %c1_324, %c0_325] : memref<9x25x128xf32, #tpu.memory_space<vmem>>, vector<1x1x128xf32>
    %315 = vector.shape_cast %314 : vector<1x1x128xf32> to vector<1x128xf32>
    %316 = vector.shape_cast %313 : vector<1x128xf32> to vector<1x1x128xf32>
    tpu.vector_store %arg12[%c3_323, %c1_324, %c0_325], %316 {strides = array<i32>} : memref<9x25x128xf32, #tpu.memory_space<vmem>>, vector<1x1x128xf32>,
    %c16_326 = arith.constant 16 : index
    %c0_327 = arith.constant 0 : index
    %317 = vector.load %arg10[%c16_326, %c0_327] : memref<144x128xf32, #tpu.memory_space<vmem>>, vector<1x128xf32>
    %c3_328 = arith.constant 3 : index
    %c2_329 = arith.constant 2 : index
    %c0_330 = arith.constant 0 : index
    %318 = vector.load %arg12[%c3_328, %c2_329, %c0_330] : memref<9x25x128xf32, #tpu.memory_space<vmem>>, vector<1x1x128xf32>
    %319 = vector.shape_cast %318 : vector<1x1x128xf32> to vector<1x128xf32>
    %320 = vector.shape_cast %317 : vector<1x128xf32> to vector<1x1x128xf32>
    tpu.vector_store %arg12[%c3_328, %c2_329, %c0_330], %320 {strides = array<i32>} : memref<9x25x128xf32, #tpu.memory_space<vmem>>, vector<1x1x128xf32>,
    %c18_331 = arith.constant 18 : index
    %c0_332 = arith.constant 0 : index
    %321 = vector.load %arg10[%c18_331, %c0_332] : memref<144x128xf32, #tpu.memory_space<vmem>>, vector<1x128xf32>
    %c3_333 = arith.constant 3 : index
    %c3_334 = arith.constant 3 : index
    %c0_335 = arith.constant 0 : index
    %322 = vector.load %arg12[%c3_333, %c3_334, %c0_335] : memref<9x25x128xf32, #tpu.memory_space<vmem>>, vector<1x1x128xf32>
    %323 = vector.shape_cast %322 : vector<1x1x128xf32> to vector<1x128xf32>
    %324 = vector.shape_cast %321 : vector<1x128xf32> to vector<1x1x128xf32>
    tpu.vector_store %arg12[%c3_333, %c3_334, %c0_335], %324 {strides = array<i32>} : memref<9x25x128xf32, #tpu.memory_space<vmem>>, vector<1x1x128xf32>,
    %c20_336 = arith.constant 20 : index
    %c0_337 = arith.constant 0 : index
    %325 = vector.load %arg10[%c20_336, %c0_337] : memref<144x128xf32, #tpu.memory_space<vmem>>, vector<1x128xf32>
    %c3_338 = arith.constant 3 : index
    %c4_339 = arith.constant 4 : index
    %c0_340 = arith.constant 0 : index
    %326 = vector.load %arg12[%c3_338, %c4_339, %c0_340] : memref<9x25x128xf32, #tpu.memory_space<vmem>>, vector<1x1x128xf32>
    %327 = vector.shape_cast %326 : vector<1x1x128xf32> to vector<1x128xf32>
    %328 = vector.shape_cast %325 : vector<1x128xf32> to vector<1x1x128xf32>
    tpu.vector_store %arg12[%c3_338, %c4_339, %c0_340], %328 {strides = array<i32>} : memref<9x25x128xf32, #tpu.memory_space<vmem>>, vector<1x1x128xf32>,
    %c36 = arith.constant 36 : index
    %c0_341 = arith.constant 0 : index
    %329 = vector.load %arg10[%c36, %c0_341] : memref<144x128xf32, #tpu.memory_space<vmem>>, vector<1x128xf32>
    %c3_342 = arith.constant 3 : index
    %c5_343 = arith.constant 5 : index
    %c0_344 = arith.constant 0 : index
    %330 = vector.load %arg12[%c3_342, %c5_343, %c0_344] : memref<9x25x128xf32, #tpu.memory_space<vmem>>, vector<1x1x128xf32>
    %331 = vector.shape_cast %330 : vector<1x1x128xf32> to vector<1x128xf32>
    %332 = vector.shape_cast %329 : vector<1x128xf32> to vector<1x1x128xf32>
    tpu.vector_store %arg12[%c3_342, %c5_343, %c0_344], %332 {strides = array<i32>} : memref<9x25x128xf32, #tpu.memory_space<vmem>>, vector<1x1x128xf32>,
    %c38 = arith.constant 38 : index
    %c0_345 = arith.constant 0 : index
    %333 = vector.load %arg10[%c38, %c0_345] : memref<144x128xf32, #tpu.memory_space<vmem>>, vector<1x128xf32>
    %c3_346 = arith.constant 3 : index
    %c6_347 = arith.constant 6 : index
    %c0_348 = arith.constant 0 : index
    %334 = vector.load %arg12[%c3_346, %c6_347, %c0_348] : memref<9x25x128xf32, #tpu.memory_space<vmem>>, vector<1x1x128xf32>
    %335 = vector.shape_cast %334 : vector<1x1x128xf32> to vector<1x128xf32>
    %336 = vector.shape_cast %333 : vector<1x128xf32> to vector<1x1x128xf32>
    tpu.vector_store %arg12[%c3_346, %c6_347, %c0_348], %336 {strides = array<i32>} : memref<9x25x128xf32, #tpu.memory_space<vmem>>, vector<1x1x128xf32>,
    %c40 = arith.constant 40 : index
    %c0_349 = arith.constant 0 : index
    %337 = vector.load %arg10[%c40, %c0_349] : memref<144x128xf32, #tpu.memory_space<vmem>>, vector<1x128xf32>
    %c3_350 = arith.constant 3 : index
    %c7_351 = arith.constant 7 : index
    %c0_352 = arith.constant 0 : index
    %338 = vector.load %arg12[%c3_350, %c7_351, %c0_352] : memref<9x25x128xf32, #tpu.memory_space<vmem>>, vector<1x1x128xf32>
    %339 = vector.shape_cast %338 : vector<1x1x128xf32> to vector<1x128xf32>
    %340 = vector.shape_cast %337 : vector<1x128xf32> to vector<1x1x128xf32>
    tpu.vector_store %arg12[%c3_350, %c7_351, %c0_352], %340 {strides = array<i32>} : memref<9x25x128xf32, #tpu.memory_space<vmem>>, vector<1x1x128xf32>,
    %c42 = arith.constant 42 : index
    %c0_353 = arith.constant 0 : index
    %341 = vector.load %arg10[%c42, %c0_353] : memref<144x128xf32, #tpu.memory_space<vmem>>, vector<1x128xf32>
    %c3_354 = arith.constant 3 : index
    %c8_355 = arith.constant 8 : index
    %c0_356 = arith.constant 0 : index
    %342 = vector.load %arg12[%c3_354, %c8_355, %c0_356] : memref<9x25x128xf32, #tpu.memory_space<vmem>>, vector<1x1x128xf32>
    %343 = vector.shape_cast %342 : vector<1x1x128xf32> to vector<1x128xf32>
    %344 = vector.shape_cast %341 : vector<1x128xf32> to vector<1x1x128xf32>
    tpu.vector_store %arg12[%c3_354, %c8_355, %c0_356], %344 {strides = array<i32>} : memref<9x25x128xf32, #tpu.memory_space<vmem>>, vector<1x1x128xf32>,
    %c44 = arith.constant 44 : index
    %c0_357 = arith.constant 0 : index
    %345 = vector.load %arg10[%c44, %c0_357] : memref<144x128xf32, #tpu.memory_space<vmem>>, vector<1x128xf32>
    %c3_358 = arith.constant 3 : index
    %c9_359 = arith.constant 9 : index
    %c0_360 = arith.constant 0 : index
    %346 = vector.load %arg12[%c3_358, %c9_359, %c0_360] : memref<9x25x128xf32, #tpu.memory_space<vmem>>, vector<1x1x128xf32>
    %347 = vector.shape_cast %346 : vector<1x1x128xf32> to vector<1x128xf32>
    %348 = vector.shape_cast %345 : vector<1x128xf32> to vector<1x1x128xf32>
    tpu.vector_store %arg12[%c3_358, %c9_359, %c0_360], %348 {strides = array<i32>} : memref<9x25x128xf32, #tpu.memory_space<vmem>>, vector<1x1x128xf32>,
    %c60 = arith.constant 60 : index
    %c0_361 = arith.constant 0 : index
    %349 = vector.load %arg10[%c60, %c0_361] : memref<144x128xf32, #tpu.memory_space<vmem>>, vector<1x128xf32>
    %c3_362 = arith.constant 3 : index
    %c10_363 = arith.constant 10 : index
    %c0_364 = arith.constant 0 : index
    %350 = vector.load %arg12[%c3_362, %c10_363, %c0_364] : memref<9x25x128xf32, #tpu.memory_space<vmem>>, vector<1x1x128xf32>
    %351 = vector.shape_cast %350 : vector<1x1x128xf32> to vector<1x128xf32>
    %352 = vector.shape_cast %349 : vector<1x128xf32> to vector<1x1x128xf32>
    tpu.vector_store %arg12[%c3_362, %c10_363, %c0_364], %352 {strides = array<i32>} : memref<9x25x128xf32, #tpu.memory_space<vmem>>, vector<1x1x128xf32>,
    %c62 = arith.constant 62 : index
    %c0_365 = arith.constant 0 : index
    %353 = vector.load %arg10[%c62, %c0_365] : memref<144x128xf32, #tpu.memory_space<vmem>>, vector<1x128xf32>
    %c3_366 = arith.constant 3 : index
    %c11_367 = arith.constant 11 : index
    %c0_368 = arith.constant 0 : index
    %354 = vector.load %arg12[%c3_366, %c11_367, %c0_368] : memref<9x25x128xf32, #tpu.memory_space<vmem>>, vector<1x1x128xf32>
    %355 = vector.shape_cast %354 : vector<1x1x128xf32> to vector<1x128xf32>
    %356 = vector.shape_cast %353 : vector<1x128xf32> to vector<1x1x128xf32>
    tpu.vector_store %arg12[%c3_366, %c11_367, %c0_368], %356 {strides = array<i32>} : memref<9x25x128xf32, #tpu.memory_space<vmem>>, vector<1x1x128xf32>,
    %c64 = arith.constant 64 : index
    %c0_369 = arith.constant 0 : index
    %357 = vector.load %arg10[%c64, %c0_369] : memref<144x128xf32, #tpu.memory_space<vmem>>, vector<1x128xf32>
    %c3_370 = arith.constant 3 : index
    %c12_371 = arith.constant 12 : index
    %c0_372 = arith.constant 0 : index
    %358 = vector.load %arg12[%c3_370, %c12_371, %c0_372] : memref<9x25x128xf32, #tpu.memory_space<vmem>>, vector<1x1x128xf32>
    %359 = vector.shape_cast %358 : vector<1x1x128xf32> to vector<1x128xf32>
    %360 = vector.shape_cast %357 : vector<1x128xf32> to vector<1x1x128xf32>
    tpu.vector_store %arg12[%c3_370, %c12_371, %c0_372], %360 {strides = array<i32>} : memref<9x25x128xf32, #tpu.memory_space<vmem>>, vector<1x1x128xf32>,
    %c66 = arith.constant 66 : index
    %c0_373 = arith.constant 0 : index
    %361 = vector.load %arg10[%c66, %c0_373] : memref<144x128xf32, #tpu.memory_space<vmem>>, vector<1x128xf32>
    %c3_374 = arith.constant 3 : index
    %c13_375 = arith.constant 13 : index
    %c0_376 = arith.constant 0 : index
    %362 = vector.load %arg12[%c3_374, %c13_375, %c0_376] : memref<9x25x128xf32, #tpu.memory_space<vmem>>, vector<1x1x128xf32>
    %363 = vector.shape_cast %362 : vector<1x1x128xf32> to vector<1x128xf32>
    %364 = vector.shape_cast %361 : vector<1x128xf32> to vector<1x1x128xf32>
    tpu.vector_store %arg12[%c3_374, %c13_375, %c0_376], %364 {strides = array<i32>} : memref<9x25x128xf32, #tpu.memory_space<vmem>>, vector<1x1x128xf32>,
    %c68 = arith.constant 68 : index
    %c0_377 = arith.constant 0 : index
    %365 = vector.load %arg10[%c68, %c0_377] : memref<144x128xf32, #tpu.memory_space<vmem>>, vector<1x128xf32>
    %c3_378 = arith.constant 3 : index
    %c14_379 = arith.constant 14 : index
    %c0_380 = arith.constant 0 : index
    %366 = vector.load %arg12[%c3_378, %c14_379, %c0_380] : memref<9x25x128xf32, #tpu.memory_space<vmem>>, vector<1x1x128xf32>
    %367 = vector.shape_cast %366 : vector<1x1x128xf32> to vector<1x128xf32>
    %368 = vector.shape_cast %365 : vector<1x128xf32> to vector<1x1x128xf32>
    tpu.vector_store %arg12[%c3_378, %c14_379, %c0_380], %368 {strides = array<i32>} : memref<9x25x128xf32, #tpu.memory_space<vmem>>, vector<1x1x128xf32>,
    %c84 = arith.constant 84 : index
    %c0_381 = arith.constant 0 : index
    %369 = vector.load %arg10[%c84, %c0_381] : memref<144x128xf32, #tpu.memory_space<vmem>>, vector<1x128xf32>
    %c3_382 = arith.constant 3 : index
    %c15_383 = arith.constant 15 : index
    %c0_384 = arith.constant 0 : index
    %370 = vector.load %arg12[%c3_382, %c15_383, %c0_384] : memref<9x25x128xf32, #tpu.memory_space<vmem>>, vector<1x1x128xf32>
    %371 = vector.shape_cast %370 : vector<1x1x128xf32> to vector<1x128xf32>
    %372 = vector.shape_cast %369 : vector<1x128xf32> to vector<1x1x128xf32>
    tpu.vector_store %arg12[%c3_382, %c15_383, %c0_384], %372 {strides = array<i32>} : memref<9x25x128xf32, #tpu.memory_space<vmem>>, vector<1x1x128xf32>,
    %c86 = arith.constant 86 : index
    %c0_385 = arith.constant 0 : index
    %373 = vector.load %arg10[%c86, %c0_385] : memref<144x128xf32, #tpu.memory_space<vmem>>, vector<1x128xf32>
    %c3_386 = arith.constant 3 : index
    %c16_387 = arith.constant 16 : index
    %c0_388 = arith.constant 0 : index
    %374 = vector.load %arg12[%c3_386, %c16_387, %c0_388] : memref<9x25x128xf32, #tpu.memory_space<vmem>>, vector<1x1x128xf32>
    %375 = vector.shape_cast %374 : vector<1x1x128xf32> to vector<1x128xf32>
    %376 = vector.shape_cast %373 : vector<1x128xf32> to vector<1x1x128xf32>
    tpu.vector_store %arg12[%c3_386, %c16_387, %c0_388], %376 {strides = array<i32>} : memref<9x25x128xf32, #tpu.memory_space<vmem>>, vector<1x1x128xf32>,
    %c88 = arith.constant 88 : index
    %c0_389 = arith.constant 0 : index
    %377 = vector.load %arg10[%c88, %c0_389] : memref<144x128xf32, #tpu.memory_space<vmem>>, vector<1x128xf32>
    %c3_390 = arith.constant 3 : index
    %c17_391 = arith.constant 17 : index
    %c0_392 = arith.constant 0 : index
    %378 = vector.load %arg12[%c3_390, %c17_391, %c0_392] : memref<9x25x128xf32, #tpu.memory_space<vmem>>, vector<1x1x128xf32>
    %379 = vector.shape_cast %378 : vector<1x1x128xf32> to vector<1x128xf32>
    %380 = vector.shape_cast %377 : vector<1x128xf32> to vector<1x1x128xf32>
    tpu.vector_store %arg12[%c3_390, %c17_391, %c0_392], %380 {strides = array<i32>} : memref<9x25x128xf32, #tpu.memory_space<vmem>>, vector<1x1x128xf32>,
    %c90 = arith.constant 90 : index
    %c0_393 = arith.constant 0 : index
    %381 = vector.load %arg10[%c90, %c0_393] : memref<144x128xf32, #tpu.memory_space<vmem>>, vector<1x128xf32>
    %c3_394 = arith.constant 3 : index
    %c18_395 = arith.constant 18 : index
    %c0_396 = arith.constant 0 : index
    %382 = vector.load %arg12[%c3_394, %c18_395, %c0_396] : memref<9x25x128xf32, #tpu.memory_space<vmem>>, vector<1x1x128xf32>
    %383 = vector.shape_cast %382 : vector<1x1x128xf32> to vector<1x128xf32>
    %384 = vector.shape_cast %381 : vector<1x128xf32> to vector<1x1x128xf32>
    tpu.vector_store %arg12[%c3_394, %c18_395, %c0_396], %384 {strides = array<i32>} : memref<9x25x128xf32, #tpu.memory_space<vmem>>, vector<1x1x128xf32>,
    %c92 = arith.constant 92 : index
    %c0_397 = arith.constant 0 : index
    %385 = vector.load %arg10[%c92, %c0_397] : memref<144x128xf32, #tpu.memory_space<vmem>>, vector<1x128xf32>
    %c3_398 = arith.constant 3 : index
    %c19_399 = arith.constant 19 : index
    %c0_400 = arith.constant 0 : index
    %386 = vector.load %arg12[%c3_398, %c19_399, %c0_400] : memref<9x25x128xf32, #tpu.memory_space<vmem>>, vector<1x1x128xf32>
    %387 = vector.shape_cast %386 : vector<1x1x128xf32> to vector<1x128xf32>
    %388 = vector.shape_cast %385 : vector<1x128xf32> to vector<1x1x128xf32>
    tpu.vector_store %arg12[%c3_398, %c19_399, %c0_400], %388 {strides = array<i32>} : memref<9x25x128xf32, #tpu.memory_space<vmem>>, vector<1x1x128xf32>,
    %c108 = arith.constant 108 : index
    %c0_401 = arith.constant 0 : index
    %389 = vector.load %arg10[%c108, %c0_401] : memref<144x128xf32, #tpu.memory_space<vmem>>, vector<1x128xf32>
    %c3_402 = arith.constant 3 : index
    %c20_403 = arith.constant 20 : index
    %c0_404 = arith.constant 0 : index
    %390 = vector.load %arg12[%c3_402, %c20_403, %c0_404] : memref<9x25x128xf32, #tpu.memory_space<vmem>>, vector<1x1x128xf32>
    %391 = vector.shape_cast %390 : vector<1x1x128xf32> to vector<1x128xf32>
    %392 = vector.shape_cast %389 : vector<1x128xf32> to vector<1x1x128xf32>
    tpu.vector_store %arg12[%c3_402, %c20_403, %c0_404], %392 {strides = array<i32>} : memref<9x25x128xf32, #tpu.memory_space<vmem>>, vector<1x1x128xf32>,
    %c110 = arith.constant 110 : index
    %c0_405 = arith.constant 0 : index
    %393 = vector.load %arg10[%c110, %c0_405] : memref<144x128xf32, #tpu.memory_space<vmem>>, vector<1x128xf32>
    %c3_406 = arith.constant 3 : index
    %c21_407 = arith.constant 21 : index
    %c0_408 = arith.constant 0 : index
    %394 = vector.load %arg12[%c3_406, %c21_407, %c0_408] : memref<9x25x128xf32, #tpu.memory_space<vmem>>, vector<1x1x128xf32>
    %395 = vector.shape_cast %394 : vector<1x1x128xf32> to vector<1x128xf32>
    %396 = vector.shape_cast %393 : vector<1x128xf32> to vector<1x1x128xf32>
    tpu.vector_store %arg12[%c3_406, %c21_407, %c0_408], %396 {strides = array<i32>} : memref<9x25x128xf32, #tpu.memory_space<vmem>>, vector<1x1x128xf32>,
    %c112 = arith.constant 112 : index
    %c0_409 = arith.constant 0 : index
    %397 = vector.load %arg10[%c112, %c0_409] : memref<144x128xf32, #tpu.memory_space<vmem>>, vector<1x128xf32>
    %c3_410 = arith.constant 3 : index
    %c22_411 = arith.constant 22 : index
    %c0_412 = arith.constant 0 : index
    %398 = vector.load %arg12[%c3_410, %c22_411, %c0_412] : memref<9x25x128xf32, #tpu.memory_space<vmem>>, vector<1x1x128xf32>
    %399 = vector.shape_cast %398 : vector<1x1x128xf32> to vector<1x128xf32>
    %400 = vector.shape_cast %397 : vector<1x128xf32> to vector<1x1x128xf32>
    tpu.vector_store %arg12[%c3_410, %c22_411, %c0_412], %400 {strides = array<i32>} : memref<9x25x128xf32, #tpu.memory_space<vmem>>, vector<1x1x128xf32>,
    %c114 = arith.constant 114 : index
    %c0_413 = arith.constant 0 : index
    %401 = vector.load %arg10[%c114, %c0_413] : memref<144x128xf32, #tpu.memory_space<vmem>>, vector<1x128xf32>
    %c3_414 = arith.constant 3 : index
    %c23_415 = arith.constant 23 : index
    %c0_416 = arith.constant 0 : index
    %402 = vector.load %arg12[%c3_414, %c23_415, %c0_416] : memref<9x25x128xf32, #tpu.memory_space<vmem>>, vector<1x1x128xf32>
    %403 = vector.shape_cast %402 : vector<1x1x128xf32> to vector<1x128xf32>
    %404 = vector.shape_cast %401 : vector<1x128xf32> to vector<1x1x128xf32>
    tpu.vector_store %arg12[%c3_414, %c23_415, %c0_416], %404 {strides = array<i32>} : memref<9x25x128xf32, #tpu.memory_space<vmem>>, vector<1x1x128xf32>,
    %c116 = arith.constant 116 : index
    %c0_417 = arith.constant 0 : index
    %405 = vector.load %arg10[%c116, %c0_417] : memref<144x128xf32, #tpu.memory_space<vmem>>, vector<1x128xf32>
    %c3_418 = arith.constant 3 : index
    %c24_419 = arith.constant 24 : index
    %c0_420 = arith.constant 0 : index
    %406 = vector.load %arg12[%c3_418, %c24_419, %c0_420] : memref<9x25x128xf32, #tpu.memory_space<vmem>>, vector<1x1x128xf32>
    %407 = vector.shape_cast %406 : vector<1x1x128xf32> to vector<1x128xf32>
    %408 = vector.shape_cast %405 : vector<1x128xf32> to vector<1x1x128xf32>
    tpu.vector_store %arg12[%c3_418, %c24_419, %c0_420], %408 {strides = array<i32>} : memref<9x25x128xf32, #tpu.memory_space<vmem>>, vector<1x1x128xf32>,
    %c13_421 = arith.constant 13 : index
    %c0_422 = arith.constant 0 : index
    %409 = vector.load %arg10[%c13_421, %c0_422] : memref<144x128xf32, #tpu.memory_space<vmem>>, vector<1x128xf32>
    %c4_423 = arith.constant 4 : index
    %c0_424 = arith.constant 0 : index
    %c0_425 = arith.constant 0 : index
    %410 = vector.load %arg12[%c4_423, %c0_424, %c0_425] : memref<9x25x128xf32, #tpu.memory_space<vmem>>, vector<1x1x128xf32>
    %411 = vector.shape_cast %410 : vector<1x1x128xf32> to vector<1x128xf32>
    %412 = vector.shape_cast %409 : vector<1x128xf32> to vector<1x1x128xf32>
    tpu.vector_store %arg12[%c4_423, %c0_424, %c0_425], %412 {strides = array<i32>} : memref<9x25x128xf32, #tpu.memory_space<vmem>>, vector<1x1x128xf32>,
    %c15_426 = arith.constant 15 : index
    %c0_427 = arith.constant 0 : index
    %413 = vector.load %arg10[%c15_426, %c0_427] : memref<144x128xf32, #tpu.memory_space<vmem>>, vector<1x128xf32>
    %c4_428 = arith.constant 4 : index
    %c1_429 = arith.constant 1 : index
    %c0_430 = arith.constant 0 : index
    %414 = vector.load %arg12[%c4_428, %c1_429, %c0_430] : memref<9x25x128xf32, #tpu.memory_space<vmem>>, vector<1x1x128xf32>
    %415 = vector.shape_cast %414 : vector<1x1x128xf32> to vector<1x128xf32>
    %416 = vector.shape_cast %413 : vector<1x128xf32> to vector<1x1x128xf32>
    tpu.vector_store %arg12[%c4_428, %c1_429, %c0_430], %416 {strides = array<i32>} : memref<9x25x128xf32, #tpu.memory_space<vmem>>, vector<1x1x128xf32>,
    %c17_431 = arith.constant 17 : index
    %c0_432 = arith.constant 0 : index
    %417 = vector.load %arg10[%c17_431, %c0_432] : memref<144x128xf32, #tpu.memory_space<vmem>>, vector<1x128xf32>
    %c4_433 = arith.constant 4 : index
    %c2_434 = arith.constant 2 : index
    %c0_435 = arith.constant 0 : index
    %418 = vector.load %arg12[%c4_433, %c2_434, %c0_435] : memref<9x25x128xf32, #tpu.memory_space<vmem>>, vector<1x1x128xf32>
    %419 = vector.shape_cast %418 : vector<1x1x128xf32> to vector<1x128xf32>
    %420 = vector.shape_cast %417 : vector<1x128xf32> to vector<1x1x128xf32>
    tpu.vector_store %arg12[%c4_433, %c2_434, %c0_435], %420 {strides = array<i32>} : memref<9x25x128xf32, #tpu.memory_space<vmem>>, vector<1x1x128xf32>,
    %c19_436 = arith.constant 19 : index
    %c0_437 = arith.constant 0 : index
    %421 = vector.load %arg10[%c19_436, %c0_437] : memref<144x128xf32, #tpu.memory_space<vmem>>, vector<1x128xf32>
    %c4_438 = arith.constant 4 : index
    %c3_439 = arith.constant 3 : index
    %c0_440 = arith.constant 0 : index
    %422 = vector.load %arg12[%c4_438, %c3_439, %c0_440] : memref<9x25x128xf32, #tpu.memory_space<vmem>>, vector<1x1x128xf32>
    %423 = vector.shape_cast %422 : vector<1x1x128xf32> to vector<1x128xf32>
    %424 = vector.shape_cast %421 : vector<1x128xf32> to vector<1x1x128xf32>
    tpu.vector_store %arg12[%c4_438, %c3_439, %c0_440], %424 {strides = array<i32>} : memref<9x25x128xf32, #tpu.memory_space<vmem>>, vector<1x1x128xf32>,
    %c21_441 = arith.constant 21 : index
    %c0_442 = arith.constant 0 : index
    %425 = vector.load %arg10[%c21_441, %c0_442] : memref<144x128xf32, #tpu.memory_space<vmem>>, vector<1x128xf32>
    %c4_443 = arith.constant 4 : index
    %c4_444 = arith.constant 4 : index
    %c0_445 = arith.constant 0 : index
    %426 = vector.load %arg12[%c4_443, %c4_444, %c0_445] : memref<9x25x128xf32, #tpu.memory_space<vmem>>, vector<1x1x128xf32>
    %427 = vector.shape_cast %426 : vector<1x1x128xf32> to vector<1x128xf32>
    %428 = vector.shape_cast %425 : vector<1x128xf32> to vector<1x1x128xf32>
    tpu.vector_store %arg12[%c4_443, %c4_444, %c0_445], %428 {strides = array<i32>} : memref<9x25x128xf32, #tpu.memory_space<vmem>>, vector<1x1x128xf32>,
    %c37 = arith.constant 37 : index
    %c0_446 = arith.constant 0 : index
    %429 = vector.load %arg10[%c37, %c0_446] : memref<144x128xf32, #tpu.memory_space<vmem>>, vector<1x128xf32>
    %c4_447 = arith.constant 4 : index
    %c5_448 = arith.constant 5 : index
    %c0_449 = arith.constant 0 : index
    %430 = vector.load %arg12[%c4_447, %c5_448, %c0_449] : memref<9x25x128xf32, #tpu.memory_space<vmem>>, vector<1x1x128xf32>
    %431 = vector.shape_cast %430 : vector<1x1x128xf32> to vector<1x128xf32>
    %432 = vector.shape_cast %429 : vector<1x128xf32> to vector<1x1x128xf32>
    tpu.vector_store %arg12[%c4_447, %c5_448, %c0_449], %432 {strides = array<i32>} : memref<9x25x128xf32, #tpu.memory_space<vmem>>, vector<1x1x128xf32>,
    %c39 = arith.constant 39 : index
    %c0_450 = arith.constant 0 : index
    %433 = vector.load %arg10[%c39, %c0_450] : memref<144x128xf32, #tpu.memory_space<vmem>>, vector<1x128xf32>
    %c4_451 = arith.constant 4 : index
    %c6_452 = arith.constant 6 : index
    %c0_453 = arith.constant 0 : index
    %434 = vector.load %arg12[%c4_451, %c6_452, %c0_453] : memref<9x25x128xf32, #tpu.memory_space<vmem>>, vector<1x1x128xf32>
    %435 = vector.shape_cast %434 : vector<1x1x128xf32> to vector<1x128xf32>
    %436 = vector.shape_cast %433 : vector<1x128xf32> to vector<1x1x128xf32>
    tpu.vector_store %arg12[%c4_451, %c6_452, %c0_453], %436 {strides = array<i32>} : memref<9x25x128xf32, #tpu.memory_space<vmem>>, vector<1x1x128xf32>,
    %c41 = arith.constant 41 : index
    %c0_454 = arith.constant 0 : index
    %437 = vector.load %arg10[%c41, %c0_454] : memref<144x128xf32, #tpu.memory_space<vmem>>, vector<1x128xf32>
    %c4_455 = arith.constant 4 : index
    %c7_456 = arith.constant 7 : index
    %c0_457 = arith.constant 0 : index
    %438 = vector.load %arg12[%c4_455, %c7_456, %c0_457] : memref<9x25x128xf32, #tpu.memory_space<vmem>>, vector<1x1x128xf32>
    %439 = vector.shape_cast %438 : vector<1x1x128xf32> to vector<1x128xf32>
    %440 = vector.shape_cast %437 : vector<1x128xf32> to vector<1x1x128xf32>
    tpu.vector_store %arg12[%c4_455, %c7_456, %c0_457], %440 {strides = array<i32>} : memref<9x25x128xf32, #tpu.memory_space<vmem>>, vector<1x1x128xf32>,
    %c43 = arith.constant 43 : index
    %c0_458 = arith.constant 0 : index
    %441 = vector.load %arg10[%c43, %c0_458] : memref<144x128xf32, #tpu.memory_space<vmem>>, vector<1x128xf32>
    %c4_459 = arith.constant 4 : index
    %c8_460 = arith.constant 8 : index
    %c0_461 = arith.constant 0 : index
    %442 = vector.load %arg12[%c4_459, %c8_460, %c0_461] : memref<9x25x128xf32, #tpu.memory_space<vmem>>, vector<1x1x128xf32>
    %443 = vector.shape_cast %442 : vector<1x1x128xf32> to vector<1x128xf32>
    %444 = vector.shape_cast %441 : vector<1x128xf32> to vector<1x1x128xf32>
    tpu.vector_store %arg12[%c4_459, %c8_460, %c0_461], %444 {strides = array<i32>} : memref<9x25x128xf32, #tpu.memory_space<vmem>>, vector<1x1x128xf32>,
    %c45 = arith.constant 45 : index
    %c0_462 = arith.constant 0 : index
    %445 = vector.load %arg10[%c45, %c0_462] : memref<144x128xf32, #tpu.memory_space<vmem>>, vector<1x128xf32>
    %c4_463 = arith.constant 4 : index
    %c9_464 = arith.constant 9 : index
    %c0_465 = arith.constant 0 : index
    %446 = vector.load %arg12[%c4_463, %c9_464, %c0_465] : memref<9x25x128xf32, #tpu.memory_space<vmem>>, vector<1x1x128xf32>
    %447 = vector.shape_cast %446 : vector<1x1x128xf32> to vector<1x128xf32>
    %448 = vector.shape_cast %445 : vector<1x128xf32> to vector<1x1x128xf32>
    tpu.vector_store %arg12[%c4_463, %c9_464, %c0_465], %448 {strides = array<i32>} : memref<9x25x128xf32, #tpu.memory_space<vmem>>, vector<1x1x128xf32>,
    %c61 = arith.constant 61 : index
    %c0_466 = arith.constant 0 : index
    %449 = vector.load %arg10[%c61, %c0_466] : memref<144x128xf32, #tpu.memory_space<vmem>>, vector<1x128xf32>
    %c4_467 = arith.constant 4 : index
    %c10_468 = arith.constant 10 : index
    %c0_469 = arith.constant 0 : index
    %450 = vector.load %arg12[%c4_467, %c10_468, %c0_469] : memref<9x25x128xf32, #tpu.memory_space<vmem>>, vector<1x1x128xf32>
    %451 = vector.shape_cast %450 : vector<1x1x128xf32> to vector<1x128xf32>
    %452 = vector.shape_cast %449 : vector<1x128xf32> to vector<1x1x128xf32>
    tpu.vector_store %arg12[%c4_467, %c10_468, %c0_469], %452 {strides = array<i32>} : memref<9x25x128xf32, #tpu.memory_space<vmem>>, vector<1x1x128xf32>,
    %c63 = arith.constant 63 : index
    %c0_470 = arith.constant 0 : index
    %453 = vector.load %arg10[%c63, %c0_470] : memref<144x128xf32, #tpu.memory_space<vmem>>, vector<1x128xf32>
    %c4_471 = arith.constant 4 : index
    %c11_472 = arith.constant 11 : index
    %c0_473 = arith.constant 0 : index
    %454 = vector.load %arg12[%c4_471, %c11_472, %c0_473] : memref<9x25x128xf32, #tpu.memory_space<vmem>>, vector<1x1x128xf32>
    %455 = vector.shape_cast %454 : vector<1x1x128xf32> to vector<1x128xf32>
    %456 = vector.shape_cast %453 : vector<1x128xf32> to vector<1x1x128xf32>
    tpu.vector_store %arg12[%c4_471, %c11_472, %c0_473], %456 {strides = array<i32>} : memref<9x25x128xf32, #tpu.memory_space<vmem>>, vector<1x1x128xf32>,
    %c65 = arith.constant 65 : index
    %c0_474 = arith.constant 0 : index
    %457 = vector.load %arg10[%c65, %c0_474] : memref<144x128xf32, #tpu.memory_space<vmem>>, vector<1x128xf32>
    %c4_475 = arith.constant 4 : index
    %c12_476 = arith.constant 12 : index
    %c0_477 = arith.constant 0 : index
    %458 = vector.load %arg12[%c4_475, %c12_476, %c0_477] : memref<9x25x128xf32, #tpu.memory_space<vmem>>, vector<1x1x128xf32>
    %459 = vector.shape_cast %458 : vector<1x1x128xf32> to vector<1x128xf32>
    %460 = vector.shape_cast %457 : vector<1x128xf32> to vector<1x1x128xf32>
    tpu.vector_store %arg12[%c4_475, %c12_476, %c0_477], %460 {strides = array<i32>} : memref<9x25x128xf32, #tpu.memory_space<vmem>>, vector<1x1x128xf32>,
    %c67 = arith.constant 67 : index
    %c0_478 = arith.constant 0 : index
    %461 = vector.load %arg10[%c67, %c0_478] : memref<144x128xf32, #tpu.memory_space<vmem>>, vector<1x128xf32>
    %c4_479 = arith.constant 4 : index
    %c13_480 = arith.constant 13 : index
    %c0_481 = arith.constant 0 : index
    %462 = vector.load %arg12[%c4_479, %c13_480, %c0_481] : memref<9x25x128xf32, #tpu.memory_space<vmem>>, vector<1x1x128xf32>
    %463 = vector.shape_cast %462 : vector<1x1x128xf32> to vector<1x128xf32>
    %464 = vector.shape_cast %461 : vector<1x128xf32> to vector<1x1x128xf32>
    tpu.vector_store %arg12[%c4_479, %c13_480, %c0_481], %464 {strides = array<i32>} : memref<9x25x128xf32, #tpu.memory_space<vmem>>, vector<1x1x128xf32>,
    %c69 = arith.constant 69 : index
    %c0_482 = arith.constant 0 : index
    %465 = vector.load %arg10[%c69, %c0_482] : memref<144x128xf32, #tpu.memory_space<vmem>>, vector<1x128xf32>
    %c4_483 = arith.constant 4 : index
    %c14_484 = arith.constant 14 : index
    %c0_485 = arith.constant 0 : index
    %466 = vector.load %arg12[%c4_483, %c14_484, %c0_485] : memref<9x25x128xf32, #tpu.memory_space<vmem>>, vector<1x1x128xf32>
    %467 = vector.shape_cast %466 : vector<1x1x128xf32> to vector<1x128xf32>
    %468 = vector.shape_cast %465 : vector<1x128xf32> to vector<1x1x128xf32>
    tpu.vector_store %arg12[%c4_483, %c14_484, %c0_485], %468 {strides = array<i32>} : memref<9x25x128xf32, #tpu.memory_space<vmem>>, vector<1x1x128xf32>,
    %c85 = arith.constant 85 : index
    %c0_486 = arith.constant 0 : index
    %469 = vector.load %arg10[%c85, %c0_486] : memref<144x128xf32, #tpu.memory_space<vmem>>, vector<1x128xf32>
    %c4_487 = arith.constant 4 : index
    %c15_488 = arith.constant 15 : index
    %c0_489 = arith.constant 0 : index
    %470 = vector.load %arg12[%c4_487, %c15_488, %c0_489] : memref<9x25x128xf32, #tpu.memory_space<vmem>>, vector<1x1x128xf32>
    %471 = vector.shape_cast %470 : vector<1x1x128xf32> to vector<1x128xf32>
    %472 = vector.shape_cast %469 : vector<1x128xf32> to vector<1x1x128xf32>
    tpu.vector_store %arg12[%c4_487, %c15_488, %c0_489], %472 {strides = array<i32>} : memref<9x25x128xf32, #tpu.memory_space<vmem>>, vector<1x1x128xf32>,
    %c87 = arith.constant 87 : index
    %c0_490 = arith.constant 0 : index
    %473 = vector.load %arg10[%c87, %c0_490] : memref<144x128xf32, #tpu.memory_space<vmem>>, vector<1x128xf32>
    %c4_491 = arith.constant 4 : index
    %c16_492 = arith.constant 16 : index
    %c0_493 = arith.constant 0 : index
    %474 = vector.load %arg12[%c4_491, %c16_492, %c0_493] : memref<9x25x128xf32, #tpu.memory_space<vmem>>, vector<1x1x128xf32>
    %475 = vector.shape_cast %474 : vector<1x1x128xf32> to vector<1x128xf32>
    %476 = vector.shape_cast %473 : vector<1x128xf32> to vector<1x1x128xf32>
    tpu.vector_store %arg12[%c4_491, %c16_492, %c0_493], %476 {strides = array<i32>} : memref<9x25x128xf32, #tpu.memory_space<vmem>>, vector<1x1x128xf32>,
    %c89 = arith.constant 89 : index
    %c0_494 = arith.constant 0 : index
    %477 = vector.load %arg10[%c89, %c0_494] : memref<144x128xf32, #tpu.memory_space<vmem>>, vector<1x128xf32>
    %c4_495 = arith.constant 4 : index
    %c17_496 = arith.constant 17 : index
    %c0_497 = arith.constant 0 : index
    %478 = vector.load %arg12[%c4_495, %c17_496, %c0_497] : memref<9x25x128xf32, #tpu.memory_space<vmem>>, vector<1x1x128xf32>
    %479 = vector.shape_cast %478 : vector<1x1x128xf32> to vector<1x128xf32>
    %480 = vector.shape_cast %477 : vector<1x128xf32> to vector<1x1x128xf32>
    tpu.vector_store %arg12[%c4_495, %c17_496, %c0_497], %480 {strides = array<i32>} : memref<9x25x128xf32, #tpu.memory_space<vmem>>, vector<1x1x128xf32>,
    %c91 = arith.constant 91 : index
    %c0_498 = arith.constant 0 : index
    %481 = vector.load %arg10[%c91, %c0_498] : memref<144x128xf32, #tpu.memory_space<vmem>>, vector<1x128xf32>
    %c4_499 = arith.constant 4 : index
    %c18_500 = arith.constant 18 : index
    %c0_501 = arith.constant 0 : index
    %482 = vector.load %arg12[%c4_499, %c18_500, %c0_501] : memref<9x25x128xf32, #tpu.memory_space<vmem>>, vector<1x1x128xf32>
    %483 = vector.shape_cast %482 : vector<1x1x128xf32> to vector<1x128xf32>
    %484 = vector.shape_cast %481 : vector<1x128xf32> to vector<1x1x128xf32>
    tpu.vector_store %arg12[%c4_499, %c18_500, %c0_501], %484 {strides = array<i32>} : memref<9x25x128xf32, #tpu.memory_space<vmem>>, vector<1x1x128xf32>,
    %c93 = arith.constant 93 : index
    %c0_502 = arith.constant 0 : index
    %485 = vector.load %arg10[%c93, %c0_502] : memref<144x128xf32, #tpu.memory_space<vmem>>, vector<1x128xf32>
    %c4_503 = arith.constant 4 : index
    %c19_504 = arith.constant 19 : index
    %c0_505 = arith.constant 0 : index
    %486 = vector.load %arg12[%c4_503, %c19_504, %c0_505] : memref<9x25x128xf32, #tpu.memory_space<vmem>>, vector<1x1x128xf32>
    %487 = vector.shape_cast %486 : vector<1x1x128xf32> to vector<1x128xf32>
    %488 = vector.shape_cast %485 : vector<1x128xf32> to vector<1x1x128xf32>
    tpu.vector_store %arg12[%c4_503, %c19_504, %c0_505], %488 {strides = array<i32>} : memref<9x25x128xf32, #tpu.memory_space<vmem>>, vector<1x1x128xf32>,
    %c109 = arith.constant 109 : index
    %c0_506 = arith.constant 0 : index
    %489 = vector.load %arg10[%c109, %c0_506] : memref<144x128xf32, #tpu.memory_space<vmem>>, vector<1x128xf32>
    %c4_507 = arith.constant 4 : index
    %c20_508 = arith.constant 20 : index
    %c0_509 = arith.constant 0 : index
    %490 = vector.load %arg12[%c4_507, %c20_508, %c0_509] : memref<9x25x128xf32, #tpu.memory_space<vmem>>, vector<1x1x128xf32>
    %491 = vector.shape_cast %490 : vector<1x1x128xf32> to vector<1x128xf32>
    %492 = vector.shape_cast %489 : vector<1x128xf32> to vector<1x1x128xf32>
    tpu.vector_store %arg12[%c4_507, %c20_508, %c0_509], %492 {strides = array<i32>} : memref<9x25x128xf32, #tpu.memory_space<vmem>>, vector<1x1x128xf32>,
    %c111 = arith.constant 111 : index
    %c0_510 = arith.constant 0 : index
    %493 = vector.load %arg10[%c111, %c0_510] : memref<144x128xf32, #tpu.memory_space<vmem>>, vector<1x128xf32>
    %c4_511 = arith.constant 4 : index
    %c21_512 = arith.constant 21 : index
    %c0_513 = arith.constant 0 : index
    %494 = vector.load %arg12[%c4_511, %c21_512, %c0_513] : memref<9x25x128xf32, #tpu.memory_space<vmem>>, vector<1x1x128xf32>
    %495 = vector.shape_cast %494 : vector<1x1x128xf32> to vector<1x128xf32>
    %496 = vector.shape_cast %493 : vector<1x128xf32> to vector<1x1x128xf32>
    tpu.vector_store %arg12[%c4_511, %c21_512, %c0_513], %496 {strides = array<i32>} : memref<9x25x128xf32, #tpu.memory_space<vmem>>, vector<1x1x128xf32>,
    %c113 = arith.constant 113 : index
    %c0_514 = arith.constant 0 : index
    %497 = vector.load %arg10[%c113, %c0_514] : memref<144x128xf32, #tpu.memory_space<vmem>>, vector<1x128xf32>
    %c4_515 = arith.constant 4 : index
    %c22_516 = arith.constant 22 : index
    %c0_517 = arith.constant 0 : index
    %498 = vector.load %arg12[%c4_515, %c22_516, %c0_517] : memref<9x25x128xf32, #tpu.memory_space<vmem>>, vector<1x1x128xf32>
    %499 = vector.shape_cast %498 : vector<1x1x128xf32> to vector<1x128xf32>
    %500 = vector.shape_cast %497 : vector<1x128xf32> to vector<1x1x128xf32>
    tpu.vector_store %arg12[%c4_515, %c22_516, %c0_517], %500 {strides = array<i32>} : memref<9x25x128xf32, #tpu.memory_space<vmem>>, vector<1x1x128xf32>,
    %c115 = arith.constant 115 : index
    %c0_518 = arith.constant 0 : index
    %501 = vector.load %arg10[%c115, %c0_518] : memref<144x128xf32, #tpu.memory_space<vmem>>, vector<1x128xf32>
    %c4_519 = arith.constant 4 : index
    %c23_520 = arith.constant 23 : index
    %c0_521 = arith.constant 0 : index
    %502 = vector.load %arg12[%c4_519, %c23_520, %c0_521] : memref<9x25x128xf32, #tpu.memory_space<vmem>>, vector<1x1x128xf32>
    %503 = vector.shape_cast %502 : vector<1x1x128xf32> to vector<1x128xf32>
    %504 = vector.shape_cast %501 : vector<1x128xf32> to vector<1x1x128xf32>
    tpu.vector_store %arg12[%c4_519, %c23_520, %c0_521], %504 {strides = array<i32>} : memref<9x25x128xf32, #tpu.memory_space<vmem>>, vector<1x1x128xf32>,
    %c117 = arith.constant 117 : index
    %c0_522 = arith.constant 0 : index
    %505 = vector.load %arg10[%c117, %c0_522] : memref<144x128xf32, #tpu.memory_space<vmem>>, vector<1x128xf32>
    %c4_523 = arith.constant 4 : index
    %c24_524 = arith.constant 24 : index
    %c0_525 = arith.constant 0 : index
    %506 = vector.load %arg12[%c4_523, %c24_524, %c0_525] : memref<9x25x128xf32, #tpu.memory_space<vmem>>, vector<1x1x128xf32>
    %507 = vector.shape_cast %506 : vector<1x1x128xf32> to vector<1x128xf32>
    %508 = vector.shape_cast %505 : vector<1x128xf32> to vector<1x1x128xf32>
    tpu.vector_store %arg12[%c4_523, %c24_524, %c0_525], %508 {strides = array<i32>} : memref<9x25x128xf32, #tpu.memory_space<vmem>>, vector<1x1x128xf32>,
    %c14_526 = arith.constant 14 : index
    %c0_527 = arith.constant 0 : index
    %509 = vector.load %arg10[%c14_526, %c0_527] : memref<144x128xf32, #tpu.memory_space<vmem>>, vector<1x128xf32>
    %c5_528 = arith.constant 5 : index
    %c0_529 = arith.constant 0 : index
    %c0_530 = arith.constant 0 : index
    %510 = vector.load %arg12[%c5_528, %c0_529, %c0_530] : memref<9x25x128xf32, #tpu.memory_space<vmem>>, vector<1x1x128xf32>
    %511 = vector.shape_cast %510 : vector<1x1x128xf32> to vector<1x128xf32>
    %512 = vector.shape_cast %509 : vector<1x128xf32> to vector<1x1x128xf32>
    tpu.vector_store %arg12[%c5_528, %c0_529, %c0_530], %512 {strides = array<i32>} : memref<9x25x128xf32, #tpu.memory_space<vmem>>, vector<1x1x128xf32>,
    %c16_531 = arith.constant 16 : index
    %c0_532 = arith.constant 0 : index
    %513 = vector.load %arg10[%c16_531, %c0_532] : memref<144x128xf32, #tpu.memory_space<vmem>>, vector<1x128xf32>
    %c5_533 = arith.constant 5 : index
    %c1_534 = arith.constant 1 : index
    %c0_535 = arith.constant 0 : index
    %514 = vector.load %arg12[%c5_533, %c1_534, %c0_535] : memref<9x25x128xf32, #tpu.memory_space<vmem>>, vector<1x1x128xf32>
    %515 = vector.shape_cast %514 : vector<1x1x128xf32> to vector<1x128xf32>
    %516 = vector.shape_cast %513 : vector<1x128xf32> to vector<1x1x128xf32>
    tpu.vector_store %arg12[%c5_533, %c1_534, %c0_535], %516 {strides = array<i32>} : memref<9x25x128xf32, #tpu.memory_space<vmem>>, vector<1x1x128xf32>,
    %c18_536 = arith.constant 18 : index
    %c0_537 = arith.constant 0 : index
    %517 = vector.load %arg10[%c18_536, %c0_537] : memref<144x128xf32, #tpu.memory_space<vmem>>, vector<1x128xf32>
    %c5_538 = arith.constant 5 : index
    %c2_539 = arith.constant 2 : index
    %c0_540 = arith.constant 0 : index
    %518 = vector.load %arg12[%c5_538, %c2_539, %c0_540] : memref<9x25x128xf32, #tpu.memory_space<vmem>>, vector<1x1x128xf32>
    %519 = vector.shape_cast %518 : vector<1x1x128xf32> to vector<1x128xf32>
    %520 = vector.shape_cast %517 : vector<1x128xf32> to vector<1x1x128xf32>
    tpu.vector_store %arg12[%c5_538, %c2_539, %c0_540], %520 {strides = array<i32>} : memref<9x25x128xf32, #tpu.memory_space<vmem>>, vector<1x1x128xf32>,
    %c20_541 = arith.constant 20 : index
    %c0_542 = arith.constant 0 : index
    %521 = vector.load %arg10[%c20_541, %c0_542] : memref<144x128xf32, #tpu.memory_space<vmem>>, vector<1x128xf32>
    %c5_543 = arith.constant 5 : index
    %c3_544 = arith.constant 3 : index
    %c0_545 = arith.constant 0 : index
    %522 = vector.load %arg12[%c5_543, %c3_544, %c0_545] : memref<9x25x128xf32, #tpu.memory_space<vmem>>, vector<1x1x128xf32>
    %523 = vector.shape_cast %522 : vector<1x1x128xf32> to vector<1x128xf32>
    %524 = vector.shape_cast %521 : vector<1x128xf32> to vector<1x1x128xf32>
    tpu.vector_store %arg12[%c5_543, %c3_544, %c0_545], %524 {strides = array<i32>} : memref<9x25x128xf32, #tpu.memory_space<vmem>>, vector<1x1x128xf32>,
    %c22_546 = arith.constant 22 : index
    %c0_547 = arith.constant 0 : index
    %525 = vector.load %arg10[%c22_546, %c0_547] : memref<144x128xf32, #tpu.memory_space<vmem>>, vector<1x128xf32>
    %c5_548 = arith.constant 5 : index
    %c4_549 = arith.constant 4 : index
    %c0_550 = arith.constant 0 : index
    %526 = vector.load %arg12[%c5_548, %c4_549, %c0_550] : memref<9x25x128xf32, #tpu.memory_space<vmem>>, vector<1x1x128xf32>
    %527 = vector.shape_cast %526 : vector<1x1x128xf32> to vector<1x128xf32>
    %528 = vector.shape_cast %525 : vector<1x128xf32> to vector<1x1x128xf32>
    tpu.vector_store %arg12[%c5_548, %c4_549, %c0_550], %528 {strides = array<i32>} : memref<9x25x128xf32, #tpu.memory_space<vmem>>, vector<1x1x128xf32>,
    %c38_551 = arith.constant 38 : index
    %c0_552 = arith.constant 0 : index
    %529 = vector.load %arg10[%c38_551, %c0_552] : memref<144x128xf32, #tpu.memory_space<vmem>>, vector<1x128xf32>
    %c5_553 = arith.constant 5 : index
    %c5_554 = arith.constant 5 : index
    %c0_555 = arith.constant 0 : index
    %530 = vector.load %arg12[%c5_553, %c5_554, %c0_555] : memref<9x25x128xf32, #tpu.memory_space<vmem>>, vector<1x1x128xf32>
    %531 = vector.shape_cast %530 : vector<1x1x128xf32> to vector<1x128xf32>
    %532 = vector.shape_cast %529 : vector<1x128xf32> to vector<1x1x128xf32>
    tpu.vector_store %arg12[%c5_553, %c5_554, %c0_555], %532 {strides = array<i32>} : memref<9x25x128xf32, #tpu.memory_space<vmem>>, vector<1x1x128xf32>,
    %c40_556 = arith.constant 40 : index
    %c0_557 = arith.constant 0 : index
    %533 = vector.load %arg10[%c40_556, %c0_557] : memref<144x128xf32, #tpu.memory_space<vmem>>, vector<1x128xf32>
    %c5_558 = arith.constant 5 : index
    %c6_559 = arith.constant 6 : index
    %c0_560 = arith.constant 0 : index
    %534 = vector.load %arg12[%c5_558, %c6_559, %c0_560] : memref<9x25x128xf32, #tpu.memory_space<vmem>>, vector<1x1x128xf32>
    %535 = vector.shape_cast %534 : vector<1x1x128xf32> to vector<1x128xf32>
    %536 = vector.shape_cast %533 : vector<1x128xf32> to vector<1x1x128xf32>
    tpu.vector_store %arg12[%c5_558, %c6_559, %c0_560], %536 {strides = array<i32>} : memref<9x25x128xf32, #tpu.memory_space<vmem>>, vector<1x1x128xf32>,
    %c42_561 = arith.constant 42 : index
    %c0_562 = arith.constant 0 : index
    %537 = vector.load %arg10[%c42_561, %c0_562] : memref<144x128xf32, #tpu.memory_space<vmem>>, vector<1x128xf32>
    %c5_563 = arith.constant 5 : index
    %c7_564 = arith.constant 7 : index
    %c0_565 = arith.constant 0 : index
    %538 = vector.load %arg12[%c5_563, %c7_564, %c0_565] : memref<9x25x128xf32, #tpu.memory_space<vmem>>, vector<1x1x128xf32>
    %539 = vector.shape_cast %538 : vector<1x1x128xf32> to vector<1x128xf32>
    %540 = vector.shape_cast %537 : vector<1x128xf32> to vector<1x1x128xf32>
    tpu.vector_store %arg12[%c5_563, %c7_564, %c0_565], %540 {strides = array<i32>} : memref<9x25x128xf32, #tpu.memory_space<vmem>>, vector<1x1x128xf32>,
    %c44_566 = arith.constant 44 : index
    %c0_567 = arith.constant 0 : index
    %541 = vector.load %arg10[%c44_566, %c0_567] : memref<144x128xf32, #tpu.memory_space<vmem>>, vector<1x128xf32>
    %c5_568 = arith.constant 5 : index
    %c8_569 = arith.constant 8 : index
    %c0_570 = arith.constant 0 : index
    %542 = vector.load %arg12[%c5_568, %c8_569, %c0_570] : memref<9x25x128xf32, #tpu.memory_space<vmem>>, vector<1x1x128xf32>
    %543 = vector.shape_cast %542 : vector<1x1x128xf32> to vector<1x128xf32>
    %544 = vector.shape_cast %541 : vector<1x128xf32> to vector<1x1x128xf32>
    tpu.vector_store %arg12[%c5_568, %c8_569, %c0_570], %544 {strides = array<i32>} : memref<9x25x128xf32, #tpu.memory_space<vmem>>, vector<1x1x128xf32>,
    %c46 = arith.constant 46 : index
    %c0_571 = arith.constant 0 : index
    %545 = vector.load %arg10[%c46, %c0_571] : memref<144x128xf32, #tpu.memory_space<vmem>>, vector<1x128xf32>
    %c5_572 = arith.constant 5 : index
    %c9_573 = arith.constant 9 : index
    %c0_574 = arith.constant 0 : index
    %546 = vector.load %arg12[%c5_572, %c9_573, %c0_574] : memref<9x25x128xf32, #tpu.memory_space<vmem>>, vector<1x1x128xf32>
    %547 = vector.shape_cast %546 : vector<1x1x128xf32> to vector<1x128xf32>
    %548 = vector.shape_cast %545 : vector<1x128xf32> to vector<1x1x128xf32>
    tpu.vector_store %arg12[%c5_572, %c9_573, %c0_574], %548 {strides = array<i32>} : memref<9x25x128xf32, #tpu.memory_space<vmem>>, vector<1x1x128xf32>,
    %c62_575 = arith.constant 62 : index
    %c0_576 = arith.constant 0 : index
    %549 = vector.load %arg10[%c62_575, %c0_576] : memref<144x128xf32, #tpu.memory_space<vmem>>, vector<1x128xf32>
    %c5_577 = arith.constant 5 : index
    %c10_578 = arith.constant 10 : index
    %c0_579 = arith.constant 0 : index
    %550 = vector.load %arg12[%c5_577, %c10_578, %c0_579] : memref<9x25x128xf32, #tpu.memory_space<vmem>>, vector<1x1x128xf32>
    %551 = vector.shape_cast %550 : vector<1x1x128xf32> to vector<1x128xf32>
    %552 = vector.shape_cast %549 : vector<1x128xf32> to vector<1x1x128xf32>
    tpu.vector_store %arg12[%c5_577, %c10_578, %c0_579], %552 {strides = array<i32>} : memref<9x25x128xf32, #tpu.memory_space<vmem>>, vector<1x1x128xf32>,
    %c64_580 = arith.constant 64 : index
    %c0_581 = arith.constant 0 : index
    %553 = vector.load %arg10[%c64_580, %c0_581] : memref<144x128xf32, #tpu.memory_space<vmem>>, vector<1x128xf32>
    %c5_582 = arith.constant 5 : index
    %c11_583 = arith.constant 11 : index
    %c0_584 = arith.constant 0 : index
    %554 = vector.load %arg12[%c5_582, %c11_583, %c0_584] : memref<9x25x128xf32, #tpu.memory_space<vmem>>, vector<1x1x128xf32>
    %555 = vector.shape_cast %554 : vector<1x1x128xf32> to vector<1x128xf32>
    %556 = vector.shape_cast %553 : vector<1x128xf32> to vector<1x1x128xf32>
    tpu.vector_store %arg12[%c5_582, %c11_583, %c0_584], %556 {strides = array<i32>} : memref<9x25x128xf32, #tpu.memory_space<vmem>>, vector<1x1x128xf32>,
    %c66_585 = arith.constant 66 : index
    %c0_586 = arith.constant 0 : index
    %557 = vector.load %arg10[%c66_585, %c0_586] : memref<144x128xf32, #tpu.memory_space<vmem>>, vector<1x128xf32>
    %c5_587 = arith.constant 5 : index
    %c12_588 = arith.constant 12 : index
    %c0_589 = arith.constant 0 : index
    %558 = vector.load %arg12[%c5_587, %c12_588, %c0_589] : memref<9x25x128xf32, #tpu.memory_space<vmem>>, vector<1x1x128xf32>
    %559 = vector.shape_cast %558 : vector<1x1x128xf32> to vector<1x128xf32>
    %560 = vector.shape_cast %557 : vector<1x128xf32> to vector<1x1x128xf32>
    tpu.vector_store %arg12[%c5_587, %c12_588, %c0_589], %560 {strides = array<i32>} : memref<9x25x128xf32, #tpu.memory_space<vmem>>, vector<1x1x128xf32>,
    %c68_590 = arith.constant 68 : index
    %c0_591 = arith.constant 0 : index
    %561 = vector.load %arg10[%c68_590, %c0_591] : memref<144x128xf32, #tpu.memory_space<vmem>>, vector<1x128xf32>
    %c5_592 = arith.constant 5 : index
    %c13_593 = arith.constant 13 : index
    %c0_594 = arith.constant 0 : index
    %562 = vector.load %arg12[%c5_592, %c13_593, %c0_594] : memref<9x25x128xf32, #tpu.memory_space<vmem>>, vector<1x1x128xf32>
    %563 = vector.shape_cast %562 : vector<1x1x128xf32> to vector<1x128xf32>
    %564 = vector.shape_cast %561 : vector<1x128xf32> to vector<1x1x128xf32>
    tpu.vector_store %arg12[%c5_592, %c13_593, %c0_594], %564 {strides = array<i32>} : memref<9x25x128xf32, #tpu.memory_space<vmem>>, vector<1x1x128xf32>,
    %c70 = arith.constant 70 : index
    %c0_595 = arith.constant 0 : index
    %565 = vector.load %arg10[%c70, %c0_595] : memref<144x128xf32, #tpu.memory_space<vmem>>, vector<1x128xf32>
    %c5_596 = arith.constant 5 : index
    %c14_597 = arith.constant 14 : index
    %c0_598 = arith.constant 0 : index
    %566 = vector.load %arg12[%c5_596, %c14_597, %c0_598] : memref<9x25x128xf32, #tpu.memory_space<vmem>>, vector<1x1x128xf32>
    %567 = vector.shape_cast %566 : vector<1x1x128xf32> to vector<1x128xf32>
    %568 = vector.shape_cast %565 : vector<1x128xf32> to vector<1x1x128xf32>
    tpu.vector_store %arg12[%c5_596, %c14_597, %c0_598], %568 {strides = array<i32>} : memref<9x25x128xf32, #tpu.memory_space<vmem>>, vector<1x1x128xf32>,
    %c86_599 = arith.constant 86 : index
    %c0_600 = arith.constant 0 : index
    %569 = vector.load %arg10[%c86_599, %c0_600] : memref<144x128xf32, #tpu.memory_space<vmem>>, vector<1x128xf32>
    %c5_601 = arith.constant 5 : index
    %c15_602 = arith.constant 15 : index
    %c0_603 = arith.constant 0 : index
    %570 = vector.load %arg12[%c5_601, %c15_602, %c0_603] : memref<9x25x128xf32, #tpu.memory_space<vmem>>, vector<1x1x128xf32>
    %571 = vector.shape_cast %570 : vector<1x1x128xf32> to vector<1x128xf32>
    %572 = vector.shape_cast %569 : vector<1x128xf32> to vector<1x1x128xf32>
    tpu.vector_store %arg12[%c5_601, %c15_602, %c0_603], %572 {strides = array<i32>} : memref<9x25x128xf32, #tpu.memory_space<vmem>>, vector<1x1x128xf32>,
    %c88_604 = arith.constant 88 : index
    %c0_605 = arith.constant 0 : index
    %573 = vector.load %arg10[%c88_604, %c0_605] : memref<144x128xf32, #tpu.memory_space<vmem>>, vector<1x128xf32>
    %c5_606 = arith.constant 5 : index
    %c16_607 = arith.constant 16 : index
    %c0_608 = arith.constant 0 : index
    %574 = vector.load %arg12[%c5_606, %c16_607, %c0_608] : memref<9x25x128xf32, #tpu.memory_space<vmem>>, vector<1x1x128xf32>
    %575 = vector.shape_cast %574 : vector<1x1x128xf32> to vector<1x128xf32>
    %576 = vector.shape_cast %573 : vector<1x128xf32> to vector<1x1x128xf32>
    tpu.vector_store %arg12[%c5_606, %c16_607, %c0_608], %576 {strides = array<i32>} : memref<9x25x128xf32, #tpu.memory_space<vmem>>, vector<1x1x128xf32>,
    %c90_609 = arith.constant 90 : index
    %c0_610 = arith.constant 0 : index
    %577 = vector.load %arg10[%c90_609, %c0_610] : memref<144x128xf32, #tpu.memory_space<vmem>>, vector<1x128xf32>
    %c5_611 = arith.constant 5 : index
    %c17_612 = arith.constant 17 : index
    %c0_613 = arith.constant 0 : index
    %578 = vector.load %arg12[%c5_611, %c17_612, %c0_613] : memref<9x25x128xf32, #tpu.memory_space<vmem>>, vector<1x1x128xf32>
    %579 = vector.shape_cast %578 : vector<1x1x128xf32> to vector<1x128xf32>
    %580 = vector.shape_cast %577 : vector<1x128xf32> to vector<1x1x128xf32>
    tpu.vector_store %arg12[%c5_611, %c17_612, %c0_613], %580 {strides = array<i32>} : memref<9x25x128xf32, #tpu.memory_space<vmem>>, vector<1x1x128xf32>,
    %c92_614 = arith.constant 92 : index
    %c0_615 = arith.constant 0 : index
    %581 = vector.load %arg10[%c92_614, %c0_615] : memref<144x128xf32, #tpu.memory_space<vmem>>, vector<1x128xf32>
    %c5_616 = arith.constant 5 : index
    %c18_617 = arith.constant 18 : index
    %c0_618 = arith.constant 0 : index
    %582 = vector.load %arg12[%c5_616, %c18_617, %c0_618] : memref<9x25x128xf32, #tpu.memory_space<vmem>>, vector<1x1x128xf32>
    %583 = vector.shape_cast %582 : vector<1x1x128xf32> to vector<1x128xf32>
    %584 = vector.shape_cast %581 : vector<1x128xf32> to vector<1x1x128xf32>
    tpu.vector_store %arg12[%c5_616, %c18_617, %c0_618], %584 {strides = array<i32>} : memref<9x25x128xf32, #tpu.memory_space<vmem>>, vector<1x1x128xf32>,
    %c94 = arith.constant 94 : index
    %c0_619 = arith.constant 0 : index
    %585 = vector.load %arg10[%c94, %c0_619] : memref<144x128xf32, #tpu.memory_space<vmem>>, vector<1x128xf32>
    %c5_620 = arith.constant 5 : index
    %c19_621 = arith.constant 19 : index
    %c0_622 = arith.constant 0 : index
    %586 = vector.load %arg12[%c5_620, %c19_621, %c0_622] : memref<9x25x128xf32, #tpu.memory_space<vmem>>, vector<1x1x128xf32>
    %587 = vector.shape_cast %586 : vector<1x1x128xf32> to vector<1x128xf32>
    %588 = vector.shape_cast %585 : vector<1x128xf32> to vector<1x1x128xf32>
    tpu.vector_store %arg12[%c5_620, %c19_621, %c0_622], %588 {strides = array<i32>} : memref<9x25x128xf32, #tpu.memory_space<vmem>>, vector<1x1x128xf32>,
    %c110_623 = arith.constant 110 : index
    %c0_624 = arith.constant 0 : index
    %589 = vector.load %arg10[%c110_623, %c0_624] : memref<144x128xf32, #tpu.memory_space<vmem>>, vector<1x128xf32>
    %c5_625 = arith.constant 5 : index
    %c20_626 = arith.constant 20 : index
    %c0_627 = arith.constant 0 : index
    %590 = vector.load %arg12[%c5_625, %c20_626, %c0_627] : memref<9x25x128xf32, #tpu.memory_space<vmem>>, vector<1x1x128xf32>
    %591 = vector.shape_cast %590 : vector<1x1x128xf32> to vector<1x128xf32>
    %592 = vector.shape_cast %589 : vector<1x128xf32> to vector<1x1x128xf32>
    tpu.vector_store %arg12[%c5_625, %c20_626, %c0_627], %592 {strides = array<i32>} : memref<9x25x128xf32, #tpu.memory_space<vmem>>, vector<1x1x128xf32>,
    %c112_628 = arith.constant 112 : index
    %c0_629 = arith.constant 0 : index
    %593 = vector.load %arg10[%c112_628, %c0_629] : memref<144x128xf32, #tpu.memory_space<vmem>>, vector<1x128xf32>
    %c5_630 = arith.constant 5 : index
    %c21_631 = arith.constant 21 : index
    %c0_632 = arith.constant 0 : index
    %594 = vector.load %arg12[%c5_630, %c21_631, %c0_632] : memref<9x25x128xf32, #tpu.memory_space<vmem>>, vector<1x1x128xf32>
    %595 = vector.shape_cast %594 : vector<1x1x128xf32> to vector<1x128xf32>
    %596 = vector.shape_cast %593 : vector<1x128xf32> to vector<1x1x128xf32>
    tpu.vector_store %arg12[%c5_630, %c21_631, %c0_632], %596 {strides = array<i32>} : memref<9x25x128xf32, #tpu.memory_space<vmem>>, vector<1x1x128xf32>,
    %c114_633 = arith.constant 114 : index
    %c0_634 = arith.constant 0 : index
    %597 = vector.load %arg10[%c114_633, %c0_634] : memref<144x128xf32, #tpu.memory_space<vmem>>, vector<1x128xf32>
    %c5_635 = arith.constant 5 : index
    %c22_636 = arith.constant 22 : index
    %c0_637 = arith.constant 0 : index
    %598 = vector.load %arg12[%c5_635, %c22_636, %c0_637] : memref<9x25x128xf32, #tpu.memory_space<vmem>>, vector<1x1x128xf32>
    %599 = vector.shape_cast %598 : vector<1x1x128xf32> to vector<1x128xf32>
    %600 = vector.shape_cast %597 : vector<1x128xf32> to vector<1x1x128xf32>
    tpu.vector_store %arg12[%c5_635, %c22_636, %c0_637], %600 {strides = array<i32>} : memref<9x25x128xf32, #tpu.memory_space<vmem>>, vector<1x1x128xf32>,
    %c116_638 = arith.constant 116 : index
    %c0_639 = arith.constant 0 : index
    %601 = vector.load %arg10[%c116_638, %c0_639] : memref<144x128xf32, #tpu.memory_space<vmem>>, vector<1x128xf32>
    %c5_640 = arith.constant 5 : index
    %c23_641 = arith.constant 23 : index
    %c0_642 = arith.constant 0 : index
    %602 = vector.load %arg12[%c5_640, %c23_641, %c0_642] : memref<9x25x128xf32, #tpu.memory_space<vmem>>, vector<1x1x128xf32>
    %603 = vector.shape_cast %602 : vector<1x1x128xf32> to vector<1x128xf32>
    %604 = vector.shape_cast %601 : vector<1x128xf32> to vector<1x1x128xf32>
    tpu.vector_store %arg12[%c5_640, %c23_641, %c0_642], %604 {strides = array<i32>} : memref<9x25x128xf32, #tpu.memory_space<vmem>>, vector<1x1x128xf32>,
    %c118 = arith.constant 118 : index
    %c0_643 = arith.constant 0 : index
    %605 = vector.load %arg10[%c118, %c0_643] : memref<144x128xf32, #tpu.memory_space<vmem>>, vector<1x128xf32>
    %c5_644 = arith.constant 5 : index
    %c24_645 = arith.constant 24 : index
    %c0_646 = arith.constant 0 : index
    %606 = vector.load %arg12[%c5_644, %c24_645, %c0_646] : memref<9x25x128xf32, #tpu.memory_space<vmem>>, vector<1x1x128xf32>
    %607 = vector.shape_cast %606 : vector<1x1x128xf32> to vector<1x128xf32>
    %608 = vector.shape_cast %605 : vector<1x128xf32> to vector<1x1x128xf32>
    tpu.vector_store %arg12[%c5_644, %c24_645, %c0_646], %608 {strides = array<i32>} : memref<9x25x128xf32, #tpu.memory_space<vmem>>, vector<1x1x128xf32>,
    %c24_647 = arith.constant 24 : index
    %c0_648 = arith.constant 0 : index
    %609 = vector.load %arg10[%c24_647, %c0_648] : memref<144x128xf32, #tpu.memory_space<vmem>>, vector<1x128xf32>
    %c6_649 = arith.constant 6 : index
    %c0_650 = arith.constant 0 : index
    %c0_651 = arith.constant 0 : index
    %610 = vector.load %arg12[%c6_649, %c0_650, %c0_651] : memref<9x25x128xf32, #tpu.memory_space<vmem>>, vector<1x1x128xf32>
    %611 = vector.shape_cast %610 : vector<1x1x128xf32> to vector<1x128xf32>
    %612 = vector.shape_cast %609 : vector<1x128xf32> to vector<1x1x128xf32>
    tpu.vector_store %arg12[%c6_649, %c0_650, %c0_651], %612 {strides = array<i32>} : memref<9x25x128xf32, #tpu.memory_space<vmem>>, vector<1x1x128xf32>,
    %c26_652 = arith.constant 26 : index
    %c0_653 = arith.constant 0 : index
    %613 = vector.load %arg10[%c26_652, %c0_653] : memref<144x128xf32, #tpu.memory_space<vmem>>, vector<1x128xf32>
    %c6_654 = arith.constant 6 : index
    %c1_655 = arith.constant 1 : index
    %c0_656 = arith.constant 0 : index
    %614 = vector.load %arg12[%c6_654, %c1_655, %c0_656] : memref<9x25x128xf32, #tpu.memory_space<vmem>>, vector<1x1x128xf32>
    %615 = vector.shape_cast %614 : vector<1x1x128xf32> to vector<1x128xf32>
    %616 = vector.shape_cast %613 : vector<1x128xf32> to vector<1x1x128xf32>
    tpu.vector_store %arg12[%c6_654, %c1_655, %c0_656], %616 {strides = array<i32>} : memref<9x25x128xf32, #tpu.memory_space<vmem>>, vector<1x1x128xf32>,
    %c28_657 = arith.constant 28 : index
    %c0_658 = arith.constant 0 : index
    %617 = vector.load %arg10[%c28_657, %c0_658] : memref<144x128xf32, #tpu.memory_space<vmem>>, vector<1x128xf32>
    %c6_659 = arith.constant 6 : index
    %c2_660 = arith.constant 2 : index
    %c0_661 = arith.constant 0 : index
    %618 = vector.load %arg12[%c6_659, %c2_660, %c0_661] : memref<9x25x128xf32, #tpu.memory_space<vmem>>, vector<1x1x128xf32>
    %619 = vector.shape_cast %618 : vector<1x1x128xf32> to vector<1x128xf32>
    %620 = vector.shape_cast %617 : vector<1x128xf32> to vector<1x1x128xf32>
    tpu.vector_store %arg12[%c6_659, %c2_660, %c0_661], %620 {strides = array<i32>} : memref<9x25x128xf32, #tpu.memory_space<vmem>>, vector<1x1x128xf32>,
    %c30_662 = arith.constant 30 : index
    %c0_663 = arith.constant 0 : index
    %621 = vector.load %arg10[%c30_662, %c0_663] : memref<144x128xf32, #tpu.memory_space<vmem>>, vector<1x128xf32>
    %c6_664 = arith.constant 6 : index
    %c3_665 = arith.constant 3 : index
    %c0_666 = arith.constant 0 : index
    %622 = vector.load %arg12[%c6_664, %c3_665, %c0_666] : memref<9x25x128xf32, #tpu.memory_space<vmem>>, vector<1x1x128xf32>
    %623 = vector.shape_cast %622 : vector<1x1x128xf32> to vector<1x128xf32>
    %624 = vector.shape_cast %621 : vector<1x128xf32> to vector<1x1x128xf32>
    tpu.vector_store %arg12[%c6_664, %c3_665, %c0_666], %624 {strides = array<i32>} : memref<9x25x128xf32, #tpu.memory_space<vmem>>, vector<1x1x128xf32>,
    %c32_667 = arith.constant 32 : index
    %c0_668 = arith.constant 0 : index
    %625 = vector.load %arg10[%c32_667, %c0_668] : memref<144x128xf32, #tpu.memory_space<vmem>>, vector<1x128xf32>
    %c6_669 = arith.constant 6 : index
    %c4_670 = arith.constant 4 : index
    %c0_671 = arith.constant 0 : index
    %626 = vector.load %arg12[%c6_669, %c4_670, %c0_671] : memref<9x25x128xf32, #tpu.memory_space<vmem>>, vector<1x1x128xf32>
    %627 = vector.shape_cast %626 : vector<1x1x128xf32> to vector<1x128xf32>
    %628 = vector.shape_cast %625 : vector<1x128xf32> to vector<1x1x128xf32>
    tpu.vector_store %arg12[%c6_669, %c4_670, %c0_671], %628 {strides = array<i32>} : memref<9x25x128xf32, #tpu.memory_space<vmem>>, vector<1x1x128xf32>,
    %c48_672 = arith.constant 48 : index
    %c0_673 = arith.constant 0 : index
    %629 = vector.load %arg10[%c48_672, %c0_673] : memref<144x128xf32, #tpu.memory_space<vmem>>, vector<1x128xf32>
    %c6_674 = arith.constant 6 : index
    %c5_675 = arith.constant 5 : index
    %c0_676 = arith.constant 0 : index
    %630 = vector.load %arg12[%c6_674, %c5_675, %c0_676] : memref<9x25x128xf32, #tpu.memory_space<vmem>>, vector<1x1x128xf32>
    %631 = vector.shape_cast %630 : vector<1x1x128xf32> to vector<1x128xf32>
    %632 = vector.shape_cast %629 : vector<1x128xf32> to vector<1x1x128xf32>
    tpu.vector_store %arg12[%c6_674, %c5_675, %c0_676], %632 {strides = array<i32>} : memref<9x25x128xf32, #tpu.memory_space<vmem>>, vector<1x1x128xf32>,
    %c50_677 = arith.constant 50 : index
    %c0_678 = arith.constant 0 : index
    %633 = vector.load %arg10[%c50_677, %c0_678] : memref<144x128xf32, #tpu.memory_space<vmem>>, vector<1x128xf32>
    %c6_679 = arith.constant 6 : index
    %c6_680 = arith.constant 6 : index
    %c0_681 = arith.constant 0 : index
    %634 = vector.load %arg12[%c6_679, %c6_680, %c0_681] : memref<9x25x128xf32, #tpu.memory_space<vmem>>, vector<1x1x128xf32>
    %635 = vector.shape_cast %634 : vector<1x1x128xf32> to vector<1x128xf32>
    %636 = vector.shape_cast %633 : vector<1x128xf32> to vector<1x1x128xf32>
    tpu.vector_store %arg12[%c6_679, %c6_680, %c0_681], %636 {strides = array<i32>} : memref<9x25x128xf32, #tpu.memory_space<vmem>>, vector<1x1x128xf32>,
    %c52_682 = arith.constant 52 : index
    %c0_683 = arith.constant 0 : index
    %637 = vector.load %arg10[%c52_682, %c0_683] : memref<144x128xf32, #tpu.memory_space<vmem>>, vector<1x128xf32>
    %c6_684 = arith.constant 6 : index
    %c7_685 = arith.constant 7 : index
    %c0_686 = arith.constant 0 : index
    %638 = vector.load %arg12[%c6_684, %c7_685, %c0_686] : memref<9x25x128xf32, #tpu.memory_space<vmem>>, vector<1x1x128xf32>
    %639 = vector.shape_cast %638 : vector<1x1x128xf32> to vector<1x128xf32>
    %640 = vector.shape_cast %637 : vector<1x128xf32> to vector<1x1x128xf32>
    tpu.vector_store %arg12[%c6_684, %c7_685, %c0_686], %640 {strides = array<i32>} : memref<9x25x128xf32, #tpu.memory_space<vmem>>, vector<1x1x128xf32>,
    %c54_687 = arith.constant 54 : index
    %c0_688 = arith.constant 0 : index
    %641 = vector.load %arg10[%c54_687, %c0_688] : memref<144x128xf32, #tpu.memory_space<vmem>>, vector<1x128xf32>
    %c6_689 = arith.constant 6 : index
    %c8_690 = arith.constant 8 : index
    %c0_691 = arith.constant 0 : index
    %642 = vector.load %arg12[%c6_689, %c8_690, %c0_691] : memref<9x25x128xf32, #tpu.memory_space<vmem>>, vector<1x1x128xf32>
    %643 = vector.shape_cast %642 : vector<1x1x128xf32> to vector<1x128xf32>
    %644 = vector.shape_cast %641 : vector<1x128xf32> to vector<1x1x128xf32>
    tpu.vector_store %arg12[%c6_689, %c8_690, %c0_691], %644 {strides = array<i32>} : memref<9x25x128xf32, #tpu.memory_space<vmem>>, vector<1x1x128xf32>,
    %c56_692 = arith.constant 56 : index
    %c0_693 = arith.constant 0 : index
    %645 = vector.load %arg10[%c56_692, %c0_693] : memref<144x128xf32, #tpu.memory_space<vmem>>, vector<1x128xf32>
    %c6_694 = arith.constant 6 : index
    %c9_695 = arith.constant 9 : index
    %c0_696 = arith.constant 0 : index
    %646 = vector.load %arg12[%c6_694, %c9_695, %c0_696] : memref<9x25x128xf32, #tpu.memory_space<vmem>>, vector<1x1x128xf32>
    %647 = vector.shape_cast %646 : vector<1x1x128xf32> to vector<1x128xf32>
    %648 = vector.shape_cast %645 : vector<1x128xf32> to vector<1x1x128xf32>
    tpu.vector_store %arg12[%c6_694, %c9_695, %c0_696], %648 {strides = array<i32>} : memref<9x25x128xf32, #tpu.memory_space<vmem>>, vector<1x1x128xf32>,
    %c72_697 = arith.constant 72 : index
    %c0_698 = arith.constant 0 : index
    %649 = vector.load %arg10[%c72_697, %c0_698] : memref<144x128xf32, #tpu.memory_space<vmem>>, vector<1x128xf32>
    %c6_699 = arith.constant 6 : index
    %c10_700 = arith.constant 10 : index
    %c0_701 = arith.constant 0 : index
    %650 = vector.load %arg12[%c6_699, %c10_700, %c0_701] : memref<9x25x128xf32, #tpu.memory_space<vmem>>, vector<1x1x128xf32>
    %651 = vector.shape_cast %650 : vector<1x1x128xf32> to vector<1x128xf32>
    %652 = vector.shape_cast %649 : vector<1x128xf32> to vector<1x1x128xf32>
    tpu.vector_store %arg12[%c6_699, %c10_700, %c0_701], %652 {strides = array<i32>} : memref<9x25x128xf32, #tpu.memory_space<vmem>>, vector<1x1x128xf32>,
    %c74_702 = arith.constant 74 : index
    %c0_703 = arith.constant 0 : index
    %653 = vector.load %arg10[%c74_702, %c0_703] : memref<144x128xf32, #tpu.memory_space<vmem>>, vector<1x128xf32>
    %c6_704 = arith.constant 6 : index
    %c11_705 = arith.constant 11 : index
    %c0_706 = arith.constant 0 : index
    %654 = vector.load %arg12[%c6_704, %c11_705, %c0_706] : memref<9x25x128xf32, #tpu.memory_space<vmem>>, vector<1x1x128xf32>
    %655 = vector.shape_cast %654 : vector<1x1x128xf32> to vector<1x128xf32>
    %656 = vector.shape_cast %653 : vector<1x128xf32> to vector<1x1x128xf32>
    tpu.vector_store %arg12[%c6_704, %c11_705, %c0_706], %656 {strides = array<i32>} : memref<9x25x128xf32, #tpu.memory_space<vmem>>, vector<1x1x128xf32>,
    %c76_707 = arith.constant 76 : index
    %c0_708 = arith.constant 0 : index
    %657 = vector.load %arg10[%c76_707, %c0_708] : memref<144x128xf32, #tpu.memory_space<vmem>>, vector<1x128xf32>
    %c6_709 = arith.constant 6 : index
    %c12_710 = arith.constant 12 : index
    %c0_711 = arith.constant 0 : index
    %658 = vector.load %arg12[%c6_709, %c12_710, %c0_711] : memref<9x25x128xf32, #tpu.memory_space<vmem>>, vector<1x1x128xf32>
    %659 = vector.shape_cast %658 : vector<1x1x128xf32> to vector<1x128xf32>
    %660 = vector.shape_cast %657 : vector<1x128xf32> to vector<1x1x128xf32>
    tpu.vector_store %arg12[%c6_709, %c12_710, %c0_711], %660 {strides = array<i32>} : memref<9x25x128xf32, #tpu.memory_space<vmem>>, vector<1x1x128xf32>,
    %c78_712 = arith.constant 78 : index
    %c0_713 = arith.constant 0 : index
    %661 = vector.load %arg10[%c78_712, %c0_713] : memref<144x128xf32, #tpu.memory_space<vmem>>, vector<1x128xf32>
    %c6_714 = arith.constant 6 : index
    %c13_715 = arith.constant 13 : index
    %c0_716 = arith.constant 0 : index
    %662 = vector.load %arg12[%c6_714, %c13_715, %c0_716] : memref<9x25x128xf32, #tpu.memory_space<vmem>>, vector<1x1x128xf32>
    %663 = vector.shape_cast %662 : vector<1x1x128xf32> to vector<1x128xf32>
    %664 = vector.shape_cast %661 : vector<1x128xf32> to vector<1x1x128xf32>
    tpu.vector_store %arg12[%c6_714, %c13_715, %c0_716], %664 {strides = array<i32>} : memref<9x25x128xf32, #tpu.memory_space<vmem>>, vector<1x1x128xf32>,
    %c80_717 = arith.constant 80 : index
    %c0_718 = arith.constant 0 : index
    %665 = vector.load %arg10[%c80_717, %c0_718] : memref<144x128xf32, #tpu.memory_space<vmem>>, vector<1x128xf32>
    %c6_719 = arith.constant 6 : index
    %c14_720 = arith.constant 14 : index
    %c0_721 = arith.constant 0 : index
    %666 = vector.load %arg12[%c6_719, %c14_720, %c0_721] : memref<9x25x128xf32, #tpu.memory_space<vmem>>, vector<1x1x128xf32>
    %667 = vector.shape_cast %666 : vector<1x1x128xf32> to vector<1x128xf32>
    %668 = vector.shape_cast %665 : vector<1x128xf32> to vector<1x1x128xf32>
    tpu.vector_store %arg12[%c6_719, %c14_720, %c0_721], %668 {strides = array<i32>} : memref<9x25x128xf32, #tpu.memory_space<vmem>>, vector<1x1x128xf32>,
    %c96_722 = arith.constant 96 : index
    %c0_723 = arith.constant 0 : index
    %669 = vector.load %arg10[%c96_722, %c0_723] : memref<144x128xf32, #tpu.memory_space<vmem>>, vector<1x128xf32>
    %c6_724 = arith.constant 6 : index
    %c15_725 = arith.constant 15 : index
    %c0_726 = arith.constant 0 : index
    %670 = vector.load %arg12[%c6_724, %c15_725, %c0_726] : memref<9x25x128xf32, #tpu.memory_space<vmem>>, vector<1x1x128xf32>
    %671 = vector.shape_cast %670 : vector<1x1x128xf32> to vector<1x128xf32>
    %672 = vector.shape_cast %669 : vector<1x128xf32> to vector<1x1x128xf32>
    tpu.vector_store %arg12[%c6_724, %c15_725, %c0_726], %672 {strides = array<i32>} : memref<9x25x128xf32, #tpu.memory_space<vmem>>, vector<1x1x128xf32>,
    %c98_727 = arith.constant 98 : index
    %c0_728 = arith.constant 0 : index
    %673 = vector.load %arg10[%c98_727, %c0_728] : memref<144x128xf32, #tpu.memory_space<vmem>>, vector<1x128xf32>
    %c6_729 = arith.constant 6 : index
    %c16_730 = arith.constant 16 : index
    %c0_731 = arith.constant 0 : index
    %674 = vector.load %arg12[%c6_729, %c16_730, %c0_731] : memref<9x25x128xf32, #tpu.memory_space<vmem>>, vector<1x1x128xf32>
    %675 = vector.shape_cast %674 : vector<1x1x128xf32> to vector<1x128xf32>
    %676 = vector.shape_cast %673 : vector<1x128xf32> to vector<1x1x128xf32>
    tpu.vector_store %arg12[%c6_729, %c16_730, %c0_731], %676 {strides = array<i32>} : memref<9x25x128xf32, #tpu.memory_space<vmem>>, vector<1x1x128xf32>,
    %c100_732 = arith.constant 100 : index
    %c0_733 = arith.constant 0 : index
    %677 = vector.load %arg10[%c100_732, %c0_733] : memref<144x128xf32, #tpu.memory_space<vmem>>, vector<1x128xf32>
    %c6_734 = arith.constant 6 : index
    %c17_735 = arith.constant 17 : index
    %c0_736 = arith.constant 0 : index
    %678 = vector.load %arg12[%c6_734, %c17_735, %c0_736] : memref<9x25x128xf32, #tpu.memory_space<vmem>>, vector<1x1x128xf32>
    %679 = vector.shape_cast %678 : vector<1x1x128xf32> to vector<1x128xf32>
    %680 = vector.shape_cast %677 : vector<1x128xf32> to vector<1x1x128xf32>
    tpu.vector_store %arg12[%c6_734, %c17_735, %c0_736], %680 {strides = array<i32>} : memref<9x25x128xf32, #tpu.memory_space<vmem>>, vector<1x1x128xf32>,
    %c102_737 = arith.constant 102 : index
    %c0_738 = arith.constant 0 : index
    %681 = vector.load %arg10[%c102_737, %c0_738] : memref<144x128xf32, #tpu.memory_space<vmem>>, vector<1x128xf32>
    %c6_739 = arith.constant 6 : index
    %c18_740 = arith.constant 18 : index
    %c0_741 = arith.constant 0 : index
    %682 = vector.load %arg12[%c6_739, %c18_740, %c0_741] : memref<9x25x128xf32, #tpu.memory_space<vmem>>, vector<1x1x128xf32>
    %683 = vector.shape_cast %682 : vector<1x1x128xf32> to vector<1x128xf32>
    %684 = vector.shape_cast %681 : vector<1x128xf32> to vector<1x1x128xf32>
    tpu.vector_store %arg12[%c6_739, %c18_740, %c0_741], %684 {strides = array<i32>} : memref<9x25x128xf32, #tpu.memory_space<vmem>>, vector<1x1x128xf32>,
    %c104_742 = arith.constant 104 : index
    %c0_743 = arith.constant 0 : index
    %685 = vector.load %arg10[%c104_742, %c0_743] : memref<144x128xf32, #tpu.memory_space<vmem>>, vector<1x128xf32>
    %c6_744 = arith.constant 6 : index
    %c19_745 = arith.constant 19 : index
    %c0_746 = arith.constant 0 : index
    %686 = vector.load %arg12[%c6_744, %c19_745, %c0_746] : memref<9x25x128xf32, #tpu.memory_space<vmem>>, vector<1x1x128xf32>
    %687 = vector.shape_cast %686 : vector<1x1x128xf32> to vector<1x128xf32>
    %688 = vector.shape_cast %685 : vector<1x128xf32> to vector<1x1x128xf32>
    tpu.vector_store %arg12[%c6_744, %c19_745, %c0_746], %688 {strides = array<i32>} : memref<9x25x128xf32, #tpu.memory_space<vmem>>, vector<1x1x128xf32>,
    %c120 = arith.constant 120 : index
    %c0_747 = arith.constant 0 : index
    %689 = vector.load %arg10[%c120, %c0_747] : memref<144x128xf32, #tpu.memory_space<vmem>>, vector<1x128xf32>
    %c6_748 = arith.constant 6 : index
    %c20_749 = arith.constant 20 : index
    %c0_750 = arith.constant 0 : index
    %690 = vector.load %arg12[%c6_748, %c20_749, %c0_750] : memref<9x25x128xf32, #tpu.memory_space<vmem>>, vector<1x1x128xf32>
    %691 = vector.shape_cast %690 : vector<1x1x128xf32> to vector<1x128xf32>
    %692 = vector.shape_cast %689 : vector<1x128xf32> to vector<1x1x128xf32>
    tpu.vector_store %arg12[%c6_748, %c20_749, %c0_750], %692 {strides = array<i32>} : memref<9x25x128xf32, #tpu.memory_space<vmem>>, vector<1x1x128xf32>,
    %c122 = arith.constant 122 : index
    %c0_751 = arith.constant 0 : index
    %693 = vector.load %arg10[%c122, %c0_751] : memref<144x128xf32, #tpu.memory_space<vmem>>, vector<1x128xf32>
    %c6_752 = arith.constant 6 : index
    %c21_753 = arith.constant 21 : index
    %c0_754 = arith.constant 0 : index
    %694 = vector.load %arg12[%c6_752, %c21_753, %c0_754] : memref<9x25x128xf32, #tpu.memory_space<vmem>>, vector<1x1x128xf32>
    %695 = vector.shape_cast %694 : vector<1x1x128xf32> to vector<1x128xf32>
    %696 = vector.shape_cast %693 : vector<1x128xf32> to vector<1x1x128xf32>
    tpu.vector_store %arg12[%c6_752, %c21_753, %c0_754], %696 {strides = array<i32>} : memref<9x25x128xf32, #tpu.memory_space<vmem>>, vector<1x1x128xf32>,
    %c124 = arith.constant 124 : index
    %c0_755 = arith.constant 0 : index
    %697 = vector.load %arg10[%c124, %c0_755] : memref<144x128xf32, #tpu.memory_space<vmem>>, vector<1x128xf32>
    %c6_756 = arith.constant 6 : index
    %c22_757 = arith.constant 22 : index
    %c0_758 = arith.constant 0 : index
    %698 = vector.load %arg12[%c6_756, %c22_757, %c0_758] : memref<9x25x128xf32, #tpu.memory_space<vmem>>, vector<1x1x128xf32>
    %699 = vector.shape_cast %698 : vector<1x1x128xf32> to vector<1x128xf32>
    %700 = vector.shape_cast %697 : vector<1x128xf32> to vector<1x1x128xf32>
    tpu.vector_store %arg12[%c6_756, %c22_757, %c0_758], %700 {strides = array<i32>} : memref<9x25x128xf32, #tpu.memory_space<vmem>>, vector<1x1x128xf32>,
    %c126 = arith.constant 126 : index
    %c0_759 = arith.constant 0 : index
    %701 = vector.load %arg10[%c126, %c0_759] : memref<144x128xf32, #tpu.memory_space<vmem>>, vector<1x128xf32>
    %c6_760 = arith.constant 6 : index
    %c23_761 = arith.constant 23 : index
    %c0_762 = arith.constant 0 : index
    %702 = vector.load %arg12[%c6_760, %c23_761, %c0_762] : memref<9x25x128xf32, #tpu.memory_space<vmem>>, vector<1x1x128xf32>
    %703 = vector.shape_cast %702 : vector<1x1x128xf32> to vector<1x128xf32>
    %704 = vector.shape_cast %701 : vector<1x128xf32> to vector<1x1x128xf32>
    tpu.vector_store %arg12[%c6_760, %c23_761, %c0_762], %704 {strides = array<i32>} : memref<9x25x128xf32, #tpu.memory_space<vmem>>, vector<1x1x128xf32>,
    %c128 = arith.constant 128 : index
    %c0_763 = arith.constant 0 : index
    %705 = vector.load %arg10[%c128, %c0_763] : memref<144x128xf32, #tpu.memory_space<vmem>>, vector<1x128xf32>
    %c6_764 = arith.constant 6 : index
    %c24_765 = arith.constant 24 : index
    %c0_766 = arith.constant 0 : index
    %706 = vector.load %arg12[%c6_764, %c24_765, %c0_766] : memref<9x25x128xf32, #tpu.memory_space<vmem>>, vector<1x1x128xf32>
    %707 = vector.shape_cast %706 : vector<1x1x128xf32> to vector<1x128xf32>
    %708 = vector.shape_cast %705 : vector<1x128xf32> to vector<1x1x128xf32>
    tpu.vector_store %arg12[%c6_764, %c24_765, %c0_766], %708 {strides = array<i32>} : memref<9x25x128xf32, #tpu.memory_space<vmem>>, vector<1x1x128xf32>,
    %c25_767 = arith.constant 25 : index
    %c0_768 = arith.constant 0 : index
    %709 = vector.load %arg10[%c25_767, %c0_768] : memref<144x128xf32, #tpu.memory_space<vmem>>, vector<1x128xf32>
    %c7_769 = arith.constant 7 : index
    %c0_770 = arith.constant 0 : index
    %c0_771 = arith.constant 0 : index
    %710 = vector.load %arg12[%c7_769, %c0_770, %c0_771] : memref<9x25x128xf32, #tpu.memory_space<vmem>>, vector<1x1x128xf32>
    %711 = vector.shape_cast %710 : vector<1x1x128xf32> to vector<1x128xf32>
    %712 = vector.shape_cast %709 : vector<1x128xf32> to vector<1x1x128xf32>
    tpu.vector_store %arg12[%c7_769, %c0_770, %c0_771], %712 {strides = array<i32>} : memref<9x25x128xf32, #tpu.memory_space<vmem>>, vector<1x1x128xf32>,
    %c27_772 = arith.constant 27 : index
    %c0_773 = arith.constant 0 : index
    %713 = vector.load %arg10[%c27_772, %c0_773] : memref<144x128xf32, #tpu.memory_space<vmem>>, vector<1x128xf32>
    %c7_774 = arith.constant 7 : index
    %c1_775 = arith.constant 1 : index
    %c0_776 = arith.constant 0 : index
    %714 = vector.load %arg12[%c7_774, %c1_775, %c0_776] : memref<9x25x128xf32, #tpu.memory_space<vmem>>, vector<1x1x128xf32>
    %715 = vector.shape_cast %714 : vector<1x1x128xf32> to vector<1x128xf32>
    %716 = vector.shape_cast %713 : vector<1x128xf32> to vector<1x1x128xf32>
    tpu.vector_store %arg12[%c7_774, %c1_775, %c0_776], %716 {strides = array<i32>} : memref<9x25x128xf32, #tpu.memory_space<vmem>>, vector<1x1x128xf32>,
    %c29_777 = arith.constant 29 : index
    %c0_778 = arith.constant 0 : index
    %717 = vector.load %arg10[%c29_777, %c0_778] : memref<144x128xf32, #tpu.memory_space<vmem>>, vector<1x128xf32>
    %c7_779 = arith.constant 7 : index
    %c2_780 = arith.constant 2 : index
    %c0_781 = arith.constant 0 : index
    %718 = vector.load %arg12[%c7_779, %c2_780, %c0_781] : memref<9x25x128xf32, #tpu.memory_space<vmem>>, vector<1x1x128xf32>
    %719 = vector.shape_cast %718 : vector<1x1x128xf32> to vector<1x128xf32>
    %720 = vector.shape_cast %717 : vector<1x128xf32> to vector<1x1x128xf32>
    tpu.vector_store %arg12[%c7_779, %c2_780, %c0_781], %720 {strides = array<i32>} : memref<9x25x128xf32, #tpu.memory_space<vmem>>, vector<1x1x128xf32>,
    %c31_782 = arith.constant 31 : index
    %c0_783 = arith.constant 0 : index
    %721 = vector.load %arg10[%c31_782, %c0_783] : memref<144x128xf32, #tpu.memory_space<vmem>>, vector<1x128xf32>
    %c7_784 = arith.constant 7 : index
    %c3_785 = arith.constant 3 : index
    %c0_786 = arith.constant 0 : index
    %722 = vector.load %arg12[%c7_784, %c3_785, %c0_786] : memref<9x25x128xf32, #tpu.memory_space<vmem>>, vector<1x1x128xf32>
    %723 = vector.shape_cast %722 : vector<1x1x128xf32> to vector<1x128xf32>
    %724 = vector.shape_cast %721 : vector<1x128xf32> to vector<1x1x128xf32>
    tpu.vector_store %arg12[%c7_784, %c3_785, %c0_786], %724 {strides = array<i32>} : memref<9x25x128xf32, #tpu.memory_space<vmem>>, vector<1x1x128xf32>,
    %c33_787 = arith.constant 33 : index
    %c0_788 = arith.constant 0 : index
    %725 = vector.load %arg10[%c33_787, %c0_788] : memref<144x128xf32, #tpu.memory_space<vmem>>, vector<1x128xf32>
    %c7_789 = arith.constant 7 : index
    %c4_790 = arith.constant 4 : index
    %c0_791 = arith.constant 0 : index
    %726 = vector.load %arg12[%c7_789, %c4_790, %c0_791] : memref<9x25x128xf32, #tpu.memory_space<vmem>>, vector<1x1x128xf32>
    %727 = vector.shape_cast %726 : vector<1x1x128xf32> to vector<1x128xf32>
    %728 = vector.shape_cast %725 : vector<1x128xf32> to vector<1x1x128xf32>
    tpu.vector_store %arg12[%c7_789, %c4_790, %c0_791], %728 {strides = array<i32>} : memref<9x25x128xf32, #tpu.memory_space<vmem>>, vector<1x1x128xf32>,
    %c49_792 = arith.constant 49 : index
    %c0_793 = arith.constant 0 : index
    %729 = vector.load %arg10[%c49_792, %c0_793] : memref<144x128xf32, #tpu.memory_space<vmem>>, vector<1x128xf32>
    %c7_794 = arith.constant 7 : index
    %c5_795 = arith.constant 5 : index
    %c0_796 = arith.constant 0 : index
    %730 = vector.load %arg12[%c7_794, %c5_795, %c0_796] : memref<9x25x128xf32, #tpu.memory_space<vmem>>, vector<1x1x128xf32>
    %731 = vector.shape_cast %730 : vector<1x1x128xf32> to vector<1x128xf32>
    %732 = vector.shape_cast %729 : vector<1x128xf32> to vector<1x1x128xf32>
    tpu.vector_store %arg12[%c7_794, %c5_795, %c0_796], %732 {strides = array<i32>} : memref<9x25x128xf32, #tpu.memory_space<vmem>>, vector<1x1x128xf32>,
    %c51_797 = arith.constant 51 : index
    %c0_798 = arith.constant 0 : index
    %733 = vector.load %arg10[%c51_797, %c0_798] : memref<144x128xf32, #tpu.memory_space<vmem>>, vector<1x128xf32>
    %c7_799 = arith.constant 7 : index
    %c6_800 = arith.constant 6 : index
    %c0_801 = arith.constant 0 : index
    %734 = vector.load %arg12[%c7_799, %c6_800, %c0_801] : memref<9x25x128xf32, #tpu.memory_space<vmem>>, vector<1x1x128xf32>
    %735 = vector.shape_cast %734 : vector<1x1x128xf32> to vector<1x128xf32>
    %736 = vector.shape_cast %733 : vector<1x128xf32> to vector<1x1x128xf32>
    tpu.vector_store %arg12[%c7_799, %c6_800, %c0_801], %736 {strides = array<i32>} : memref<9x25x128xf32, #tpu.memory_space<vmem>>, vector<1x1x128xf32>,
    %c53_802 = arith.constant 53 : index
    %c0_803 = arith.constant 0 : index
    %737 = vector.load %arg10[%c53_802, %c0_803] : memref<144x128xf32, #tpu.memory_space<vmem>>, vector<1x128xf32>
    %c7_804 = arith.constant 7 : index
    %c7_805 = arith.constant 7 : index
    %c0_806 = arith.constant 0 : index
    %738 = vector.load %arg12[%c7_804, %c7_805, %c0_806] : memref<9x25x128xf32, #tpu.memory_space<vmem>>, vector<1x1x128xf32>
    %739 = vector.shape_cast %738 : vector<1x1x128xf32> to vector<1x128xf32>
    %740 = vector.shape_cast %737 : vector<1x128xf32> to vector<1x1x128xf32>
    tpu.vector_store %arg12[%c7_804, %c7_805, %c0_806], %740 {strides = array<i32>} : memref<9x25x128xf32, #tpu.memory_space<vmem>>, vector<1x1x128xf32>,
    %c55_807 = arith.constant 55 : index
    %c0_808 = arith.constant 0 : index
    %741 = vector.load %arg10[%c55_807, %c0_808] : memref<144x128xf32, #tpu.memory_space<vmem>>, vector<1x128xf32>
    %c7_809 = arith.constant 7 : index
    %c8_810 = arith.constant 8 : index
    %c0_811 = arith.constant 0 : index
    %742 = vector.load %arg12[%c7_809, %c8_810, %c0_811] : memref<9x25x128xf32, #tpu.memory_space<vmem>>, vector<1x1x128xf32>
    %743 = vector.shape_cast %742 : vector<1x1x128xf32> to vector<1x128xf32>
    %744 = vector.shape_cast %741 : vector<1x128xf32> to vector<1x1x128xf32>
    tpu.vector_store %arg12[%c7_809, %c8_810, %c0_811], %744 {strides = array<i32>} : memref<9x25x128xf32, #tpu.memory_space<vmem>>, vector<1x1x128xf32>,
    %c57_812 = arith.constant 57 : index
    %c0_813 = arith.constant 0 : index
    %745 = vector.load %arg10[%c57_812, %c0_813] : memref<144x128xf32, #tpu.memory_space<vmem>>, vector<1x128xf32>
    %c7_814 = arith.constant 7 : index
    %c9_815 = arith.constant 9 : index
    %c0_816 = arith.constant 0 : index
    %746 = vector.load %arg12[%c7_814, %c9_815, %c0_816] : memref<9x25x128xf32, #tpu.memory_space<vmem>>, vector<1x1x128xf32>
    %747 = vector.shape_cast %746 : vector<1x1x128xf32> to vector<1x128xf32>
    %748 = vector.shape_cast %745 : vector<1x128xf32> to vector<1x1x128xf32>
    tpu.vector_store %arg12[%c7_814, %c9_815, %c0_816], %748 {strides = array<i32>} : memref<9x25x128xf32, #tpu.memory_space<vmem>>, vector<1x1x128xf32>,
    %c73_817 = arith.constant 73 : index
    %c0_818 = arith.constant 0 : index
    %749 = vector.load %arg10[%c73_817, %c0_818] : memref<144x128xf32, #tpu.memory_space<vmem>>, vector<1x128xf32>
    %c7_819 = arith.constant 7 : index
    %c10_820 = arith.constant 10 : index
    %c0_821 = arith.constant 0 : index
    %750 = vector.load %arg12[%c7_819, %c10_820, %c0_821] : memref<9x25x128xf32, #tpu.memory_space<vmem>>, vector<1x1x128xf32>
    %751 = vector.shape_cast %750 : vector<1x1x128xf32> to vector<1x128xf32>
    %752 = vector.shape_cast %749 : vector<1x128xf32> to vector<1x1x128xf32>
    tpu.vector_store %arg12[%c7_819, %c10_820, %c0_821], %752 {strides = array<i32>} : memref<9x25x128xf32, #tpu.memory_space<vmem>>, vector<1x1x128xf32>,
    %c75_822 = arith.constant 75 : index
    %c0_823 = arith.constant 0 : index
    %753 = vector.load %arg10[%c75_822, %c0_823] : memref<144x128xf32, #tpu.memory_space<vmem>>, vector<1x128xf32>
    %c7_824 = arith.constant 7 : index
    %c11_825 = arith.constant 11 : index
    %c0_826 = arith.constant 0 : index
    %754 = vector.load %arg12[%c7_824, %c11_825, %c0_826] : memref<9x25x128xf32, #tpu.memory_space<vmem>>, vector<1x1x128xf32>
    %755 = vector.shape_cast %754 : vector<1x1x128xf32> to vector<1x128xf32>
    %756 = vector.shape_cast %753 : vector<1x128xf32> to vector<1x1x128xf32>
    tpu.vector_store %arg12[%c7_824, %c11_825, %c0_826], %756 {strides = array<i32>} : memref<9x25x128xf32, #tpu.memory_space<vmem>>, vector<1x1x128xf32>,
    %c77_827 = arith.constant 77 : index
    %c0_828 = arith.constant 0 : index
    %757 = vector.load %arg10[%c77_827, %c0_828] : memref<144x128xf32, #tpu.memory_space<vmem>>, vector<1x128xf32>
    %c7_829 = arith.constant 7 : index
    %c12_830 = arith.constant 12 : index
    %c0_831 = arith.constant 0 : index
    %758 = vector.load %arg12[%c7_829, %c12_830, %c0_831] : memref<9x25x128xf32, #tpu.memory_space<vmem>>, vector<1x1x128xf32>
    %759 = vector.shape_cast %758 : vector<1x1x128xf32> to vector<1x128xf32>
    %760 = vector.shape_cast %757 : vector<1x128xf32> to vector<1x1x128xf32>
    tpu.vector_store %arg12[%c7_829, %c12_830, %c0_831], %760 {strides = array<i32>} : memref<9x25x128xf32, #tpu.memory_space<vmem>>, vector<1x1x128xf32>,
    %c79_832 = arith.constant 79 : index
    %c0_833 = arith.constant 0 : index
    %761 = vector.load %arg10[%c79_832, %c0_833] : memref<144x128xf32, #tpu.memory_space<vmem>>, vector<1x128xf32>
    %c7_834 = arith.constant 7 : index
    %c13_835 = arith.constant 13 : index
    %c0_836 = arith.constant 0 : index
    %762 = vector.load %arg12[%c7_834, %c13_835, %c0_836] : memref<9x25x128xf32, #tpu.memory_space<vmem>>, vector<1x1x128xf32>
    %763 = vector.shape_cast %762 : vector<1x1x128xf32> to vector<1x128xf32>
    %764 = vector.shape_cast %761 : vector<1x128xf32> to vector<1x1x128xf32>
    tpu.vector_store %arg12[%c7_834, %c13_835, %c0_836], %764 {strides = array<i32>} : memref<9x25x128xf32, #tpu.memory_space<vmem>>, vector<1x1x128xf32>,
    %c81_837 = arith.constant 81 : index
    %c0_838 = arith.constant 0 : index
    %765 = vector.load %arg10[%c81_837, %c0_838] : memref<144x128xf32, #tpu.memory_space<vmem>>, vector<1x128xf32>
    %c7_839 = arith.constant 7 : index
    %c14_840 = arith.constant 14 : index
    %c0_841 = arith.constant 0 : index
    %766 = vector.load %arg12[%c7_839, %c14_840, %c0_841] : memref<9x25x128xf32, #tpu.memory_space<vmem>>, vector<1x1x128xf32>
    %767 = vector.shape_cast %766 : vector<1x1x128xf32> to vector<1x128xf32>
    %768 = vector.shape_cast %765 : vector<1x128xf32> to vector<1x1x128xf32>
    tpu.vector_store %arg12[%c7_839, %c14_840, %c0_841], %768 {strides = array<i32>} : memref<9x25x128xf32, #tpu.memory_space<vmem>>, vector<1x1x128xf32>,
    %c97_842 = arith.constant 97 : index
    %c0_843 = arith.constant 0 : index
    %769 = vector.load %arg10[%c97_842, %c0_843] : memref<144x128xf32, #tpu.memory_space<vmem>>, vector<1x128xf32>
    %c7_844 = arith.constant 7 : index
    %c15_845 = arith.constant 15 : index
    %c0_846 = arith.constant 0 : index
    %770 = vector.load %arg12[%c7_844, %c15_845, %c0_846] : memref<9x25x128xf32, #tpu.memory_space<vmem>>, vector<1x1x128xf32>
    %771 = vector.shape_cast %770 : vector<1x1x128xf32> to vector<1x128xf32>
    %772 = vector.shape_cast %769 : vector<1x128xf32> to vector<1x1x128xf32>
    tpu.vector_store %arg12[%c7_844, %c15_845, %c0_846], %772 {strides = array<i32>} : memref<9x25x128xf32, #tpu.memory_space<vmem>>, vector<1x1x128xf32>,
    %c99_847 = arith.constant 99 : index
    %c0_848 = arith.constant 0 : index
    %773 = vector.load %arg10[%c99_847, %c0_848] : memref<144x128xf32, #tpu.memory_space<vmem>>, vector<1x128xf32>
    %c7_849 = arith.constant 7 : index
    %c16_850 = arith.constant 16 : index
    %c0_851 = arith.constant 0 : index
    %774 = vector.load %arg12[%c7_849, %c16_850, %c0_851] : memref<9x25x128xf32, #tpu.memory_space<vmem>>, vector<1x1x128xf32>
    %775 = vector.shape_cast %774 : vector<1x1x128xf32> to vector<1x128xf32>
    %776 = vector.shape_cast %773 : vector<1x128xf32> to vector<1x1x128xf32>
    tpu.vector_store %arg12[%c7_849, %c16_850, %c0_851], %776 {strides = array<i32>} : memref<9x25x128xf32, #tpu.memory_space<vmem>>, vector<1x1x128xf32>,
    %c101_852 = arith.constant 101 : index
    %c0_853 = arith.constant 0 : index
    %777 = vector.load %arg10[%c101_852, %c0_853] : memref<144x128xf32, #tpu.memory_space<vmem>>, vector<1x128xf32>
    %c7_854 = arith.constant 7 : index
    %c17_855 = arith.constant 17 : index
    %c0_856 = arith.constant 0 : index
    %778 = vector.load %arg12[%c7_854, %c17_855, %c0_856] : memref<9x25x128xf32, #tpu.memory_space<vmem>>, vector<1x1x128xf32>
    %779 = vector.shape_cast %778 : vector<1x1x128xf32> to vector<1x128xf32>
    %780 = vector.shape_cast %777 : vector<1x128xf32> to vector<1x1x128xf32>
    tpu.vector_store %arg12[%c7_854, %c17_855, %c0_856], %780 {strides = array<i32>} : memref<9x25x128xf32, #tpu.memory_space<vmem>>, vector<1x1x128xf32>,
    %c103_857 = arith.constant 103 : index
    %c0_858 = arith.constant 0 : index
    %781 = vector.load %arg10[%c103_857, %c0_858] : memref<144x128xf32, #tpu.memory_space<vmem>>, vector<1x128xf32>
    %c7_859 = arith.constant 7 : index
    %c18_860 = arith.constant 18 : index
    %c0_861 = arith.constant 0 : index
    %782 = vector.load %arg12[%c7_859, %c18_860, %c0_861] : memref<9x25x128xf32, #tpu.memory_space<vmem>>, vector<1x1x128xf32>
    %783 = vector.shape_cast %782 : vector<1x1x128xf32> to vector<1x128xf32>
    %784 = vector.shape_cast %781 : vector<1x128xf32> to vector<1x1x128xf32>
    tpu.vector_store %arg12[%c7_859, %c18_860, %c0_861], %784 {strides = array<i32>} : memref<9x25x128xf32, #tpu.memory_space<vmem>>, vector<1x1x128xf32>,
    %c105_862 = arith.constant 105 : index
    %c0_863 = arith.constant 0 : index
    %785 = vector.load %arg10[%c105_862, %c0_863] : memref<144x128xf32, #tpu.memory_space<vmem>>, vector<1x128xf32>
    %c7_864 = arith.constant 7 : index
    %c19_865 = arith.constant 19 : index
    %c0_866 = arith.constant 0 : index
    %786 = vector.load %arg12[%c7_864, %c19_865, %c0_866] : memref<9x25x128xf32, #tpu.memory_space<vmem>>, vector<1x1x128xf32>
    %787 = vector.shape_cast %786 : vector<1x1x128xf32> to vector<1x128xf32>
    %788 = vector.shape_cast %785 : vector<1x128xf32> to vector<1x1x128xf32>
    tpu.vector_store %arg12[%c7_864, %c19_865, %c0_866], %788 {strides = array<i32>} : memref<9x25x128xf32, #tpu.memory_space<vmem>>, vector<1x1x128xf32>,
    %c121 = arith.constant 121 : index
    %c0_867 = arith.constant 0 : index
    %789 = vector.load %arg10[%c121, %c0_867] : memref<144x128xf32, #tpu.memory_space<vmem>>, vector<1x128xf32>
    %c7_868 = arith.constant 7 : index
    %c20_869 = arith.constant 20 : index
    %c0_870 = arith.constant 0 : index
    %790 = vector.load %arg12[%c7_868, %c20_869, %c0_870] : memref<9x25x128xf32, #tpu.memory_space<vmem>>, vector<1x1x128xf32>
    %791 = vector.shape_cast %790 : vector<1x1x128xf32> to vector<1x128xf32>
    %792 = vector.shape_cast %789 : vector<1x128xf32> to vector<1x1x128xf32>
    tpu.vector_store %arg12[%c7_868, %c20_869, %c0_870], %792 {strides = array<i32>} : memref<9x25x128xf32, #tpu.memory_space<vmem>>, vector<1x1x128xf32>,
    %c123 = arith.constant 123 : index
    %c0_871 = arith.constant 0 : index
    %793 = vector.load %arg10[%c123, %c0_871] : memref<144x128xf32, #tpu.memory_space<vmem>>, vector<1x128xf32>
    %c7_872 = arith.constant 7 : index
    %c21_873 = arith.constant 21 : index
    %c0_874 = arith.constant 0 : index
    %794 = vector.load %arg12[%c7_872, %c21_873, %c0_874] : memref<9x25x128xf32, #tpu.memory_space<vmem>>, vector<1x1x128xf32>
    %795 = vector.shape_cast %794 : vector<1x1x128xf32> to vector<1x128xf32>
    %796 = vector.shape_cast %793 : vector<1x128xf32> to vector<1x1x128xf32>
    tpu.vector_store %arg12[%c7_872, %c21_873, %c0_874], %796 {strides = array<i32>} : memref<9x25x128xf32, #tpu.memory_space<vmem>>, vector<1x1x128xf32>,
    %c125 = arith.constant 125 : index
    %c0_875 = arith.constant 0 : index
    %797 = vector.load %arg10[%c125, %c0_875] : memref<144x128xf32, #tpu.memory_space<vmem>>, vector<1x128xf32>
    %c7_876 = arith.constant 7 : index
    %c22_877 = arith.constant 22 : index
    %c0_878 = arith.constant 0 : index
    %798 = vector.load %arg12[%c7_876, %c22_877, %c0_878] : memref<9x25x128xf32, #tpu.memory_space<vmem>>, vector<1x1x128xf32>
    %799 = vector.shape_cast %798 : vector<1x1x128xf32> to vector<1x128xf32>
    %800 = vector.shape_cast %797 : vector<1x128xf32> to vector<1x1x128xf32>
    tpu.vector_store %arg12[%c7_876, %c22_877, %c0_878], %800 {strides = array<i32>} : memref<9x25x128xf32, #tpu.memory_space<vmem>>, vector<1x1x128xf32>,
    %c127 = arith.constant 127 : index
    %c0_879 = arith.constant 0 : index
    %801 = vector.load %arg10[%c127, %c0_879] : memref<144x128xf32, #tpu.memory_space<vmem>>, vector<1x128xf32>
    %c7_880 = arith.constant 7 : index
    %c23_881 = arith.constant 23 : index
    %c0_882 = arith.constant 0 : index
    %802 = vector.load %arg12[%c7_880, %c23_881, %c0_882] : memref<9x25x128xf32, #tpu.memory_space<vmem>>, vector<1x1x128xf32>
    %803 = vector.shape_cast %802 : vector<1x1x128xf32> to vector<1x128xf32>
    %804 = vector.shape_cast %801 : vector<1x128xf32> to vector<1x1x128xf32>
    tpu.vector_store %arg12[%c7_880, %c23_881, %c0_882], %804 {strides = array<i32>} : memref<9x25x128xf32, #tpu.memory_space<vmem>>, vector<1x1x128xf32>,
    %c129 = arith.constant 129 : index
    %c0_883 = arith.constant 0 : index
    %805 = vector.load %arg10[%c129, %c0_883] : memref<144x128xf32, #tpu.memory_space<vmem>>, vector<1x128xf32>
    %c7_884 = arith.constant 7 : index
    %c24_885 = arith.constant 24 : index
    %c0_886 = arith.constant 0 : index
    %806 = vector.load %arg12[%c7_884, %c24_885, %c0_886] : memref<9x25x128xf32, #tpu.memory_space<vmem>>, vector<1x1x128xf32>
    %807 = vector.shape_cast %806 : vector<1x1x128xf32> to vector<1x128xf32>
    %808 = vector.shape_cast %805 : vector<1x128xf32> to vector<1x1x128xf32>
    tpu.vector_store %arg12[%c7_884, %c24_885, %c0_886], %808 {strides = array<i32>} : memref<9x25x128xf32, #tpu.memory_space<vmem>>, vector<1x1x128xf32>,
    %c26_887 = arith.constant 26 : index
    %c0_888 = arith.constant 0 : index
    %809 = vector.load %arg10[%c26_887, %c0_888] : memref<144x128xf32, #tpu.memory_space<vmem>>, vector<1x128xf32>
    %c8_889 = arith.constant 8 : index
    %c0_890 = arith.constant 0 : index
    %c0_891 = arith.constant 0 : index
    %810 = vector.load %arg12[%c8_889, %c0_890, %c0_891] : memref<9x25x128xf32, #tpu.memory_space<vmem>>, vector<1x1x128xf32>
    %811 = vector.shape_cast %810 : vector<1x1x128xf32> to vector<1x128xf32>
    %812 = vector.shape_cast %809 : vector<1x128xf32> to vector<1x1x128xf32>
    tpu.vector_store %arg12[%c8_889, %c0_890, %c0_891], %812 {strides = array<i32>} : memref<9x25x128xf32, #tpu.memory_space<vmem>>, vector<1x1x128xf32>,
    %c28_892 = arith.constant 28 : index
    %c0_893 = arith.constant 0 : index
    %813 = vector.load %arg10[%c28_892, %c0_893] : memref<144x128xf32, #tpu.memory_space<vmem>>, vector<1x128xf32>
    %c8_894 = arith.constant 8 : index
    %c1_895 = arith.constant 1 : index
    %c0_896 = arith.constant 0 : index
    %814 = vector.load %arg12[%c8_894, %c1_895, %c0_896] : memref<9x25x128xf32, #tpu.memory_space<vmem>>, vector<1x1x128xf32>
    %815 = vector.shape_cast %814 : vector<1x1x128xf32> to vector<1x128xf32>
    %816 = vector.shape_cast %813 : vector<1x128xf32> to vector<1x1x128xf32>
    tpu.vector_store %arg12[%c8_894, %c1_895, %c0_896], %816 {strides = array<i32>} : memref<9x25x128xf32, #tpu.memory_space<vmem>>, vector<1x1x128xf32>,
    %c30_897 = arith.constant 30 : index
    %c0_898 = arith.constant 0 : index
    %817 = vector.load %arg10[%c30_897, %c0_898] : memref<144x128xf32, #tpu.memory_space<vmem>>, vector<1x128xf32>
    %c8_899 = arith.constant 8 : index
    %c2_900 = arith.constant 2 : index
    %c0_901 = arith.constant 0 : index
    %818 = vector.load %arg12[%c8_899, %c2_900, %c0_901] : memref<9x25x128xf32, #tpu.memory_space<vmem>>, vector<1x1x128xf32>
    %819 = vector.shape_cast %818 : vector<1x1x128xf32> to vector<1x128xf32>
    %820 = vector.shape_cast %817 : vector<1x128xf32> to vector<1x1x128xf32>
    tpu.vector_store %arg12[%c8_899, %c2_900, %c0_901], %820 {strides = array<i32>} : memref<9x25x128xf32, #tpu.memory_space<vmem>>, vector<1x1x128xf32>,
    %c32_902 = arith.constant 32 : index
    %c0_903 = arith.constant 0 : index
    %821 = vector.load %arg10[%c32_902, %c0_903] : memref<144x128xf32, #tpu.memory_space<vmem>>, vector<1x128xf32>
    %c8_904 = arith.constant 8 : index
    %c3_905 = arith.constant 3 : index
    %c0_906 = arith.constant 0 : index
    %822 = vector.load %arg12[%c8_904, %c3_905, %c0_906] : memref<9x25x128xf32, #tpu.memory_space<vmem>>, vector<1x1x128xf32>
    %823 = vector.shape_cast %822 : vector<1x1x128xf32> to vector<1x128xf32>
    %824 = vector.shape_cast %821 : vector<1x128xf32> to vector<1x1x128xf32>
    tpu.vector_store %arg12[%c8_904, %c3_905, %c0_906], %824 {strides = array<i32>} : memref<9x25x128xf32, #tpu.memory_space<vmem>>, vector<1x1x128xf32>,
    %c34_907 = arith.constant 34 : index
    %c0_908 = arith.constant 0 : index
    %825 = vector.load %arg10[%c34_907, %c0_908] : memref<144x128xf32, #tpu.memory_space<vmem>>, vector<1x128xf32>
    %c8_909 = arith.constant 8 : index
    %c4_910 = arith.constant 4 : index
    %c0_911 = arith.constant 0 : index
    %826 = vector.load %arg12[%c8_909, %c4_910, %c0_911] : memref<9x25x128xf32, #tpu.memory_space<vmem>>, vector<1x1x128xf32>
    %827 = vector.shape_cast %826 : vector<1x1x128xf32> to vector<1x128xf32>
    %828 = vector.shape_cast %825 : vector<1x128xf32> to vector<1x1x128xf32>
    tpu.vector_store %arg12[%c8_909, %c4_910, %c0_911], %828 {strides = array<i32>} : memref<9x25x128xf32, #tpu.memory_space<vmem>>, vector<1x1x128xf32>,
    %c50_912 = arith.constant 50 : index
    %c0_913 = arith.constant 0 : index
    %829 = vector.load %arg10[%c50_912, %c0_913] : memref<144x128xf32, #tpu.memory_space<vmem>>, vector<1x128xf32>
    %c8_914 = arith.constant 8 : index
    %c5_915 = arith.constant 5 : index
    %c0_916 = arith.constant 0 : index
    %830 = vector.load %arg12[%c8_914, %c5_915, %c0_916] : memref<9x25x128xf32, #tpu.memory_space<vmem>>, vector<1x1x128xf32>
    %831 = vector.shape_cast %830 : vector<1x1x128xf32> to vector<1x128xf32>
    %832 = vector.shape_cast %829 : vector<1x128xf32> to vector<1x1x128xf32>
    tpu.vector_store %arg12[%c8_914, %c5_915, %c0_916], %832 {strides = array<i32>} : memref<9x25x128xf32, #tpu.memory_space<vmem>>, vector<1x1x128xf32>,
    %c52_917 = arith.constant 52 : index
    %c0_918 = arith.constant 0 : index
    %833 = vector.load %arg10[%c52_917, %c0_918] : memref<144x128xf32, #tpu.memory_space<vmem>>, vector<1x128xf32>
    %c8_919 = arith.constant 8 : index
    %c6_920 = arith.constant 6 : index
    %c0_921 = arith.constant 0 : index
    %834 = vector.load %arg12[%c8_919, %c6_920, %c0_921] : memref<9x25x128xf32, #tpu.memory_space<vmem>>, vector<1x1x128xf32>
    %835 = vector.shape_cast %834 : vector<1x1x128xf32> to vector<1x128xf32>
    %836 = vector.shape_cast %833 : vector<1x128xf32> to vector<1x1x128xf32>
    tpu.vector_store %arg12[%c8_919, %c6_920, %c0_921], %836 {strides = array<i32>} : memref<9x25x128xf32, #tpu.memory_space<vmem>>, vector<1x1x128xf32>,
    %c54_922 = arith.constant 54 : index
    %c0_923 = arith.constant 0 : index
    %837 = vector.load %arg10[%c54_922, %c0_923] : memref<144x128xf32, #tpu.memory_space<vmem>>, vector<1x128xf32>
    %c8_924 = arith.constant 8 : index
    %c7_925 = arith.constant 7 : index
    %c0_926 = arith.constant 0 : index
    %838 = vector.load %arg12[%c8_924, %c7_925, %c0_926] : memref<9x25x128xf32, #tpu.memory_space<vmem>>, vector<1x1x128xf32>
    %839 = vector.shape_cast %838 : vector<1x1x128xf32> to vector<1x128xf32>
    %840 = vector.shape_cast %837 : vector<1x128xf32> to vector<1x1x128xf32>
    tpu.vector_store %arg12[%c8_924, %c7_925, %c0_926], %840 {strides = array<i32>} : memref<9x25x128xf32, #tpu.memory_space<vmem>>, vector<1x1x128xf32>,
    %c56_927 = arith.constant 56 : index
    %c0_928 = arith.constant 0 : index
    %841 = vector.load %arg10[%c56_927, %c0_928] : memref<144x128xf32, #tpu.memory_space<vmem>>, vector<1x128xf32>
    %c8_929 = arith.constant 8 : index
    %c8_930 = arith.constant 8 : index
    %c0_931 = arith.constant 0 : index
    %842 = vector.load %arg12[%c8_929, %c8_930, %c0_931] : memref<9x25x128xf32, #tpu.memory_space<vmem>>, vector<1x1x128xf32>
    %843 = vector.shape_cast %842 : vector<1x1x128xf32> to vector<1x128xf32>
    %844 = vector.shape_cast %841 : vector<1x128xf32> to vector<1x1x128xf32>
    tpu.vector_store %arg12[%c8_929, %c8_930, %c0_931], %844 {strides = array<i32>} : memref<9x25x128xf32, #tpu.memory_space<vmem>>, vector<1x1x128xf32>,
    %c58_932 = arith.constant 58 : index
    %c0_933 = arith.constant 0 : index
    %845 = vector.load %arg10[%c58_932, %c0_933] : memref<144x128xf32, #tpu.memory_space<vmem>>, vector<1x128xf32>
    %c8_934 = arith.constant 8 : index
    %c9_935 = arith.constant 9 : index
    %c0_936 = arith.constant 0 : index
    %846 = vector.load %arg12[%c8_934, %c9_935, %c0_936] : memref<9x25x128xf32, #tpu.memory_space<vmem>>, vector<1x1x128xf32>
    %847 = vector.shape_cast %846 : vector<1x1x128xf32> to vector<1x128xf32>
    %848 = vector.shape_cast %845 : vector<1x128xf32> to vector<1x1x128xf32>
    tpu.vector_store %arg12[%c8_934, %c9_935, %c0_936], %848 {strides = array<i32>} : memref<9x25x128xf32, #tpu.memory_space<vmem>>, vector<1x1x128xf32>,
    %c74_937 = arith.constant 74 : index
    %c0_938 = arith.constant 0 : index
    %849 = vector.load %arg10[%c74_937, %c0_938] : memref<144x128xf32, #tpu.memory_space<vmem>>, vector<1x128xf32>
    %c8_939 = arith.constant 8 : index
    %c10_940 = arith.constant 10 : index
    %c0_941 = arith.constant 0 : index
    %850 = vector.load %arg12[%c8_939, %c10_940, %c0_941] : memref<9x25x128xf32, #tpu.memory_space<vmem>>, vector<1x1x128xf32>
    %851 = vector.shape_cast %850 : vector<1x1x128xf32> to vector<1x128xf32>
    %852 = vector.shape_cast %849 : vector<1x128xf32> to vector<1x1x128xf32>
    tpu.vector_store %arg12[%c8_939, %c10_940, %c0_941], %852 {strides = array<i32>} : memref<9x25x128xf32, #tpu.memory_space<vmem>>, vector<1x1x128xf32>,
    %c76_942 = arith.constant 76 : index
    %c0_943 = arith.constant 0 : index
    %853 = vector.load %arg10[%c76_942, %c0_943] : memref<144x128xf32, #tpu.memory_space<vmem>>, vector<1x128xf32>
    %c8_944 = arith.constant 8 : index
    %c11_945 = arith.constant 11 : index
    %c0_946 = arith.constant 0 : index
    %854 = vector.load %arg12[%c8_944, %c11_945, %c0_946] : memref<9x25x128xf32, #tpu.memory_space<vmem>>, vector<1x1x128xf32>
    %855 = vector.shape_cast %854 : vector<1x1x128xf32> to vector<1x128xf32>
    %856 = vector.shape_cast %853 : vector<1x128xf32> to vector<1x1x128xf32>
    tpu.vector_store %arg12[%c8_944, %c11_945, %c0_946], %856 {strides = array<i32>} : memref<9x25x128xf32, #tpu.memory_space<vmem>>, vector<1x1x128xf32>,
    %c78_947 = arith.constant 78 : index
    %c0_948 = arith.constant 0 : index
    %857 = vector.load %arg10[%c78_947, %c0_948] : memref<144x128xf32, #tpu.memory_space<vmem>>, vector<1x128xf32>
    %c8_949 = arith.constant 8 : index
    %c12_950 = arith.constant 12 : index
    %c0_951 = arith.constant 0 : index
    %858 = vector.load %arg12[%c8_949, %c12_950, %c0_951] : memref<9x25x128xf32, #tpu.memory_space<vmem>>, vector<1x1x128xf32>
    %859 = vector.shape_cast %858 : vector<1x1x128xf32> to vector<1x128xf32>
    %860 = vector.shape_cast %857 : vector<1x128xf32> to vector<1x1x128xf32>
    tpu.vector_store %arg12[%c8_949, %c12_950, %c0_951], %860 {strides = array<i32>} : memref<9x25x128xf32, #tpu.memory_space<vmem>>, vector<1x1x128xf32>,
    %c80_952 = arith.constant 80 : index
    %c0_953 = arith.constant 0 : index
    %861 = vector.load %arg10[%c80_952, %c0_953] : memref<144x128xf32, #tpu.memory_space<vmem>>, vector<1x128xf32>
    %c8_954 = arith.constant 8 : index
    %c13_955 = arith.constant 13 : index
    %c0_956 = arith.constant 0 : index
    %862 = vector.load %arg12[%c8_954, %c13_955, %c0_956] : memref<9x25x128xf32, #tpu.memory_space<vmem>>, vector<1x1x128xf32>
    %863 = vector.shape_cast %862 : vector<1x1x128xf32> to vector<1x128xf32>
    %864 = vector.shape_cast %861 : vector<1x128xf32> to vector<1x1x128xf32>
    tpu.vector_store %arg12[%c8_954, %c13_955, %c0_956], %864 {strides = array<i32>} : memref<9x25x128xf32, #tpu.memory_space<vmem>>, vector<1x1x128xf32>,
    %c82_957 = arith.constant 82 : index
    %c0_958 = arith.constant 0 : index
    %865 = vector.load %arg10[%c82_957, %c0_958] : memref<144x128xf32, #tpu.memory_space<vmem>>, vector<1x128xf32>
    %c8_959 = arith.constant 8 : index
    %c14_960 = arith.constant 14 : index
    %c0_961 = arith.constant 0 : index
    %866 = vector.load %arg12[%c8_959, %c14_960, %c0_961] : memref<9x25x128xf32, #tpu.memory_space<vmem>>, vector<1x1x128xf32>
    %867 = vector.shape_cast %866 : vector<1x1x128xf32> to vector<1x128xf32>
    %868 = vector.shape_cast %865 : vector<1x128xf32> to vector<1x1x128xf32>
    tpu.vector_store %arg12[%c8_959, %c14_960, %c0_961], %868 {strides = array<i32>} : memref<9x25x128xf32, #tpu.memory_space<vmem>>, vector<1x1x128xf32>,
    %c98_962 = arith.constant 98 : index
    %c0_963 = arith.constant 0 : index
    %869 = vector.load %arg10[%c98_962, %c0_963] : memref<144x128xf32, #tpu.memory_space<vmem>>, vector<1x128xf32>
    %c8_964 = arith.constant 8 : index
    %c15_965 = arith.constant 15 : index
    %c0_966 = arith.constant 0 : index
    %870 = vector.load %arg12[%c8_964, %c15_965, %c0_966] : memref<9x25x128xf32, #tpu.memory_space<vmem>>, vector<1x1x128xf32>
    %871 = vector.shape_cast %870 : vector<1x1x128xf32> to vector<1x128xf32>
    %872 = vector.shape_cast %869 : vector<1x128xf32> to vector<1x1x128xf32>
    tpu.vector_store %arg12[%c8_964, %c15_965, %c0_966], %872 {strides = array<i32>} : memref<9x25x128xf32, #tpu.memory_space<vmem>>, vector<1x1x128xf32>,
    %c100_967 = arith.constant 100 : index
    %c0_968 = arith.constant 0 : index
    %873 = vector.load %arg10[%c100_967, %c0_968] : memref<144x128xf32, #tpu.memory_space<vmem>>, vector<1x128xf32>
    %c8_969 = arith.constant 8 : index
    %c16_970 = arith.constant 16 : index
    %c0_971 = arith.constant 0 : index
    %874 = vector.load %arg12[%c8_969, %c16_970, %c0_971] : memref<9x25x128xf32, #tpu.memory_space<vmem>>, vector<1x1x128xf32>
    %875 = vector.shape_cast %874 : vector<1x1x128xf32> to vector<1x128xf32>
    %876 = vector.shape_cast %873 : vector<1x128xf32> to vector<1x1x128xf32>
    tpu.vector_store %arg12[%c8_969, %c16_970, %c0_971], %876 {strides = array<i32>} : memref<9x25x128xf32, #tpu.memory_space<vmem>>, vector<1x1x128xf32>,
    %c102_972 = arith.constant 102 : index
    %c0_973 = arith.constant 0 : index
    %877 = vector.load %arg10[%c102_972, %c0_973] : memref<144x128xf32, #tpu.memory_space<vmem>>, vector<1x128xf32>
    %c8_974 = arith.constant 8 : index
    %c17_975 = arith.constant 17 : index
    %c0_976 = arith.constant 0 : index
    %878 = vector.load %arg12[%c8_974, %c17_975, %c0_976] : memref<9x25x128xf32, #tpu.memory_space<vmem>>, vector<1x1x128xf32>
    %879 = vector.shape_cast %878 : vector<1x1x128xf32> to vector<1x128xf32>
    %880 = vector.shape_cast %877 : vector<1x128xf32> to vector<1x1x128xf32>
    tpu.vector_store %arg12[%c8_974, %c17_975, %c0_976], %880 {strides = array<i32>} : memref<9x25x128xf32, #tpu.memory_space<vmem>>, vector<1x1x128xf32>,
    %c104_977 = arith.constant 104 : index
    %c0_978 = arith.constant 0 : index
    %881 = vector.load %arg10[%c104_977, %c0_978] : memref<144x128xf32, #tpu.memory_space<vmem>>, vector<1x128xf32>
    %c8_979 = arith.constant 8 : index
    %c18_980 = arith.constant 18 : index
    %c0_981 = arith.constant 0 : index
    %882 = vector.load %arg12[%c8_979, %c18_980, %c0_981] : memref<9x25x128xf32, #tpu.memory_space<vmem>>, vector<1x1x128xf32>
    %883 = vector.shape_cast %882 : vector<1x1x128xf32> to vector<1x128xf32>
    %884 = vector.shape_cast %881 : vector<1x128xf32> to vector<1x1x128xf32>
    tpu.vector_store %arg12[%c8_979, %c18_980, %c0_981], %884 {strides = array<i32>} : memref<9x25x128xf32, #tpu.memory_space<vmem>>, vector<1x1x128xf32>,
    %c106_982 = arith.constant 106 : index
    %c0_983 = arith.constant 0 : index
    %885 = vector.load %arg10[%c106_982, %c0_983] : memref<144x128xf32, #tpu.memory_space<vmem>>, vector<1x128xf32>
    %c8_984 = arith.constant 8 : index
    %c19_985 = arith.constant 19 : index
    %c0_986 = arith.constant 0 : index
    %886 = vector.load %arg12[%c8_984, %c19_985, %c0_986] : memref<9x25x128xf32, #tpu.memory_space<vmem>>, vector<1x1x128xf32>
    %887 = vector.shape_cast %886 : vector<1x1x128xf32> to vector<1x128xf32>
    %888 = vector.shape_cast %885 : vector<1x128xf32> to vector<1x1x128xf32>
    tpu.vector_store %arg12[%c8_984, %c19_985, %c0_986], %888 {strides = array<i32>} : memref<9x25x128xf32, #tpu.memory_space<vmem>>, vector<1x1x128xf32>,
    %c122_987 = arith.constant 122 : index
    %c0_988 = arith.constant 0 : index
    %889 = vector.load %arg10[%c122_987, %c0_988] : memref<144x128xf32, #tpu.memory_space<vmem>>, vector<1x128xf32>
    %c8_989 = arith.constant 8 : index
    %c20_990 = arith.constant 20 : index
    %c0_991 = arith.constant 0 : index
    %890 = vector.load %arg12[%c8_989, %c20_990, %c0_991] : memref<9x25x128xf32, #tpu.memory_space<vmem>>, vector<1x1x128xf32>
    %891 = vector.shape_cast %890 : vector<1x1x128xf32> to vector<1x128xf32>
    %892 = vector.shape_cast %889 : vector<1x128xf32> to vector<1x1x128xf32>
    tpu.vector_store %arg12[%c8_989, %c20_990, %c0_991], %892 {strides = array<i32>} : memref<9x25x128xf32, #tpu.memory_space<vmem>>, vector<1x1x128xf32>,
    %c124_992 = arith.constant 124 : index
    %c0_993 = arith.constant 0 : index
    %893 = vector.load %arg10[%c124_992, %c0_993] : memref<144x128xf32, #tpu.memory_space<vmem>>, vector<1x128xf32>
    %c8_994 = arith.constant 8 : index
    %c21_995 = arith.constant 21 : index
    %c0_996 = arith.constant 0 : index
    %894 = vector.load %arg12[%c8_994, %c21_995, %c0_996] : memref<9x25x128xf32, #tpu.memory_space<vmem>>, vector<1x1x128xf32>
    %895 = vector.shape_cast %894 : vector<1x1x128xf32> to vector<1x128xf32>
    %896 = vector.shape_cast %893 : vector<1x128xf32> to vector<1x1x128xf32>
    tpu.vector_store %arg12[%c8_994, %c21_995, %c0_996], %896 {strides = array<i32>} : memref<9x25x128xf32, #tpu.memory_space<vmem>>, vector<1x1x128xf32>,
    %c126_997 = arith.constant 126 : index
    %c0_998 = arith.constant 0 : index
    %897 = vector.load %arg10[%c126_997, %c0_998] : memref<144x128xf32, #tpu.memory_space<vmem>>, vector<1x128xf32>
    %c8_999 = arith.constant 8 : index
    %c22_1000 = arith.constant 22 : index
    %c0_1001 = arith.constant 0 : index
    %898 = vector.load %arg12[%c8_999, %c22_1000, %c0_1001] : memref<9x25x128xf32, #tpu.memory_space<vmem>>, vector<1x1x128xf32>
    %899 = vector.shape_cast %898 : vector<1x1x128xf32> to vector<1x128xf32>
    %900 = vector.shape_cast %897 : vector<1x128xf32> to vector<1x1x128xf32>
    tpu.vector_store %arg12[%c8_999, %c22_1000, %c0_1001], %900 {strides = array<i32>} : memref<9x25x128xf32, #tpu.memory_space<vmem>>, vector<1x1x128xf32>,
    %c128_1002 = arith.constant 128 : index
    %c0_1003 = arith.constant 0 : index
    %901 = vector.load %arg10[%c128_1002, %c0_1003] : memref<144x128xf32, #tpu.memory_space<vmem>>, vector<1x128xf32>
    %c8_1004 = arith.constant 8 : index
    %c23_1005 = arith.constant 23 : index
    %c0_1006 = arith.constant 0 : index
    %902 = vector.load %arg12[%c8_1004, %c23_1005, %c0_1006] : memref<9x25x128xf32, #tpu.memory_space<vmem>>, vector<1x1x128xf32>
    %903 = vector.shape_cast %902 : vector<1x1x128xf32> to vector<1x128xf32>
    %904 = vector.shape_cast %901 : vector<1x128xf32> to vector<1x1x128xf32>
    tpu.vector_store %arg12[%c8_1004, %c23_1005, %c0_1006], %904 {strides = array<i32>} : memref<9x25x128xf32, #tpu.memory_space<vmem>>, vector<1x1x128xf32>,
    %c130 = arith.constant 130 : index
    %c0_1007 = arith.constant 0 : index
    %905 = vector.load %arg10[%c130, %c0_1007] : memref<144x128xf32, #tpu.memory_space<vmem>>, vector<1x128xf32>
    %c8_1008 = arith.constant 8 : index
    %c24_1009 = arith.constant 24 : index
    %c0_1010 = arith.constant 0 : index
    %906 = vector.load %arg12[%c8_1008, %c24_1009, %c0_1010] : memref<9x25x128xf32, #tpu.memory_space<vmem>>, vector<1x1x128xf32>
    %907 = vector.shape_cast %906 : vector<1x1x128xf32> to vector<1x128xf32>
    %908 = vector.shape_cast %905 : vector<1x128xf32> to vector<1x1x128xf32>
    tpu.vector_store %arg12[%c8_1008, %c24_1009, %c0_1010], %908 {strides = array<i32>} : memref<9x25x128xf32, #tpu.memory_space<vmem>>, vector<1x1x128xf32>,
    %cst_1011 = arith.constant 0.000000e+00 : f32
    %909 = vector.broadcast %cst_1011 : f32 to vector<25x128xf32>
    %c0_1012 = arith.constant 0 : index
    %c0_1013 = arith.constant 0 : index
    %c0_1014 = arith.constant 0 : index
    %910 = vector.load %arg12[%c0_1012, %c0_1013, %c0_1014] : memref<9x25x128xf32, #tpu.memory_space<vmem>>, vector<1x25x128xf32>
    %911 = vector.shape_cast %910 : vector<1x25x128xf32> to vector<25x128xf32>
    %912 = vector.extract_strided_slice %911 {offsets = [0, 0], sizes = [25, 16], strides = [1, 1]} : vector<25x128xf32> to vector<25x16xf32>
    %c0_1015 = arith.constant 0 : index
    %c0_1016 = arith.constant 0 : index
    %c0_1017 = arith.constant 0 : index
    %913 = vector.load %arg3[%c0_1015, %c0_1016, %c0_1017] : memref<9x16x128xf32, #tpu.memory_space<vmem>>, vector<1x16x128xf32>
    %914 = vector.shape_cast %913 : vector<1x16x128xf32> to vector<16x128xf32>
    %cst_1018 = arith.constant dense<0.000000e+00> : vector<25x128xf32>
    %915 = tpu.matmul %912, %914, %cst_1018 {dimension_numbers = #tpu.dot_dimension_numbers<[1], [0], [0], [1], [0, 0, 1, 1], [], []>} : vector<25x16xf32>, vector<16x128xf32>, vector<25x128xf32> -> vector<25x128xf32>
    %916 = arith.addf %909, %915 : vector<25x128xf32>
    %c1_1019 = arith.constant 1 : index
    %c0_1020 = arith.constant 0 : index
    %c0_1021 = arith.constant 0 : index
    %917 = vector.load %arg12[%c1_1019, %c0_1020, %c0_1021] : memref<9x25x128xf32, #tpu.memory_space<vmem>>, vector<1x25x128xf32>
    %918 = vector.shape_cast %917 : vector<1x25x128xf32> to vector<25x128xf32>
    %919 = vector.extract_strided_slice %918 {offsets = [0, 0], sizes = [25, 16], strides = [1, 1]} : vector<25x128xf32> to vector<25x16xf32>
    %c1_1022 = arith.constant 1 : index
    %c0_1023 = arith.constant 0 : index
    %c0_1024 = arith.constant 0 : index
    %920 = vector.load %arg3[%c1_1022, %c0_1023, %c0_1024] : memref<9x16x128xf32, #tpu.memory_space<vmem>>, vector<1x16x128xf32>
    %921 = vector.shape_cast %920 : vector<1x16x128xf32> to vector<16x128xf32>
    %cst_1025 = arith.constant dense<0.000000e+00> : vector<25x128xf32>
    %922 = tpu.matmul %919, %921, %cst_1025 {dimension_numbers = #tpu.dot_dimension_numbers<[1], [0], [0], [1], [0, 0, 1, 1], [], []>} : vector<25x16xf32>, vector<16x128xf32>, vector<25x128xf32> -> vector<25x128xf32>
    %923 = arith.addf %916, %922 : vector<25x128xf32>
    %c2_1026 = arith.constant 2 : index
    %c0_1027 = arith.constant 0 : index
    %c0_1028 = arith.constant 0 : index
    %924 = vector.load %arg12[%c2_1026, %c0_1027, %c0_1028] : memref<9x25x128xf32, #tpu.memory_space<vmem>>, vector<1x25x128xf32>
    %925 = vector.shape_cast %924 : vector<1x25x128xf32> to vector<25x128xf32>
    %926 = vector.extract_strided_slice %925 {offsets = [0, 0], sizes = [25, 16], strides = [1, 1]} : vector<25x128xf32> to vector<25x16xf32>
    %c2_1029 = arith.constant 2 : index
    %c0_1030 = arith.constant 0 : index
    %c0_1031 = arith.constant 0 : index
    %927 = vector.load %arg3[%c2_1029, %c0_1030, %c0_1031] : memref<9x16x128xf32, #tpu.memory_space<vmem>>, vector<1x16x128xf32>
    %928 = vector.shape_cast %927 : vector<1x16x128xf32> to vector<16x128xf32>
    %cst_1032 = arith.constant dense<0.000000e+00> : vector<25x128xf32>
    %929 = tpu.matmul %926, %928, %cst_1032 {dimension_numbers = #tpu.dot_dimension_numbers<[1], [0], [0], [1], [0, 0, 1, 1], [], []>} : vector<25x16xf32>, vector<16x128xf32>, vector<25x128xf32> -> vector<25x128xf32>
    %930 = arith.addf %923, %929 : vector<25x128xf32>
    %c3_1033 = arith.constant 3 : index
    %c0_1034 = arith.constant 0 : index
    %c0_1035 = arith.constant 0 : index
    %931 = vector.load %arg12[%c3_1033, %c0_1034, %c0_1035] : memref<9x25x128xf32, #tpu.memory_space<vmem>>, vector<1x25x128xf32>
    %932 = vector.shape_cast %931 : vector<1x25x128xf32> to vector<25x128xf32>
    %933 = vector.extract_strided_slice %932 {offsets = [0, 0], sizes = [25, 16], strides = [1, 1]} : vector<25x128xf32> to vector<25x16xf32>
    %c3_1036 = arith.constant 3 : index
    %c0_1037 = arith.constant 0 : index
    %c0_1038 = arith.constant 0 : index
    %934 = vector.load %arg3[%c3_1036, %c0_1037, %c0_1038] : memref<9x16x128xf32, #tpu.memory_space<vmem>>, vector<1x16x128xf32>
    %935 = vector.shape_cast %934 : vector<1x16x128xf32> to vector<16x128xf32>
    %cst_1039 = arith.constant dense<0.000000e+00> : vector<25x128xf32>
    %936 = tpu.matmul %933, %935, %cst_1039 {dimension_numbers = #tpu.dot_dimension_numbers<[1], [0], [0], [1], [0, 0, 1, 1], [], []>} : vector<25x16xf32>, vector<16x128xf32>, vector<25x128xf32> -> vector<25x128xf32>
    %937 = arith.addf %930, %936 : vector<25x128xf32>
    %c4_1040 = arith.constant 4 : index
    %c0_1041 = arith.constant 0 : index
    %c0_1042 = arith.constant 0 : index
    %938 = vector.load %arg12[%c4_1040, %c0_1041, %c0_1042] : memref<9x25x128xf32, #tpu.memory_space<vmem>>, vector<1x25x128xf32>
    %939 = vector.shape_cast %938 : vector<1x25x128xf32> to vector<25x128xf32>
    %940 = vector.extract_strided_slice %939 {offsets = [0, 0], sizes = [25, 16], strides = [1, 1]} : vector<25x128xf32> to vector<25x16xf32>
    %c4_1043 = arith.constant 4 : index
    %c0_1044 = arith.constant 0 : index
    %c0_1045 = arith.constant 0 : index
    %941 = vector.load %arg3[%c4_1043, %c0_1044, %c0_1045] : memref<9x16x128xf32, #tpu.memory_space<vmem>>, vector<1x16x128xf32>
    %942 = vector.shape_cast %941 : vector<1x16x128xf32> to vector<16x128xf32>
    %cst_1046 = arith.constant dense<0.000000e+00> : vector<25x128xf32>
    %943 = tpu.matmul %940, %942, %cst_1046 {dimension_numbers = #tpu.dot_dimension_numbers<[1], [0], [0], [1], [0, 0, 1, 1], [], []>} : vector<25x16xf32>, vector<16x128xf32>, vector<25x128xf32> -> vector<25x128xf32>
    %944 = arith.addf %937, %943 : vector<25x128xf32>
    %c5_1047 = arith.constant 5 : index
    %c0_1048 = arith.constant 0 : index
    %c0_1049 = arith.constant 0 : index
    %945 = vector.load %arg12[%c5_1047, %c0_1048, %c0_1049] : memref<9x25x128xf32, #tpu.memory_space<vmem>>, vector<1x25x128xf32>
    %946 = vector.shape_cast %945 : vector<1x25x128xf32> to vector<25x128xf32>
    %947 = vector.extract_strided_slice %946 {offsets = [0, 0], sizes = [25, 16], strides = [1, 1]} : vector<25x128xf32> to vector<25x16xf32>
    %c5_1050 = arith.constant 5 : index
    %c0_1051 = arith.constant 0 : index
    %c0_1052 = arith.constant 0 : index
    %948 = vector.load %arg3[%c5_1050, %c0_1051, %c0_1052] : memref<9x16x128xf32, #tpu.memory_space<vmem>>, vector<1x16x128xf32>
    %949 = vector.shape_cast %948 : vector<1x16x128xf32> to vector<16x128xf32>
    %cst_1053 = arith.constant dense<0.000000e+00> : vector<25x128xf32>
    %950 = tpu.matmul %947, %949, %cst_1053 {dimension_numbers = #tpu.dot_dimension_numbers<[1], [0], [0], [1], [0, 0, 1, 1], [], []>} : vector<25x16xf32>, vector<16x128xf32>, vector<25x128xf32> -> vector<25x128xf32>
    %951 = arith.addf %944, %950 : vector<25x128xf32>
    %c6_1054 = arith.constant 6 : index
    %c0_1055 = arith.constant 0 : index
    %c0_1056 = arith.constant 0 : index
    %952 = vector.load %arg12[%c6_1054, %c0_1055, %c0_1056] : memref<9x25x128xf32, #tpu.memory_space<vmem>>, vector<1x25x128xf32>
    %953 = vector.shape_cast %952 : vector<1x25x128xf32> to vector<25x128xf32>
    %954 = vector.extract_strided_slice %953 {offsets = [0, 0], sizes = [25, 16], strides = [1, 1]} : vector<25x128xf32> to vector<25x16xf32>
    %c6_1057 = arith.constant 6 : index
    %c0_1058 = arith.constant 0 : index
    %c0_1059 = arith.constant 0 : index
    %955 = vector.load %arg3[%c6_1057, %c0_1058, %c0_1059] : memref<9x16x128xf32, #tpu.memory_space<vmem>>, vector<1x16x128xf32>
    %956 = vector.shape_cast %955 : vector<1x16x128xf32> to vector<16x128xf32>
    %cst_1060 = arith.constant dense<0.000000e+00> : vector<25x128xf32>
    %957 = tpu.matmul %954, %956, %cst_1060 {dimension_numbers = #tpu.dot_dimension_numbers<[1], [0], [0], [1], [0, 0, 1, 1], [], []>} : vector<25x16xf32>, vector<16x128xf32>, vector<25x128xf32> -> vector<25x128xf32>
    %958 = arith.addf %951, %957 : vector<25x128xf32>
    %c7_1061 = arith.constant 7 : index
    %c0_1062 = arith.constant 0 : index
    %c0_1063 = arith.constant 0 : index
    %959 = vector.load %arg12[%c7_1061, %c0_1062, %c0_1063] : memref<9x25x128xf32, #tpu.memory_space<vmem>>, vector<1x25x128xf32>
    %960 = vector.shape_cast %959 : vector<1x25x128xf32> to vector<25x128xf32>
    %961 = vector.extract_strided_slice %960 {offsets = [0, 0], sizes = [25, 16], strides = [1, 1]} : vector<25x128xf32> to vector<25x16xf32>
    %c7_1064 = arith.constant 7 : index
    %c0_1065 = arith.constant 0 : index
    %c0_1066 = arith.constant 0 : index
    %962 = vector.load %arg3[%c7_1064, %c0_1065, %c0_1066] : memref<9x16x128xf32, #tpu.memory_space<vmem>>, vector<1x16x128xf32>
    %963 = vector.shape_cast %962 : vector<1x16x128xf32> to vector<16x128xf32>
    %cst_1067 = arith.constant dense<0.000000e+00> : vector<25x128xf32>
    %964 = tpu.matmul %961, %963, %cst_1067 {dimension_numbers = #tpu.dot_dimension_numbers<[1], [0], [0], [1], [0, 0, 1, 1], [], []>} : vector<25x16xf32>, vector<16x128xf32>, vector<25x128xf32> -> vector<25x128xf32>
    %965 = arith.addf %958, %964 : vector<25x128xf32>
    %c8_1068 = arith.constant 8 : index
    %c0_1069 = arith.constant 0 : index
    %c0_1070 = arith.constant 0 : index
    %966 = vector.load %arg12[%c8_1068, %c0_1069, %c0_1070] : memref<9x25x128xf32, #tpu.memory_space<vmem>>, vector<1x25x128xf32>
    %967 = vector.shape_cast %966 : vector<1x25x128xf32> to vector<25x128xf32>
    %968 = vector.extract_strided_slice %967 {offsets = [0, 0], sizes = [25, 16], strides = [1, 1]} : vector<25x128xf32> to vector<25x16xf32>
    %c8_1071 = arith.constant 8 : index
    %c0_1072 = arith.constant 0 : index
    %c0_1073 = arith.constant 0 : index
    %969 = vector.load %arg3[%c8_1071, %c0_1072, %c0_1073] : memref<9x16x128xf32, #tpu.memory_space<vmem>>, vector<1x16x128xf32>
    %970 = vector.shape_cast %969 : vector<1x16x128xf32> to vector<16x128xf32>
    %cst_1074 = arith.constant dense<0.000000e+00> : vector<25x128xf32>
    %971 = tpu.matmul %968, %970, %cst_1074 {dimension_numbers = #tpu.dot_dimension_numbers<[1], [0], [0], [1], [0, 0, 1, 1], [], []>} : vector<25x16xf32>, vector<16x128xf32>, vector<25x128xf32> -> vector<25x128xf32>
    %972 = arith.addf %965, %971 : vector<25x128xf32>
    %c0_1075 = arith.constant 0 : index
    %c0_1076 = arith.constant 0 : index
    %973 = vector.load %arg4[%c0_1075, %c0_1076] : memref<1x128xf32, #tpu.memory_space<vmem>>, vector<1x128xf32>
    %974 = vector.broadcast %973 : vector<1x128xf32> to vector<25x128xf32>
    %975 = arith.addf %972, %974 : vector<25x128xf32>
    %cst_1077 = arith.constant 0.000000e+00 : f32
    %976 = vector.broadcast %cst_1077 : f32 to vector<25x128xf32>
    %977 = arith.maximumf %975, %976 : vector<25x128xf32>
    %c0_1078 = arith.constant 0 : index
    %c0_1079 = arith.constant 0 : index
    %978 = vector.load %arg11[%c0_1078, %c0_1079] : memref<25x128xf32, #tpu.memory_space<vmem>>, vector<25x128xf32>
    tpu.vector_store %arg11[%c0_1078, %c0_1079], %977 {strides = array<i32>} : memref<25x128xf32, #tpu.memory_space<vmem>>, vector<25x128xf32>,
    %c0_1080 = arith.constant 0 : index
    %c0_1081 = arith.constant 0 : index
    %979 = vector.load %arg11[%c0_1080, %c0_1081] : memref<25x128xf32, #tpu.memory_space<vmem>>, vector<1x128xf32>
    %c0_1082 = arith.constant 0 : index
    %c0_1083 = arith.constant 0 : index
    %c0_1084 = arith.constant 0 : index
    %980 = vector.load %arg13[%c0_1082, %c0_1083, %c0_1084] : memref<9x4x128xf32, #tpu.memory_space<vmem>>, vector<1x1x128xf32>
    %981 = vector.shape_cast %980 : vector<1x1x128xf32> to vector<1x128xf32>
    %982 = vector.shape_cast %979 : vector<1x128xf32> to vector<1x1x128xf32>
    tpu.vector_store %arg13[%c0_1082, %c0_1083, %c0_1084], %982 {strides = array<i32>} : memref<9x4x128xf32, #tpu.memory_space<vmem>>, vector<1x1x128xf32>,
    %c2_1085 = arith.constant 2 : index
    %c0_1086 = arith.constant 0 : index
    %983 = vector.load %arg11[%c2_1085, %c0_1086] : memref<25x128xf32, #tpu.memory_space<vmem>>, vector<1x128xf32>
    %c0_1087 = arith.constant 0 : index
    %c1_1088 = arith.constant 1 : index
    %c0_1089 = arith.constant 0 : index
    %984 = vector.load %arg13[%c0_1087, %c1_1088, %c0_1089] : memref<9x4x128xf32, #tpu.memory_space<vmem>>, vector<1x1x128xf32>
    %985 = vector.shape_cast %984 : vector<1x1x128xf32> to vector<1x128xf32>
    %986 = vector.shape_cast %983 : vector<1x128xf32> to vector<1x1x128xf32>
    tpu.vector_store %arg13[%c0_1087, %c1_1088, %c0_1089], %986 {strides = array<i32>} : memref<9x4x128xf32, #tpu.memory_space<vmem>>, vector<1x1x128xf32>,
    %c10_1090 = arith.constant 10 : index
    %c0_1091 = arith.constant 0 : index
    %987 = vector.load %arg11[%c10_1090, %c0_1091] : memref<25x128xf32, #tpu.memory_space<vmem>>, vector<1x128xf32>
    %c0_1092 = arith.constant 0 : index
    %c2_1093 = arith.constant 2 : index
    %c0_1094 = arith.constant 0 : index
    %988 = vector.load %arg13[%c0_1092, %c2_1093, %c0_1094] : memref<9x4x128xf32, #tpu.memory_space<vmem>>, vector<1x1x128xf32>
    %989 = vector.shape_cast %988 : vector<1x1x128xf32> to vector<1x128xf32>
    %990 = vector.shape_cast %987 : vector<1x128xf32> to vector<1x1x128xf32>
    tpu.vector_store %arg13[%c0_1092, %c2_1093, %c0_1094], %990 {strides = array<i32>} : memref<9x4x128xf32, #tpu.memory_space<vmem>>, vector<1x1x128xf32>,
    %c12_1095 = arith.constant 12 : index
    %c0_1096 = arith.constant 0 : index
    %991 = vector.load %arg11[%c12_1095, %c0_1096] : memref<25x128xf32, #tpu.memory_space<vmem>>, vector<1x128xf32>
    %c0_1097 = arith.constant 0 : index
    %c3_1098 = arith.constant 3 : index
    %c0_1099 = arith.constant 0 : index
    %992 = vector.load %arg13[%c0_1097, %c3_1098, %c0_1099] : memref<9x4x128xf32, #tpu.memory_space<vmem>>, vector<1x1x128xf32>
    %993 = vector.shape_cast %992 : vector<1x1x128xf32> to vector<1x128xf32>
    %994 = vector.shape_cast %991 : vector<1x128xf32> to vector<1x1x128xf32>
    tpu.vector_store %arg13[%c0_1097, %c3_1098, %c0_1099], %994 {strides = array<i32>} : memref<9x4x128xf32, #tpu.memory_space<vmem>>, vector<1x1x128xf32>,
    %c1_1100 = arith.constant 1 : index
    %c0_1101 = arith.constant 0 : index
    %995 = vector.load %arg11[%c1_1100, %c0_1101] : memref<25x128xf32, #tpu.memory_space<vmem>>, vector<1x128xf32>
    %c1_1102 = arith.constant 1 : index
    %c0_1103 = arith.constant 0 : index
    %c0_1104 = arith.constant 0 : index
    %996 = vector.load %arg13[%c1_1102, %c0_1103, %c0_1104] : memref<9x4x128xf32, #tpu.memory_space<vmem>>, vector<1x1x128xf32>
    %997 = vector.shape_cast %996 : vector<1x1x128xf32> to vector<1x128xf32>
    %998 = vector.shape_cast %995 : vector<1x128xf32> to vector<1x1x128xf32>
    tpu.vector_store %arg13[%c1_1102, %c0_1103, %c0_1104], %998 {strides = array<i32>} : memref<9x4x128xf32, #tpu.memory_space<vmem>>, vector<1x1x128xf32>,
    %c3_1105 = arith.constant 3 : index
    %c0_1106 = arith.constant 0 : index
    %999 = vector.load %arg11[%c3_1105, %c0_1106] : memref<25x128xf32, #tpu.memory_space<vmem>>, vector<1x128xf32>
    %c1_1107 = arith.constant 1 : index
    %c1_1108 = arith.constant 1 : index
    %c0_1109 = arith.constant 0 : index
    %1000 = vector.load %arg13[%c1_1107, %c1_1108, %c0_1109] : memref<9x4x128xf32, #tpu.memory_space<vmem>>, vector<1x1x128xf32>
    %1001 = vector.shape_cast %1000 : vector<1x1x128xf32> to vector<1x128xf32>
    %1002 = vector.shape_cast %999 : vector<1x128xf32> to vector<1x1x128xf32>
    tpu.vector_store %arg13[%c1_1107, %c1_1108, %c0_1109], %1002 {strides = array<i32>} : memref<9x4x128xf32, #tpu.memory_space<vmem>>, vector<1x1x128xf32>,
    %c11_1110 = arith.constant 11 : index
    %c0_1111 = arith.constant 0 : index
    %1003 = vector.load %arg11[%c11_1110, %c0_1111] : memref<25x128xf32, #tpu.memory_space<vmem>>, vector<1x128xf32>
    %c1_1112 = arith.constant 1 : index
    %c2_1113 = arith.constant 2 : index
    %c0_1114 = arith.constant 0 : index
    %1004 = vector.load %arg13[%c1_1112, %c2_1113, %c0_1114] : memref<9x4x128xf32, #tpu.memory_space<vmem>>, vector<1x1x128xf32>
    %1005 = vector.shape_cast %1004 : vector<1x1x128xf32> to vector<1x128xf32>
    %1006 = vector.shape_cast %1003 : vector<1x128xf32> to vector<1x1x128xf32>
    tpu.vector_store %arg13[%c1_1112, %c2_1113, %c0_1114], %1006 {strides = array<i32>} : memref<9x4x128xf32, #tpu.memory_space<vmem>>, vector<1x1x128xf32>,
    %c13_1115 = arith.constant 13 : index
    %c0_1116 = arith.constant 0 : index
    %1007 = vector.load %arg11[%c13_1115, %c0_1116] : memref<25x128xf32, #tpu.memory_space<vmem>>, vector<1x128xf32>
    %c1_1117 = arith.constant 1 : index
    %c3_1118 = arith.constant 3 : index
    %c0_1119 = arith.constant 0 : index
    %1008 = vector.load %arg13[%c1_1117, %c3_1118, %c0_1119] : memref<9x4x128xf32, #tpu.memory_space<vmem>>, vector<1x1x128xf32>
    %1009 = vector.shape_cast %1008 : vector<1x1x128xf32> to vector<1x128xf32>
    %1010 = vector.shape_cast %1007 : vector<1x128xf32> to vector<1x1x128xf32>
    tpu.vector_store %arg13[%c1_1117, %c3_1118, %c0_1119], %1010 {strides = array<i32>} : memref<9x4x128xf32, #tpu.memory_space<vmem>>, vector<1x1x128xf32>,
    %c2_1120 = arith.constant 2 : index
    %c0_1121 = arith.constant 0 : index
    %1011 = vector.load %arg11[%c2_1120, %c0_1121] : memref<25x128xf32, #tpu.memory_space<vmem>>, vector<1x128xf32>
    %c2_1122 = arith.constant 2 : index
    %c0_1123 = arith.constant 0 : index
    %c0_1124 = arith.constant 0 : index
    %1012 = vector.load %arg13[%c2_1122, %c0_1123, %c0_1124] : memref<9x4x128xf32, #tpu.memory_space<vmem>>, vector<1x1x128xf32>
    %1013 = vector.shape_cast %1012 : vector<1x1x128xf32> to vector<1x128xf32>
    %1014 = vector.shape_cast %1011 : vector<1x128xf32> to vector<1x1x128xf32>
    tpu.vector_store %arg13[%c2_1122, %c0_1123, %c0_1124], %1014 {strides = array<i32>} : memref<9x4x128xf32, #tpu.memory_space<vmem>>, vector<1x1x128xf32>,
    %c4_1125 = arith.constant 4 : index
    %c0_1126 = arith.constant 0 : index
    %1015 = vector.load %arg11[%c4_1125, %c0_1126] : memref<25x128xf32, #tpu.memory_space<vmem>>, vector<1x128xf32>
    %c2_1127 = arith.constant 2 : index
    %c1_1128 = arith.constant 1 : index
    %c0_1129 = arith.constant 0 : index
    %1016 = vector.load %arg13[%c2_1127, %c1_1128, %c0_1129] : memref<9x4x128xf32, #tpu.memory_space<vmem>>, vector<1x1x128xf32>
    %1017 = vector.shape_cast %1016 : vector<1x1x128xf32> to vector<1x128xf32>
    %1018 = vector.shape_cast %1015 : vector<1x128xf32> to vector<1x1x128xf32>
    tpu.vector_store %arg13[%c2_1127, %c1_1128, %c0_1129], %1018 {strides = array<i32>} : memref<9x4x128xf32, #tpu.memory_space<vmem>>, vector<1x1x128xf32>,
    %c12_1130 = arith.constant 12 : index
    %c0_1131 = arith.constant 0 : index
    %1019 = vector.load %arg11[%c12_1130, %c0_1131] : memref<25x128xf32, #tpu.memory_space<vmem>>, vector<1x128xf32>
    %c2_1132 = arith.constant 2 : index
    %c2_1133 = arith.constant 2 : index
    %c0_1134 = arith.constant 0 : index
    %1020 = vector.load %arg13[%c2_1132, %c2_1133, %c0_1134] : memref<9x4x128xf32, #tpu.memory_space<vmem>>, vector<1x1x128xf32>
    %1021 = vector.shape_cast %1020 : vector<1x1x128xf32> to vector<1x128xf32>
    %1022 = vector.shape_cast %1019 : vector<1x128xf32> to vector<1x1x128xf32>
    tpu.vector_store %arg13[%c2_1132, %c2_1133, %c0_1134], %1022 {strides = array<i32>} : memref<9x4x128xf32, #tpu.memory_space<vmem>>, vector<1x1x128xf32>,
    %c14_1135 = arith.constant 14 : index
    %c0_1136 = arith.constant 0 : index
    %1023 = vector.load %arg11[%c14_1135, %c0_1136] : memref<25x128xf32, #tpu.memory_space<vmem>>, vector<1x128xf32>
    %c2_1137 = arith.constant 2 : index
    %c3_1138 = arith.constant 3 : index
    %c0_1139 = arith.constant 0 : index
    %1024 = vector.load %arg13[%c2_1137, %c3_1138, %c0_1139] : memref<9x4x128xf32, #tpu.memory_space<vmem>>, vector<1x1x128xf32>
    %1025 = vector.shape_cast %1024 : vector<1x1x128xf32> to vector<1x128xf32>
    %1026 = vector.shape_cast %1023 : vector<1x128xf32> to vector<1x1x128xf32>
    tpu.vector_store %arg13[%c2_1137, %c3_1138, %c0_1139], %1026 {strides = array<i32>} : memref<9x4x128xf32, #tpu.memory_space<vmem>>, vector<1x1x128xf32>,
    %c5_1140 = arith.constant 5 : index
    %c0_1141 = arith.constant 0 : index
    %1027 = vector.load %arg11[%c5_1140, %c0_1141] : memref<25x128xf32, #tpu.memory_space<vmem>>, vector<1x128xf32>
    %c3_1142 = arith.constant 3 : index
    %c0_1143 = arith.constant 0 : index
    %c0_1144 = arith.constant 0 : index
    %1028 = vector.load %arg13[%c3_1142, %c0_1143, %c0_1144] : memref<9x4x128xf32, #tpu.memory_space<vmem>>, vector<1x1x128xf32>
    %1029 = vector.shape_cast %1028 : vector<1x1x128xf32> to vector<1x128xf32>
    %1030 = vector.shape_cast %1027 : vector<1x128xf32> to vector<1x1x128xf32>
    tpu.vector_store %arg13[%c3_1142, %c0_1143, %c0_1144], %1030 {strides = array<i32>} : memref<9x4x128xf32, #tpu.memory_space<vmem>>, vector<1x1x128xf32>,
    %c7_1145 = arith.constant 7 : index
    %c0_1146 = arith.constant 0 : index
    %1031 = vector.load %arg11[%c7_1145, %c0_1146] : memref<25x128xf32, #tpu.memory_space<vmem>>, vector<1x128xf32>
    %c3_1147 = arith.constant 3 : index
    %c1_1148 = arith.constant 1 : index
    %c0_1149 = arith.constant 0 : index
    %1032 = vector.load %arg13[%c3_1147, %c1_1148, %c0_1149] : memref<9x4x128xf32, #tpu.memory_space<vmem>>, vector<1x1x128xf32>
    %1033 = vector.shape_cast %1032 : vector<1x1x128xf32> to vector<1x128xf32>
    %1034 = vector.shape_cast %1031 : vector<1x128xf32> to vector<1x1x128xf32>
    tpu.vector_store %arg13[%c3_1147, %c1_1148, %c0_1149], %1034 {strides = array<i32>} : memref<9x4x128xf32, #tpu.memory_space<vmem>>, vector<1x1x128xf32>,
    %c15_1150 = arith.constant 15 : index
    %c0_1151 = arith.constant 0 : index
    %1035 = vector.load %arg11[%c15_1150, %c0_1151] : memref<25x128xf32, #tpu.memory_space<vmem>>, vector<1x128xf32>
    %c3_1152 = arith.constant 3 : index
    %c2_1153 = arith.constant 2 : index
    %c0_1154 = arith.constant 0 : index
    %1036 = vector.load %arg13[%c3_1152, %c2_1153, %c0_1154] : memref<9x4x128xf32, #tpu.memory_space<vmem>>, vector<1x1x128xf32>
    %1037 = vector.shape_cast %1036 : vector<1x1x128xf32> to vector<1x128xf32>
    %1038 = vector.shape_cast %1035 : vector<1x128xf32> to vector<1x1x128xf32>
    tpu.vector_store %arg13[%c3_1152, %c2_1153, %c0_1154], %1038 {strides = array<i32>} : memref<9x4x128xf32, #tpu.memory_space<vmem>>, vector<1x1x128xf32>,
    %c17_1155 = arith.constant 17 : index
    %c0_1156 = arith.constant 0 : index
    %1039 = vector.load %arg11[%c17_1155, %c0_1156] : memref<25x128xf32, #tpu.memory_space<vmem>>, vector<1x128xf32>
    %c3_1157 = arith.constant 3 : index
    %c3_1158 = arith.constant 3 : index
    %c0_1159 = arith.constant 0 : index
    %1040 = vector.load %arg13[%c3_1157, %c3_1158, %c0_1159] : memref<9x4x128xf32, #tpu.memory_space<vmem>>, vector<1x1x128xf32>
    %1041 = vector.shape_cast %1040 : vector<1x1x128xf32> to vector<1x128xf32>
    %1042 = vector.shape_cast %1039 : vector<1x128xf32> to vector<1x1x128xf32>
    tpu.vector_store %arg13[%c3_1157, %c3_1158, %c0_1159], %1042 {strides = array<i32>} : memref<9x4x128xf32, #tpu.memory_space<vmem>>, vector<1x1x128xf32>,
    %c6_1160 = arith.constant 6 : index
    %c0_1161 = arith.constant 0 : index
    %1043 = vector.load %arg11[%c6_1160, %c0_1161] : memref<25x128xf32, #tpu.memory_space<vmem>>, vector<1x128xf32>
    %c4_1162 = arith.constant 4 : index
    %c0_1163 = arith.constant 0 : index
    %c0_1164 = arith.constant 0 : index
    %1044 = vector.load %arg13[%c4_1162, %c0_1163, %c0_1164] : memref<9x4x128xf32, #tpu.memory_space<vmem>>, vector<1x1x128xf32>
    %1045 = vector.shape_cast %1044 : vector<1x1x128xf32> to vector<1x128xf32>
    %1046 = vector.shape_cast %1043 : vector<1x128xf32> to vector<1x1x128xf32>
    tpu.vector_store %arg13[%c4_1162, %c0_1163, %c0_1164], %1046 {strides = array<i32>} : memref<9x4x128xf32, #tpu.memory_space<vmem>>, vector<1x1x128xf32>,
    %c8_1165 = arith.constant 8 : index
    %c0_1166 = arith.constant 0 : index
    %1047 = vector.load %arg11[%c8_1165, %c0_1166] : memref<25x128xf32, #tpu.memory_space<vmem>>, vector<1x128xf32>
    %c4_1167 = arith.constant 4 : index
    %c1_1168 = arith.constant 1 : index
    %c0_1169 = arith.constant 0 : index
    %1048 = vector.load %arg13[%c4_1167, %c1_1168, %c0_1169] : memref<9x4x128xf32, #tpu.memory_space<vmem>>, vector<1x1x128xf32>
    %1049 = vector.shape_cast %1048 : vector<1x1x128xf32> to vector<1x128xf32>
    %1050 = vector.shape_cast %1047 : vector<1x128xf32> to vector<1x1x128xf32>
    tpu.vector_store %arg13[%c4_1167, %c1_1168, %c0_1169], %1050 {strides = array<i32>} : memref<9x4x128xf32, #tpu.memory_space<vmem>>, vector<1x1x128xf32>,
    %c16_1170 = arith.constant 16 : index
    %c0_1171 = arith.constant 0 : index
    %1051 = vector.load %arg11[%c16_1170, %c0_1171] : memref<25x128xf32, #tpu.memory_space<vmem>>, vector<1x128xf32>
    %c4_1172 = arith.constant 4 : index
    %c2_1173 = arith.constant 2 : index
    %c0_1174 = arith.constant 0 : index
    %1052 = vector.load %arg13[%c4_1172, %c2_1173, %c0_1174] : memref<9x4x128xf32, #tpu.memory_space<vmem>>, vector<1x1x128xf32>
    %1053 = vector.shape_cast %1052 : vector<1x1x128xf32> to vector<1x128xf32>
    %1054 = vector.shape_cast %1051 : vector<1x128xf32> to vector<1x1x128xf32>
    tpu.vector_store %arg13[%c4_1172, %c2_1173, %c0_1174], %1054 {strides = array<i32>} : memref<9x4x128xf32, #tpu.memory_space<vmem>>, vector<1x1x128xf32>,
    %c18_1175 = arith.constant 18 : index
    %c0_1176 = arith.constant 0 : index
    %1055 = vector.load %arg11[%c18_1175, %c0_1176] : memref<25x128xf32, #tpu.memory_space<vmem>>, vector<1x128xf32>
    %c4_1177 = arith.constant 4 : index
    %c3_1178 = arith.constant 3 : index
    %c0_1179 = arith.constant 0 : index
    %1056 = vector.load %arg13[%c4_1177, %c3_1178, %c0_1179] : memref<9x4x128xf32, #tpu.memory_space<vmem>>, vector<1x1x128xf32>
    %1057 = vector.shape_cast %1056 : vector<1x1x128xf32> to vector<1x128xf32>
    %1058 = vector.shape_cast %1055 : vector<1x128xf32> to vector<1x1x128xf32>
    tpu.vector_store %arg13[%c4_1177, %c3_1178, %c0_1179], %1058 {strides = array<i32>} : memref<9x4x128xf32, #tpu.memory_space<vmem>>, vector<1x1x128xf32>,
    %c7_1180 = arith.constant 7 : index
    %c0_1181 = arith.constant 0 : index
    %1059 = vector.load %arg11[%c7_1180, %c0_1181] : memref<25x128xf32, #tpu.memory_space<vmem>>, vector<1x128xf32>
    %c5_1182 = arith.constant 5 : index
    %c0_1183 = arith.constant 0 : index
    %c0_1184 = arith.constant 0 : index
    %1060 = vector.load %arg13[%c5_1182, %c0_1183, %c0_1184] : memref<9x4x128xf32, #tpu.memory_space<vmem>>, vector<1x1x128xf32>
    %1061 = vector.shape_cast %1060 : vector<1x1x128xf32> to vector<1x128xf32>
    %1062 = vector.shape_cast %1059 : vector<1x128xf32> to vector<1x1x128xf32>
    tpu.vector_store %arg13[%c5_1182, %c0_1183, %c0_1184], %1062 {strides = array<i32>} : memref<9x4x128xf32, #tpu.memory_space<vmem>>, vector<1x1x128xf32>,
    %c9_1185 = arith.constant 9 : index
    %c0_1186 = arith.constant 0 : index
    %1063 = vector.load %arg11[%c9_1185, %c0_1186] : memref<25x128xf32, #tpu.memory_space<vmem>>, vector<1x128xf32>
    %c5_1187 = arith.constant 5 : index
    %c1_1188 = arith.constant 1 : index
    %c0_1189 = arith.constant 0 : index
    %1064 = vector.load %arg13[%c5_1187, %c1_1188, %c0_1189] : memref<9x4x128xf32, #tpu.memory_space<vmem>>, vector<1x1x128xf32>
    %1065 = vector.shape_cast %1064 : vector<1x1x128xf32> to vector<1x128xf32>
    %1066 = vector.shape_cast %1063 : vector<1x128xf32> to vector<1x1x128xf32>
    tpu.vector_store %arg13[%c5_1187, %c1_1188, %c0_1189], %1066 {strides = array<i32>} : memref<9x4x128xf32, #tpu.memory_space<vmem>>, vector<1x1x128xf32>,
    %c17_1190 = arith.constant 17 : index
    %c0_1191 = arith.constant 0 : index
    %1067 = vector.load %arg11[%c17_1190, %c0_1191] : memref<25x128xf32, #tpu.memory_space<vmem>>, vector<1x128xf32>
    %c5_1192 = arith.constant 5 : index
    %c2_1193 = arith.constant 2 : index
    %c0_1194 = arith.constant 0 : index
    %1068 = vector.load %arg13[%c5_1192, %c2_1193, %c0_1194] : memref<9x4x128xf32, #tpu.memory_space<vmem>>, vector<1x1x128xf32>
    %1069 = vector.shape_cast %1068 : vector<1x1x128xf32> to vector<1x128xf32>
    %1070 = vector.shape_cast %1067 : vector<1x128xf32> to vector<1x1x128xf32>
    tpu.vector_store %arg13[%c5_1192, %c2_1193, %c0_1194], %1070 {strides = array<i32>} : memref<9x4x128xf32, #tpu.memory_space<vmem>>, vector<1x1x128xf32>,
    %c19_1195 = arith.constant 19 : index
    %c0_1196 = arith.constant 0 : index
    %1071 = vector.load %arg11[%c19_1195, %c0_1196] : memref<25x128xf32, #tpu.memory_space<vmem>>, vector<1x128xf32>
    %c5_1197 = arith.constant 5 : index
    %c3_1198 = arith.constant 3 : index
    %c0_1199 = arith.constant 0 : index
    %1072 = vector.load %arg13[%c5_1197, %c3_1198, %c0_1199] : memref<9x4x128xf32, #tpu.memory_space<vmem>>, vector<1x1x128xf32>
    %1073 = vector.shape_cast %1072 : vector<1x1x128xf32> to vector<1x128xf32>
    %1074 = vector.shape_cast %1071 : vector<1x128xf32> to vector<1x1x128xf32>
    tpu.vector_store %arg13[%c5_1197, %c3_1198, %c0_1199], %1074 {strides = array<i32>} : memref<9x4x128xf32, #tpu.memory_space<vmem>>, vector<1x1x128xf32>,
    %c10_1200 = arith.constant 10 : index
    %c0_1201 = arith.constant 0 : index
    %1075 = vector.load %arg11[%c10_1200, %c0_1201] : memref<25x128xf32, #tpu.memory_space<vmem>>, vector<1x128xf32>
    %c6_1202 = arith.constant 6 : index
    %c0_1203 = arith.constant 0 : index
    %c0_1204 = arith.constant 0 : index
    %1076 = vector.load %arg13[%c6_1202, %c0_1203, %c0_1204] : memref<9x4x128xf32, #tpu.memory_space<vmem>>, vector<1x1x128xf32>
    %1077 = vector.shape_cast %1076 : vector<1x1x128xf32> to vector<1x128xf32>
    %1078 = vector.shape_cast %1075 : vector<1x128xf32> to vector<1x1x128xf32>
    tpu.vector_store %arg13[%c6_1202, %c0_1203, %c0_1204], %1078 {strides = array<i32>} : memref<9x4x128xf32, #tpu.memory_space<vmem>>, vector<1x1x128xf32>,
    %c12_1205 = arith.constant 12 : index
    %c0_1206 = arith.constant 0 : index
    %1079 = vector.load %arg11[%c12_1205, %c0_1206] : memref<25x128xf32, #tpu.memory_space<vmem>>, vector<1x128xf32>
    %c6_1207 = arith.constant 6 : index
    %c1_1208 = arith.constant 1 : index
    %c0_1209 = arith.constant 0 : index
    %1080 = vector.load %arg13[%c6_1207, %c1_1208, %c0_1209] : memref<9x4x128xf32, #tpu.memory_space<vmem>>, vector<1x1x128xf32>
    %1081 = vector.shape_cast %1080 : vector<1x1x128xf32> to vector<1x128xf32>
    %1082 = vector.shape_cast %1079 : vector<1x128xf32> to vector<1x1x128xf32>
    tpu.vector_store %arg13[%c6_1207, %c1_1208, %c0_1209], %1082 {strides = array<i32>} : memref<9x4x128xf32, #tpu.memory_space<vmem>>, vector<1x1x128xf32>,
    %c20_1210 = arith.constant 20 : index
    %c0_1211 = arith.constant 0 : index
    %1083 = vector.load %arg11[%c20_1210, %c0_1211] : memref<25x128xf32, #tpu.memory_space<vmem>>, vector<1x128xf32>
    %c6_1212 = arith.constant 6 : index
    %c2_1213 = arith.constant 2 : index
    %c0_1214 = arith.constant 0 : index
    %1084 = vector.load %arg13[%c6_1212, %c2_1213, %c0_1214] : memref<9x4x128xf32, #tpu.memory_space<vmem>>, vector<1x1x128xf32>
    %1085 = vector.shape_cast %1084 : vector<1x1x128xf32> to vector<1x128xf32>
    %1086 = vector.shape_cast %1083 : vector<1x128xf32> to vector<1x1x128xf32>
    tpu.vector_store %arg13[%c6_1212, %c2_1213, %c0_1214], %1086 {strides = array<i32>} : memref<9x4x128xf32, #tpu.memory_space<vmem>>, vector<1x1x128xf32>,
    %c22_1215 = arith.constant 22 : index
    %c0_1216 = arith.constant 0 : index
    %1087 = vector.load %arg11[%c22_1215, %c0_1216] : memref<25x128xf32, #tpu.memory_space<vmem>>, vector<1x128xf32>
    %c6_1217 = arith.constant 6 : index
    %c3_1218 = arith.constant 3 : index
    %c0_1219 = arith.constant 0 : index
    %1088 = vector.load %arg13[%c6_1217, %c3_1218, %c0_1219] : memref<9x4x128xf32, #tpu.memory_space<vmem>>, vector<1x1x128xf32>
    %1089 = vector.shape_cast %1088 : vector<1x1x128xf32> to vector<1x128xf32>
    %1090 = vector.shape_cast %1087 : vector<1x128xf32> to vector<1x1x128xf32>
    tpu.vector_store %arg13[%c6_1217, %c3_1218, %c0_1219], %1090 {strides = array<i32>} : memref<9x4x128xf32, #tpu.memory_space<vmem>>, vector<1x1x128xf32>,
    %c11_1220 = arith.constant 11 : index
    %c0_1221 = arith.constant 0 : index
    %1091 = vector.load %arg11[%c11_1220, %c0_1221] : memref<25x128xf32, #tpu.memory_space<vmem>>, vector<1x128xf32>
    %c7_1222 = arith.constant 7 : index
    %c0_1223 = arith.constant 0 : index
    %c0_1224 = arith.constant 0 : index
    %1092 = vector.load %arg13[%c7_1222, %c0_1223, %c0_1224] : memref<9x4x128xf32, #tpu.memory_space<vmem>>, vector<1x1x128xf32>
    %1093 = vector.shape_cast %1092 : vector<1x1x128xf32> to vector<1x128xf32>
    %1094 = vector.shape_cast %1091 : vector<1x128xf32> to vector<1x1x128xf32>
    tpu.vector_store %arg13[%c7_1222, %c0_1223, %c0_1224], %1094 {strides = array<i32>} : memref<9x4x128xf32, #tpu.memory_space<vmem>>, vector<1x1x128xf32>,
    %c13_1225 = arith.constant 13 : index
    %c0_1226 = arith.constant 0 : index
    %1095 = vector.load %arg11[%c13_1225, %c0_1226] : memref<25x128xf32, #tpu.memory_space<vmem>>, vector<1x128xf32>
    %c7_1227 = arith.constant 7 : index
    %c1_1228 = arith.constant 1 : index
    %c0_1229 = arith.constant 0 : index
    %1096 = vector.load %arg13[%c7_1227, %c1_1228, %c0_1229] : memref<9x4x128xf32, #tpu.memory_space<vmem>>, vector<1x1x128xf32>
    %1097 = vector.shape_cast %1096 : vector<1x1x128xf32> to vector<1x128xf32>
    %1098 = vector.shape_cast %1095 : vector<1x128xf32> to vector<1x1x128xf32>
    tpu.vector_store %arg13[%c7_1227, %c1_1228, %c0_1229], %1098 {strides = array<i32>} : memref<9x4x128xf32, #tpu.memory_space<vmem>>, vector<1x1x128xf32>,
    %c21_1230 = arith.constant 21 : index
    %c0_1231 = arith.constant 0 : index
    %1099 = vector.load %arg11[%c21_1230, %c0_1231] : memref<25x128xf32, #tpu.memory_space<vmem>>, vector<1x128xf32>
    %c7_1232 = arith.constant 7 : index
    %c2_1233 = arith.constant 2 : index
    %c0_1234 = arith.constant 0 : index
    %1100 = vector.load %arg13[%c7_1232, %c2_1233, %c0_1234] : memref<9x4x128xf32, #tpu.memory_space<vmem>>, vector<1x1x128xf32>
    %1101 = vector.shape_cast %1100 : vector<1x1x128xf32> to vector<1x128xf32>
    %1102 = vector.shape_cast %1099 : vector<1x128xf32> to vector<1x1x128xf32>
    tpu.vector_store %arg13[%c7_1232, %c2_1233, %c0_1234], %1102 {strides = array<i32>} : memref<9x4x128xf32, #tpu.memory_space<vmem>>, vector<1x1x128xf32>,
    %c23_1235 = arith.constant 23 : index
    %c0_1236 = arith.constant 0 : index
    %1103 = vector.load %arg11[%c23_1235, %c0_1236] : memref<25x128xf32, #tpu.memory_space<vmem>>, vector<1x128xf32>
    %c7_1237 = arith.constant 7 : index
    %c3_1238 = arith.constant 3 : index
    %c0_1239 = arith.constant 0 : index
    %1104 = vector.load %arg13[%c7_1237, %c3_1238, %c0_1239] : memref<9x4x128xf32, #tpu.memory_space<vmem>>, vector<1x1x128xf32>
    %1105 = vector.shape_cast %1104 : vector<1x1x128xf32> to vector<1x128xf32>
    %1106 = vector.shape_cast %1103 : vector<1x128xf32> to vector<1x1x128xf32>
    tpu.vector_store %arg13[%c7_1237, %c3_1238, %c0_1239], %1106 {strides = array<i32>} : memref<9x4x128xf32, #tpu.memory_space<vmem>>, vector<1x1x128xf32>,
    %c12_1240 = arith.constant 12 : index
    %c0_1241 = arith.constant 0 : index
    %1107 = vector.load %arg11[%c12_1240, %c0_1241] : memref<25x128xf32, #tpu.memory_space<vmem>>, vector<1x128xf32>
    %c8_1242 = arith.constant 8 : index
    %c0_1243 = arith.constant 0 : index
    %c0_1244 = arith.constant 0 : index
    %1108 = vector.load %arg13[%c8_1242, %c0_1243, %c0_1244] : memref<9x4x128xf32, #tpu.memory_space<vmem>>, vector<1x1x128xf32>
    %1109 = vector.shape_cast %1108 : vector<1x1x128xf32> to vector<1x128xf32>
    %1110 = vector.shape_cast %1107 : vector<1x128xf32> to vector<1x1x128xf32>
    tpu.vector_store %arg13[%c8_1242, %c0_1243, %c0_1244], %1110 {strides = array<i32>} : memref<9x4x128xf32, #tpu.memory_space<vmem>>, vector<1x1x128xf32>,
    %c14_1245 = arith.constant 14 : index
    %c0_1246 = arith.constant 0 : index
    %1111 = vector.load %arg11[%c14_1245, %c0_1246] : memref<25x128xf32, #tpu.memory_space<vmem>>, vector<1x128xf32>
    %c8_1247 = arith.constant 8 : index
    %c1_1248 = arith.constant 1 : index
    %c0_1249 = arith.constant 0 : index
    %1112 = vector.load %arg13[%c8_1247, %c1_1248, %c0_1249] : memref<9x4x128xf32, #tpu.memory_space<vmem>>, vector<1x1x128xf32>
    %1113 = vector.shape_cast %1112 : vector<1x1x128xf32> to vector<1x128xf32>
    %1114 = vector.shape_cast %1111 : vector<1x128xf32> to vector<1x1x128xf32>
    tpu.vector_store %arg13[%c8_1247, %c1_1248, %c0_1249], %1114 {strides = array<i32>} : memref<9x4x128xf32, #tpu.memory_space<vmem>>, vector<1x1x128xf32>,
    %c22_1250 = arith.constant 22 : index
    %c0_1251 = arith.constant 0 : index
    %1115 = vector.load %arg11[%c22_1250, %c0_1251] : memref<25x128xf32, #tpu.memory_space<vmem>>, vector<1x128xf32>
    %c8_1252 = arith.constant 8 : index
    %c2_1253 = arith.constant 2 : index
    %c0_1254 = arith.constant 0 : index
    %1116 = vector.load %arg13[%c8_1252, %c2_1253, %c0_1254] : memref<9x4x128xf32, #tpu.memory_space<vmem>>, vector<1x1x128xf32>
    %1117 = vector.shape_cast %1116 : vector<1x1x128xf32> to vector<1x128xf32>
    %1118 = vector.shape_cast %1115 : vector<1x128xf32> to vector<1x1x128xf32>
    tpu.vector_store %arg13[%c8_1252, %c2_1253, %c0_1254], %1118 {strides = array<i32>} : memref<9x4x128xf32, #tpu.memory_space<vmem>>, vector<1x1x128xf32>,
    %c24_1255 = arith.constant 24 : index
    %c0_1256 = arith.constant 0 : index
    %1119 = vector.load %arg11[%c24_1255, %c0_1256] : memref<25x128xf32, #tpu.memory_space<vmem>>, vector<1x128xf32>
    %c8_1257 = arith.constant 8 : index
    %c3_1258 = arith.constant 3 : index
    %c0_1259 = arith.constant 0 : index
    %1120 = vector.load %arg13[%c8_1257, %c3_1258, %c0_1259] : memref<9x4x128xf32, #tpu.memory_space<vmem>>, vector<1x1x128xf32>
    %1121 = vector.shape_cast %1120 : vector<1x1x128xf32> to vector<1x128xf32>
    %1122 = vector.shape_cast %1119 : vector<1x128xf32> to vector<1x1x128xf32>
    tpu.vector_store %arg13[%c8_1257, %c3_1258, %c0_1259], %1122 {strides = array<i32>} : memref<9x4x128xf32, #tpu.memory_space<vmem>>, vector<1x1x128xf32>,
    %cst_1260 = arith.constant 0.000000e+00 : f32
    %1123 = vector.broadcast %cst_1260 : f32 to vector<4x128xf32>
    %c0_1261 = arith.constant 0 : index
    %c0_1262 = arith.constant 0 : index
    %c0_1263 = arith.constant 0 : index
    %1124 = vector.load %arg13[%c0_1261, %c0_1262, %c0_1263] : memref<9x4x128xf32, #tpu.memory_space<vmem>>, vector<1x4x128xf32>
    %1125 = vector.shape_cast %1124 : vector<1x4x128xf32> to vector<4x128xf32>
    %1126 = vector.extract_strided_slice %1125 {offsets = [0, 0], sizes = [4, 32], strides = [1, 1]} : vector<4x128xf32> to vector<4x32xf32>
    %c0_1264 = arith.constant 0 : index
    %c0_1265 = arith.constant 0 : index
    %c0_1266 = arith.constant 0 : index
    %1127 = vector.load %arg5[%c0_1264, %c0_1265, %c0_1266] : memref<9x32x128xf32, #tpu.memory_space<vmem>>, vector<1x32x128xf32>
    %1128 = vector.shape_cast %1127 : vector<1x32x128xf32> to vector<32x128xf32>
    %cst_1267 = arith.constant dense<0.000000e+00> : vector<4x128xf32>
    %1129 = tpu.matmul %1126, %1128, %cst_1267 {dimension_numbers = #tpu.dot_dimension_numbers<[1], [0], [0], [1], [0, 0, 1, 1], [], []>} : vector<4x32xf32>, vector<32x128xf32>, vector<4x128xf32> -> vector<4x128xf32>
    %1130 = arith.addf %1123, %1129 : vector<4x128xf32>
    %c1_1268 = arith.constant 1 : index
    %c0_1269 = arith.constant 0 : index
    %c0_1270 = arith.constant 0 : index
    %1131 = vector.load %arg13[%c1_1268, %c0_1269, %c0_1270] : memref<9x4x128xf32, #tpu.memory_space<vmem>>, vector<1x4x128xf32>
    %1132 = vector.shape_cast %1131 : vector<1x4x128xf32> to vector<4x128xf32>
    %1133 = vector.extract_strided_slice %1132 {offsets = [0, 0], sizes = [4, 32], strides = [1, 1]} : vector<4x128xf32> to vector<4x32xf32>
    %c1_1271 = arith.constant 1 : index
    %c0_1272 = arith.constant 0 : index
    %c0_1273 = arith.constant 0 : index
    %1134 = vector.load %arg5[%c1_1271, %c0_1272, %c0_1273] : memref<9x32x128xf32, #tpu.memory_space<vmem>>, vector<1x32x128xf32>
    %1135 = vector.shape_cast %1134 : vector<1x32x128xf32> to vector<32x128xf32>
    %cst_1274 = arith.constant dense<0.000000e+00> : vector<4x128xf32>
    %1136 = tpu.matmul %1133, %1135, %cst_1274 {dimension_numbers = #tpu.dot_dimension_numbers<[1], [0], [0], [1], [0, 0, 1, 1], [], []>} : vector<4x32xf32>, vector<32x128xf32>, vector<4x128xf32> -> vector<4x128xf32>
    %1137 = arith.addf %1130, %1136 : vector<4x128xf32>
    %c2_1275 = arith.constant 2 : index
    %c0_1276 = arith.constant 0 : index
    %c0_1277 = arith.constant 0 : index
    %1138 = vector.load %arg13[%c2_1275, %c0_1276, %c0_1277] : memref<9x4x128xf32, #tpu.memory_space<vmem>>, vector<1x4x128xf32>
    %1139 = vector.shape_cast %1138 : vector<1x4x128xf32> to vector<4x128xf32>
    %1140 = vector.extract_strided_slice %1139 {offsets = [0, 0], sizes = [4, 32], strides = [1, 1]} : vector<4x128xf32> to vector<4x32xf32>
    %c2_1278 = arith.constant 2 : index
    %c0_1279 = arith.constant 0 : index
    %c0_1280 = arith.constant 0 : index
    %1141 = vector.load %arg5[%c2_1278, %c0_1279, %c0_1280] : memref<9x32x128xf32, #tpu.memory_space<vmem>>, vector<1x32x128xf32>
    %1142 = vector.shape_cast %1141 : vector<1x32x128xf32> to vector<32x128xf32>
    %cst_1281 = arith.constant dense<0.000000e+00> : vector<4x128xf32>
    %1143 = tpu.matmul %1140, %1142, %cst_1281 {dimension_numbers = #tpu.dot_dimension_numbers<[1], [0], [0], [1], [0, 0, 1, 1], [], []>} : vector<4x32xf32>, vector<32x128xf32>, vector<4x128xf32> -> vector<4x128xf32>
    %1144 = arith.addf %1137, %1143 : vector<4x128xf32>
    %c3_1282 = arith.constant 3 : index
    %c0_1283 = arith.constant 0 : index
    %c0_1284 = arith.constant 0 : index
    %1145 = vector.load %arg13[%c3_1282, %c0_1283, %c0_1284] : memref<9x4x128xf32, #tpu.memory_space<vmem>>, vector<1x4x128xf32>
    %1146 = vector.shape_cast %1145 : vector<1x4x128xf32> to vector<4x128xf32>
    %1147 = vector.extract_strided_slice %1146 {offsets = [0, 0], sizes = [4, 32], strides = [1, 1]} : vector<4x128xf32> to vector<4x32xf32>
    %c3_1285 = arith.constant 3 : index
    %c0_1286 = arith.constant 0 : index
    %c0_1287 = arith.constant 0 : index
    %1148 = vector.load %arg5[%c3_1285, %c0_1286, %c0_1287] : memref<9x32x128xf32, #tpu.memory_space<vmem>>, vector<1x32x128xf32>
    %1149 = vector.shape_cast %1148 : vector<1x32x128xf32> to vector<32x128xf32>
    %cst_1288 = arith.constant dense<0.000000e+00> : vector<4x128xf32>
    %1150 = tpu.matmul %1147, %1149, %cst_1288 {dimension_numbers = #tpu.dot_dimension_numbers<[1], [0], [0], [1], [0, 0, 1, 1], [], []>} : vector<4x32xf32>, vector<32x128xf32>, vector<4x128xf32> -> vector<4x128xf32>
    %1151 = arith.addf %1144, %1150 : vector<4x128xf32>
    %c4_1289 = arith.constant 4 : index
    %c0_1290 = arith.constant 0 : index
    %c0_1291 = arith.constant 0 : index
    %1152 = vector.load %arg13[%c4_1289, %c0_1290, %c0_1291] : memref<9x4x128xf32, #tpu.memory_space<vmem>>, vector<1x4x128xf32>
    %1153 = vector.shape_cast %1152 : vector<1x4x128xf32> to vector<4x128xf32>
    %1154 = vector.extract_strided_slice %1153 {offsets = [0, 0], sizes = [4, 32], strides = [1, 1]} : vector<4x128xf32> to vector<4x32xf32>
    %c4_1292 = arith.constant 4 : index
    %c0_1293 = arith.constant 0 : index
    %c0_1294 = arith.constant 0 : index
    %1155 = vector.load %arg5[%c4_1292, %c0_1293, %c0_1294] : memref<9x32x128xf32, #tpu.memory_space<vmem>>, vector<1x32x128xf32>
    %1156 = vector.shape_cast %1155 : vector<1x32x128xf32> to vector<32x128xf32>
    %cst_1295 = arith.constant dense<0.000000e+00> : vector<4x128xf32>
    %1157 = tpu.matmul %1154, %1156, %cst_1295 {dimension_numbers = #tpu.dot_dimension_numbers<[1], [0], [0], [1], [0, 0, 1, 1], [], []>} : vector<4x32xf32>, vector<32x128xf32>, vector<4x128xf32> -> vector<4x128xf32>
    %1158 = arith.addf %1151, %1157 : vector<4x128xf32>
    %c5_1296 = arith.constant 5 : index
    %c0_1297 = arith.constant 0 : index
    %c0_1298 = arith.constant 0 : index
    %1159 = vector.load %arg13[%c5_1296, %c0_1297, %c0_1298] : memref<9x4x128xf32, #tpu.memory_space<vmem>>, vector<1x4x128xf32>
    %1160 = vector.shape_cast %1159 : vector<1x4x128xf32> to vector<4x128xf32>
    %1161 = vector.extract_strided_slice %1160 {offsets = [0, 0], sizes = [4, 32], strides = [1, 1]} : vector<4x128xf32> to vector<4x32xf32>
    %c5_1299 = arith.constant 5 : index
    %c0_1300 = arith.constant 0 : index
    %c0_1301 = arith.constant 0 : index
    %1162 = vector.load %arg5[%c5_1299, %c0_1300, %c0_1301] : memref<9x32x128xf32, #tpu.memory_space<vmem>>, vector<1x32x128xf32>
    %1163 = vector.shape_cast %1162 : vector<1x32x128xf32> to vector<32x128xf32>
    %cst_1302 = arith.constant dense<0.000000e+00> : vector<4x128xf32>
    %1164 = tpu.matmul %1161, %1163, %cst_1302 {dimension_numbers = #tpu.dot_dimension_numbers<[1], [0], [0], [1], [0, 0, 1, 1], [], []>} : vector<4x32xf32>, vector<32x128xf32>, vector<4x128xf32> -> vector<4x128xf32>
    %1165 = arith.addf %1158, %1164 : vector<4x128xf32>
    %c6_1303 = arith.constant 6 : index
    %c0_1304 = arith.constant 0 : index
    %c0_1305 = arith.constant 0 : index
    %1166 = vector.load %arg13[%c6_1303, %c0_1304, %c0_1305] : memref<9x4x128xf32, #tpu.memory_space<vmem>>, vector<1x4x128xf32>
    %1167 = vector.shape_cast %1166 : vector<1x4x128xf32> to vector<4x128xf32>
    %1168 = vector.extract_strided_slice %1167 {offsets = [0, 0], sizes = [4, 32], strides = [1, 1]} : vector<4x128xf32> to vector<4x32xf32>
    %c6_1306 = arith.constant 6 : index
    %c0_1307 = arith.constant 0 : index
    %c0_1308 = arith.constant 0 : index
    %1169 = vector.load %arg5[%c6_1306, %c0_1307, %c0_1308] : memref<9x32x128xf32, #tpu.memory_space<vmem>>, vector<1x32x128xf32>
    %1170 = vector.shape_cast %1169 : vector<1x32x128xf32> to vector<32x128xf32>
    %cst_1309 = arith.constant dense<0.000000e+00> : vector<4x128xf32>
    %1171 = tpu.matmul %1168, %1170, %cst_1309 {dimension_numbers = #tpu.dot_dimension_numbers<[1], [0], [0], [1], [0, 0, 1, 1], [], []>} : vector<4x32xf32>, vector<32x128xf32>, vector<4x128xf32> -> vector<4x128xf32>
    %1172 = arith.addf %1165, %1171 : vector<4x128xf32>
    %c7_1310 = arith.constant 7 : index
    %c0_1311 = arith.constant 0 : index
    %c0_1312 = arith.constant 0 : index
    %1173 = vector.load %arg13[%c7_1310, %c0_1311, %c0_1312] : memref<9x4x128xf32, #tpu.memory_space<vmem>>, vector<1x4x128xf32>
    %1174 = vector.shape_cast %1173 : vector<1x4x128xf32> to vector<4x128xf32>
    %1175 = vector.extract_strided_slice %1174 {offsets = [0, 0], sizes = [4, 32], strides = [1, 1]} : vector<4x128xf32> to vector<4x32xf32>
    %c7_1313 = arith.constant 7 : index
    %c0_1314 = arith.constant 0 : index
    %c0_1315 = arith.constant 0 : index
    %1176 = vector.load %arg5[%c7_1313, %c0_1314, %c0_1315] : memref<9x32x128xf32, #tpu.memory_space<vmem>>, vector<1x32x128xf32>
    %1177 = vector.shape_cast %1176 : vector<1x32x128xf32> to vector<32x128xf32>
    %cst_1316 = arith.constant dense<0.000000e+00> : vector<4x128xf32>
    %1178 = tpu.matmul %1175, %1177, %cst_1316 {dimension_numbers = #tpu.dot_dimension_numbers<[1], [0], [0], [1], [0, 0, 1, 1], [], []>} : vector<4x32xf32>, vector<32x128xf32>, vector<4x128xf32> -> vector<4x128xf32>
    %1179 = arith.addf %1172, %1178 : vector<4x128xf32>
    %c8_1317 = arith.constant 8 : index
    %c0_1318 = arith.constant 0 : index
    %c0_1319 = arith.constant 0 : index
    %1180 = vector.load %arg13[%c8_1317, %c0_1318, %c0_1319] : memref<9x4x128xf32, #tpu.memory_space<vmem>>, vector<1x4x128xf32>
    %1181 = vector.shape_cast %1180 : vector<1x4x128xf32> to vector<4x128xf32>
    %1182 = vector.extract_strided_slice %1181 {offsets = [0, 0], sizes = [4, 32], strides = [1, 1]} : vector<4x128xf32> to vector<4x32xf32>
    %c8_1320 = arith.constant 8 : index
    %c0_1321 = arith.constant 0 : index
    %c0_1322 = arith.constant 0 : index
    %1183 = vector.load %arg5[%c8_1320, %c0_1321, %c0_1322] : memref<9x32x128xf32, #tpu.memory_space<vmem>>, vector<1x32x128xf32>
    %1184 = vector.shape_cast %1183 : vector<1x32x128xf32> to vector<32x128xf32>
    %cst_1323 = arith.constant dense<0.000000e+00> : vector<4x128xf32>
    %1185 = tpu.matmul %1182, %1184, %cst_1323 {dimension_numbers = #tpu.dot_dimension_numbers<[1], [0], [0], [1], [0, 0, 1, 1], [], []>} : vector<4x32xf32>, vector<32x128xf32>, vector<4x128xf32> -> vector<4x128xf32>
    %1186 = arith.addf %1179, %1185 : vector<4x128xf32>
    %c0_1324 = arith.constant 0 : index
    %c0_1325 = arith.constant 0 : index
    %1187 = vector.load %arg6[%c0_1324, %c0_1325] : memref<1x128xf32, #tpu.memory_space<vmem>>, vector<1x128xf32>
    %1188 = vector.broadcast %1187 : vector<1x128xf32> to vector<4x128xf32>
    %1189 = arith.addf %1186, %1188 : vector<4x128xf32>
    %cst_1326 = arith.constant 0.000000e+00 : f32
    %1190 = vector.broadcast %cst_1326 : f32 to vector<4x128xf32>
    %1191 = arith.maximumf %1189, %1190 : vector<4x128xf32>
    %c0_1327 = arith.constant 0 : index
    %c0_1328 = arith.constant 0 : index
    %1192 = vector.load %arg8[%c0_1327, %c0_1328] : memref<1x128xf32, #tpu.memory_space<vmem>>, vector<1x128xf32>
    %1193 = vector.extract_strided_slice %1191 {offsets = [0, 0], sizes = [1, 8], strides = [1, 1]} : vector<4x128xf32> to vector<1x8xf32>
    %c0_1329 = arith.constant 0 : index
    %c0_1330 = arith.constant 0 : index
    %c0_1331 = arith.constant 0 : index
    %1194 = vector.load %arg7[%c0_1329, %c0_1330, %c0_1331] : memref<4x8x128xf32, #tpu.memory_space<vmem>>, vector<1x8x128xf32>
    %1195 = vector.shape_cast %1194 : vector<1x8x128xf32> to vector<8x128xf32>
    %cst_1332 = arith.constant dense<0.000000e+00> : vector<1x128xf32>
    %1196 = tpu.matmul %1193, %1195, %cst_1332 {dimension_numbers = #tpu.dot_dimension_numbers<[1], [0], [0], [1], [0, 0, 1, 1], [], []>} : vector<1x8xf32>, vector<8x128xf32>, vector<1x128xf32> -> vector<1x128xf32>
    %1197 = arith.addf %1192, %1196 : vector<1x128xf32>
    %1198 = vector.extract_strided_slice %1191 {offsets = [1, 0], sizes = [1, 8], strides = [1, 1]} : vector<4x128xf32> to vector<1x8xf32>
    %c1_1333 = arith.constant 1 : index
    %c0_1334 = arith.constant 0 : index
    %c0_1335 = arith.constant 0 : index
    %1199 = vector.load %arg7[%c1_1333, %c0_1334, %c0_1335] : memref<4x8x128xf32, #tpu.memory_space<vmem>>, vector<1x8x128xf32>
    %1200 = vector.shape_cast %1199 : vector<1x8x128xf32> to vector<8x128xf32>
    %cst_1336 = arith.constant dense<0.000000e+00> : vector<1x128xf32>
    %1201 = tpu.matmul %1198, %1200, %cst_1336 {dimension_numbers = #tpu.dot_dimension_numbers<[1], [0], [0], [1], [0, 0, 1, 1], [], []>} : vector<1x8xf32>, vector<8x128xf32>, vector<1x128xf32> -> vector<1x128xf32>
    %1202 = arith.addf %1197, %1201 : vector<1x128xf32>
    %1203 = vector.extract_strided_slice %1191 {offsets = [2, 0], sizes = [1, 8], strides = [1, 1]} : vector<4x128xf32> to vector<1x8xf32>
    %c2_1337 = arith.constant 2 : index
    %c0_1338 = arith.constant 0 : index
    %c0_1339 = arith.constant 0 : index
    %1204 = vector.load %arg7[%c2_1337, %c0_1338, %c0_1339] : memref<4x8x128xf32, #tpu.memory_space<vmem>>, vector<1x8x128xf32>
    %1205 = vector.shape_cast %1204 : vector<1x8x128xf32> to vector<8x128xf32>
    %cst_1340 = arith.constant dense<0.000000e+00> : vector<1x128xf32>
    %1206 = tpu.matmul %1203, %1205, %cst_1340 {dimension_numbers = #tpu.dot_dimension_numbers<[1], [0], [0], [1], [0, 0, 1, 1], [], []>} : vector<1x8xf32>, vector<8x128xf32>, vector<1x128xf32> -> vector<1x128xf32>
    %1207 = arith.addf %1202, %1206 : vector<1x128xf32>
    %1208 = vector.extract_strided_slice %1191 {offsets = [3, 0], sizes = [1, 8], strides = [1, 1]} : vector<4x128xf32> to vector<1x8xf32>
    %c3_1341 = arith.constant 3 : index
    %c0_1342 = arith.constant 0 : index
    %c0_1343 = arith.constant 0 : index
    %1209 = vector.load %arg7[%c3_1341, %c0_1342, %c0_1343] : memref<4x8x128xf32, #tpu.memory_space<vmem>>, vector<1x8x128xf32>
    %1210 = vector.shape_cast %1209 : vector<1x8x128xf32> to vector<8x128xf32>
    %cst_1344 = arith.constant dense<0.000000e+00> : vector<1x128xf32>
    %1211 = tpu.matmul %1208, %1210, %cst_1344 {dimension_numbers = #tpu.dot_dimension_numbers<[1], [0], [0], [1], [0, 0, 1, 1], [], []>} : vector<1x8xf32>, vector<8x128xf32>, vector<1x128xf32> -> vector<1x128xf32>
    %1212 = arith.addf %1207, %1211 : vector<1x128xf32>
    %1213 = tpu.iota {dimensions = array<i32: 1>} : vector<1x128xi32>
    %c6_i32 = arith.constant 6 : i32
    %1214 = vector.broadcast %c6_i32 : i32 to vector<1x128xi32>
    %1215 = arith.cmpi slt, %1213, %1214 : vector<1x128xi32>
    %cst_1345 = arith.constant -1.000000e+30 : f32
    %1216 = vector.broadcast %cst_1345 : f32 to vector<1x128xf32>
    %1217 = arith.select %1215, %1212, %1216 : vector<1x128xi1>, vector<1x128xf32>
    %cst_1346 = arith.constant dense<0xFF800000> : vector<1xf32>
    %1218 = vector.multi_reduction <maximumf>, %1217, %cst_1346 [1] : vector<1x128xf32> to vector<1xf32>
    %1219 = vector.shape_cast %1218 : vector<1xf32> to vector<1x1xf32>
    %1220 = vector.broadcast %1219 : vector<1x1xf32> to vector<1x128xf32>
    %1221 = arith.subf %1217, %1220 : vector<1x128xf32>
    %1222 = math.exp %1221 : vector<1x128xf32>
    %cst_1347 = arith.constant 0.000000e+00 : f32
    %1223 = vector.broadcast %cst_1347 : f32 to vector<1x128xf32>
    %1224 = arith.select %1215, %1222, %1223 : vector<1x128xi1>, vector<1x128xf32>
    %cst_1348 = arith.constant dense<0.000000e+00> : vector<1xf32>
    %1225 = vector.multi_reduction <add>, %1224, %cst_1348 [1] : vector<1x128xf32> to vector<1xf32>
    %1226 = vector.shape_cast %1225 : vector<1xf32> to vector<1x1xf32>
    %1227 = tpu.reciprocal %1226 {approx = true} : vector<1x1xf32> -> vector<1x1xf32>
    %1228 = vector.broadcast %1227 : vector<1x1xf32> to vector<1x128xf32>
    %1229 = arith.mulf %1224, %1228 : vector<1x128xf32>
    %c6_i32_1349 = arith.constant 6 : i32
    %1230 = vector.broadcast %c6_i32_1349 : i32 to vector<1x128xi32>
    %1231 = arith.cmpi eq, %1213, %1230 : vector<1x128xi32>
    %cst_1350 = arith.constant 0.000000e+00 : f32
    %1232 = vector.broadcast %cst_1350 : f32 to vector<1x128xf32>
    %1233 = arith.select %1231, %1212, %1232 : vector<1x128xi1>, vector<1x128xf32>
    %1234 = arith.addf %1229, %1233 : vector<1x128xf32>
    %c0_1351 = arith.constant 0 : index
    %c0_1352 = arith.constant 0 : index
    %1235 = vector.load %arg9[%c0_1351, %c0_1352] : memref<1x128xf32, #tpu.memory_space<vmem>>, vector<1x128xf32>
    tpu.vector_store %arg9[%c0_1351, %c0_1352], %1234 {strides = array<i32>} : memref<1x128xf32, #tpu.memory_space<vmem>>, vector<1x128xf32>,
    return
  }
}

</mosaic_0001>

<bundles_post_ra>
// kernel: forward.1
= control target key start
LH: loop header
LB: loop body
LE: loop exit
PB: predicated region body
PF: predicated region fallthrough
CT: control target
= control target key end

     0   :  { %vm735_vm0 = vcmask 130048   ;;  %vm3523_vm1 = vmmov 0   ;;  %vm1796_vm2 = vcmask 261120   ;;  %vm2514_vm3 = vcmask 64512   ;;  %s4002_s1 = inlined_call_operand.vmem [shape: f32[128,128], index: 1, kind: input, shape index: {}]   ;;  %s4003_s0 = inlined_call_operand.vmem [shape: f32[144,128], index: 0, kind: input, shape index: {}]   ;;  %s4004_s3 = inlined_call_operand.vmem [shape: f32[9,16,128], index: 3, kind: input, shape index: {}]   ;;  %s4005_s2 = inlined_call_operand.vmem [shape: f32[1,128], index: 2, kind: input, shape index: {}]   ;;  %s4006_s5 = inlined_call_operand.vmem [shape: f32[9,32,128], index: 5, kind: input, shape index: {}]   ;;  %s4007_s4 = inlined_call_operand.vmem [shape: f32[1,128], index: 4, kind: input, shape index: {}]   ;;  %s4008_s7 = inlined_call_operand.vmem [shape: f32[4,8,128], index: 7, kind: input, shape index: {}]   ;;  %s4009_s6 = inlined_call_operand.vmem [shape: f32[1,128], index: 6, kind: input, shape index: {}]   ;;  %s4010_s8 = inlined_call_operand.vmem [shape: f32[1,128], index: 8, kind: input, shape index: {}]   ;;  %s4011_s9 = inlined_call_operand.vmem [shape: f32[1,128], index: 9, kind: output, shape index: {}]  }
   0x1   :  { %v50_v0 = vld [vmem:[%s4002_s1] sm:$0xff]  ;;  %v51_v1 = vld [vmem:[%s4002_s1 + $0x8] sm:$0xff]  ;;  %v52_v2 = vld [vmem:[%s4002_s1 + $0x10] sm:$0xff]  ;;  %vm2821_vm6 = vcmask 1040384  }
   0x2   :  { %v3354_v3 = vpack.c.bf16 %v51_v1, %v50_v0  ;;  %v53_v4 = vld [vmem:[%s4002_s1 + $0x18] sm:$0xff]  ;;  %v54_v6 = vld [vmem:[%s4002_s1 + $0x20] sm:$0xff]  ;;  %v55_v7 = vld [vmem:[%s4002_s1 + $0x28] sm:$0xff] }
   0x3   :  { %v3358_v5 = vpack.c.bf16 %v53_v4, %v52_v2  ;;  %v3362_v8 = vpack.c.bf16 %v55_v7, %v54_v6  ;;  %v32_v9 = vld [vmem:[%s4003_s0] sm:$0xff]  ;;  %v56_v10 = vld [vmem:[%s4002_s1 + $0x30] sm:$0xff]  ;;  %v57_v11 = vld [vmem:[%s4002_s1 + $0x38] sm:$0xff] }
   0x4   :  { %3355 = vmatprep.subr.bf16.mxu0 %v3354_v3  ;;  %3118 = vmatprep.mubr.f32.mxu0 %v32_v9  ;;  %v3366_v12 = vpack.c.bf16 %v57_v11, %v56_v10  ;;  %v58_v13 = vld [vmem:[%s4002_s1 + $0x40] sm:$0xff]  ;;  %v59_v14 = vld [vmem:[%s4002_s1 + $0x48] sm:$0xff]  ;;  %v60_v16 = vld [vmem:[%s4002_s1 + $0x50] sm:$0xff] }
   0x5   :  { %3357 = vmatpush3.bf16.msra.mxu0 %v3354_v3  ;;  %v3370_v15 = vpack.c.bf16 %v59_v14, %v58_v13  ;;  %v61_v17 = vld [vmem:[%s4002_s1 + $0x58] sm:$0xff]  ;;  %v62_v19 = vld [vmem:[%s4002_s1 + $0x60] sm:$0xff]  ;;  %v63_v20 = vld [vmem:[%s4002_s1 + $0x68] sm:$0xff] }
   0x6   :  { %3359 = vmatprep.subr.bf16.mxu0 %v3358_v5  ;;  %v3374_v18 = vpack.c.bf16 %v61_v17, %v60_v16  ;;  %v3378_v21 = vpack.c.bf16 %v63_v20, %v62_v19  ;;  %v64_v22 = vld [vmem:[%s4002_s1 + $0x70] sm:$0xff]  ;;  %v65_v23 = vld [vmem:[%s4002_s1 + $0x78] sm:$0xff]  ;;  %v33_v25 = vld [vmem:[%s4003_s0 + $0x8] sm:$0xff] }
   0x7   :  { %v3382_v24 = vpack.c.bf16 %v65_v23, %v64_v22  ;;  %v34_v26 = vld [vmem:[%s4003_s0 + $0x10] sm:$0xff]  ;;  %v35_v27 = vld [vmem:[%s4003_s0 + $0x18] sm:$0xff]  ;;  %v36_v28 = vld [vmem:[%s4003_s0 + $0x20] sm:$0xff] }
   0x8   :  { %v37_v29 = vld [vmem:[%s4003_s0 + $0x28] sm:$0xff]  ;;  %v38_v30 = vld [vmem:[%s4003_s0 + $0x30] sm:$0xff]  ;;  %v39_v31 = vld [vmem:[%s4003_s0 + $0x38] sm:$0xff] }
   0x9   :  { %3361 = vmatpush3.bf16.msra.mxu0 %v3358_v5  ;;  %v40_v32 = vld [vmem:[%s4003_s0 + $0x40] sm:$0xff]  ;;  %v41_v33 = vld [vmem:[%s4003_s0 + $0x48] sm:$0xff]  ;;  %v42_v34 = vld [vmem:[%s4003_s0 + $0x50] sm:$0xff] }
   0xa   :  { %3363 = vmatprep.subr.bf16.mxu0 %v3362_v8  ;;  %v43_v35 = vld [vmem:[%s4003_s0 + $0x58] sm:$0xff]  ;;  %v44_v36 = vld [vmem:[%s4003_s0 + $0x60] sm:$0xff]  ;;  %v45_v37 = vld [vmem:[%s4003_s0 + $0x68] sm:$0xff] }
   0xb   :  { %v46_v38 = vld [vmem:[%s4003_s0 + $0x70] sm:$0xff]  ;;  %v47_v39 = vld [vmem:[%s4003_s0 + $0x78] sm:$0xff]  ;;  %v48_v40 = vld [vmem:[%s4003_s0 + $0x80] sm:$0xff] }
   0xc   :  { %v49_v41 = vld [vmem:[%s4003_s0 + $0x88] sm:$0xff]  ;;  %v2843_v42 = vld [vmem:[%s4004_s3 + $0x10] sm:$0xff]  ;;  %v2844_v43 = vld [vmem:[%s4004_s3 + $0x18] sm:$0xff] }
   0xd   :  { %3365 = vmatpush3.bf16.msra.mxu0 %v3362_v8  ;;  %v3386_v44 = vpack.c.bf16 %v2844_v43, %v2843_v42  ;;  %v726_v45 = vld [vmem:[%s4004_s3] sm:$0xff]  ;;  %v727_v46 = vld [vmem:[%s4004_s3 + $0x8] sm:$0xff] }
   0xe   :  { %3367 = vmatprep.subr.bf16.mxu0 %v3366_v12  ;;  %v3689_v47 = vpack.c.bf16 %v727_v46, %v726_v45  ;;  %v3695_v48 = vld [vmem:[%s4005_s2] ss:$0 sm:$0xff] }
   0xf   :  { %3387 = vmatprep.subr.bf16.mxu1 %v3386_v44 }
  0x10   :  { %3389 = vmatpush3.bf16.msra.mxu1 %v3386_v44 }
  0x11   :  { %3369 = vmatpush3.bf16.msra.mxu0 %v3366_v12  ;;  %3391 = vmatprep.subr.bf16.mxu1 %v3689_v47 }
  0x12   :  { %3371 = vmatprep.subr.bf16.mxu0 %v3370_v15 }
  0x15   :  { %3373 = vmatpush3.bf16.msra.mxu0 %v3370_v15 }
  0x16   :  { %3375 = vmatprep.subr.bf16.mxu0 %v3374_v18 }
  0x19   :  { %3377 = vmatpush3.bf16.msra.mxu0 %v3374_v18 }
  0x1a   :  { %3379 = vmatprep.subr.bf16.mxu0 %v3378_v21 }
  0x1d   :  { %3381 = vmatpush3.bf16.msra.mxu0 %v3378_v21 }
  0x1e   :  { %3383 = vmatprep.subr.bf16.mxu0 %v3382_v24 }
  0x21   :  { %3385 = vmatpush3.bf16.msra.mxu0 %v3382_v24 }
  0x24   :  { %3119 = vmatmul.mubr.f32.vlgmr.msra.gmra.mrb[0].mxu0 %v33_v25 }
  0x25   :  { %3121 = vmatprep.mubr.f32.mxu0 %v34_v26 }
  0x28   :  { %3122 = vmatmul.mubr.f32.gmra.mrb[2].mxu0 %v35_v27 }
  0x29   :  { %3124 = vmatprep.mubr.f32.mxu0 %v36_v28 }
  0x2c   :  { %3125 = vmatmul.mubr.f32.gmra.mrb[4].mxu0 %v37_v29 }
  0x2d   :  { %3127 = vmatprep.mubr.f32.mxu0 %v38_v30 }
  0x30   :  { %3128 = vmatmul.mubr.f32.gmra.mrb[6].mxu0 %v39_v31 }
  0x31   :  { %3130 = vmatprep.mubr.f32.mxu0 %v40_v32 }
  0x34   :  { %3131 = vmatmul.mubr.f32.gmra.mrb[8].mxu0 %v41_v33 }
  0x35   :  { %3133 = vmatprep.mubr.f32.mxu0 %v42_v34 }
  0x38   :  { %3134 = vmatmul.mubr.f32.gmra.mrb[10].mxu0 %v43_v35 }
  0x39   :  { %3136 = vmatprep.mubr.f32.mxu0 %v44_v36 }
  0x3c   :  { %3137 = vmatmul.mubr.f32.gmra.mrb[12].mxu0 %v45_v37 }
  0x3d   :  { %3139 = vmatprep.mubr.f32.mxu0 %v46_v38 }
  0x40   :  { %3140 = vmatmul.mubr.f32.gmra.mrb[14].mxu0 %v47_v39 }
  0x41   :  { %3142 = vmatprep.mubr.f32.mxu0 %v48_v40 }
  0x44   :  { %3143 = vmatmul.mubr.f32.gmra.mrb[16].mxu0 %v49_v41 }
  0xf7   :  { %v3120_v49 = vpop.f32.mrb[0].mxu0 }
  0xf8   :  { %v145_v50 = vadd.f32 %v3120_v49, %v3695_v48  ;;  %v139_v51 = vpop.f32.mrb[1].mxu0 }
  0xf9   :  { %v140_v52 = vadd.f32 %v3695_v48, %v139_v51 }
  0xfa   :  { %v229_v53 = vmax.f32 %v145_v50, 0.0 }
  0xfb   :  { %v228_v54 = vmax.f32 %v140_v52, 0.0  ;;  %v3123_v55 = vpop.f32.mrb[2].mxu0 }
  0xfc   :  { %247 = vst [vmem:[#allocation2 + $0x8] sm:$0xff] %v229_v53  ;;  %v155_v56 = vadd.f32 %v3123_v55, %v3695_v48  ;;  %v149_v57 = vpop.f32.mrb[3].mxu0 }
  0xfd   :  { %246 = vst [vmem:[#allocation2] sm:$0xff] %v228_v54  ;;  %v150_v58 = vadd.f32 %v3695_v48, %v149_v57 }
  0xfe   :  { %v231_v59 = vmax.f32 %v155_v56, 0.0 }
  0xff   :  { %v230_v60 = vmax.f32 %v150_v58, 0.0  ;;  %v3126_v61 = vpop.f32.mrb[4].mxu0 }
 0x100   :  { %249 = vst [vmem:[#allocation2 + $0x18] sm:$0xff] %v231_v59  ;;  %v165_v62 = vadd.f32 %v3126_v61, %v3695_v48  ;;  %v3702_v63 = vpop.f32.mrb[5].mxu0 }
 0x101   :  { %248 = vst [vmem:[#allocation2 + $0x10] sm:$0xff] %v230_v60  ;;  %v160_v46 = vadd.f32 %v3695_v48, %v3702_v63 }
 0x102   :  { %v233_v0 = vmax.f32 %v165_v62, 0.0 }
 0x103   :  { %v272_v1 = vld [vmem:[#allocation2 + $0x8] sm:$0x1]  ;;  %v374_v3 = vld [vmem:[#allocation2 + $0xa] sm:$0x1]  ;;  %v416_v4 = vld [vmem:[#allocation2 + $0xc] sm:$0x1] }
 0x104   :  { %v372_v2 = vld [vmem:[#allocation2 + $0x8] sm:$0x1]  ;;  %273 = vst [vmem:[#allocation4 + $0x4] sm:$0x1] %v272_v1  ;;  %375 = vst [vmem:[#allocation4 + $0x44] sm:$0x1] %v374_v3 }
 0x105   :  { %373 = vst [vmem:[#allocation4 + $0x43] sm:$0x1] %v372_v2  ;;  %v419_v5 = vld [vmem:[#allocation2 + $0xe] sm:$0x1]  ;;  %v467_v6 = vld [vmem:[#allocation2 + $0xd] sm:$0x1] }
 0x106   :  { %251 = vst [vmem:[#allocation2 + $0x28] sm:$0xff] %v233_v0  ;;  %418 = vst [vmem:[#allocation4 + $0x60] sm:$0x1] %v416_v4  ;;  %v470_v7 = vld [vmem:[#allocation2 + $0xf] sm:$0x1]  ;;  %v232_v58 = vmax.f32 %v160_v46, 0.0 }
 0x107   :  { %420 = vst [vmem:[#allocation4 + $0x61] sm:$0x1] %v419_v5  ;;  %469 = vst [vmem:[#allocation4 + $0x80] sm:$0x1] %v467_v6  ;;  %v518_v8 = vld [vmem:[#allocation2 + $0xe] sm:$0x1] }
 0x108   :  { %v264_v9 = vld [vmem:[#allocation2] sm:$0x1]  ;;  %471 = vst [vmem:[#allocation4 + $0x81] sm:$0x1] %v470_v7  ;;  %520 = vst [vmem:[#allocation4 + $0xa0] sm:$0x1] %v518_v8 }
 0x109   :  { %265 = vst [vmem:[#allocation4] sm:$0x1] %v264_v9  ;;  %v266_v10 = vld [vmem:[#allocation2 + $0x2] sm:$0x1]  ;;  %v268_v11 = vld [vmem:[#allocation2 + $0x4] sm:$0x1] }
 0x10a   :  { %v270_v12 = vld [vmem:[#allocation2 + $0x6] sm:$0x1]  ;;  %267 = vst [vmem:[#allocation4 + $0x1] sm:$0x1] %v266_v10  ;;  %269 = vst [vmem:[#allocation4 + $0x2] sm:$0x1] %v268_v11 }
 0x10b   :  { %271 = vst [vmem:[#allocation4 + $0x3] sm:$0x1] %v270_v12  ;;  %v365_v13 = vld [vmem:[#allocation2 + $0x2] sm:$0x1]  ;;  %v368_v14 = vld [vmem:[#allocation2 + $0x4] sm:$0x1] }
 0x10c   :  { %v370_v15 = vld [vmem:[#allocation2 + $0x6] sm:$0x1]  ;;  %367 = vst [vmem:[#allocation4 + $0x40] sm:$0x1] %v365_v13  ;;  %369 = vst [vmem:[#allocation4 + $0x41] sm:$0x1] %v368_v14 }
 0x10d   :  { %371 = vst [vmem:[#allocation4 + $0x42] sm:$0x1] %v370_v15  ;;  %v274_v16 = vld [vmem:[#allocation2 + $0x18] sm:$0x1]  ;;  %v276_v17 = vld [vmem:[#allocation2 + $0x1a] sm:$0x1] }
 0x10e   :  { %v278_v18 = vld [vmem:[#allocation2 + $0x1c] sm:$0x1]  ;;  %275 = vst [vmem:[#allocation4 + $0x5] sm:$0x1] %v274_v16  ;;  %277 = vst [vmem:[#allocation4 + $0x6] sm:$0x1] %v276_v17 }
 0x10f   :  { %279 = vst [vmem:[#allocation4 + $0x7] sm:$0x1] %v278_v18  ;;  %v280_v19 = vld [vmem:[#allocation2 + $0x1e] sm:$0x1]  ;;  %v331_v20 = vld [vmem:[#allocation2 + $0x1f] sm:$0x1] }
 0x110   :  { %v376_v21 = vld [vmem:[#allocation2 + $0x1a] sm:$0x1]  ;;  %281 = vst [vmem:[#allocation4 + $0x8] sm:$0x1] %v280_v19  ;;  %332 = vst [vmem:[#allocation4 + $0x28] sm:$0x1] %v331_v20 }
 0x111   :  { %377 = vst [vmem:[#allocation4 + $0x45] sm:$0x1] %v376_v21  ;;  %v378_v22 = vld [vmem:[#allocation2 + $0x1c] sm:$0x1]  ;;  %v380_v23 = vld [vmem:[#allocation2 + $0x1e] sm:$0x1] }
 0x112   :  { %v569_v24 = vld [vmem:[#allocation2 + $0x18] sm:$0x1]  ;;  %379 = vst [vmem:[#allocation4 + $0x46] sm:$0x1] %v378_v22  ;;  %381 = vst [vmem:[#allocation4 + $0x47] sm:$0x1] %v380_v23 }
 0x113   :  { %571 = vst [vmem:[#allocation4 + $0xc0] sm:$0x1] %v569_v24  ;;  %v572_v25 = vld [vmem:[#allocation2 + $0x1a] sm:$0x1]  ;;  %v574_v26 = vld [vmem:[#allocation2 + $0x1c] sm:$0x1] }
 0x114   :  { %v576_v27 = vld [vmem:[#allocation2 + $0x1e] sm:$0x1]  ;;  %573 = vst [vmem:[#allocation4 + $0xc1] sm:$0x1] %v572_v25  ;;  %575 = vst [vmem:[#allocation4 + $0xc2] sm:$0x1] %v574_v26 }
 0x115   :  { %577 = vst [vmem:[#allocation4 + $0xc3] sm:$0x1] %v576_v27  ;;  %v620_v28 = vld [vmem:[#allocation2 + $0x19] sm:$0x1]  ;;  %v623_v29 = vld [vmem:[#allocation2 + $0x1b] sm:$0x1] }
 0x116   :  { %v625_v30 = vld [vmem:[#allocation2 + $0x1d] sm:$0x1]  ;;  %622 = vst [vmem:[#allocation4 + $0xe0] sm:$0x1] %v620_v28  ;;  %624 = vst [vmem:[#allocation4 + $0xe1] sm:$0x1] %v623_v29 }
 0x117   :  { %626 = vst [vmem:[#allocation4 + $0xe2] sm:$0x1] %v625_v30  ;;  %v627_v31 = vld [vmem:[#allocation2 + $0x1f] sm:$0x1]  ;;  %v671_v32 = vld [vmem:[#allocation2 + $0x1a] sm:$0x1] }
 0x118   :  { %v674_v33 = vld [vmem:[#allocation2 + $0x1c] sm:$0x1]  ;;  %628 = vst [vmem:[#allocation4 + $0xe3] sm:$0x1] %v627_v31  ;;  %673 = vst [vmem:[#allocation4 + $0x100] sm:$0x1] %v671_v32 }
 0x119   :  { %675 = vst [vmem:[#allocation4 + $0x101] sm:$0x1] %v674_v33  ;;  %v676_v34 = vld [vmem:[#allocation2 + $0x1e] sm:$0x1]  ;;  %v421_v35 = vld [vmem:[#allocation2 + $0x10] sm:$0x1] }
 0x11a   :  { %v423_v36 = vld [vmem:[#allocation2 + $0x12] sm:$0x1]  ;;  %677 = vst [vmem:[#allocation4 + $0x102] sm:$0x1] %v676_v34  ;;  %422 = vst [vmem:[#allocation4 + $0x62] sm:$0x1] %v421_v35 }
 0x11b   :  { %424 = vst [vmem:[#allocation4 + $0x63] sm:$0x1] %v423_v36  ;;  %v425_v37 = vld [vmem:[#allocation2 + $0x14] sm:$0x1]  ;;  %v472_v38 = vld [vmem:[#allocation2 + $0x11] sm:$0x1] }
 0x11c   :  { %v474_v39 = vld [vmem:[#allocation2 + $0x13] sm:$0x1]  ;;  %426 = vst [vmem:[#allocation4 + $0x64] sm:$0x1] %v425_v37  ;;  %473 = vst [vmem:[#allocation4 + $0x82] sm:$0x1] %v472_v38 }
 0x11d   :  { %475 = vst [vmem:[#allocation4 + $0x83] sm:$0x1] %v474_v39  ;;  %v476_v40 = vld [vmem:[#allocation2 + $0x15] sm:$0x1]  ;;  %v521_v41 = vld [vmem:[#allocation2 + $0x10] sm:$0x1] }
 0x11e   :  { %v523_v42 = vld [vmem:[#allocation2 + $0x12] sm:$0x1]  ;;  %477 = vst [vmem:[#allocation4 + $0x84] sm:$0x1] %v476_v40  ;;  %522 = vst [vmem:[#allocation4 + $0xa1] sm:$0x1] %v521_v41 }
 0x11f   :  { %524 = vst [vmem:[#allocation4 + $0xa2] sm:$0x1] %v523_v42  ;;  %v525_v43 = vld [vmem:[#allocation2 + $0x14] sm:$0x1]  ;;  %v527_v44 = vld [vmem:[#allocation2 + $0x16] sm:$0x1] }
 0x120   :  { %v431_v45 = vld [vmem:[#allocation2 + $0x28] sm:$0x1]  ;;  %526 = vst [vmem:[#allocation4 + $0xa3] sm:$0x1] %v525_v43  ;;  %528 = vst [vmem:[#allocation4 + $0xa4] sm:$0x1] %v527_v44 }
 0x121   :  { %432 = vst [vmem:[#allocation4 + $0x67] sm:$0x1] %v431_v45  ;;  %v433_v49 = vld [vmem:[#allocation2 + $0x2a] sm:$0x1]  ;;  %v435_v50 = vld [vmem:[#allocation2 + $0x2c] sm:$0x1] }
 0x122   :  { %v482_v51 = vld [vmem:[#allocation2 + $0x29] sm:$0x1]  ;;  %434 = vst [vmem:[#allocation4 + $0x68] sm:$0x1] %v433_v49  ;;  %436 = vst [vmem:[#allocation4 + $0x69] sm:$0x1] %v435_v50 }
 0x123   :  { %483 = vst [vmem:[#allocation4 + $0x87] sm:$0x1] %v482_v51  ;;  %v484_v52 = vld [vmem:[#allocation2 + $0x2b] sm:$0x1]  ;;  %v486_v53 = vld [vmem:[#allocation2 + $0x2d] sm:$0x1] }
 0x124   :  { %v531_v54 = vld [vmem:[#allocation2 + $0x28] sm:$0x1]  ;;  %485 = vst [vmem:[#allocation4 + $0x88] sm:$0x1] %v484_v52  ;;  %487 = vst [vmem:[#allocation4 + $0x89] sm:$0x1] %v486_v53 }
 0x125   :  { %532 = vst [vmem:[#allocation4 + $0xa6] sm:$0x1] %v531_v54  ;;  %v533_v55 = vld [vmem:[#allocation2 + $0x2a] sm:$0x1]  ;;  %v535_v56 = vld [vmem:[#allocation2 + $0x2c] sm:$0x1] }
 0x126   :  { %v537_v57 = vld [vmem:[#allocation2 + $0x2e] sm:$0x1]  ;;  %534 = vst [vmem:[#allocation4 + $0xa7] sm:$0x1] %v533_v55  ;;  %536 = vst [vmem:[#allocation4 + $0xa8] sm:$0x1] %v535_v56 }
 0x127   :  { %538 = vst [vmem:[#allocation4 + $0xa9] sm:$0x1] %v537_v57  ;;  %v3129_v59 = vpop.f32.mrb[6].mxu0  ;;  %v314_v60 = vld [vmem:[#allocation2 + $0x1] sm:$0x1]  ;;  %250 = vst [vmem:[#allocation2 + $0x20] sm:$0xff] %v232_v58 }
 0x128   :  { %v317_v61 = vld [vmem:[#allocation2 + $0x3] sm:$0x1]  ;;  %v175_v62 = vadd.f32 %v3129_v59, %v3695_v48  ;;  %v169_v63 = vpop.f32.mrb[7].mxu0  ;;  %316 = vst [vmem:[#allocation4 + $0x20] sm:$0x1] %v314_v60 }
 0x129   :  { %318 = vst [vmem:[#allocation4 + $0x21] sm:$0x1] %v317_v61  ;;  %v319_v0 = vld [vmem:[#allocation2 + $0x5] sm:$0x1]  ;;  %v321_v1 = vld [vmem:[#allocation2 + $0x7] sm:$0x1]  ;;  %v170_v2 = vadd.f32 %v3695_v48, %v169_v63 }
 0x12a   :  { %v3132_v3 = vpop.f32.mrb[8].mxu0  ;;  %320 = vst [vmem:[#allocation4 + $0x22] sm:$0x1] %v319_v0  ;;  %322 = vst [vmem:[#allocation4 + $0x23] sm:$0x1] %v321_v1  ;;  %v235_v6 = vmax.f32 %v175_v62, 0.0 }
 0x12b   :  { %v323_v4 = vld [vmem:[#allocation2 + $0x9] sm:$0x1]  ;;  %v325_v5 = vld [vmem:[#allocation2 + $0x19] sm:$0x1]  ;;  %v185_v7 = vadd.f32 %v3132_v3, %v3695_v48  ;;  %v179_v8 = vpop.f32.mrb[9].mxu0  ;;  %v234_v11 = vmax.f32 %v170_v2, 0.0 }
 0x12c   :  { %324 = vst [vmem:[#allocation4 + $0x24] sm:$0x1] %v323_v4  ;;  %326 = vst [vmem:[#allocation4 + $0x25] sm:$0x1] %v325_v5  ;;  %v327_v9 = vld [vmem:[#allocation2 + $0x1b] sm:$0x1]  ;;  %v180_v12 = vadd.f32 %v3695_v48, %v179_v8 }
 0x12d   :  { %v329_v10 = vld [vmem:[#allocation2 + $0x1d] sm:$0x1]  ;;  %v3135_v13 = vpop.f32.mrb[10].mxu0  ;;  %328 = vst [vmem:[#allocation4 + $0x26] sm:$0x1] %v327_v9  ;;  %253 = vst [vmem:[#allocation2 + $0x38] sm:$0xff] %v235_v6 }
 0x12e   :  { %330 = vst [vmem:[#allocation4 + $0x27] sm:$0x1] %v329_v10  ;;  %v237_v14 = vmax.f32 %v185_v7, 0.0  ;;  %v195_v15 = vadd.f32 %v3135_v13, %v3695_v48  ;;  %v189_v16 = vpop.f32.mrb[11].mxu0  ;;  %252 = vst [vmem:[#allocation2 + $0x30] sm:$0xff] %v234_v11  ;;  %v236_v17 = vmax.f32 %v180_v12, 0.0 }
 0x12f   :  { %v190_v18 = vadd.f32 %v3695_v48, %v189_v16  ;;  %v3712_v19 = vpop.f32.mrb[12].mxu0  ;;  %v282_v24 = vld [vmem:[#allocation2 + $0x20] sm:$0x1]  ;;  %v333_v25 = vld [vmem:[#allocation2 + $0x21] sm:$0x1] }
 0x130   :  { %255 = vst [vmem:[#allocation2 + $0x48] sm:$0xff] %v237_v14  ;;  %v239_v20 = vmax.f32 %v195_v15, 0.0  ;;  %v3714_v21 = vpop.f32.mrb[13].mxu0  ;;  %254 = vst [vmem:[#allocation2 + $0x40] sm:$0xff] %v236_v17  ;;  %v382_v26 = vld [vmem:[#allocation2 + $0x20] sm:$0x1] }
 0x131   :  { %v238_v22 = vmax.f32 %v190_v18, 0.0  ;;  %v3716_v23 = vpop.f32.mrb[14].mxu0  ;;  %283 = vst [vmem:[#allocation4 + $0x9] sm:$0x1] %v282_v24  ;;  %334 = vst [vmem:[#allocation4 + $0x29] sm:$0x1] %v333_v25 }
 0x132   :  { %257 = vst [vmem:[#allocation2 + $0x58] sm:$0xff] %v239_v20  ;;  %383 = vst [vmem:[#allocation4 + $0x48] sm:$0x1] %v382_v26  ;;  %v384_v27 = vld [vmem:[#allocation2 + $0x22] sm:$0x1] }
 0x133   :  { %v427_v28 = vld [vmem:[#allocation2 + $0x24] sm:$0x1]  ;;  %v429_v29 = vld [vmem:[#allocation2 + $0x26] sm:$0x1]  ;;  %256 = vst [vmem:[#allocation2 + $0x50] sm:$0xff] %v238_v22 }
 0x134   :  { %385 = vst [vmem:[#allocation4 + $0x49] sm:$0x1] %v384_v27  ;;  %428 = vst [vmem:[#allocation4 + $0x65] sm:$0x1] %v427_v28  ;;  %v478_v30 = vld [vmem:[#allocation2 + $0x25] sm:$0x1] }
 0x135   :  { %430 = vst [vmem:[#allocation4 + $0x66] sm:$0x1] %v429_v29  ;;  %v480_v31 = vld [vmem:[#allocation2 + $0x27] sm:$0x1]  ;;  %v529_v32 = vld [vmem:[#allocation2 + $0x26] sm:$0x1] }
 0x136   :  { %479 = vst [vmem:[#allocation4 + $0x85] sm:$0x1] %v478_v30  ;;  %481 = vst [vmem:[#allocation4 + $0x86] sm:$0x1] %v480_v31  ;;  %v578_v33 = vld [vmem:[#allocation2 + $0x20] sm:$0x1] }
 0x137   :  { %530 = vst [vmem:[#allocation4 + $0xa5] sm:$0x1] %v529_v32  ;;  %v629_v34 = vld [vmem:[#allocation2 + $0x21] sm:$0x1]  ;;  %v678_v35 = vld [vmem:[#allocation2 + $0x20] sm:$0x1] }
 0x138   :  { %579 = vst [vmem:[#allocation4 + $0xc4] sm:$0x1] %v578_v33  ;;  %630 = vst [vmem:[#allocation4 + $0xe4] sm:$0x1] %v629_v34  ;;  %v680_v36 = vld [vmem:[#allocation2 + $0x22] sm:$0x1] }
 0x139   :  { %679 = vst [vmem:[#allocation4 + $0x103] sm:$0x1] %v678_v35  ;;  %v292_v37 = vld [vmem:[#allocation2 + $0x38] sm:$0x1]  ;;  %v343_v38 = vld [vmem:[#allocation2 + $0x39] sm:$0x1] }
 0x13a   :  { %681 = vst [vmem:[#allocation4 + $0x104] sm:$0x1] %v680_v36  ;;  %293 = vst [vmem:[#allocation4 + $0xe] sm:$0x1] %v292_v37  ;;  %v392_v39 = vld [vmem:[#allocation2 + $0x38] sm:$0x1] }
 0x13b   :  { %344 = vst [vmem:[#allocation4 + $0x2e] sm:$0x1] %v343_v38  ;;  %v394_v40 = vld [vmem:[#allocation2 + $0x3a] sm:$0x1]  ;;  %v437_v41 = vld [vmem:[#allocation2 + $0x3c] sm:$0x1] }
 0x13c   :  { %393 = vst [vmem:[#allocation4 + $0x4d] sm:$0x1] %v392_v39  ;;  %395 = vst [vmem:[#allocation4 + $0x4e] sm:$0x1] %v394_v40  ;;  %v439_v42 = vld [vmem:[#allocation2 + $0x3e] sm:$0x1] }
 0x13d   :  { %438 = vst [vmem:[#allocation4 + $0x6a] sm:$0x1] %v437_v41  ;;  %v488_v43 = vld [vmem:[#allocation2 + $0x3d] sm:$0x1]  ;;  %v490_v44 = vld [vmem:[#allocation2 + $0x3f] sm:$0x1] }
 0x13e   :  { %440 = vst [vmem:[#allocation4 + $0x6b] sm:$0x1] %v439_v42  ;;  %489 = vst [vmem:[#allocation4 + $0x8a] sm:$0x1] %v488_v43  ;;  %v539_v45 = vld [vmem:[#allocation2 + $0x3e] sm:$0x1] }
 0x13f   :  { %491 = vst [vmem:[#allocation4 + $0x8b] sm:$0x1] %v490_v44  ;;  %v588_v46 = vld [vmem:[#allocation2 + $0x38] sm:$0x1]  ;;  %v639_v49 = vld [vmem:[#allocation2 + $0x39] sm:$0x1] }
 0x140   :  { %540 = vst [vmem:[#allocation4 + $0xaa] sm:$0x1] %v539_v45  ;;  %589 = vst [vmem:[#allocation4 + $0xc9] sm:$0x1] %v588_v46  ;;  %v688_v50 = vld [vmem:[#allocation2 + $0x38] sm:$0x1] }
 0x141   :  { %640 = vst [vmem:[#allocation4 + $0xe9] sm:$0x1] %v639_v49  ;;  %v690_v51 = vld [vmem:[#allocation2 + $0x3a] sm:$0x1]  ;;  %v284_v52 = vld [vmem:[#allocation2 + $0x30] sm:$0x1] }
 0x142   :  { %689 = vst [vmem:[#allocation4 + $0x108] sm:$0x1] %v688_v50  ;;  %691 = vst [vmem:[#allocation4 + $0x109] sm:$0x1] %v690_v51  ;;  %v286_v53 = vld [vmem:[#allocation2 + $0x32] sm:$0x1] }
 0x143   :  { %285 = vst [vmem:[#allocation4 + $0xa] sm:$0x1] %v284_v52  ;;  %v288_v54 = vld [vmem:[#allocation2 + $0x34] sm:$0x1]  ;;  %v290_v55 = vld [vmem:[#allocation2 + $0x36] sm:$0x1] }
 0x144   :  { %287 = vst [vmem:[#allocation4 + $0xb] sm:$0x1] %v286_v53  ;;  %289 = vst [vmem:[#allocation4 + $0xc] sm:$0x1] %v288_v54  ;;  %v335_v56 = vld [vmem:[#allocation2 + $0x31] sm:$0x1] }
 0x145   :  { %291 = vst [vmem:[#allocation4 + $0xd] sm:$0x1] %v290_v55  ;;  %v337_v57 = vld [vmem:[#allocation2 + $0x33] sm:$0x1]  ;;  %v339_v58 = vld [vmem:[#allocation2 + $0x35] sm:$0x1] }
 0x146   :  { %336 = vst [vmem:[#allocation4 + $0x2a] sm:$0x1] %v335_v56  ;;  %338 = vst [vmem:[#allocation4 + $0x2b] sm:$0x1] %v337_v57  ;;  %v341_v59 = vld [vmem:[#allocation2 + $0x37] sm:$0x1] }
 0x147   :  { %340 = vst [vmem:[#allocation4 + $0x2c] sm:$0x1] %v339_v58  ;;  %v386_v60 = vld [vmem:[#allocation2 + $0x32] sm:$0x1]  ;;  %v388_v61 = vld [vmem:[#allocation2 + $0x34] sm:$0x1] }
 0x148   :  { %342 = vst [vmem:[#allocation4 + $0x2d] sm:$0x1] %v341_v59  ;;  %387 = vst [vmem:[#allocation4 + $0x4a] sm:$0x1] %v386_v60  ;;  %v390_v62 = vld [vmem:[#allocation2 + $0x36] sm:$0x1] }
 0x149   :  { %389 = vst [vmem:[#allocation4 + $0x4b] sm:$0x1] %v388_v61  ;;  %v580_v63 = vld [vmem:[#allocation2 + $0x30] sm:$0x1]  ;;  %v582_v0 = vld [vmem:[#allocation2 + $0x32] sm:$0x1] }
 0x14a   :  { %391 = vst [vmem:[#allocation4 + $0x4c] sm:$0x1] %v390_v62  ;;  %581 = vst [vmem:[#allocation4 + $0xc5] sm:$0x1] %v580_v63  ;;  %v584_v1 = vld [vmem:[#allocation2 + $0x34] sm:$0x1]  ;;  %v205_v62 = vadd.f32 %v3712_v19, %v3695_v48  ;;  %v200_v63 = vadd.f32 %v3695_v48, %v3714_v21 }
 0x14b   :  { %583 = vst [vmem:[#allocation4 + $0xc6] sm:$0x1] %v582_v0  ;;  %v586_v2 = vld [vmem:[#allocation2 + $0x36] sm:$0x1]  ;;  %v631_v3 = vld [vmem:[#allocation2 + $0x31] sm:$0x1]  ;;  %v215_v0 = vadd.f32 %v3716_v23, %v3695_v48 }
 0x14c   :  { %585 = vst [vmem:[#allocation4 + $0xc7] sm:$0x1] %v584_v1  ;;  %587 = vst [vmem:[#allocation4 + $0xc8] sm:$0x1] %v586_v2  ;;  %v633_v4 = vld [vmem:[#allocation2 + $0x33] sm:$0x1] }
 0x14d   :  { %632 = vst [vmem:[#allocation4 + $0xe5] sm:$0x1] %v631_v3  ;;  %v635_v5 = vld [vmem:[#allocation2 + $0x35] sm:$0x1]  ;;  %v637_v6 = vld [vmem:[#allocation2 + $0x37] sm:$0x1] }
 0x14e   :  { %634 = vst [vmem:[#allocation4 + $0xe6] sm:$0x1] %v633_v4  ;;  %636 = vst [vmem:[#allocation4 + $0xe7] sm:$0x1] %v635_v5  ;;  %v682_v7 = vld [vmem:[#allocation2 + $0x32] sm:$0x1] }
 0x14f   :  { %638 = vst [vmem:[#allocation4 + $0xe8] sm:$0x1] %v637_v6  ;;  %v684_v8 = vld [vmem:[#allocation2 + $0x34] sm:$0x1]  ;;  %v686_v9 = vld [vmem:[#allocation2 + $0x36] sm:$0x1] }
 0x150   :  { %683 = vst [vmem:[#allocation4 + $0x105] sm:$0x1] %v682_v7  ;;  %685 = vst [vmem:[#allocation4 + $0x106] sm:$0x1] %v684_v8  ;;  %v294_v10 = vld [vmem:[#allocation2 + $0x48] sm:$0x1] }
 0x151   :  { %687 = vst [vmem:[#allocation4 + $0x107] sm:$0x1] %v686_v9  ;;  %v296_v11 = vld [vmem:[#allocation2 + $0x4a] sm:$0x1]  ;;  %v298_v12 = vld [vmem:[#allocation2 + $0x4c] sm:$0x1] }
 0x152   :  { %295 = vst [vmem:[#allocation4 + $0xf] sm:$0x1] %v294_v10  ;;  %297 = vst [vmem:[#allocation4 + $0x10] sm:$0x1] %v296_v11  ;;  %v300_v13 = vld [vmem:[#allocation2 + $0x4e] sm:$0x1] }
 0x153   :  { %299 = vst [vmem:[#allocation4 + $0x11] sm:$0x1] %v298_v12  ;;  %v345_v14 = vld [vmem:[#allocation2 + $0x49] sm:$0x1]  ;;  %v347_v15 = vld [vmem:[#allocation2 + $0x4b] sm:$0x1] }
 0x154   :  { %301 = vst [vmem:[#allocation4 + $0x12] sm:$0x1] %v300_v13  ;;  %346 = vst [vmem:[#allocation4 + $0x2f] sm:$0x1] %v345_v14  ;;  %v349_v16 = vld [vmem:[#allocation2 + $0x4d] sm:$0x1] }
 0x155   :  { %348 = vst [vmem:[#allocation4 + $0x30] sm:$0x1] %v347_v15  ;;  %v351_v17 = vld [vmem:[#allocation2 + $0x4f] sm:$0x1]  ;;  %v396_v18 = vld [vmem:[#allocation2 + $0x4a] sm:$0x1] }
 0x156   :  { %350 = vst [vmem:[#allocation4 + $0x31] sm:$0x1] %v349_v16  ;;  %352 = vst [vmem:[#allocation4 + $0x32] sm:$0x1] %v351_v17  ;;  %v398_v20 = vld [vmem:[#allocation2 + $0x4c] sm:$0x1] }
 0x157   :  { %397 = vst [vmem:[#allocation4 + $0x4f] sm:$0x1] %v396_v18  ;;  %v400_v22 = vld [vmem:[#allocation2 + $0x4e] sm:$0x1]  ;;  %v590_v24 = vld [vmem:[#allocation2 + $0x48] sm:$0x1] }
 0x158   :  { %399 = vst [vmem:[#allocation4 + $0x50] sm:$0x1] %v398_v20  ;;  %401 = vst [vmem:[#allocation4 + $0x51] sm:$0x1] %v400_v22  ;;  %v592_v25 = vld [vmem:[#allocation2 + $0x4a] sm:$0x1] }
 0x159   :  { %591 = vst [vmem:[#allocation4 + $0xca] sm:$0x1] %v590_v24  ;;  %v594_v26 = vld [vmem:[#allocation2 + $0x4c] sm:$0x1]  ;;  %v596_v27 = vld [vmem:[#allocation2 + $0x4e] sm:$0x1] }
 0x15a   :  { %593 = vst [vmem:[#allocation4 + $0xcb] sm:$0x1] %v592_v25  ;;  %595 = vst [vmem:[#allocation4 + $0xcc] sm:$0x1] %v594_v26  ;;  %v641_v28 = vld [vmem:[#allocation2 + $0x49] sm:$0x1] }
 0x15b   :  { %597 = vst [vmem:[#allocation4 + $0xcd] sm:$0x1] %v596_v27  ;;  %v643_v29 = vld [vmem:[#allocation2 + $0x4b] sm:$0x1]  ;;  %v645_v30 = vld [vmem:[#allocation2 + $0x4d] sm:$0x1] }
 0x15c   :  { %642 = vst [vmem:[#allocation4 + $0xea] sm:$0x1] %v641_v28  ;;  %644 = vst [vmem:[#allocation4 + $0xeb] sm:$0x1] %v643_v29  ;;  %v647_v31 = vld [vmem:[#allocation2 + $0x4f] sm:$0x1] }
 0x15d   :  { %646 = vst [vmem:[#allocation4 + $0xec] sm:$0x1] %v645_v30  ;;  %v692_v32 = vld [vmem:[#allocation2 + $0x4a] sm:$0x1]  ;;  %v694_v33 = vld [vmem:[#allocation2 + $0x4c] sm:$0x1] }
 0x15e   :  { %648 = vst [vmem:[#allocation4 + $0xed] sm:$0x1] %v647_v31  ;;  %693 = vst [vmem:[#allocation4 + $0x10a] sm:$0x1] %v692_v32  ;;  %v696_v34 = vld [vmem:[#allocation2 + $0x4e] sm:$0x1] }
 0x15f   :  { %695 = vst [vmem:[#allocation4 + $0x10b] sm:$0x1] %v694_v33  ;;  %v441_v35 = vld [vmem:[#allocation2 + $0x40] sm:$0x1]  ;;  %v443_v36 = vld [vmem:[#allocation2 + $0x42] sm:$0x1] }
 0x160   :  { %697 = vst [vmem:[#allocation4 + $0x10c] sm:$0x1] %v696_v34  ;;  %442 = vst [vmem:[#allocation4 + $0x6c] sm:$0x1] %v441_v35  ;;  %v445_v37 = vld [vmem:[#allocation2 + $0x44] sm:$0x1] }
 0x161   :  { %444 = vst [vmem:[#allocation4 + $0x6d] sm:$0x1] %v443_v36  ;;  %v492_v38 = vld [vmem:[#allocation2 + $0x41] sm:$0x1]  ;;  %v494_v39 = vld [vmem:[#allocation2 + $0x43] sm:$0x1] }
 0x162   :  { %446 = vst [vmem:[#allocation4 + $0x6e] sm:$0x1] %v445_v37  ;;  %493 = vst [vmem:[#allocation4 + $0x8c] sm:$0x1] %v492_v38  ;;  %v496_v40 = vld [vmem:[#allocation2 + $0x45] sm:$0x1] }
 0x163   :  { %495 = vst [vmem:[#allocation4 + $0x8d] sm:$0x1] %v494_v39  ;;  %v541_v41 = vld [vmem:[#allocation2 + $0x40] sm:$0x1]  ;;  %v543_v42 = vld [vmem:[#allocation2 + $0x42] sm:$0x1] }
 0x164   :  { %497 = vst [vmem:[#allocation4 + $0x8e] sm:$0x1] %v496_v40  ;;  %542 = vst [vmem:[#allocation4 + $0xab] sm:$0x1] %v541_v41  ;;  %v545_v43 = vld [vmem:[#allocation2 + $0x44] sm:$0x1] }
 0x165   :  { %544 = vst [vmem:[#allocation4 + $0xac] sm:$0x1] %v543_v42  ;;  %v547_v44 = vld [vmem:[#allocation2 + $0x46] sm:$0x1]  ;;  %v451_v45 = vld [vmem:[#allocation2 + $0x58] sm:$0x1] }
 0x166   :  { %546 = vst [vmem:[#allocation4 + $0xad] sm:$0x1] %v545_v43  ;;  %548 = vst [vmem:[#allocation4 + $0xae] sm:$0x1] %v547_v44  ;;  %v453_v46 = vld [vmem:[#allocation2 + $0x5a] sm:$0x1] }
 0x167   :  { %452 = vst [vmem:[#allocation4 + $0x71] sm:$0x1] %v451_v45  ;;  %v455_v49 = vld [vmem:[#allocation2 + $0x5c] sm:$0x1]  ;;  %v502_v50 = vld [vmem:[#allocation2 + $0x59] sm:$0x1] }
 0x168   :  { %454 = vst [vmem:[#allocation4 + $0x72] sm:$0x1] %v453_v46  ;;  %456 = vst [vmem:[#allocation4 + $0x73] sm:$0x1] %v455_v49  ;;  %v504_v51 = vld [vmem:[#allocation2 + $0x5b] sm:$0x1] }
 0x169   :  { %503 = vst [vmem:[#allocation4 + $0x91] sm:$0x1] %v502_v50  ;;  %v506_v52 = vld [vmem:[#allocation2 + $0x5d] sm:$0x1]  ;;  %v551_v53 = vld [vmem:[#allocation2 + $0x58] sm:$0x1] }
 0x16a   :  { %505 = vst [vmem:[#allocation4 + $0x92] sm:$0x1] %v504_v51  ;;  %507 = vst [vmem:[#allocation4 + $0x93] sm:$0x1] %v506_v52  ;;  %v553_v54 = vld [vmem:[#allocation2 + $0x5a] sm:$0x1] }
 0x16b   :  { %552 = vst [vmem:[#allocation4 + $0xb0] sm:$0x1] %v551_v53  ;;  %v555_v55 = vld [vmem:[#allocation2 + $0x5c] sm:$0x1]  ;;  %v557_v56 = vld [vmem:[#allocation2 + $0x5e] sm:$0x1] }
 0x16c   :  { %v2853_v57 = vld [vmem:[%s4004_s3 + $0x20] sm:$0xff]  ;;  %v2854_v58 = vld [vmem:[%s4004_s3 + $0x28] sm:$0xff]  ;;  %554 = vst [vmem:[#allocation4 + $0xb1] sm:$0x1] %v553_v54  ;;  %556 = vst [vmem:[#allocation4 + $0xb2] sm:$0x1] %v555_v55 }
 0x16d   :  { %558 = vst [vmem:[#allocation4 + $0xb3] sm:$0x1] %v557_v56  ;;  %v302_v59 = vld [vmem:[#allocation2 + $0x50] sm:$0x1]  ;;  %v353_v60 = vld [vmem:[#allocation2 + $0x51] sm:$0x1]  ;;  %v3730_v12 = vpack.c.bf16 %v2854_v58, %v2853_v57 }
 0x16e   :  { %v402_v61 = vld [vmem:[#allocation2 + $0x50] sm:$0x1]  ;;  %303 = vst [vmem:[#allocation4 + $0x13] sm:$0x1] %v302_v59  ;;  %354 = vst [vmem:[#allocation4 + $0x33] sm:$0x1] %v353_v60 }
 0x16f   :  { %403 = vst [vmem:[#allocation4 + $0x52] sm:$0x1] %v402_v61  ;;  %v404_v1 = vld [vmem:[#allocation2 + $0x52] sm:$0x1]  ;;  %v447_v2 = vld [vmem:[#allocation2 + $0x54] sm:$0x1] }
 0x170   :  { %v449_v3 = vld [vmem:[#allocation2 + $0x56] sm:$0x1]  ;;  %405 = vst [vmem:[#allocation4 + $0x53] sm:$0x1] %v404_v1  ;;  %448 = vst [vmem:[#allocation4 + $0x6f] sm:$0x1] %v447_v2 }
 0x171   :  { %450 = vst [vmem:[#allocation4 + $0x70] sm:$0x1] %v449_v3  ;;  %v498_v4 = vld [vmem:[#allocation2 + $0x55] sm:$0x1]  ;;  %v500_v5 = vld [vmem:[#allocation2 + $0x57] sm:$0x1] }
 0x172   :  { %v549_v6 = vld [vmem:[#allocation2 + $0x56] sm:$0x1]  ;;  %499 = vst [vmem:[#allocation4 + $0x8f] sm:$0x1] %v498_v4  ;;  %501 = vst [vmem:[#allocation4 + $0x90] sm:$0x1] %v500_v5 }
 0x173   :  { %550 = vst [vmem:[#allocation4 + $0xaf] sm:$0x1] %v549_v6  ;;  %v598_v19 = vld [vmem:[#allocation2 + $0x50] sm:$0x1]  ;;  %v649_v21 = vld [vmem:[#allocation2 + $0x51] sm:$0x1] }
 0x174   :  { %v698_v7 = vld [vmem:[#allocation2 + $0x50] sm:$0x1]  ;;  %599 = vst [vmem:[#allocation4 + $0xce] sm:$0x1] %v598_v19  ;;  %650 = vst [vmem:[#allocation4 + $0xee] sm:$0x1] %v649_v21 }
 0x175   :  { %699 = vst [vmem:[#allocation4 + $0x10d] sm:$0x1] %v698_v7  ;;  %v700_v23 = vld [vmem:[#allocation2 + $0x52] sm:$0x1]  ;;  %v241_v8 = vmax.f32 %v205_v62, 0.0  ;;  %v240_v9 = vmax.f32 %v200_v63, 0.0 }
 0x176   :  { %v728_v10 = vld [vmem:[#allocation4 + $0x20] sm:$0xff]  ;;  %v243_v11 = vmax.f32 %v215_v0, 0.0  ;;  %701 = vst [vmem:[#allocation4 + $0x10e] sm:$0x1] %v700_v23  ;;  %v209_v13 = vpop.f32.mrb[15].mxu0  ;;  %v729_v14 = vld [vmem:[#allocation4 + $0x28] sm:$0xff] }
 0x177   :  { %3149 = vmatprep.mubr.msk.f32.mxu1 %vm735_vm0, %v728_v10  ;;  %259 = vst [vmem:[#allocation2 + $0x68] sm:$0xff] %v241_v8  ;;  %258 = vst [vmem:[#allocation2 + $0x60] sm:$0xff] %v240_v9  ;;  %v210_v15 = vadd.f32 %v3695_v48, %v209_v13  ;;  %v3144_v16 = vpop.f32.mrb[16].mxu0  ;;  %v3522_v17 = vmov 0.0|0.0   ;;  %v1786_v24 = vld [vmem:[%s4006_s5] sm:$0xff]  ;;  %v1787_v25 = vld [vmem:[%s4006_s5 + $0x8] sm:$0xff] }
 0x178   :  { %261 = vst [vmem:[#allocation2 + $0x78] sm:$0xff] %v243_v11  ;;  %3150 = vmatmul.mubr.msk.f32.vlgmr.msra.gmra.mrb[0].mxu1 %vm735_vm0, %v729_v14  ;;  %3428 = vmatprep.subr.bf16.mxu0 %v3522_v17  ;;  %v219_v18 = vpop.f32.mrb[17].mxu0  ;;  %v3429_v26 = vpack.c.bf16 %v1787_v25, %v1786_v24 }
 0x179   :  { %3393 = vmatpush3.bf16.msra.mxu1 %v3689_v47  ;;  %v242_v20 = vmax.f32 %v210_v15, 0.0  ;;  %v220_v22 = vadd.f32 %v3695_v48, %v219_v18 }
 0x17a   :  { %3395 = vmatprep.subr.bf16.mxu1 %v3730_v12  ;;  %3430 = vmatpush3.bf16.msra.mxu0 %v3429_v26 }
 0x17b   :  { %260 = vst [vmem:[#allocation2 + $0x70] sm:$0xff] %v242_v20  ;;  %v244_v27 = vmax.f32 %v220_v22, 0.0  ;;  %3431 = vmatprep.subr.bf16.mxu0 %v3522_v17 }
 0x17d   :  { %262 = vst [vmem:[#allocation2 + $0x80] sm:$0xff] %v244_v27 }
 0x17e   :  { %v312_v47 = vld [vmem:[#allocation2 + $0x68] sm:$0x1]  ;;  %v363_v28 = vld [vmem:[#allocation2 + $0x69] sm:$0x1]  ;;  %v414_v29 = vld [vmem:[#allocation2 + $0x6a] sm:$0x1] }
 0x17f   :  { %v412_v48 = vld [vmem:[#allocation2 + $0x68] sm:$0x1]  ;;  %313 = vst [vmem:[#allocation4 + $0x18] sm:$0x1] %v312_v47  ;;  %364 = vst [vmem:[#allocation4 + $0x38] sm:$0x1] %v363_v28 }
 0x180   :  { %413 = vst [vmem:[#allocation4 + $0x57] sm:$0x1] %v412_v48  ;;  %v457_v30 = vld [vmem:[#allocation2 + $0x6c] sm:$0x1]  ;;  %v459_v31 = vld [vmem:[#allocation2 + $0x6e] sm:$0x1] }
 0x181   :  { %415 = vst [vmem:[#allocation4 + $0x58] sm:$0x1] %v414_v29  ;;  %458 = vst [vmem:[#allocation4 + $0x74] sm:$0x1] %v457_v30  ;;  %v508_v32 = vld [vmem:[#allocation2 + $0x6d] sm:$0x1] }
 0x182   :  { %460 = vst [vmem:[#allocation4 + $0x75] sm:$0x1] %v459_v31  ;;  %v510_v33 = vld [vmem:[#allocation2 + $0x6f] sm:$0x1]  ;;  %v559_v34 = vld [vmem:[#allocation2 + $0x6e] sm:$0x1] }
 0x183   :  { %509 = vst [vmem:[#allocation4 + $0x94] sm:$0x1] %v508_v32  ;;  %511 = vst [vmem:[#allocation4 + $0x95] sm:$0x1] %v510_v33  ;;  %v608_v35 = vld [vmem:[#allocation2 + $0x68] sm:$0x1] }
 0x184   :  { %560 = vst [vmem:[#allocation4 + $0xb4] sm:$0x1] %v559_v34  ;;  %v659_v36 = vld [vmem:[#allocation2 + $0x69] sm:$0x1]  ;;  %v708_v37 = vld [vmem:[#allocation2 + $0x68] sm:$0x1] }
 0x185   :  { %609 = vst [vmem:[#allocation4 + $0xd3] sm:$0x1] %v608_v35  ;;  %660 = vst [vmem:[#allocation4 + $0xf3] sm:$0x1] %v659_v36  ;;  %v710_v38 = vld [vmem:[#allocation2 + $0x6a] sm:$0x1] }
 0x186   :  { %709 = vst [vmem:[#allocation4 + $0x112] sm:$0x1] %v708_v37  ;;  %v304_v39 = vld [vmem:[#allocation2 + $0x60] sm:$0x1]  ;;  %v306_v40 = vld [vmem:[#allocation2 + $0x62] sm:$0x1] }
 0x187   :  { %711 = vst [vmem:[#allocation4 + $0x113] sm:$0x1] %v710_v38  ;;  %305 = vst [vmem:[#allocation4 + $0x14] sm:$0x1] %v304_v39  ;;  %v308_v41 = vld [vmem:[#allocation2 + $0x64] sm:$0x1] }
 0x188   :  { %307 = vst [vmem:[#allocation4 + $0x15] sm:$0x1] %v306_v40  ;;  %v310_v42 = vld [vmem:[#allocation2 + $0x66] sm:$0x1]  ;;  %v355_v43 = vld [vmem:[#allocation2 + $0x61] sm:$0x1] }
 0x189   :  { %309 = vst [vmem:[#allocation4 + $0x16] sm:$0x1] %v308_v41  ;;  %311 = vst [vmem:[#allocation4 + $0x17] sm:$0x1] %v310_v42  ;;  %v357_v44 = vld [vmem:[#allocation2 + $0x63] sm:$0x1] }
 0x18a   :  { %356 = vst [vmem:[#allocation4 + $0x34] sm:$0x1] %v355_v43  ;;  %v359_v45 = vld [vmem:[#allocation2 + $0x65] sm:$0x1]  ;;  %v361_v46 = vld [vmem:[#allocation2 + $0x67] sm:$0x1] }
 0x18b   :  { %358 = vst [vmem:[#allocation4 + $0x35] sm:$0x1] %v357_v44  ;;  %360 = vst [vmem:[#allocation4 + $0x36] sm:$0x1] %v359_v45  ;;  %v406_v49 = vld [vmem:[#allocation2 + $0x62] sm:$0x1] }
 0x18c   :  { %362 = vst [vmem:[#allocation4 + $0x37] sm:$0x1] %v361_v46  ;;  %v408_v50 = vld [vmem:[#allocation2 + $0x64] sm:$0x1]  ;;  %v410_v51 = vld [vmem:[#allocation2 + $0x66] sm:$0x1] }
 0x18d   :  { %407 = vst [vmem:[#allocation4 + $0x54] sm:$0x1] %v406_v49  ;;  %409 = vst [vmem:[#allocation4 + $0x55] sm:$0x1] %v408_v50  ;;  %v600_v52 = vld [vmem:[#allocation2 + $0x60] sm:$0x1] }
 0x18e   :  { %411 = vst [vmem:[#allocation4 + $0x56] sm:$0x1] %v410_v51  ;;  %v602_v53 = vld [vmem:[#allocation2 + $0x62] sm:$0x1]  ;;  %v604_v54 = vld [vmem:[#allocation2 + $0x64] sm:$0x1] }
 0x18f   :  { %601 = vst [vmem:[#allocation4 + $0xcf] sm:$0x1] %v600_v52  ;;  %603 = vst [vmem:[#allocation4 + $0xd0] sm:$0x1] %v602_v53  ;;  %v606_v55 = vld [vmem:[#allocation2 + $0x66] sm:$0x1] }
 0x190   :  { %605 = vst [vmem:[#allocation4 + $0xd1] sm:$0x1] %v604_v54  ;;  %v651_v56 = vld [vmem:[#allocation2 + $0x61] sm:$0x1]  ;;  %v653_v57 = vld [vmem:[#allocation2 + $0x63] sm:$0x1] }
 0x191   :  { %607 = vst [vmem:[#allocation4 + $0xd2] sm:$0x1] %v606_v55  ;;  %652 = vst [vmem:[#allocation4 + $0xef] sm:$0x1] %v651_v56  ;;  %v655_v58 = vld [vmem:[#allocation2 + $0x65] sm:$0x1] }
 0x192   :  { %654 = vst [vmem:[#allocation4 + $0xf0] sm:$0x1] %v653_v57  ;;  %v657_v59 = vld [vmem:[#allocation2 + $0x67] sm:$0x1]  ;;  %v702_v60 = vld [vmem:[#allocation2 + $0x62] sm:$0x1] }
 0x193   :  { %656 = vst [vmem:[#allocation4 + $0xf1] sm:$0x1] %v655_v58  ;;  %658 = vst [vmem:[#allocation4 + $0xf2] sm:$0x1] %v657_v59  ;;  %v704_v61 = vld [vmem:[#allocation2 + $0x64] sm:$0x1] }
 0x194   :  { %703 = vst [vmem:[#allocation4 + $0x10f] sm:$0x1] %v702_v60  ;;  %v706_v62 = vld [vmem:[#allocation2 + $0x66] sm:$0x1]  ;;  %v610_v63 = vld [vmem:[#allocation2 + $0x78] sm:$0x1] }
 0x195   :  { %705 = vst [vmem:[#allocation4 + $0x110] sm:$0x1] %v704_v61  ;;  %707 = vst [vmem:[#allocation4 + $0x111] sm:$0x1] %v706_v62  ;;  %v612_v0 = vld [vmem:[#allocation2 + $0x7a] sm:$0x1] }
 0x196   :  { %611 = vst [vmem:[#allocation4 + $0xd4] sm:$0x1] %v610_v63  ;;  %v614_v1 = vld [vmem:[#allocation2 + $0x7c] sm:$0x1]  ;;  %v616_v2 = vld [vmem:[#allocation2 + $0x7e] sm:$0x1] }
 0x197   :  { %613 = vst [vmem:[#allocation4 + $0xd5] sm:$0x1] %v612_v0  ;;  %615 = vst [vmem:[#allocation4 + $0xd6] sm:$0x1] %v614_v1  ;;  %v661_v3 = vld [vmem:[#allocation2 + $0x79] sm:$0x1] }
 0x198   :  { %617 = vst [vmem:[#allocation4 + $0xd7] sm:$0x1] %v616_v2  ;;  %v663_v4 = vld [vmem:[#allocation2 + $0x7b] sm:$0x1]  ;;  %v665_v5 = vld [vmem:[#allocation2 + $0x7d] sm:$0x1] }
 0x199   :  { %662 = vst [vmem:[#allocation4 + $0xf4] sm:$0x1] %v661_v3  ;;  %664 = vst [vmem:[#allocation4 + $0xf5] sm:$0x1] %v663_v4  ;;  %v667_v6 = vld [vmem:[#allocation2 + $0x7f] sm:$0x1] }
 0x19a   :  { %666 = vst [vmem:[#allocation4 + $0xf6] sm:$0x1] %v665_v5  ;;  %v712_v19 = vld [vmem:[#allocation2 + $0x7a] sm:$0x1]  ;;  %v714_v21 = vld [vmem:[#allocation2 + $0x7c] sm:$0x1] }
 0x19b   :  { %668 = vst [vmem:[#allocation4 + $0xf7] sm:$0x1] %v667_v6  ;;  %713 = vst [vmem:[#allocation4 + $0x114] sm:$0x1] %v712_v19  ;;  %v716_v7 = vld [vmem:[#allocation2 + $0x7e] sm:$0x1] }
 0x19c   :  { %715 = vst [vmem:[#allocation4 + $0x115] sm:$0x1] %v714_v21  ;;  %v461_v23 = vld [vmem:[#allocation2 + $0x70] sm:$0x1]  ;;  %v463_v8 = vld [vmem:[#allocation2 + $0x72] sm:$0x1] }
 0x19d   :  { %717 = vst [vmem:[#allocation4 + $0x116] sm:$0x1] %v716_v7  ;;  %462 = vst [vmem:[#allocation4 + $0x76] sm:$0x1] %v461_v23  ;;  %v465_v9 = vld [vmem:[#allocation2 + $0x74] sm:$0x1] }
 0x19e   :  { %464 = vst [vmem:[#allocation4 + $0x77] sm:$0x1] %v463_v8  ;;  %v512_v10 = vld [vmem:[#allocation2 + $0x71] sm:$0x1]  ;;  %v514_v11 = vld [vmem:[#allocation2 + $0x73] sm:$0x1] }
 0x19f   :  { %466 = vst [vmem:[#allocation4 + $0x78] sm:$0x1] %v465_v9  ;;  %513 = vst [vmem:[#allocation4 + $0x96] sm:$0x1] %v512_v10  ;;  %v516_v13 = vld [vmem:[#allocation2 + $0x75] sm:$0x1] }
 0x1a0   :  { %515 = vst [vmem:[#allocation4 + $0x97] sm:$0x1] %v514_v11  ;;  %v561_v14 = vld [vmem:[#allocation2 + $0x70] sm:$0x1]  ;;  %v563_v15 = vld [vmem:[#allocation2 + $0x72] sm:$0x1] }
 0x1a1   :  { %517 = vst [vmem:[#allocation4 + $0x98] sm:$0x1] %v516_v13  ;;  %562 = vst [vmem:[#allocation4 + $0xb5] sm:$0x1] %v561_v14  ;;  %v565_v16 = vld [vmem:[#allocation2 + $0x74] sm:$0x1] }
 0x1a2   :  { %564 = vst [vmem:[#allocation4 + $0xb6] sm:$0x1] %v563_v15  ;;  %v567_v18 = vld [vmem:[#allocation2 + $0x76] sm:$0x1]  ;;  %v618_v20 = vld [vmem:[#allocation2 + $0x80] sm:$0x1] }
 0x1a3   :  { %566 = vst [vmem:[#allocation4 + $0xb7] sm:$0x1] %v565_v16  ;;  %568 = vst [vmem:[#allocation4 + $0xb8] sm:$0x1] %v567_v18  ;;  %v669_v22 = vld [vmem:[#allocation2 + $0x81] sm:$0x1] }
 0x1a4   :  { %619 = vst [vmem:[#allocation4 + $0xd8] sm:$0x1] %v618_v20  ;;  %v718_v24 = vld [vmem:[#allocation2 + $0x80] sm:$0x1]  ;;  %v720_v25 = vld [vmem:[#allocation2 + $0x82] sm:$0x1] }
 0x1a5   :  { %670 = vst [vmem:[#allocation4 + $0xf8] sm:$0x1] %v669_v22  ;;  %719 = vst [vmem:[#allocation4 + $0x117] sm:$0x1] %v718_v24  ;;  %v730_v26 = vld [vmem:[#allocation4 + $0x30] sm:$0xff]  ;;  %v2859_v47 = vld [vmem:[%s4004_s3 + $0x30] sm:$0xff] }
 0x1a6   :  { %721 = vst [vmem:[#allocation4 + $0x118] sm:$0x1] %v720_v25  ;;  %3152 = vmatprep.mubr.msk.f32.mxu1 %vm735_vm0, %v730_v26  ;;  %v731_v27 = vld [vmem:[#allocation4 + $0x38] sm:$0x1]  ;;  %v2860_v28 = vld [vmem:[%s4004_s3 + $0x38] sm:$0xff]  ;;  %v722_v48 = vld [vmem:[#allocation4] sm:$0xff] }
 0x1a7   :  { %3153 = vmatmul.mubr.msk.f32.gmra.mrb[2].mxu1 %vm735_vm0, %v731_v27  ;;  %v3398_v29 = vpack.c.bf16 %v2860_v28, %v2859_v47  ;;  %v723_v30 = vld [vmem:[#allocation4 + $0x8] sm:$0xff]  ;;  %v724_v31 = vld [vmem:[#allocation4 + $0x10] sm:$0xff]  ;;  %v725_v32 = vld [vmem:[#allocation4 + $0x18] sm:$0x1]  ;;  %v3524_v24 = vmov 0.0  }
 0x1a8   :  { %3159 = vmatprep.mubr.msk.f32.mxu1 %vm735_vm0, %v722_v48  ;;  %v2865_v33 = vld [vmem:[%s4004_s3 + $0x40] sm:$0xff]  ;;  %v2866_v34 = vld [vmem:[%s4004_s3 + $0x48] sm:$0xff]  ;;  %v930_v35 = vld [vmem:[#allocation4 + $0x40] sm:$0xff]  ;;  %3254 = vmatprep.mubr.msk.f32.mxu0 %vm3523_vm1, %v3524_v24 }
 0x1a9   :  { %v3402_v36 = vpack.c.bf16 %v2866_v34, %v2865_v33  ;;  %v931_v37 = vld [vmem:[#allocation4 + $0x48] sm:$0xff]  ;;  %v933_v38 = vld [vmem:[#allocation4 + $0x58] sm:$0x1]  ;;  %v2871_v39 = vld [vmem:[%s4004_s3 + $0x50] sm:$0xff] }
 0x1aa   :  { %v2872_v40 = vld [vmem:[%s4004_s3 + $0x58] sm:$0xff]  ;;  %v1038_v41 = vld [vmem:[#allocation4 + $0x60] sm:$0xff]  ;;  %v1040_v44 = vld [vmem:[#allocation4 + $0x70] sm:$0xff] }
 0x1ab   :  { %3160 = vmatmul.mubr.msk.f32.vlgmr.msra.gmra.mrb[0].mxu1 %vm735_vm0, %v723_v30  ;;  %v3406_v42 = vpack.c.bf16 %v2872_v40, %v2871_v39  ;;  %v1039_v43 = vld [vmem:[#allocation4 + $0x68] sm:$0xff]  ;;  %v1041_v45 = vld [vmem:[#allocation4 + $0x78] sm:$0x1]  ;;  %v2877_v46 = vld [vmem:[%s4004_s3 + $0x60] sm:$0xff] }
 0x1ac   :  { %3397 = vmatpush3.bf16.msra.mxu1 %v3730_v12  ;;  %3162 = vmatprep.mubr.msk.f32.mxu1 %vm735_vm0, %v724_v31  ;;  %v932_v12 = vld [vmem:[#allocation4 + $0x50] sm:$0xff]  ;;  %v2878_v49 = vld [vmem:[%s4004_s3 + $0x68] sm:$0xff]  ;;  %v1146_v50 = vld [vmem:[#allocation4 + $0x80] sm:$0xff] }
 0x1ad   :  { %3399 = vmatprep.subr.bf16.mxu1 %v3398_v29  ;;  %v3410_v51 = vpack.c.bf16 %v2878_v49, %v2877_v46  ;;  %v1147_v52 = vld [vmem:[#allocation4 + $0x88] sm:$0xff]  ;;  %v1148_v53 = vld [vmem:[#allocation4 + $0x90] sm:$0xff]  ;;  %v1149_v54 = vld [vmem:[#allocation4 + $0x98] sm:$0x1] }
 0x1ae   :  { %v2883_v55 = vld [vmem:[%s4004_s3 + $0x70] sm:$0xff]  ;;  %v2884_v56 = vld [vmem:[%s4004_s3 + $0x78] sm:$0xff]  ;;  %v1256_v60 = vld [vmem:[#allocation4 + $0xb0] sm:$0xff] }
 0x1af   :  { %3163 = vmatmul.mubr.msk.f32.gmra.mrb[2].mxu1 %vm735_vm0, %v725_v32  ;;  %v1254_v57 = vld [vmem:[#allocation4 + $0xa0] sm:$0xff]  ;;  %v3414_v58 = vpack.c.bf16 %v2884_v56, %v2883_v55  ;;  %v1255_v59 = vld [vmem:[#allocation4 + $0xa8] sm:$0xff]  ;;  %v1257_v61 = vld [vmem:[#allocation4 + $0xb8] sm:$0x1] }
 0x1b0   :  { %3169 = vmatprep.mubr.msk.f32.mxu1 %vm735_vm0, %v930_v35  ;;  %v2889_v62 = vld [vmem:[%s4004_s3 + $0x80] sm:$0xff]  ;;  %v2890_v63 = vld [vmem:[%s4004_s3 + $0x88] sm:$0xff]  ;;  %v1362_v0 = vld [vmem:[#allocation4 + $0xc0] sm:$0xff] }
 0x1b1   :  { %v3418_v1 = vpack.c.bf16 %v2890_v63, %v2889_v62  ;;  %v1363_v2 = vld [vmem:[#allocation4 + $0xc8] sm:$0xff]  ;;  %v1364_v3 = vld [vmem:[#allocation4 + $0xd0] sm:$0xff]  ;;  %v1365_v4 = vld [vmem:[#allocation4 + $0xd8] sm:$0x1] }
 0x1b2   :  { %v1470_v5 = vld [vmem:[#allocation4 + $0xe0] sm:$0xff]  ;;  %v1471_v6 = vld [vmem:[#allocation4 + $0xe8] sm:$0xff]  ;;  %v1472_v19 = vld [vmem:[#allocation4 + $0xf0] sm:$0xff] }
 0x1b3   :  { %3170 = vmatmul.mubr.msk.f32.vlgmr.msra.gmra.mrb[0].mxu1 %vm735_vm0, %v931_v37  ;;  %v1473_v21 = vld [vmem:[#allocation4 + $0xf8] sm:$0x1]  ;;  %v1578_v7 = vld [vmem:[#allocation4 + $0x100] sm:$0xff]  ;;  %v1579_v23 = vld [vmem:[#allocation4 + $0x108] sm:$0xff] }
 0x1b4   :  { %3401 = vmatpush3.bf16.msra.mxu1 %v3398_v29  ;;  %3172 = vmatprep.mubr.msk.f32.mxu1 %vm735_vm0, %v932_v12  ;;  %v1580_v8 = vld [vmem:[#allocation4 + $0x110] sm:$0xff]  ;;  %v1581_v9 = vld [vmem:[#allocation4 + $0x118] sm:$0x1]  ;;  %v1788_v14 = vld [vmem:[%s4006_s5 + $0x10] sm:$0xff] }
 0x1b5   :  { %3403 = vmatprep.subr.bf16.mxu1 %v3402_v36  ;;  %v2896_v10 = vld [vmem:[%s4006_s5 + $0x20] sm:$0xff]  ;;  %v2897_v11 = vld [vmem:[%s4006_s5 + $0x28] sm:$0xff]  ;;  %v1789_v15 = vld [vmem:[%s4006_s5 + $0x18] sm:$0xff] }
 0x1b6   :  { %v3423_v13 = vpack.c.bf16 %v2897_v11, %v2896_v10  ;;  %v2898_v16 = vld [vmem:[%s4006_s5 + $0x30] sm:$0xff]  ;;  %v3432_v18 = vpack.c.bf16 %v1789_v15, %v1788_v14  ;;  %v2899_v20 = vld [vmem:[%s4006_s5 + $0x38] sm:$0xff]  ;;  %v2895_v25 = vld [vmem:[%s4007_s4] ss:$0 sm:$0xff] }
 0x1b7   :  { %3173 = vmatmul.mubr.msk.f32.gmra.mrb[2].mxu1 %vm735_vm0, %v933_v38  ;;  %v3426_v22 = vpack.c.bf16 %v2899_v20, %v2898_v16  ;;  %v2902_v63 = vld [vmem:[%s4006_s5 + $0x40] sm:$0xff]  ;;  %v2910_v14 = vld [vmem:[%s4006_s5 + $0x78] sm:$0xff]  ;;  %v2904_v16 = vld [vmem:[%s4006_s5 + $0x50] sm:$0xff] }
 0x1b8   :  { %3179 = vmatprep.mubr.msk.f32.mxu1 %vm735_vm0, %v1038_v41  ;;  %3433 = vmatpush3.bf16.msra.mxu0 %v3432_v18  ;;  %v2905_v18 = vld [vmem:[%s4006_s5 + $0x58] sm:$0xff] }
 0x1b9   :  { %3440 = vmatprep.subr.bf16.mxu0 %v3522_v17 }
 0x1bb   :  { %3180 = vmatmul.mubr.msk.f32.vlgmr.msra.gmra.mrb[0].mxu1 %vm735_vm0, %v1039_v43 }
 0x1bc   :  { %3405 = vmatpush3.bf16.msra.mxu1 %v3402_v36  ;;  %3182 = vmatprep.mubr.msk.f32.mxu1 %vm735_vm0, %v1040_v44 }
 0x1bd   :  { %3407 = vmatprep.subr.bf16.mxu1 %v3406_v42 }
 0x1bf   :  { %3183 = vmatmul.mubr.msk.f32.gmra.mrb[2].mxu1 %vm735_vm0, %v1041_v45 }
 0x1c0   :  { %3189 = vmatprep.mubr.msk.f32.mxu1 %vm735_vm0, %v1146_v50 }
 0x1c3   :  { %3190 = vmatmul.mubr.msk.f32.vlgmr.msra.gmra.mrb[0].mxu1 %vm735_vm0, %v1147_v52 }
 0x1c4   :  { %3409 = vmatpush3.bf16.msra.mxu1 %v3406_v42  ;;  %3192 = vmatprep.mubr.msk.f32.mxu1 %vm735_vm0, %v1148_v53 }
 0x1c5   :  { %3411 = vmatprep.subr.bf16.mxu1 %v3410_v51 }
 0x1c7   :  { %3193 = vmatmul.mubr.msk.f32.gmra.mrb[2].mxu1 %vm735_vm0, %v1149_v54 }
 0x1c8   :  { %3199 = vmatprep.mubr.msk.f32.mxu1 %vm735_vm0, %v1254_v57 }
 0x1cb   :  { %3200 = vmatmul.mubr.msk.f32.vlgmr.msra.gmra.mrb[0].mxu1 %vm735_vm0, %v1255_v59  ;;  %v2908_v59 = vld [vmem:[%s4006_s5 + $0x68] sm:$0xff] }
 0x1cc   :  { %3413 = vmatpush3.bf16.msra.mxu1 %v3410_v51  ;;  %3202 = vmatprep.mubr.msk.f32.mxu1 %vm735_vm0, %v1256_v60 }
 0x1cd   :  { %3415 = vmatprep.subr.bf16.mxu1 %v3414_v58 }
 0x1cf   :  { %3203 = vmatmul.mubr.msk.f32.gmra.mrb[2].mxu1 %vm735_vm0, %v1257_v61 }
 0x1d0   :  { %3209 = vmatprep.mubr.msk.f32.mxu1 %vm735_vm0, %v1362_v0  ;;  %v2903_v0 = vld [vmem:[%s4006_s5 + $0x48] sm:$0xff] }
 0x1d1   :  { %v3435_v11 = vpack.c.bf16 %v2903_v0, %v2902_v63 }
 0x1d3   :  { %3210 = vmatmul.mubr.msk.f32.vlgmr.msra.gmra.mrb[0].mxu1 %vm735_vm0, %v1363_v2 }
 0x1d4   :  { %3417 = vmatpush3.bf16.msra.mxu1 %v3414_v58  ;;  %3212 = vmatprep.mubr.msk.f32.mxu1 %vm735_vm0, %v1364_v3  ;;  %v2907_v58 = vld [vmem:[%s4006_s5 + $0x60] sm:$0xff] }
 0x1d5   :  { %3419 = vmatprep.subr.bf16.mxu1 %v3418_v1  ;;  %v3441_v10 = vpack.c.bf16 %v2908_v59, %v2907_v58  ;;  %v2935_v58 = vld [vmem:[%s4006_s5 + $0x118] sm:$0xff] }
 0x1d7   :  { %3213 = vmatmul.mubr.msk.f32.gmra.mrb[2].mxu1 %vm735_vm0, %v1365_v4 }
 0x1d8   :  { %3219 = vmatprep.mubr.msk.f32.mxu1 %vm735_vm0, %v1470_v5 }
 0x1db   :  { %3220 = vmatmul.mubr.msk.f32.vlgmr.msra.gmra.mrb[0].mxu1 %vm735_vm0, %v1471_v6 }
 0x1dc   :  { %3421 = vmatpush3.bf16.msra.mxu1 %v3418_v1  ;;  %3222 = vmatprep.mubr.msk.f32.mxu1 %vm735_vm0, %v1472_v19 }
 0x1dd   :  { %3422 = vmatprep.subr.bf16.mxu1 %v3522_v17 }
 0x1df   :  { %3223 = vmatmul.mubr.msk.f32.gmra.mrb[2].mxu1 %vm735_vm0, %v1473_v21 }
 0x1e0   :  { %3229 = vmatprep.mubr.msk.f32.mxu1 %vm735_vm0, %v1578_v7 }
 0x1e3   :  { %3230 = vmatmul.mubr.msk.f32.vlgmr.msra.gmra.mrb[0].mxu1 %vm735_vm0, %v1579_v23 }
 0x1e4   :  { %3232 = vmatprep.mubr.msk.f32.mxu1 %vm735_vm0, %v1580_v8  ;;  %3424 = vmatpush3.bf16.msra.mxu1 %v3423_v13  ;;  %v2909_v13 = vld [vmem:[%s4006_s5 + $0x70] sm:$0xff] }
 0x1e5   :  { %3425 = vmatprep.subr.bf16.mxu1 %v3522_v17 }
 0x1e7   :  { %3233 = vmatmul.mubr.msk.f32.gmra.mrb[2].mxu1 %vm735_vm0, %v1581_v9 }
 0x1e8   :  { %3243 = vmatprep.mubr.msk.f32.mxu1 %vm3523_vm1, %v3524_v24  ;;  %3427 = vmatpush3.bf16.msra.mxu1 %v3426_v22  ;;  %v3444_v22 = vpack.c.bf16 %v2910_v14, %v2909_v13 }
 0x1e9   :  { %3434 = vmatprep.subr.bf16.mxu1 %v3522_v17 }
 0x2b6   :  { %v3231_v26 = vpop.f32.mrb[0].mxu1 }
 0x2b7   :  { %v1694_v27 = vadd.f32 %v3231_v26, %v2895_v25  ;;  %v1663_v47 = vpop.f32.mrb[1].mxu1  ;;  %v2917_v26 = vld [vmem:[%s4006_s5 + $0xa0] sm:$0xff] }
 0x2b8   :  { %v1693_v28 = vadd.f32 %v2895_v25, %v1663_v47  ;;  %v2912_v47 = vld [vmem:[%s4006_s5 + $0x80] sm:$0xff] }
 0x2b9   :  { %v1698_v48 = vmax.f32 %v1694_v27, 0.0  ;;  %v2918_v27 = vld [vmem:[%s4006_s5 + $0xa8] sm:$0xff] }
 0x2ba   :  { %v1697_v29 = vmax.f32 %v1693_v28, 0.0  ;;  %v3234_v30 = vpop.f32.mrb[2].mxu1  ;;  %v2913_v28 = vld [vmem:[%s4006_s5 + $0x88] sm:$0xff] }
 0x2bb   :  { %1702 = vst [vmem:[#allocation3 + $0x8] sm:$0xff] %v1698_v48  ;;  %v1696_v31 = vadd.f32 %v3234_v30, %v2895_v25  ;;  %v1673_v32 = vpop.f32.mrb[3].mxu1  ;;  %v3453_v48 = vpack.c.bf16 %v2918_v27, %v2917_v26  ;;  %v2919_v30 = vld [vmem:[%s4006_s5 + $0xb0] sm:$0xff] }
 0x2bc   :  { %1701 = vst [vmem:[#allocation3] sm:$0xff] %v1697_v29  ;;  %v1695_v33 = vadd.f32 %v2895_v25, %v1673_v32  ;;  %v3438_v25 = vpack.c.bf16 %v2905_v18, %v2904_v16  ;;  %v3447_v29 = vpack.c.bf16 %v2913_v28, %v2912_v47 }
 0x2bd   :  { %v1700_v34 = vmax.f32 %v1696_v31, 0.0  ;;  %v2920_v31 = vld [vmem:[%s4006_s5 + $0xb8] sm:$0xff] }
 0x2be   :  { %v1699_v35 = vmax.f32 %v1695_v33, 0.0  ;;  %v2914_v33 = vld [vmem:[%s4006_s5 + $0x90] sm:$0xff] }
 0x2bf   :  { %1704 = vst [vmem:[#allocation3 + $0x18] sm:$0x1] %v1700_v34  ;;  %v2915_v34 = vld [vmem:[%s4006_s5 + $0x98] sm:$0xff] }
 0x2c0   :  { %1703 = vst [vmem:[#allocation3 + $0x10] sm:$0xff] %v1699_v35 }
 0x2c2   :  { %v1709_v36 = vld [vmem:[#allocation3 + $0xa] sm:$0x1]  ;;  %v1711_v37 = vld [vmem:[#allocation3 + $0xc] sm:$0x1]  ;;  %v1718_v12 = vld [vmem:[#allocation3 + $0xb] sm:$0x1] }
 0x2c3   :  { %1710 = vst [vmem:[#allocation5 + $0x2] sm:$0x1] %v1709_v36  ;;  %1712 = vst [vmem:[#allocation5 + $0x3] sm:$0x1] %v1711_v37  ;;  %v1720_v38 = vld [vmem:[#allocation3 + $0xd] sm:$0x1]  ;;  %v3456_v36 = vpack.c.bf16 %v2920_v31, %v2919_v30  ;;  %v3450_v37 = vpack.c.bf16 %v2915_v34, %v2914_v33  ;;  %v2817_v34 = vlaneseq }
 0x2c4   :  { %1719 = vst [vmem:[#allocation5 + $0x6] sm:$0x1] %v1718_v12  ;;  %v1727_v39 = vld [vmem:[#allocation3 + $0xc] sm:$0x1]  ;;  %v1729_v40 = vld [vmem:[#allocation3 + $0xe] sm:$0x1] }
 0x2c5   :  { %1721 = vst [vmem:[#allocation5 + $0x7] sm:$0x1] %v1720_v38  ;;  %1728 = vst [vmem:[#allocation5 + $0xa] sm:$0x1] %v1727_v39  ;;  %v1736_v41 = vld [vmem:[#allocation3 + $0xf] sm:$0x1] }
 0x2c6   :  { %1730 = vst [vmem:[#allocation5 + $0xb] sm:$0x1] %v1729_v40  ;;  %v1743_v42 = vld [vmem:[#allocation3 + $0x8] sm:$0x1]  ;;  %v1752_v43 = vld [vmem:[#allocation3 + $0x9] sm:$0x1] }
 0x2c7   :  { %1737 = vst [vmem:[#allocation5 + $0xe] sm:$0x1] %v1736_v41  ;;  %1744 = vst [vmem:[#allocation5 + $0x11] sm:$0x1] %v1743_v42  ;;  %v1758_v44 = vld [vmem:[#allocation3 + $0xa] sm:$0x1] }
 0x2c8   :  { %1753 = vst [vmem:[#allocation5 + $0x15] sm:$0x1] %v1752_v43  ;;  %v1761_v45 = vld [vmem:[#allocation3 + $0xc] sm:$0x1]  ;;  %v1767_v46 = vld [vmem:[#allocation3 + $0xb] sm:$0x1] }
 0x2c9   :  { %1760 = vst [vmem:[#allocation5 + $0x18] sm:$0x1] %v1758_v44  ;;  %1762 = vst [vmem:[#allocation5 + $0x19] sm:$0x1] %v1761_v45  ;;  %v1770_v49 = vld [vmem:[#allocation3 + $0xd] sm:$0x1] }
 0x2ca   :  { %1769 = vst [vmem:[#allocation5 + $0x1c] sm:$0x1] %v1767_v46  ;;  %v1776_v50 = vld [vmem:[#allocation3 + $0xc] sm:$0x1]  ;;  %v1779_v51 = vld [vmem:[#allocation3 + $0xe] sm:$0x1] }
 0x2cb   :  { %1771 = vst [vmem:[#allocation5 + $0x1d] sm:$0x1] %v1770_v49  ;;  %1778 = vst [vmem:[#allocation5 + $0x20] sm:$0x1] %v1776_v50  ;;  %v1705_v52 = vld [vmem:[#allocation3] sm:$0x1] }
 0x2cc   :  { %1780 = vst [vmem:[#allocation5 + $0x21] sm:$0x1] %v1779_v51  ;;  %v1707_v53 = vld [vmem:[#allocation3 + $0x2] sm:$0x1]  ;;  %v1713_v54 = vld [vmem:[#allocation3 + $0x1] sm:$0x1] }
 0x2cd   :  { %1706 = vst [vmem:[#allocation5] sm:$0x1] %v1705_v52  ;;  %1708 = vst [vmem:[#allocation5 + $0x1] sm:$0x1] %v1707_v53  ;;  %v1716_v55 = vld [vmem:[#allocation3 + $0x3] sm:$0x1] }
 0x2ce   :  { %1715 = vst [vmem:[#allocation5 + $0x4] sm:$0x1] %v1713_v54  ;;  %v1722_v56 = vld [vmem:[#allocation3 + $0x2] sm:$0x1]  ;;  %v1725_v57 = vld [vmem:[#allocation3 + $0x4] sm:$0x1] }
 0x2cf   :  { %1717 = vst [vmem:[#allocation5 + $0x5] sm:$0x1] %v1716_v55  ;;  %1724 = vst [vmem:[#allocation5 + $0x8] sm:$0x1] %v1722_v56  ;;  %v1731_v60 = vld [vmem:[#allocation3 + $0x5] sm:$0x1] }
 0x2d0   :  { %1726 = vst [vmem:[#allocation5 + $0x9] sm:$0x1] %v1725_v57  ;;  %v1734_v61 = vld [vmem:[#allocation3 + $0x7] sm:$0x1]  ;;  %v1740_v62 = vld [vmem:[#allocation3 + $0x6] sm:$0x1] }
 0x2d1   :  { %1733 = vst [vmem:[#allocation5 + $0xc] sm:$0x1] %v1731_v60  ;;  %1735 = vst [vmem:[#allocation5 + $0xd] sm:$0x1] %v1734_v61  ;;  %v1749_v1 = vld [vmem:[#allocation3 + $0x7] sm:$0x1] }
 0x2d2   :  { %1742 = vst [vmem:[#allocation5 + $0x10] sm:$0x1] %v1740_v62  ;;  %v1783_v2 = vld [vmem:[#allocation3 + $0x18] sm:$0x1]  ;;  %v1738_v3 = vld [vmem:[#allocation3 + $0x11] sm:$0x1] }
 0x2d3   :  { %1751 = vst [vmem:[#allocation5 + $0x14] sm:$0x1] %v1749_v1  ;;  %1784 = vst [vmem:[#allocation5 + $0x23] sm:$0x1] %v1783_v2  ;;  %v1745_v4 = vld [vmem:[#allocation3 + $0x10] sm:$0x1] }
 0x2d4   :  { %1739 = vst [vmem:[#allocation5 + $0xf] sm:$0x1] %v1738_v3  ;;  %v1747_v5 = vld [vmem:[#allocation3 + $0x12] sm:$0x1]  ;;  %v1754_v6 = vld [vmem:[#allocation3 + $0x11] sm:$0x1] }
 0x2d5   :  { %1746 = vst [vmem:[#allocation5 + $0x12] sm:$0x1] %v1745_v4  ;;  %1748 = vst [vmem:[#allocation5 + $0x13] sm:$0x1] %v1747_v5  ;;  %v1756_v19 = vld [vmem:[#allocation3 + $0x13] sm:$0x1] }
 0x2d6   :  { %1755 = vst [vmem:[#allocation5 + $0x16] sm:$0x1] %v1754_v6  ;;  %v1763_v21 = vld [vmem:[#allocation3 + $0x14] sm:$0x1]  ;;  %v1765_v7 = vld [vmem:[#allocation3 + $0x16] sm:$0x1] }
 0x2d7   :  { %1757 = vst [vmem:[#allocation5 + $0x17] sm:$0x1] %v1756_v19  ;;  %1764 = vst [vmem:[#allocation5 + $0x1a] sm:$0x1] %v1763_v21  ;;  %v1772_v23 = vld [vmem:[#allocation3 + $0x15] sm:$0x1] }
 0x2d8   :  { %1766 = vst [vmem:[#allocation5 + $0x1b] sm:$0x1] %v1765_v7  ;;  %v1774_v8 = vld [vmem:[#allocation3 + $0x17] sm:$0x1]  ;;  %v1781_v9 = vld [vmem:[#allocation3 + $0x16] sm:$0x1] }
 0x2d9   :  { %1773 = vst [vmem:[#allocation5 + $0x1e] sm:$0x1] %v1772_v23  ;;  %1775 = vst [vmem:[#allocation5 + $0x1f] sm:$0x1] %v1774_v8  ;;  %v1785_v15 = vld [vmem:[#allocation5] sm:$0xf] }
 0x2da   :  { %1782 = vst [vmem:[#allocation5 + $0x22] sm:$0x1] %v1781_v9  ;;  %v1790_v20 = vld [vmem:[#allocation5 + $0x4] sm:$0xf]  ;;  %3255 = vmatmul.mubr.msk.f32.vlgmr.msra.gmra.mrb[18].mxu0 %vm1796_vm2, %v1785_v15  ;;  %v1943_v35 = vld [vmem:[#allocation5 + $0x8] sm:$0xf] }
 0x2db   :  { %3244 = vmatmul.mubr.msk.f32.vlgmr.msra.gmra.mrb[4].mxu1 %vm1796_vm2, %v1790_v20  ;;  %3442 = vmatpush3.bf16.msra.mxu0 %v3441_v10  ;;  %v2023_v32 = vld [vmem:[#allocation5 + $0xc] sm:$0xf]  ;;  %v2927_v12 = vld [vmem:[%s4006_s5 + $0xe0] sm:$0xff]  ;;  %v2928_v38 = vld [vmem:[%s4006_s5 + $0xe8] sm:$0xff] }
 0x2dc   :  { %3436 = vmatpush3.bf16.msra.mxu1 %v3435_v11  ;;  %3443 = vmatprep.subr.bf16.mxu0 %v3522_v17  ;;  %v2922_v39 = vld [vmem:[%s4006_s5 + $0xc0] sm:$0xff]  ;;  %v2923_v40 = vld [vmem:[%s4006_s5 + $0xc8] sm:$0xff]  ;;  %v3465_v41 = vpack.c.bf16 %v2928_v38, %v2927_v12  ;;  %v2929_v43 = vld [vmem:[%s4006_s5 + $0xf0] sm:$0xff] }
 0x2dd   :  { %3437 = vmatprep.subr.bf16.mxu1 %v3522_v17  ;;  %3265 = vmatprep.mubr.msk.f32.mxu1 %vm3523_vm1, %v3524_v24  ;;  %v3459_v42 = vpack.c.bf16 %v2923_v40, %v2922_v39  ;;  %v2930_v44 = vld [vmem:[%s4006_s5 + $0xf8] sm:$0xff]  ;;  %v2924_v46 = vld [vmem:[%s4006_s5 + $0xd0] sm:$0xff]  ;;  %v2103_v50 = vld [vmem:[#allocation5 + $0x10] sm:$0xf] }
 0x2de   :  { %3276 = vmatprep.mubr.msk.f32.mxu0 %vm3523_vm1, %v3524_v24  ;;  %v2183_v45 = vld [vmem:[#allocation5 + $0x14] sm:$0xf]  ;;  %v2925_v49 = vld [vmem:[%s4006_s5 + $0xd8] sm:$0xff]  ;;  %v3468_v51 = vpack.c.bf16 %v2930_v44, %v2929_v43  ;;  %v2933_v54 = vld [vmem:[%s4006_s5 + $0x108] sm:$0xff] }
 0x2df   :  { %3445 = vmatpush3.bf16.msra.mxu0 %v3444_v22  ;;  %v3462_v52 = vpack.c.bf16 %v2925_v49, %v2924_v46  ;;  %v2932_v53 = vld [vmem:[%s4006_s5 + $0x100] sm:$0xff]  ;;  %v2934_v57 = vld [vmem:[%s4006_s5 + $0x110] sm:$0xff]  ;;  %v2263_v59 = vld [vmem:[#allocation5 + $0x18] sm:$0xf] }
 0x2e0   :  { %3439 = vmatpush3.bf16.msra.mxu1 %v3438_v25  ;;  %3452 = vmatprep.subr.bf16.mxu0 %v3522_v17  ;;  %v3471_v55 = vpack.c.bf16 %v2933_v54, %v2932_v53  ;;  %v2343_v56 = vld [vmem:[#allocation5 + $0x1c] sm:$0xf]  ;;  %v3474_v60 = vpack.c.bf16 %v2935_v58, %v2934_v57  ;;  %v2513_v62 = vld [vmem:[%s4008_s7] sm:$0xff]  ;;  %v2941_v30 = vld [vmem:[%s4008_s7 + $0x10] sm:$0xff] }
 0x2e1   :  { %3446 = vmatprep.subr.bf16.mxu1 %v3522_v17  ;;  %v2423_v61 = vld [vmem:[#allocation5 + $0x20] sm:$0xf]  ;;  %v2937_v25 = vld [vmem:[%s4009_s6] ss:$0 sm:$0xff] }
 0x2e2   :  { %3277 = vmatmul.mubr.msk.f32.vlgmr.msra.gmra.mrb[20].mxu0 %vm1796_vm2, %v2023_v32  ;;  %v2943_v32 = vld [vmem:[%s4008_s7 + $0x18] sm:$0xff] }
 0x2e3   :  { %3266 = vmatmul.mubr.msk.f32.vlgmr.msra.gmra.mrb[6].mxu1 %vm1796_vm2, %v1943_v35  ;;  %3454 = vmatpush3.bf16.msra.mxu0 %v3453_v48  ;;  %v2939_v48 = vld [vmem:[%s4008_s7 + $0x8] sm:$0xff]  ;;  %v2818_v35 = vand.u32 127, %v2817_v34 }
 0x2e4   :  { %3448 = vmatpush3.bf16.msra.mxu1 %v3447_v29  ;;  %3455 = vmatprep.subr.bf16.mxu0 %v3522_v17 }
 0x2e5   :  { %3449 = vmatprep.subr.bf16.mxu1 %v3522_v17  ;;  %3287 = vmatprep.mubr.msk.f32.mxu1 %vm3523_vm1, %v3524_v24  ;;  %vm2834_vm4 = vcmp.eq.s32.totalorder %v2818_v35, 6  ;;  %vm2819_vm5 = vcmp.lt.s32.totalorder %v2818_v35, 6 }
 0x2e6   :  { %3298 = vmatprep.mubr.msk.f32.mxu0 %vm3523_vm1, %v3524_v24 }
 0x2e7   :  { %3457 = vmatpush3.bf16.msra.mxu0 %v3456_v36  ;;  %v2512_v36 = vld [vmem:[%s4010_s8] sm:$0x1] }
 0x2e8   :  { %3451 = vmatpush3.bf16.msra.mxu1 %v3450_v37  ;;  %3464 = vmatprep.subr.bf16.mxu0 %v3522_v17 }
 0x2e9   :  { %3458 = vmatprep.subr.bf16.mxu1 %v3522_v17 }
 0x2ea   :  { %3299 = vmatmul.mubr.msk.f32.vlgmr.msra.gmra.mrb[22].mxu0 %vm1796_vm2, %v2183_v45 }
 0x2eb   :  { %3288 = vmatmul.mubr.msk.f32.vlgmr.msra.gmra.mrb[8].mxu1 %vm1796_vm2, %v2103_v50  ;;  %3466 = vmatpush3.bf16.msra.mxu0 %v3465_v41 }
 0x2ec   :  { %3460 = vmatpush3.bf16.msra.mxu1 %v3459_v42  ;;  %3467 = vmatprep.subr.bf16.mxu0 %v3522_v17 }
 0x2ed   :  { %3461 = vmatprep.subr.bf16.mxu1 %v3522_v17  ;;  %3309 = vmatprep.mubr.msk.f32.mxu1 %vm3523_vm1, %v3524_v24 }
 0x2ee   :  { %3320 = vmatprep.mubr.msk.f32.mxu0 %vm3523_vm1, %v3524_v24 }
 0x2ef   :  { %3469 = vmatpush3.bf16.msra.mxu0 %v3468_v51 }
 0x2f0   :  { %3463 = vmatpush3.bf16.msra.mxu1 %v3462_v52  ;;  %3334 = vmatprep.subr.mxu0 %v3524_v24 }
 0x2f1   :  { %3470 = vmatprep.subr.bf16.mxu1 %v3522_v17 }
 0x2f2   :  { %3321 = vmatmul.mubr.msk.f32.vlgmr.msra.gmra.mrb[24].mxu0 %vm1796_vm2, %v2343_v56 }
 0x2f3   :  { %3310 = vmatmul.mubr.msk.f32.vlgmr.msra.gmra.mrb[10].mxu1 %vm1796_vm2, %v2263_v59  ;;  %3336 = vmatprep.mubr.msk.f32.mxu0 %vm3523_vm1, %v3524_v24 }
 0x2f4   :  { %3472 = vmatpush3.bf16.msra.mxu1 %v3471_v55  ;;  %3331 = vmatprep.mubr.msk.f32.mxu1 %vm3523_vm1, %v3524_v24 }
 0x2f5   :  { %3473 = vmatprep.subr.bf16.mxu1 %v3522_v17  ;;  %3335 = vmatpush3.msra.mxu0 %v2513_v62 }
 0x2f6   :  { %3339 = vmatprep.subr.mxu0 %v3524_v24 }
 0x2f8   :  { %3475 = vmatpush3.bf16.msra.mxu1 %v3474_v60 }
 0x2fb   :  { %3332 = vmatmul.mubr.msk.f32.vlgmr.msra.gmra.mrb[12].mxu1 %vm1796_vm2, %v2423_v61 }
 0x3ad   :  { %v1939_v63 = vpop.f32.mrb[18].mxu0 }
 0x3ae   :  { %v1866_v0 = vpop.f32.mrb[4].mxu1  ;;  %v3256_v1 = vpop.f32.mrb[19].mxu0 }
 0x3af   :  { %v1940_v2 = vadd.f32 %v1939_v63, %v1866_v0  ;;  %v3245_v3 = vpop.f32.mrb[5].mxu1 }
 0x3b5   :  { %v2098_v4 = vpop.f32.mrb[20].mxu0 }
 0x3b6   :  { %v2018_v5 = vpop.f32.mrb[6].mxu1  ;;  %v3278_v6 = vpop.f32.mrb[21].mxu0 }
 0x3b7   :  { %v2022_v17 = vadd.f32 %v2018_v5, %v1940_v2  ;;  %v3267_v19 = vpop.f32.mrb[7].mxu1 }
 0x3b9   :  { %v2102_v21 = vadd.f32 %v2098_v4, %v2022_v17 }
 0x3bd   :  { %v2258_v7 = vpop.f32.mrb[22].mxu0 }
 0x3be   :  { %v2178_v23 = vpop.f32.mrb[8].mxu1  ;;  %v3300_v8 = vpop.f32.mrb[23].mxu0 }
 0x3bf   :  { %v2182_v9 = vadd.f32 %v2178_v23, %v2102_v21  ;;  %v3289_v10 = vpop.f32.mrb[9].mxu1 }
 0x3c1   :  { %v2262_v11 = vadd.f32 %v2258_v7, %v2182_v9 }
 0x3c5   :  { %v2418_v13 = vpop.f32.mrb[24].mxu0 }
 0x3c6   :  { %v2338_v14 = vpop.f32.mrb[10].mxu1  ;;  %v3322_v15 = vpop.f32.mrb[25].mxu0 }
 0x3c7   :  { %v2342_v16 = vadd.f32 %v2338_v14, %v2262_v11  ;;  %v3311_v18 = vpop.f32.mrb[11].mxu1 }
 0x3c9   :  { %v2422_v20 = vadd.f32 %v2418_v13, %v2342_v16 }
 0x3ce   :  { %v2498_v22 = vpop.f32.mrb[12].mxu1 }
 0x3cf   :  { %v2502_v26 = vadd.f32 %v2498_v22, %v2422_v20  ;;  %v3333_v27 = vpop.f32.mrb[13].mxu1 }
 0x3d1   :  { %v2510_v47 = vadd.f32 %v2937_v25, %v2502_v26 }
 0x3d3   :  { %v2511_v28 = vmax.f32 %v2510_v47, 0.0 }
 0x3d5   :  { %3337 = vmatmul.mubr.msk.f32.vlgmr.msra.gmra.mrb[26].mxu0 %vm2514_vm3, %v2511_v28  ;;  %v2591_v29 = vrot.slane %v2511_v28, 1  ;;  %v2667_v31 = vrot.slane %v2511_v28, 2  ;;  %v2743_v33 = vrot.slane %v2511_v28, 3 }
 0x3d6   :  { %3340 = vmatpush3.msra.mxu0 %v2939_v48  ;;  %3341 = vmatprep.mubr.msk.f32.mxu0 %vm3523_vm1, %v3524_v24 }
 0x3d7   :  { %3344 = vmatprep.subr.mxu0 %v3524_v24 }
 0x3dd   :  { %3342 = vmatmul.mubr.msk.f32.vlgmr.msra.gmra.mrb[26].mxu0 %vm2514_vm3, %v2591_v29 }
 0x3de   :  { %3345 = vmatpush3.msra.mxu0 %v2941_v30  ;;  %3346 = vmatprep.mubr.msk.f32.mxu0 %vm3523_vm1, %v3524_v24 }
 0x3df   :  { %3349 = vmatprep.subr.mxu0 %v3524_v24 }
 0x3e5   :  { %3347 = vmatmul.mubr.msk.f32.vlgmr.msra.gmra.mrb[26].mxu0 %vm2514_vm3, %v2667_v31 }
 0x3e6   :  { %3350 = vmatpush3.msra.mxu0 %v2943_v32  ;;  %3351 = vmatprep.mubr.msk.f32.mxu0 %vm3523_vm1, %v3524_v24 }
 0x3ed   :  { %3352 = vmatmul.mubr.msk.f32.vlgmr.msra.gmra.mrb[26].mxu0 %vm2514_vm3, %v2743_v33 }
 0x4c0   :  { %v2812_v37 = vpop.f32.mrb[26].mxu0 }
 0x4c1   :  { %v3476_v12 = vadd.f32 %v2812_v37, %v2512_v36  ;;  %v3353_v38 = vpop.f32.mrb[27].mxu0 }
 0x4c3   :  { %v2835_v39 = vsel %vm2834_vm4, %v3476_v12, 0.0  ;;  %v2820_v40 = vsel %vm2819_vm5, %v3476_v12, -1e+30 }
 0x4c4   :  { %v2822_v41 = vsel %vm2821_vm6, %v2820_v40, -inf }
 0x4c5   :  { %2823 = vmax.xlane.f32.xlu0 %v2822_v41 }
 0x552   :  { %v2824_v24 = vpop.xlane.xlu0 %2823 }
 0x553   :  { %v2825_v42 = vsub.f32 %v2820_v40, %v2824_v24 }
 0x555   :  { %v2826_v43 = vmul.f32 1.442695, %v2825_v42 }
 0x557   :  { %3518 = vpow2.f32 %v2826_v43 }
 0x561   :  { %v3519_v44 = vpop.eup %3518 }
 0x562   :  { %v2828_v45 = vsel %vm2819_vm5, %v3519_v44, 0.0 }
 0x563   :  { %v2829_v46 = vsel %vm2821_vm6, %v2828_v45, 0.0 }
 0x564   :  { %2830 = vadd.xlane.f32.xlu0 %v2829_v46 }
 0x5f1   :  { %v2831_v49 = vpop.xlane.xlu0 %2830 }
 0x5f2   :  { %3520 = vrcp.f32 %v2831_v49 }
 0x5fc   :  { %v3521_v50 = vpop.eup %3520 }
 0x5fd   :  { %v2833_v51 = vmul.f32 %v3521_v50, %v2828_v45 }
 0x5ff   :  { %v2836_v52 = vadd.f32 %v2835_v39, %v2833_v51 }
 0x601   :  { %2837 = vst [vmem:[%s4011_s9] sm:$0x1] %v2836_v52 }

</bundles_post_ra>
